<compile_context>
chip_gen: v5e
topology: v5e:2x2
jax: 0.10.0
libtpu: 0.0.40
codegen_flags: <defaults>
</compile_context>

<pallas_src>
import jax
import jax.numpy as jnp
from jax import lax
from jax.experimental import pallas as pl
from jax.experimental.pallas import tpu as pltpu

EPS = 1e-6
_HIGH = lax.Precision.HIGHEST   # used by the plain-JAX reference only


# ---------------------------------------------------------------------------
# Pallas kernel
# ---------------------------------------------------------------------------
def _make_nafblock_kernel(H, W, C, TH):
    assert H % TH == 0, (H, TH)
    NT = H // TH            # number of row tiles per image
    HW = H * W
    THW = TH * W
    C2 = 2 * C

    def for_each_tile(body):
        # scf.for over row tiles (bounds live ranges vs. a python loop).
        def _body(t, carry):
            body(pl.multiple_of(t * TH, TH))
            return carry
        lax.fori_loop(0, NT, _body, 0)

    def zero_border(pad_ref, cv):
        # Only the 1-pixel border must be zero; interiors are fully
        # overwritten before every read.  Re-done every grid step (4 thin
        # strips, cheap) so it stays correct under "parallel" batch sharding.
        z_row = jnp.zeros((1, W + 2, cv), jnp.bfloat16)
        z_col = jnp.zeros((H, 1, cv), jnp.bfloat16)
        pad_ref[0:1, :, :] = z_row
        pad_ref[H + 1:H + 2, :, :] = z_row
        pad_ref[1:H + 1, 0:1, :] = z_col
        pad_ref[1:H + 1, W + 1:W + 2, :] = z_col

    def layernorm(x2d, w_ref, b_ref):
        # Per-pixel mean/var over the channel (lane) axis, like LayerNorm2d.
        mu = jnp.mean(x2d, axis=1, keepdims=True)
        xc = x2d - mu
        var = jnp.mean(xc * xc, axis=1, keepdims=True)
        return xc * lax.rsqrt(var + EPS) * w_ref[...] + b_ref[...]

    def build_col(pad_ref, col_ref, ir0, scale_row=None):
        # im2col for TH output rows starting at image row ir0: concatenate
        # the 9 taps along the lane axis in-register and store the whole
        # (TH, W, 9*cin) slab with one lane-dense store.
        taps = [pad_ref[pl.ds(ir0 + dy, TH), dx:dx + W, :]
                for dy in range(3) for dx in range(3)]
        val = jnp.concatenate(taps, axis=-1)             # (TH, W, 9*cin) bf16
        if scale_row is not None:                        # fold SCA scale in
            val = (val.astype(jnp.float32) * scale_row).astype(jnp.bfloat16)
        col_ref[...] = val

    def conv_mm(col_ref, w_ref, b_ref):
        # One fat matmul per tile: (TH*W, 9*cin) @ (9*cin, cout); bf16 in,
        # f32 accumulate, f32 per-channel bias.
        a = col_ref[...]
        a = a.reshape(THW, a.shape[-1])
        return jnp.dot(a, w_ref[...],
                       preferred_element_type=jnp.float32) + b_ref[...]

    def kernel(x_ref,
               n1w, n1b, w1, b1, w2a, b2a, w2b, b2b, wsca, bsca, w3, b3, beta,
               n2w, n2b, w4a, b4a, w4b, b4b, w5, b5, gamma,
               out_ref,
               pad_a, pad_b, pad_2c, col9, col18, pool_acc):
        zero_border(pad_a, C)
        zero_border(pad_b, C)
        zero_border(pad_2c, C2)
        pool_acc[...] = jnp.zeros_like(pool_acc)

        # ----- branch 1: norm1 -> conv1 -> conv2 -> SimpleGate -> SCA -> conv3
        def ln1_tile(ir0):
            xr = x_ref[:, pl.ds(ir0, TH), :, :].reshape(THW, C)
            v = layernorm(xr, n1w, n1b)
            pad_a[pl.ds(ir0 + 1, TH), 1:W + 1, :] = (
                v.reshape(TH, W, C).astype(jnp.bfloat16))
        for_each_tile(ln1_tile)

        def conv1_tile(ir0):                              # C -> 2C
            build_col(pad_a, col9, ir0)
            v = conv_mm(col9, w1, b1)
            pad_2c[pl.ds(ir0 + 1, TH), 1:W + 1, :] = (
                v.reshape(TH, W, C2).astype(jnp.bfloat16))
        for_each_tile(conv1_tile)

        def gate1_tile(ir0):                              # conv2 + SimpleGate
            build_col(pad_2c, col18, ir0)
            g = conv_mm(col18, w2a, b2a) * conv_mm(col18, w2b, b2b)
            pool_acc[...] += jnp.sum(g, axis=0, keepdims=True)   # SCA pool acc
            pad_a[pl.ds(ir0 + 1, TH), 1:W + 1, :] = (
                g.reshape(TH, W, C).astype(jnp.bfloat16))
        for_each_tile(gate1_tile)

        # SCA: 1x1 conv on the whole-image global average; the per-channel
        # scale is folded exactly into the conv3 im2col columns.
        pooled = pool_acc[...] * (1.0 / HW)                        # (1, C) f32
        scale = jnp.dot(pooled, wsca[...],
                        preferred_element_type=jnp.float32) + bsca[...]
        scale_row = jnp.concatenate([scale] * 9, axis=-1).reshape(1, 1, 9 * C)

        def conv3_tile(ir0):               # conv3 + residual (y) + LayerNorm2
            build_col(pad_a, col9, ir0, scale_row)
            v = conv_mm(col9, w3, b3)
            inp = x_ref[:, pl.ds(ir0, TH), :, :].reshape(THW, C)
            y = inp + v * beta[...]
            out_ref[:, pl.ds(ir0, TH), :, :] = y.reshape(1, TH, W, C)
            v2 = layernorm(y, n2w, n2b)
            pad_b[pl.ds(ir0 + 1, TH), 1:W + 1, :] = (
                v2.reshape(TH, W, C).astype(jnp.bfloat16))
        for_each_tile(conv3_tile)

        # ----- branch 2 (FFN): conv4 -> SimpleGate -> conv5
        def gate2_tile(ir0):                              # conv4 + SimpleGate
            build_col(pad_b, col9, ir0)
            g = conv_mm(col9, w4a, b4a) * conv_mm(col9, w4b, b4b)
            pad_a[pl.ds(ir0 + 1, TH), 1:W + 1, :] = (
                g.reshape(TH, W, C).astype(jnp.bfloat16))
        for_each_tile(gate2_tile)

        def conv5_tile(ir0):                              # conv5 + residual
            build_col(pad_a, col9, ir0)
            v = conv_mm(col9, w5, b5)
            y = out_ref[:, pl.ds(ir0, TH), :, :].reshape(THW, C)
            out_ref[:, pl.ds(ir0, TH), :, :] = (
                (y + v * gamma[...]).reshape(1, TH, W, C))
        for_each_tile(conv5_tile)

    return kernel


# ---------------------------------------------------------------------------
# Wrapper (glue: parameter reshapes, BlockSpecs)
# ---------------------------------------------------------------------------
def _vmem_limit_bytes():
    # Generation-aware: v7x has 64 MiB of VMEM per core, v5e/v6e have 128 MiB.
    cap = 64 * 1024 * 1024          # conservative (v7x) fallback
    try:
        cap = int(getattr(pltpu.get_tpu_info(), "vmem_capacity_bytes", cap))
    except Exception:
        pass
    return int(min(cap * 3 // 4, 96 * 1024 * 1024))


def nafblock_pallas(x_nhwc, params, x_pe=None, row_tile=8):
    if x_pe is not None:
        x_nhwc = x_nhwc + x_pe
    N, H, W, C = x_nhwc.shape
    C2 = 2 * C
    # Row-tile height; at production sizes tune so pads + cols + I/O blocks
    # fit the per-generation VMEM budget.
    TH = row_tile if (H % row_tile == 0) else H

    def r2(v):      # 1-D per-channel param -> (1, K) f32
        return jnp.asarray(v, jnp.float32).reshape(1, -1)

    def rw(w):      # (3, 3, Cin, Cout) HWIO -> (9*Cin, Cout) bf16, tap-major
        w = jnp.asarray(w, jnp.float32)
        return w.reshape(9 * w.shape[2], w.shape[3]).astype(jnp.bfloat16)

    # Split SimpleGate convs into their two output halves wrapper-side so the
    # kernel never slices activations at a lane offset of C.
    w2r = rw(params['w2'])
    b2 = jnp.asarray(params['b2'], jnp.float32)
    w4r = rw(params['w4'])
    b4 = jnp.asarray(params['b4'], jnp.float32)

    args = (
        x_nhwc.astype(jnp.float32),
        r2(params['n1w']), r2(params['n1b']),
        rw(params['w1']), r2(params['b1']),
        w2r[:, :C], b2[:C].reshape(1, C), w2r[:, C:], b2[C:].reshape(1, C),
        jnp.asarray(params['wsca'], jnp.float32), r2(params['bsca']),
        rw(params['w3']), r2(params['b3']),
        r2(params['beta']),
        r2(params['n2w']), r2(params['n2b']),
        w4r[:, :C], b4[:C].reshape(1, C), w4r[:, C:], b4[C:].reshape(1, C),
        rw(params['w5']), r2(params['b5']),
        r2(params['gamma']),
    )

    def full_spec(shape):
        nd = len(shape)
        return pl.BlockSpec(shape, lambda n, _nd=nd: (0,) * _nd)

    in_specs = [pl.BlockSpec((1, H, W, C), lambda n: (n, 0, 0, 0))]
    in_specs += [full_spec(a.shape) for a in args[1:]]

    kernel = _make_nafblock_kernel(H, W, C, TH)

    # TODO(synk): when N == 1 on v7x (2 TensorCores) add a second parallel
    # grid axis (e.g. image halves, with the SCA pool reduced across them) so
    # both cores get work; with N >= 2 the batch axis already feeds both.
    return pl.pallas_call(
        kernel,
        out_shape=jax.ShapeDtypeStruct((N, H, W, C), jnp.float32),
        grid=(N,),
        in_specs=in_specs,
        out_specs=pl.BlockSpec((1, H, W, C), lambda n: (n, 0, 0, 0)),
        scratch_shapes=[
            pltpu.VMEM((H + 2, W + 2, C), jnp.bfloat16),    # pad_a (C chans)
            pltpu.VMEM((H + 2, W + 2, C), jnp.bfloat16),    # pad_b (C chans)
            pltpu.VMEM((H + 2, W + 2, C2), jnp.bfloat16),   # pad_2c (2C chans)
            pltpu.VMEM((TH, W, 9 * C), jnp.bfloat16),       # col9 (per tile)
            pltpu.VMEM((TH, W, 9 * C2), jnp.bfloat16),      # col18 (per tile)
            pltpu.VMEM((1, C), jnp.float32),                # SCA pool accum
        ],
        compiler_params=pltpu.CompilerParams(
            dimension_semantics=("parallel",),              # batch independent
            vmem_limit_bytes=_vmem_limit_bytes()),
    )(*args)


# ---------------------------------------------------------------------------
# Plain-JAX reference (for correctness check; full f32 / HIGHEST precision)
# ---------------------------------------------------------------------------
def _layernorm2d_ref(x, w, b):
    mu = jnp.mean(x, axis=-1, keepdims=True)
    var = jnp.mean((x - mu) ** 2, axis=-1, keepdims=True)
    return (x - mu) / jnp.sqrt(var + EPS) * w + b


def _conv3x3_ref(x, w, b):
    out = lax.conv_general_dilated(
        x, w, window_strides=(1, 1), padding=((1, 1), (1, 1)),
        dimension_numbers=('NHWC', 'HWIO', 'NHWC'), precision=_HIGH)
    return out + b


def nafblock_ref(x, p, x_pe=None):
    if x_pe is not None:
        x = x + x_pe
    C = x.shape[-1]
    inp = x
    t = _layernorm2d_ref(x, p['n1w'], p['n1b'])
    t = _conv3x3_ref(t, p['w1'], p['b1'])
    t = _conv3x3_ref(t, p['w2'], p['b2'])
    t = t[..., :C] * t[..., C:]
    pooled = jnp.mean(t, axis=(1, 2), keepdims=True)
    scale = jnp.einsum('nhwc,cd->nhwd', pooled, p['wsca'],
                       precision=_HIGH) + p['bsca']
    t = t * scale
    t = _conv3x3_ref(t, p['w3'], p['b3'])
    y = inp + t * p['beta']
    t = _layernorm2d_ref(y, p['n2w'], p['n2b'])
    t = _conv3x3_ref(t, p['w4'], p['b4'])
    t = t[..., :C] * t[..., C:]
    t = _conv3x3_ref(t, p['w5'], p['b5'])
    return y + t * p['gamma']


# ---------------------------------------------------------------------------
# Deterministic parameter init (shapes from NAFBlock.__init__ with c=C)
# ---------------------------------------------------------------------------
def init_params(key, C):
    C2 = 2 * C
    keys = jax.random.split(key, 14)

    def conv_w(k, cin, cout):
        return jax.random.normal(k, (3, 3, cin, cout), jnp.float32) / jnp.sqrt(9.0 * cin)

    def vec(k, n, scale=0.1):
        return jax.random.normal(k, (n,), jnp.float32) * scale

    p = {
        'n1w': jnp.ones((C,), jnp.float32),  'n1b': jnp.zeros((C,), jnp.float32),
        'n2w': jnp.ones((C,), jnp.float32),  'n2b': jnp.zeros((C,), jnp.float32),
        'w1': conv_w(keys[0], C, C2),  'b1': vec(keys[1], C2),
        'w2': conv_w(keys[2], C2, C2), 'b2': vec(keys[3], C2),
        'w3': conv_w(keys[4], C, C),   'b3': vec(keys[5], C),
        'wsca': jax.random.normal(keys[6], (C, C), jnp.float32) / jnp.sqrt(float(C)),
        'bsca': vec(keys[7], C),
        'w4': conv_w(keys[8], C, C2),  'b4': vec(keys[9], C2),
        'w5': conv_w(keys[10], C, C),  'b5': vec(keys[11], C),
        # torch initializes beta/gamma to zeros (identity block); use nonzero
        # values so the full path is exercised.
        'beta': vec(keys[12], C, 0.5),
        'gamma': vec(keys[13], C, 0.5),
    }
    return p


if __name__ == "__main__":
    N, C, H, W = 2, 4, 16, 16
    key = jax.random.PRNGKey(0)
    kx, kp = jax.random.split(key)

    # PyTorch NAFBlock input would be NCHW (2, 4, 16, 16); kernel layout NHWC.
    x_nchw = jax.random.normal(kx, (N, C, H, W), jnp.float32)
    x = jnp.transpose(x_nchw, (0, 2, 3, 1))  # -> NHWC
    params = init_params(kp, C)

    out = jax.block_until_ready(nafblock_pallas(x, params))
    ref = jax.block_until_ready(nafblock_ref(x, params))

    assert out.shape == (N, H, W, C), out.shape
    # Kernel matmuls use single-pass bf16 MXU precision with bf16-stored
    # activations; compare against the f32 reference with an L2-relative tol.
    rel_l2 = float(jnp.linalg.norm(out - ref) / jnp.linalg.norm(ref))
    if not (rel_l2 < 2e-2):
        raise AssertionError(f"mismatch vs reference: rel L2 err {rel_l2}")
    print("KERNEL_OK")
</pallas_src>

<mosaic_0001>
module attributes {stable_mosaic.version = 11 : i64} {
  func.func @kernel(%arg0: i32, %arg1: memref<1x16x16x4xf32, #tpu.memory_space<vmem>>, %arg2: memref<1x4xf32, #tpu.memory_space<vmem>>, %arg3: memref<1x4xf32, #tpu.memory_space<vmem>>, %arg4: memref<36x8xbf16, #tpu.memory_space<vmem>>, %arg5: memref<1x8xf32, #tpu.memory_space<vmem>>, %arg6: memref<72x4xbf16, #tpu.memory_space<vmem>>, %arg7: memref<1x4xf32, #tpu.memory_space<vmem>>, %arg8: memref<72x4xbf16, #tpu.memory_space<vmem>>, %arg9: memref<1x4xf32, #tpu.memory_space<vmem>>, %arg10: memref<4x4xf32, #tpu.memory_space<vmem>>, %arg11: memref<1x4xf32, #tpu.memory_space<vmem>>, %arg12: memref<36x4xbf16, #tpu.memory_space<vmem>>, %arg13: memref<1x4xf32, #tpu.memory_space<vmem>>, %arg14: memref<1x4xf32, #tpu.memory_space<vmem>>, %arg15: memref<1x4xf32, #tpu.memory_space<vmem>>, %arg16: memref<1x4xf32, #tpu.memory_space<vmem>>, %arg17: memref<36x4xbf16, #tpu.memory_space<vmem>>, %arg18: memref<1x4xf32, #tpu.memory_space<vmem>>, %arg19: memref<36x4xbf16, #tpu.memory_space<vmem>>, %arg20: memref<1x4xf32, #tpu.memory_space<vmem>>, %arg21: memref<36x4xbf16, #tpu.memory_space<vmem>>, %arg22: memref<1x4xf32, #tpu.memory_space<vmem>>, %arg23: memref<1x4xf32, #tpu.memory_space<vmem>>, %arg24: memref<1x16x16x4xf32, #tpu.memory_space<vmem>>, %arg25: memref<18x18x4xbf16, #tpu.memory_space<vmem>>, %arg26: memref<18x18x4xbf16, #tpu.memory_space<vmem>>, %arg27: memref<18x18x8xbf16, #tpu.memory_space<vmem>>, %arg28: memref<8x16x36xbf16, #tpu.memory_space<vmem>>, %arg29: memref<8x16x72xbf16, #tpu.memory_space<vmem>>, %arg30: memref<1x4xf32, #tpu.memory_space<vmem>>) attributes {dimension_semantics = [#tpu.dimension_semantics<parallel>], iteration_bounds = array<i64: 2>, scalar_prefetch = 0 : i64, scratch_operands = 6 : i64, tpu.core_type = #tpu.core_type<tc>, window_params = [{transform_indices = @transform_0, window_bounds = array<i64: 1, 16, 16, 4>}, {pipeline_mode = #tpu.pipeline_mode<synchronous>, transform_indices = @transform_1, window_bounds = array<i64: 1, 4>}, {pipeline_mode = #tpu.pipeline_mode<synchronous>, transform_indices = @transform_2, window_bounds = array<i64: 1, 4>}, {pipeline_mode = #tpu.pipeline_mode<synchronous>, transform_indices = @transform_3, window_bounds = array<i64: 36, 8>}, {pipeline_mode = #tpu.pipeline_mode<synchronous>, transform_indices = @transform_4, window_bounds = array<i64: 1, 8>}, {pipeline_mode = #tpu.pipeline_mode<synchronous>, transform_indices = @transform_5, window_bounds = array<i64: 72, 4>}, {pipeline_mode = #tpu.pipeline_mode<synchronous>, transform_indices = @transform_6, window_bounds = array<i64: 1, 4>}, {pipeline_mode = #tpu.pipeline_mode<synchronous>, transform_indices = @transform_7, window_bounds = array<i64: 72, 4>}, {pipeline_mode = #tpu.pipeline_mode<synchronous>, transform_indices = @transform_8, window_bounds = array<i64: 1, 4>}, {pipeline_mode = #tpu.pipeline_mode<synchronous>, transform_indices = @transform_9, window_bounds = array<i64: 4, 4>}, {pipeline_mode = #tpu.pipeline_mode<synchronous>, transform_indices = @transform_10, window_bounds = array<i64: 1, 4>}, {pipeline_mode = #tpu.pipeline_mode<synchronous>, transform_indices = @transform_11, window_bounds = array<i64: 36, 4>}, {pipeline_mode = #tpu.pipeline_mode<synchronous>, transform_indices = @transform_12, window_bounds = array<i64: 1, 4>}, {pipeline_mode = #tpu.pipeline_mode<synchronous>, transform_indices = @transform_13, window_bounds = array<i64: 1, 4>}, {pipeline_mode = #tpu.pipeline_mode<synchronous>, transform_indices = @transform_14, window_bounds = array<i64: 1, 4>}, {pipeline_mode = #tpu.pipeline_mode<synchronous>, transform_indices = @transform_15, window_bounds = array<i64: 1, 4>}, {pipeline_mode = #tpu.pipeline_mode<synchronous>, transform_indices = @transform_16, window_bounds = array<i64: 36, 4>}, {pipeline_mode = #tpu.pipeline_mode<synchronous>, transform_indices = @transform_17, window_bounds = array<i64: 1, 4>}, {pipeline_mode = #tpu.pipeline_mode<synchronous>, transform_indices = @transform_18, window_bounds = array<i64: 36, 4>}, {pipeline_mode = #tpu.pipeline_mode<synchronous>, transform_indices = @transform_19, window_bounds = array<i64: 1, 4>}, {pipeline_mode = #tpu.pipeline_mode<synchronous>, transform_indices = @transform_20, window_bounds = array<i64: 36, 4>}, {pipeline_mode = #tpu.pipeline_mode<synchronous>, transform_indices = @transform_21, window_bounds = array<i64: 1, 4>}, {pipeline_mode = #tpu.pipeline_mode<synchronous>, transform_indices = @transform_22, window_bounds = array<i64: 1, 4>}, {transform_indices = @transform_23, window_bounds = array<i64: 1, 16, 16, 4>}]} {
    %cst = arith.constant 0.000000e+00 : bf16
    %0 = vector.broadcast %cst : bf16 to vector<1x18x4xbf16>
    %cst_0 = arith.constant 0.000000e+00 : bf16
    %1 = vector.broadcast %cst_0 : bf16 to vector<16x1x4xbf16>
    %c0 = arith.constant 0 : index
    %c0_1 = arith.constant 0 : index
    %c0_2 = arith.constant 0 : index
    %2 = vector.load %arg25[%c0, %c0_1, %c0_2] : memref<18x18x4xbf16, #tpu.memory_space<vmem>>, vector<1x18x4xbf16>
    tpu.vector_store %arg25[%c0, %c0_1, %c0_2], %0 {strides = array<i32>} : memref<18x18x4xbf16, #tpu.memory_space<vmem>>, vector<1x18x4xbf16>,
    %c17 = arith.constant 17 : index
    %c0_3 = arith.constant 0 : index
    %c0_4 = arith.constant 0 : index
    %3 = vector.load %arg25[%c17, %c0_3, %c0_4] : memref<18x18x4xbf16, #tpu.memory_space<vmem>>, vector<1x18x4xbf16>
    tpu.vector_store %arg25[%c17, %c0_3, %c0_4], %0 {strides = array<i32>} : memref<18x18x4xbf16, #tpu.memory_space<vmem>>, vector<1x18x4xbf16>,
    %c1 = arith.constant 1 : index
    %c0_5 = arith.constant 0 : index
    %c0_6 = arith.constant 0 : index
    %4 = vector.load %arg25[%c1, %c0_5, %c0_6] : memref<18x18x4xbf16, #tpu.memory_space<vmem>>, vector<16x1x4xbf16>
    tpu.vector_store %arg25[%c1, %c0_5, %c0_6], %1 {strides = array<i32>} : memref<18x18x4xbf16, #tpu.memory_space<vmem>>, vector<16x1x4xbf16>,
    %c1_7 = arith.constant 1 : index
    %c17_8 = arith.constant 17 : index
    %c0_9 = arith.constant 0 : index
    %5 = vector.load %arg25[%c1_7, %c17_8, %c0_9] : memref<18x18x4xbf16, #tpu.memory_space<vmem>>, vector<16x1x4xbf16>
    tpu.vector_store %arg25[%c1_7, %c17_8, %c0_9], %1 {strides = array<i32>} : memref<18x18x4xbf16, #tpu.memory_space<vmem>>, vector<16x1x4xbf16>,
    %cst_10 = arith.constant 0.000000e+00 : bf16
    %6 = vector.broadcast %cst_10 : bf16 to vector<1x18x4xbf16>
    %cst_11 = arith.constant 0.000000e+00 : bf16
    %7 = vector.broadcast %cst_11 : bf16 to vector<16x1x4xbf16>
    %c0_12 = arith.constant 0 : index
    %c0_13 = arith.constant 0 : index
    %c0_14 = arith.constant 0 : index
    %8 = vector.load %arg26[%c0_12, %c0_13, %c0_14] : memref<18x18x4xbf16, #tpu.memory_space<vmem>>, vector<1x18x4xbf16>
    tpu.vector_store %arg26[%c0_12, %c0_13, %c0_14], %6 {strides = array<i32>} : memref<18x18x4xbf16, #tpu.memory_space<vmem>>, vector<1x18x4xbf16>,
    %c17_15 = arith.constant 17 : index
    %c0_16 = arith.constant 0 : index
    %c0_17 = arith.constant 0 : index
    %9 = vector.load %arg26[%c17_15, %c0_16, %c0_17] : memref<18x18x4xbf16, #tpu.memory_space<vmem>>, vector<1x18x4xbf16>
    tpu.vector_store %arg26[%c17_15, %c0_16, %c0_17], %6 {strides = array<i32>} : memref<18x18x4xbf16, #tpu.memory_space<vmem>>, vector<1x18x4xbf16>,
    %c1_18 = arith.constant 1 : index
    %c0_19 = arith.constant 0 : index
    %c0_20 = arith.constant 0 : index
    %10 = vector.load %arg26[%c1_18, %c0_19, %c0_20] : memref<18x18x4xbf16, #tpu.memory_space<vmem>>, vector<16x1x4xbf16>
    tpu.vector_store %arg26[%c1_18, %c0_19, %c0_20], %7 {strides = array<i32>} : memref<18x18x4xbf16, #tpu.memory_space<vmem>>, vector<16x1x4xbf16>,
    %c1_21 = arith.constant 1 : index
    %c17_22 = arith.constant 17 : index
    %c0_23 = arith.constant 0 : index
    %11 = vector.load %arg26[%c1_21, %c17_22, %c0_23] : memref<18x18x4xbf16, #tpu.memory_space<vmem>>, vector<16x1x4xbf16>
    tpu.vector_store %arg26[%c1_21, %c17_22, %c0_23], %7 {strides = array<i32>} : memref<18x18x4xbf16, #tpu.memory_space<vmem>>, vector<16x1x4xbf16>,
    %cst_24 = arith.constant 0.000000e+00 : bf16
    %12 = vector.broadcast %cst_24 : bf16 to vector<1x18x8xbf16>
    %cst_25 = arith.constant 0.000000e+00 : bf16
    %13 = vector.broadcast %cst_25 : bf16 to vector<16x1x8xbf16>
    %c0_26 = arith.constant 0 : index
    %c0_27 = arith.constant 0 : index
    %c0_28 = arith.constant 0 : index
    %14 = vector.load %arg27[%c0_26, %c0_27, %c0_28] : memref<18x18x8xbf16, #tpu.memory_space<vmem>>, vector<1x18x8xbf16>
    tpu.vector_store %arg27[%c0_26, %c0_27, %c0_28], %12 {strides = array<i32>} : memref<18x18x8xbf16, #tpu.memory_space<vmem>>, vector<1x18x8xbf16>,
    %c17_29 = arith.constant 17 : index
    %c0_30 = arith.constant 0 : index
    %c0_31 = arith.constant 0 : index
    %15 = vector.load %arg27[%c17_29, %c0_30, %c0_31] : memref<18x18x8xbf16, #tpu.memory_space<vmem>>, vector<1x18x8xbf16>
    tpu.vector_store %arg27[%c17_29, %c0_30, %c0_31], %12 {strides = array<i32>} : memref<18x18x8xbf16, #tpu.memory_space<vmem>>, vector<1x18x8xbf16>,
    %c1_32 = arith.constant 1 : index
    %c0_33 = arith.constant 0 : index
    %c0_34 = arith.constant 0 : index
    %16 = vector.load %arg27[%c1_32, %c0_33, %c0_34] : memref<18x18x8xbf16, #tpu.memory_space<vmem>>, vector<16x1x8xbf16>
    tpu.vector_store %arg27[%c1_32, %c0_33, %c0_34], %13 {strides = array<i32>} : memref<18x18x8xbf16, #tpu.memory_space<vmem>>, vector<16x1x8xbf16>,
    %c1_35 = arith.constant 1 : index
    %c17_36 = arith.constant 17 : index
    %c0_37 = arith.constant 0 : index
    %17 = vector.load %arg27[%c1_35, %c17_36, %c0_37] : memref<18x18x8xbf16, #tpu.memory_space<vmem>>, vector<16x1x8xbf16>
    tpu.vector_store %arg27[%c1_35, %c17_36, %c0_37], %13 {strides = array<i32>} : memref<18x18x8xbf16, #tpu.memory_space<vmem>>, vector<16x1x8xbf16>,
    %cst_38 = arith.constant 0.000000e+00 : f32
    %18 = vector.broadcast %cst_38 : f32 to vector<1x4xf32>
    %c0_39 = arith.constant 0 : index
    %c0_40 = arith.constant 0 : index
    %19 = vector.load %arg30[%c0_39, %c0_40] : memref<1x4xf32, #tpu.memory_space<vmem>>, vector<1x4xf32>
    tpu.vector_store %arg30[%c0_39, %c0_40], %18 {strides = array<i32>} : memref<1x4xf32, #tpu.memory_space<vmem>>, vector<1x4xf32>,
    %c0_i32 = arith.constant 0 : i32
    %c2_i32 = arith.constant 2 : i32
    %20 = arith.addi %c0_i32, %c2_i32 : i32
    %c1_i32 = arith.constant 1 : i32
    scf.for %arg31 = %c0_i32 to %20 step %c1_i32  : i32 {
      %c8_i32 = arith.constant 8 : i32
      %35 = arith.muli %arg31, %c8_i32 : i32
      %36 = tpu.assume_multiple %35, 8 : i32
      %c0_70 = arith.constant 0 : index
      %37 = arith.index_cast %36 : i32 to index
      %c0_71 = arith.constant 0 : index
      %c0_72 = arith.constant 0 : index
      %38 = vector.load %arg1[%c0_70, %37, %c0_71, %c0_72] : memref<1x16x16x4xf32, #tpu.memory_space<vmem>>, vector<1x8x16x4xf32>
      %39 = vector.shape_cast %38 : vector<1x8x16x4xf32> to vector<128x4xf32>
      %cst_73 = arith.constant dense<0.000000e+00> : vector<128xf32>
      %40 = vector.multi_reduction <add>, %39, %cst_73 [1] : vector<128x4xf32> to vector<128xf32>
      %41 = vector.shape_cast %40 : vector<128xf32> to vector<128x1xf32>
      %cst_74 = arith.constant 4.000000e+00 : f32
      %42 = vector.broadcast %cst_74 : f32 to vector<128x1xf32>
      %43 = arith.divf %41, %42 : vector<128x1xf32>
      %44 = vector.broadcast %43 : vector<128x1xf32> to vector<128x4xf32>
      %45 = arith.subf %39, %44 : vector<128x4xf32>
      %46 = arith.mulf %45, %45 : vector<128x4xf32>
      %cst_75 = arith.constant dense<0.000000e+00> : vector<128xf32>
      %47 = vector.multi_reduction <add>, %46, %cst_75 [1] : vector<128x4xf32> to vector<128xf32>
      %48 = vector.shape_cast %47 : vector<128xf32> to vector<128x1xf32>
      %cst_76 = arith.constant 4.000000e+00 : f32
      %49 = vector.broadcast %cst_76 : f32 to vector<128x1xf32>
      %50 = arith.divf %48, %49 : vector<128x1xf32>
      %cst_77 = arith.constant 9.99999997E-7 : f32
      %51 = vector.broadcast %cst_77 : f32 to vector<128x1xf32>
      %52 = arith.addf %50, %51 : vector<128x1xf32>
      %53 = math.rsqrt %52 : vector<128x1xf32>
      %54 = vector.broadcast %53 : vector<128x1xf32> to vector<128x4xf32>
      %55 = arith.mulf %45, %54 : vector<128x4xf32>
      %c0_78 = arith.constant 0 : index
      %c0_79 = arith.constant 0 : index
      %56 = vector.load %arg2[%c0_78, %c0_79] : memref<1x4xf32, #tpu.memory_space<vmem>>, vector<1x4xf32>
      %57 = vector.broadcast %56 : vector<1x4xf32> to vector<128x4xf32>
      %58 = arith.mulf %55, %57 : vector<128x4xf32>
      %c0_80 = arith.constant 0 : index
      %c0_81 = arith.constant 0 : index
      %59 = vector.load %arg3[%c0_80, %c0_81] : memref<1x4xf32, #tpu.memory_space<vmem>>, vector<1x4xf32>
      %60 = vector.broadcast %59 : vector<1x4xf32> to vector<128x4xf32>
      %61 = arith.addf %58, %60 : vector<128x4xf32>
      %62 = vector.shape_cast %61 : vector<128x4xf32> to vector<8x16x4xf32>
      %63 = arith.truncf %62 : vector<8x16x4xf32> to vector<8x16x4xbf16>
      %c1_i32_82 = arith.constant 1 : i32
      %64 = arith.addi %36, %c1_i32_82 : i32
      %65 = arith.index_cast %64 : i32 to index
      %c1_83 = arith.constant 1 : index
      %c0_84 = arith.constant 0 : index
      %66 = vector.load %arg25[%65, %c1_83, %c0_84] : memref<18x18x4xbf16, #tpu.memory_space<vmem>>, vector<8x16x4xbf16>
      tpu.vector_store %arg25[%65, %c1_83, %c0_84], %63 {strides = array<i32>} : memref<18x18x4xbf16, #tpu.memory_space<vmem>>, vector<8x16x4xbf16>,
    }
    %c2_i32_41 = arith.constant 2 : i32
    %c0_i32_42 = arith.constant 0 : i32
    %c2_i32_43 = arith.constant 2 : i32
    %21 = arith.addi %c0_i32_42, %c2_i32_43 : i32
    %c1_i32_44 = arith.constant 1 : i32
    scf.for %arg31 = %c0_i32_42 to %21 step %c1_i32_44  : i32 {
      %c8_i32 = arith.constant 8 : i32
      %35 = arith.muli %arg31, %c8_i32 : i32
      %36 = tpu.assume_multiple %35, 8 : i32
      %c0_i32_70 = arith.constant 0 : i32
      %37 = arith.addi %36, %c0_i32_70 : i32
      %38 = arith.index_cast %37 : i32 to index
      %c0_71 = arith.constant 0 : index
      %c0_72 = arith.constant 0 : index
      %39 = vector.load %arg25[%38, %c0_71, %c0_72] : memref<18x18x4xbf16, #tpu.memory_space<vmem>>, vector<8x16x4xbf16>
      %c0_i32_73 = arith.constant 0 : i32
      %40 = arith.addi %36, %c0_i32_73 : i32
      %41 = arith.index_cast %40 : i32 to index
      %c1_74 = arith.constant 1 : index
      %c0_75 = arith.constant 0 : index
      %42 = vector.load %arg25[%41, %c1_74, %c0_75] : memref<18x18x4xbf16, #tpu.memory_space<vmem>>, vector<8x16x4xbf16>
      %c0_i32_76 = arith.constant 0 : i32
      %43 = arith.addi %36, %c0_i32_76 : i32
      %44 = arith.index_cast %43 : i32 to index
      %c2 = arith.constant 2 : index
      %c0_77 = arith.constant 0 : index
      %45 = vector.load %arg25[%44, %c2, %c0_77] : memref<18x18x4xbf16, #tpu.memory_space<vmem>>, vector<8x16x4xbf16>
      %c1_i32_78 = arith.constant 1 : i32
      %46 = arith.addi %36, %c1_i32_78 : i32
      %47 = arith.index_cast %46 : i32 to index
      %c0_79 = arith.constant 0 : index
      %c0_80 = arith.constant 0 : index
      %48 = vector.load %arg25[%47, %c0_79, %c0_80] : memref<18x18x4xbf16, #tpu.memory_space<vmem>>, vector<8x16x4xbf16>
      %c1_i32_81 = arith.constant 1 : i32
      %49 = arith.addi %36, %c1_i32_81 : i32
      %50 = arith.index_cast %49 : i32 to index
      %c1_82 = arith.constant 1 : index
      %c0_83 = arith.constant 0 : index
      %51 = vector.load %arg25[%50, %c1_82, %c0_83] : memref<18x18x4xbf16, #tpu.memory_space<vmem>>, vector<8x16x4xbf16>
      %c1_i32_84 = arith.constant 1 : i32
      %52 = arith.addi %36, %c1_i32_84 : i32
      %53 = arith.index_cast %52 : i32 to index
      %c2_85 = arith.constant 2 : index
      %c0_86 = arith.constant 0 : index
      %54 = vector.load %arg25[%53, %c2_85, %c0_86] : memref<18x18x4xbf16, #tpu.memory_space<vmem>>, vector<8x16x4xbf16>
      %c2_i32_87 = arith.constant 2 : i32
      %55 = arith.addi %36, %c2_i32_87 : i32
      %56 = arith.index_cast %55 : i32 to index
      %c0_88 = arith.constant 0 : index
      %c0_89 = arith.constant 0 : index
      %57 = vector.load %arg25[%56, %c0_88, %c0_89] : memref<18x18x4xbf16, #tpu.memory_space<vmem>>, vector<8x16x4xbf16>
      %c2_i32_90 = arith.constant 2 : i32
      %58 = arith.addi %36, %c2_i32_90 : i32
      %59 = arith.index_cast %58 : i32 to index
      %c1_91 = arith.constant 1 : index
      %c0_92 = arith.constant 0 : index
      %60 = vector.load %arg25[%59, %c1_91, %c0_92] : memref<18x18x4xbf16, #tpu.memory_space<vmem>>, vector<8x16x4xbf16>
      %c2_i32_93 = arith.constant 2 : i32
      %61 = arith.addi %36, %c2_i32_93 : i32
      %62 = arith.index_cast %61 : i32 to index
      %c2_94 = arith.constant 2 : index
      %c0_95 = arith.constant 0 : index
      %63 = vector.load %arg25[%62, %c2_94, %c0_95] : memref<18x18x4xbf16, #tpu.memory_space<vmem>>, vector<8x16x4xbf16>
      %64 = tpu.concatenate %39, %42, %45, %48, %51, %54, %57, %60, %63 in 2 : vector<8x16x4xbf16>, vector<8x16x4xbf16>, vector<8x16x4xbf16>, vector<8x16x4xbf16>, vector<8x16x4xbf16>, vector<8x16x4xbf16>, vector<8x16x4xbf16>, vector<8x16x4xbf16>, vector<8x16x4xbf16> -> vector<8x16x36xbf16>
      %c0_96 = arith.constant 0 : index
      %c0_97 = arith.constant 0 : index
      %c0_98 = arith.constant 0 : index
      %65 = vector.load %arg28[%c0_96, %c0_97, %c0_98] : memref<8x16x36xbf16, #tpu.memory_space<vmem>>, vector<8x16x36xbf16>
      tpu.vector_store %arg28[%c0_96, %c0_97, %c0_98], %64 {strides = array<i32>} : memref<8x16x36xbf16, #tpu.memory_space<vmem>>, vector<8x16x36xbf16>,
      %c0_99 = arith.constant 0 : index
      %c0_100 = arith.constant 0 : index
      %c0_101 = arith.constant 0 : index
      %66 = vector.load %arg28[%c0_99, %c0_100, %c0_101] : memref<8x16x36xbf16, #tpu.memory_space<vmem>>, vector<8x16x36xbf16>
      %67 = vector.shape_cast %66 : vector<8x16x36xbf16> to vector<128x36xbf16>
      %c0_102 = arith.constant 0 : index
      %c0_103 = arith.constant 0 : index
      %68 = vector.load %arg4[%c0_102, %c0_103] : memref<36x8xbf16, #tpu.memory_space<vmem>>, vector<36x8xbf16>
      %cst_104 = arith.constant dense<0.000000e+00> : vector<128x8xf32>
      %69 = tpu.matmul %67, %68, %cst_104 {dimension_numbers = #tpu.dot_dimension_numbers<[1], [0], [0], [1], [0, 0, 1, 1], [], []>} : vector<128x36xbf16>, vector<36x8xbf16>, vector<128x8xf32> -> vector<128x8xf32>
      %c0_105 = arith.constant 0 : index
      %c0_106 = arith.constant 0 : index
      %70 = vector.load %arg5[%c0_105, %c0_106] : memref<1x8xf32, #tpu.memory_space<vmem>>, vector<1x8xf32>
      %71 = vector.broadcast %70 : vector<1x8xf32> to vector<128x8xf32>
      %72 = arith.addf %69, %71 : vector<128x8xf32>
      %73 = vector.shape_cast %72 : vector<128x8xf32> to vector<8x16x8xf32>
      %74 = arith.truncf %73 : vector<8x16x8xf32> to vector<8x16x8xbf16>
      %c1_i32_107 = arith.constant 1 : i32
      %75 = arith.addi %36, %c1_i32_107 : i32
      %76 = arith.index_cast %75 : i32 to index
      %c1_108 = arith.constant 1 : index
      %c0_109 = arith.constant 0 : index
      %77 = vector.load %arg27[%76, %c1_108, %c0_109] : memref<18x18x8xbf16, #tpu.memory_space<vmem>>, vector<8x16x8xbf16>
      tpu.vector_store %arg27[%76, %c1_108, %c0_109], %74 {strides = array<i32>} : memref<18x18x8xbf16, #tpu.memory_space<vmem>>, vector<8x16x8xbf16>,
    }
    %c2_i32_45 = arith.constant 2 : i32
    %c0_i32_46 = arith.constant 0 : i32
    %c2_i32_47 = arith.constant 2 : i32
    %22 = arith.addi %c0_i32_46, %c2_i32_47 : i32
    %c1_i32_48 = arith.constant 1 : i32
    scf.for %arg31 = %c0_i32_46 to %22 step %c1_i32_48  : i32 {
      %c8_i32 = arith.constant 8 : i32
      %35 = arith.muli %arg31, %c8_i32 : i32
      %36 = tpu.assume_multiple %35, 8 : i32
      %c0_i32_70 = arith.constant 0 : i32
      %37 = arith.addi %36, %c0_i32_70 : i32
      %38 = arith.index_cast %37 : i32 to index
      %c0_71 = arith.constant 0 : index
      %c0_72 = arith.constant 0 : index
      %39 = vector.load %arg27[%38, %c0_71, %c0_72] : memref<18x18x8xbf16, #tpu.memory_space<vmem>>, vector<8x16x8xbf16>
      %c0_i32_73 = arith.constant 0 : i32
      %40 = arith.addi %36, %c0_i32_73 : i32
      %41 = arith.index_cast %40 : i32 to index
      %c1_74 = arith.constant 1 : index
      %c0_75 = arith.constant 0 : index
      %42 = vector.load %arg27[%41, %c1_74, %c0_75] : memref<18x18x8xbf16, #tpu.memory_space<vmem>>, vector<8x16x8xbf16>
      %c0_i32_76 = arith.constant 0 : i32
      %43 = arith.addi %36, %c0_i32_76 : i32
      %44 = arith.index_cast %43 : i32 to index
      %c2 = arith.constant 2 : index
      %c0_77 = arith.constant 0 : index
      %45 = vector.load %arg27[%44, %c2, %c0_77] : memref<18x18x8xbf16, #tpu.memory_space<vmem>>, vector<8x16x8xbf16>
      %c1_i32_78 = arith.constant 1 : i32
      %46 = arith.addi %36, %c1_i32_78 : i32
      %47 = arith.index_cast %46 : i32 to index
      %c0_79 = arith.constant 0 : index
      %c0_80 = arith.constant 0 : index
      %48 = vector.load %arg27[%47, %c0_79, %c0_80] : memref<18x18x8xbf16, #tpu.memory_space<vmem>>, vector<8x16x8xbf16>
      %c1_i32_81 = arith.constant 1 : i32
      %49 = arith.addi %36, %c1_i32_81 : i32
      %50 = arith.index_cast %49 : i32 to index
      %c1_82 = arith.constant 1 : index
      %c0_83 = arith.constant 0 : index
      %51 = vector.load %arg27[%50, %c1_82, %c0_83] : memref<18x18x8xbf16, #tpu.memory_space<vmem>>, vector<8x16x8xbf16>
      %c1_i32_84 = arith.constant 1 : i32
      %52 = arith.addi %36, %c1_i32_84 : i32
      %53 = arith.index_cast %52 : i32 to index
      %c2_85 = arith.constant 2 : index
      %c0_86 = arith.constant 0 : index
      %54 = vector.load %arg27[%53, %c2_85, %c0_86] : memref<18x18x8xbf16, #tpu.memory_space<vmem>>, vector<8x16x8xbf16>
      %c2_i32_87 = arith.constant 2 : i32
      %55 = arith.addi %36, %c2_i32_87 : i32
      %56 = arith.index_cast %55 : i32 to index
      %c0_88 = arith.constant 0 : index
      %c0_89 = arith.constant 0 : index
      %57 = vector.load %arg27[%56, %c0_88, %c0_89] : memref<18x18x8xbf16, #tpu.memory_space<vmem>>, vector<8x16x8xbf16>
      %c2_i32_90 = arith.constant 2 : i32
      %58 = arith.addi %36, %c2_i32_90 : i32
      %59 = arith.index_cast %58 : i32 to index
      %c1_91 = arith.constant 1 : index
      %c0_92 = arith.constant 0 : index
      %60 = vector.load %arg27[%59, %c1_91, %c0_92] : memref<18x18x8xbf16, #tpu.memory_space<vmem>>, vector<8x16x8xbf16>
      %c2_i32_93 = arith.constant 2 : i32
      %61 = arith.addi %36, %c2_i32_93 : i32
      %62 = arith.index_cast %61 : i32 to index
      %c2_94 = arith.constant 2 : index
      %c0_95 = arith.constant 0 : index
      %63 = vector.load %arg27[%62, %c2_94, %c0_95] : memref<18x18x8xbf16, #tpu.memory_space<vmem>>, vector<8x16x8xbf16>
      %64 = tpu.concatenate %39, %42, %45, %48, %51, %54, %57, %60, %63 in 2 : vector<8x16x8xbf16>, vector<8x16x8xbf16>, vector<8x16x8xbf16>, vector<8x16x8xbf16>, vector<8x16x8xbf16>, vector<8x16x8xbf16>, vector<8x16x8xbf16>, vector<8x16x8xbf16>, vector<8x16x8xbf16> -> vector<8x16x72xbf16>
      %c0_96 = arith.constant 0 : index
      %c0_97 = arith.constant 0 : index
      %c0_98 = arith.constant 0 : index
      %65 = vector.load %arg29[%c0_96, %c0_97, %c0_98] : memref<8x16x72xbf16, #tpu.memory_space<vmem>>, vector<8x16x72xbf16>
      tpu.vector_store %arg29[%c0_96, %c0_97, %c0_98], %64 {strides = array<i32>} : memref<8x16x72xbf16, #tpu.memory_space<vmem>>, vector<8x16x72xbf16>,
      %c0_99 = arith.constant 0 : index
      %c0_100 = arith.constant 0 : index
      %c0_101 = arith.constant 0 : index
      %66 = vector.load %arg29[%c0_99, %c0_100, %c0_101] : memref<8x16x72xbf16, #tpu.memory_space<vmem>>, vector<8x16x72xbf16>
      %67 = vector.shape_cast %66 : vector<8x16x72xbf16> to vector<128x72xbf16>
      %c0_102 = arith.constant 0 : index
      %c0_103 = arith.constant 0 : index
      %68 = vector.load %arg6[%c0_102, %c0_103] : memref<72x4xbf16, #tpu.memory_space<vmem>>, vector<72x4xbf16>
      %cst_104 = arith.constant dense<0.000000e+00> : vector<128x4xf32>
      %69 = tpu.matmul %67, %68, %cst_104 {dimension_numbers = #tpu.dot_dimension_numbers<[1], [0], [0], [1], [0, 0, 1, 1], [], []>} : vector<128x72xbf16>, vector<72x4xbf16>, vector<128x4xf32> -> vector<128x4xf32>
      %c0_105 = arith.constant 0 : index
      %c0_106 = arith.constant 0 : index
      %70 = vector.load %arg7[%c0_105, %c0_106] : memref<1x4xf32, #tpu.memory_space<vmem>>, vector<1x4xf32>
      %71 = vector.broadcast %70 : vector<1x4xf32> to vector<128x4xf32>
      %72 = arith.addf %69, %71 : vector<128x4xf32>
      %c0_107 = arith.constant 0 : index
      %c0_108 = arith.constant 0 : index
      %c0_109 = arith.constant 0 : index
      %73 = vector.load %arg29[%c0_107, %c0_108, %c0_109] : memref<8x16x72xbf16, #tpu.memory_space<vmem>>, vector<8x16x72xbf16>
      %74 = vector.shape_cast %73 : vector<8x16x72xbf16> to vector<128x72xbf16>
      %c0_110 = arith.constant 0 : index
      %c0_111 = arith.constant 0 : index
      %75 = vector.load %arg8[%c0_110, %c0_111] : memref<72x4xbf16, #tpu.memory_space<vmem>>, vector<72x4xbf16>
      %cst_112 = arith.constant dense<0.000000e+00> : vector<128x4xf32>
      %76 = tpu.matmul %74, %75, %cst_112 {dimension_numbers = #tpu.dot_dimension_numbers<[1], [0], [0], [1], [0, 0, 1, 1], [], []>} : vector<128x72xbf16>, vector<72x4xbf16>, vector<128x4xf32> -> vector<128x4xf32>
      %c0_113 = arith.constant 0 : index
      %c0_114 = arith.constant 0 : index
      %77 = vector.load %arg9[%c0_113, %c0_114] : memref<1x4xf32, #tpu.memory_space<vmem>>, vector<1x4xf32>
      %78 = vector.broadcast %77 : vector<1x4xf32> to vector<128x4xf32>
      %79 = arith.addf %76, %78 : vector<128x4xf32>
      %80 = arith.mulf %72, %79 : vector<128x4xf32>
      %c0_115 = arith.constant 0 : index
      %c0_116 = arith.constant 0 : index
      %81 = vector.load %arg30[%c0_115, %c0_116] : memref<1x4xf32, #tpu.memory_space<vmem>>, vector<1x4xf32>
      %cst_117 = arith.constant dense<0.000000e+00> : vector<4xf32>
      %82 = vector.multi_reduction <add>, %80, %cst_117 [0] : vector<128x4xf32> to vector<4xf32>
      %83 = vector.shape_cast %82 : vector<4xf32> to vector<1x4xf32>
      %84 = arith.addf %81, %83 : vector<1x4xf32>
      %c0_118 = arith.constant 0 : index
      %c0_119 = arith.constant 0 : index
      %85 = vector.load %arg30[%c0_118, %c0_119] : memref<1x4xf32, #tpu.memory_space<vmem>>, vector<1x4xf32>
      tpu.vector_store %arg30[%c0_118, %c0_119], %84 {strides = array<i32>} : memref<1x4xf32, #tpu.memory_space<vmem>>, vector<1x4xf32>,
      %86 = vector.shape_cast %80 : vector<128x4xf32> to vector<8x16x4xf32>
      %87 = arith.truncf %86 : vector<8x16x4xf32> to vector<8x16x4xbf16>
      %c1_i32_120 = arith.constant 1 : i32
      %88 = arith.addi %36, %c1_i32_120 : i32
      %89 = arith.index_cast %88 : i32 to index
      %c1_121 = arith.constant 1 : index
      %c0_122 = arith.constant 0 : index
      %90 = vector.load %arg25[%89, %c1_121, %c0_122] : memref<18x18x4xbf16, #tpu.memory_space<vmem>>, vector<8x16x4xbf16>
      tpu.vector_store %arg25[%89, %c1_121, %c0_122], %87 {strides = array<i32>} : memref<18x18x4xbf16, #tpu.memory_space<vmem>>, vector<8x16x4xbf16>,
    }
    %c2_i32_49 = arith.constant 2 : i32
    %c0_50 = arith.constant 0 : index
    %c0_51 = arith.constant 0 : index
    %23 = vector.load %arg30[%c0_50, %c0_51] : memref<1x4xf32, #tpu.memory_space<vmem>>, vector<1x4xf32>
    %cst_52 = arith.constant 3.906250e-03 : f32
    %24 = vector.broadcast %cst_52 : f32 to vector<1x4xf32>
    %25 = arith.mulf %23, %24 : vector<1x4xf32>
    %c0_53 = arith.constant 0 : index
    %c0_54 = arith.constant 0 : index
    %26 = vector.load %arg10[%c0_53, %c0_54] : memref<4x4xf32, #tpu.memory_space<vmem>>, vector<4x4xf32>
    %cst_55 = arith.constant dense<0.000000e+00> : vector<1x4xf32>
    %27 = tpu.matmul %25, %26, %cst_55 {dimension_numbers = #tpu.dot_dimension_numbers<[1], [0], [0], [1], [0, 0, 1, 1], [], []>} : vector<1x4xf32>, vector<4x4xf32>, vector<1x4xf32> -> vector<1x4xf32>
    %c0_56 = arith.constant 0 : index
    %c0_57 = arith.constant 0 : index
    %28 = vector.load %arg11[%c0_56, %c0_57] : memref<1x4xf32, #tpu.memory_space<vmem>>, vector<1x4xf32>
    %29 = arith.addf %27, %28 : vector<1x4xf32>
    %30 = tpu.concatenate %29, %29, %29, %29, %29, %29, %29, %29, %29 in 1 : vector<1x4xf32>, vector<1x4xf32>, vector<1x4xf32>, vector<1x4xf32>, vector<1x4xf32>, vector<1x4xf32>, vector<1x4xf32>, vector<1x4xf32>, vector<1x4xf32> -> vector<1x36xf32>
    %31 = vector.shape_cast %30 : vector<1x36xf32> to vector<1x1x36xf32>
    %c0_i32_58 = arith.constant 0 : i32
    %c2_i32_59 = arith.constant 2 : i32
    %32 = arith.addi %c0_i32_58, %c2_i32_59 : i32
    %c1_i32_60 = arith.constant 1 : i32
    scf.for %arg31 = %c0_i32_58 to %32 step %c1_i32_60  : i32 {
      %c8_i32 = arith.constant 8 : i32
      %35 = arith.muli %arg31, %c8_i32 : i32
      %36 = tpu.assume_multiple %35, 8 : i32
      %c0_i32_70 = arith.constant 0 : i32
      %37 = arith.addi %36, %c0_i32_70 : i32
      %38 = arith.index_cast %37 : i32 to index
      %c0_71 = arith.constant 0 : index
      %c0_72 = arith.constant 0 : index
      %39 = vector.load %arg25[%38, %c0_71, %c0_72] : memref<18x18x4xbf16, #tpu.memory_space<vmem>>, vector<8x16x4xbf16>
      %c0_i32_73 = arith.constant 0 : i32
      %40 = arith.addi %36, %c0_i32_73 : i32
      %41 = arith.index_cast %40 : i32 to index
      %c1_74 = arith.constant 1 : index
      %c0_75 = arith.constant 0 : index
      %42 = vector.load %arg25[%41, %c1_74, %c0_75] : memref<18x18x4xbf16, #tpu.memory_space<vmem>>, vector<8x16x4xbf16>
      %c0_i32_76 = arith.constant 0 : i32
      %43 = arith.addi %36, %c0_i32_76 : i32
      %44 = arith.index_cast %43 : i32 to index
      %c2 = arith.constant 2 : index
      %c0_77 = arith.constant 0 : index
      %45 = vector.load %arg25[%44, %c2, %c0_77] : memref<18x18x4xbf16, #tpu.memory_space<vmem>>, vector<8x16x4xbf16>
      %c1_i32_78 = arith.constant 1 : i32
      %46 = arith.addi %36, %c1_i32_78 : i32
      %47 = arith.index_cast %46 : i32 to index
      %c0_79 = arith.constant 0 : index
      %c0_80 = arith.constant 0 : index
      %48 = vector.load %arg25[%47, %c0_79, %c0_80] : memref<18x18x4xbf16, #tpu.memory_space<vmem>>, vector<8x16x4xbf16>
      %c1_i32_81 = arith.constant 1 : i32
      %49 = arith.addi %36, %c1_i32_81 : i32
      %50 = arith.index_cast %49 : i32 to index
      %c1_82 = arith.constant 1 : index
      %c0_83 = arith.constant 0 : index
      %51 = vector.load %arg25[%50, %c1_82, %c0_83] : memref<18x18x4xbf16, #tpu.memory_space<vmem>>, vector<8x16x4xbf16>
      %c1_i32_84 = arith.constant 1 : i32
      %52 = arith.addi %36, %c1_i32_84 : i32
      %53 = arith.index_cast %52 : i32 to index
      %c2_85 = arith.constant 2 : index
      %c0_86 = arith.constant 0 : index
      %54 = vector.load %arg25[%53, %c2_85, %c0_86] : memref<18x18x4xbf16, #tpu.memory_space<vmem>>, vector<8x16x4xbf16>
      %c2_i32_87 = arith.constant 2 : i32
      %55 = arith.addi %36, %c2_i32_87 : i32
      %56 = arith.index_cast %55 : i32 to index
      %c0_88 = arith.constant 0 : index
      %c0_89 = arith.constant 0 : index
      %57 = vector.load %arg25[%56, %c0_88, %c0_89] : memref<18x18x4xbf16, #tpu.memory_space<vmem>>, vector<8x16x4xbf16>
      %c2_i32_90 = arith.constant 2 : i32
      %58 = arith.addi %36, %c2_i32_90 : i32
      %59 = arith.index_cast %58 : i32 to index
      %c1_91 = arith.constant 1 : index
      %c0_92 = arith.constant 0 : index
      %60 = vector.load %arg25[%59, %c1_91, %c0_92] : memref<18x18x4xbf16, #tpu.memory_space<vmem>>, vector<8x16x4xbf16>
      %c2_i32_93 = arith.constant 2 : i32
      %61 = arith.addi %36, %c2_i32_93 : i32
      %62 = arith.index_cast %61 : i32 to index
      %c2_94 = arith.constant 2 : index
      %c0_95 = arith.constant 0 : index
      %63 = vector.load %arg25[%62, %c2_94, %c0_95] : memref<18x18x4xbf16, #tpu.memory_space<vmem>>, vector<8x16x4xbf16>
      %64 = tpu.concatenate %39, %42, %45, %48, %51, %54, %57, %60, %63 in 2 : vector<8x16x4xbf16>, vector<8x16x4xbf16>, vector<8x16x4xbf16>, vector<8x16x4xbf16>, vector<8x16x4xbf16>, vector<8x16x4xbf16>, vector<8x16x4xbf16>, vector<8x16x4xbf16>, vector<8x16x4xbf16> -> vector<8x16x36xbf16>
      %65 = arith.extf %64 : vector<8x16x36xbf16> to vector<8x16x36xf32>
      %66 = vector.broadcast %31 : vector<1x1x36xf32> to vector<8x16x36xf32>
      %67 = arith.mulf %65, %66 : vector<8x16x36xf32>
      %68 = arith.truncf %67 : vector<8x16x36xf32> to vector<8x16x36xbf16>
      %c0_96 = arith.constant 0 : index
      %c0_97 = arith.constant 0 : index
      %c0_98 = arith.constant 0 : index
      %69 = vector.load %arg28[%c0_96, %c0_97, %c0_98] : memref<8x16x36xbf16, #tpu.memory_space<vmem>>, vector<8x16x36xbf16>
      tpu.vector_store %arg28[%c0_96, %c0_97, %c0_98], %68 {strides = array<i32>} : memref<8x16x36xbf16, #tpu.memory_space<vmem>>, vector<8x16x36xbf16>,
      %c0_99 = arith.constant 0 : index
      %c0_100 = arith.constant 0 : index
      %c0_101 = arith.constant 0 : index
      %70 = vector.load %arg28[%c0_99, %c0_100, %c0_101] : memref<8x16x36xbf16, #tpu.memory_space<vmem>>, vector<8x16x36xbf16>
      %71 = vector.shape_cast %70 : vector<8x16x36xbf16> to vector<128x36xbf16>
      %c0_102 = arith.constant 0 : index
      %c0_103 = arith.constant 0 : index
      %72 = vector.load %arg12[%c0_102, %c0_103] : memref<36x4xbf16, #tpu.memory_space<vmem>>, vector<36x4xbf16>
      %cst_104 = arith.constant dense<0.000000e+00> : vector<128x4xf32>
      %73 = tpu.matmul %71, %72, %cst_104 {dimension_numbers = #tpu.dot_dimension_numbers<[1], [0], [0], [1], [0, 0, 1, 1], [], []>} : vector<128x36xbf16>, vector<36x4xbf16>, vector<128x4xf32> -> vector<128x4xf32>
      %c0_105 = arith.constant 0 : index
      %c0_106 = arith.constant 0 : index
      %74 = vector.load %arg13[%c0_105, %c0_106] : memref<1x4xf32, #tpu.memory_space<vmem>>, vector<1x4xf32>
      %75 = vector.broadcast %74 : vector<1x4xf32> to vector<128x4xf32>
      %76 = arith.addf %73, %75 : vector<128x4xf32>
      %c0_107 = arith.constant 0 : index
      %77 = arith.index_cast %36 : i32 to index
      %c0_108 = arith.constant 0 : index
      %c0_109 = arith.constant 0 : index
      %78 = vector.load %arg1[%c0_107, %77, %c0_108, %c0_109] : memref<1x16x16x4xf32, #tpu.memory_space<vmem>>, vector<1x8x16x4xf32>
      %79 = vector.shape_cast %78 : vector<1x8x16x4xf32> to vector<128x4xf32>
      %c0_110 = arith.constant 0 : index
      %c0_111 = arith.constant 0 : index
      %80 = vector.load %arg14[%c0_110, %c0_111] : memref<1x4xf32, #tpu.memory_space<vmem>>, vector<1x4xf32>
      %81 = vector.broadcast %80 : vector<1x4xf32> to vector<128x4xf32>
      %82 = arith.mulf %76, %81 : vector<128x4xf32>
      %83 = arith.addf %79, %82 : vector<128x4xf32>
      %84 = vector.shape_cast %83 : vector<128x4xf32> to vector<1x8x16x4xf32>
      %c0_112 = arith.constant 0 : index
      %85 = arith.index_cast %36 : i32 to index
      %c0_113 = arith.constant 0 : index
      %c0_114 = arith.constant 0 : index
      %86 = vector.load %arg24[%c0_112, %85, %c0_113, %c0_114] : memref<1x16x16x4xf32, #tpu.memory_space<vmem>>, vector<1x8x16x4xf32>
      tpu.vector_store %arg24[%c0_112, %85, %c0_113, %c0_114], %84 {strides = array<i32>} : memref<1x16x16x4xf32, #tpu.memory_space<vmem>>, vector<1x8x16x4xf32>,
      %cst_115 = arith.constant dense<0.000000e+00> : vector<128xf32>
      %87 = vector.multi_reduction <add>, %83, %cst_115 [1] : vector<128x4xf32> to vector<128xf32>
      %88 = vector.shape_cast %87 : vector<128xf32> to vector<128x1xf32>
      %cst_116 = arith.constant 4.000000e+00 : f32
      %89 = vector.broadcast %cst_116 : f32 to vector<128x1xf32>
      %90 = arith.divf %88, %89 : vector<128x1xf32>
      %91 = vector.broadcast %90 : vector<128x1xf32> to vector<128x4xf32>
      %92 = arith.subf %83, %91 : vector<128x4xf32>
      %93 = arith.mulf %92, %92 : vector<128x4xf32>
      %cst_117 = arith.constant dense<0.000000e+00> : vector<128xf32>
      %94 = vector.multi_reduction <add>, %93, %cst_117 [1] : vector<128x4xf32> to vector<128xf32>
      %95 = vector.shape_cast %94 : vector<128xf32> to vector<128x1xf32>
      %cst_118 = arith.constant 4.000000e+00 : f32
      %96 = vector.broadcast %cst_118 : f32 to vector<128x1xf32>
      %97 = arith.divf %95, %96 : vector<128x1xf32>
      %cst_119 = arith.constant 9.99999997E-7 : f32
      %98 = vector.broadcast %cst_119 : f32 to vector<128x1xf32>
      %99 = arith.addf %97, %98 : vector<128x1xf32>
      %100 = math.rsqrt %99 : vector<128x1xf32>
      %101 = vector.broadcast %100 : vector<128x1xf32> to vector<128x4xf32>
      %102 = arith.mulf %92, %101 : vector<128x4xf32>
      %c0_120 = arith.constant 0 : index
      %c0_121 = arith.constant 0 : index
      %103 = vector.load %arg15[%c0_120, %c0_121] : memref<1x4xf32, #tpu.memory_space<vmem>>, vector<1x4xf32>
      %104 = vector.broadcast %103 : vector<1x4xf32> to vector<128x4xf32>
      %105 = arith.mulf %102, %104 : vector<128x4xf32>
      %c0_122 = arith.constant 0 : index
      %c0_123 = arith.constant 0 : index
      %106 = vector.load %arg16[%c0_122, %c0_123] : memref<1x4xf32, #tpu.memory_space<vmem>>, vector<1x4xf32>
      %107 = vector.broadcast %106 : vector<1x4xf32> to vector<128x4xf32>
      %108 = arith.addf %105, %107 : vector<128x4xf32>
      %109 = vector.shape_cast %108 : vector<128x4xf32> to vector<8x16x4xf32>
      %110 = arith.truncf %109 : vector<8x16x4xf32> to vector<8x16x4xbf16>
      %c1_i32_124 = arith.constant 1 : i32
      %111 = arith.addi %36, %c1_i32_124 : i32
      %112 = arith.index_cast %111 : i32 to index
      %c1_125 = arith.constant 1 : index
      %c0_126 = arith.constant 0 : index
      %113 = vector.load %arg26[%112, %c1_125, %c0_126] : memref<18x18x4xbf16, #tpu.memory_space<vmem>>, vector<8x16x4xbf16>
      tpu.vector_store %arg26[%112, %c1_125, %c0_126], %110 {strides = array<i32>} : memref<18x18x4xbf16, #tpu.memory_space<vmem>>, vector<8x16x4xbf16>,
    }
    %c2_i32_61 = arith.constant 2 : i32
    %c0_i32_62 = arith.constant 0 : i32
    %c2_i32_63 = arith.constant 2 : i32
    %33 = arith.addi %c0_i32_62, %c2_i32_63 : i32
    %c1_i32_64 = arith.constant 1 : i32
    scf.for %arg31 = %c0_i32_62 to %33 step %c1_i32_64  : i32 {
      %c8_i32 = arith.constant 8 : i32
      %35 = arith.muli %arg31, %c8_i32 : i32
      %36 = tpu.assume_multiple %35, 8 : i32
      %c0_i32_70 = arith.constant 0 : i32
      %37 = arith.addi %36, %c0_i32_70 : i32
      %38 = arith.index_cast %37 : i32 to index
      %c0_71 = arith.constant 0 : index
      %c0_72 = arith.constant 0 : index
      %39 = vector.load %arg26[%38, %c0_71, %c0_72] : memref<18x18x4xbf16, #tpu.memory_space<vmem>>, vector<8x16x4xbf16>
      %c0_i32_73 = arith.constant 0 : i32
      %40 = arith.addi %36, %c0_i32_73 : i32
      %41 = arith.index_cast %40 : i32 to index
      %c1_74 = arith.constant 1 : index
      %c0_75 = arith.constant 0 : index
      %42 = vector.load %arg26[%41, %c1_74, %c0_75] : memref<18x18x4xbf16, #tpu.memory_space<vmem>>, vector<8x16x4xbf16>
      %c0_i32_76 = arith.constant 0 : i32
      %43 = arith.addi %36, %c0_i32_76 : i32
      %44 = arith.index_cast %43 : i32 to index
      %c2 = arith.constant 2 : index
      %c0_77 = arith.constant 0 : index
      %45 = vector.load %arg26[%44, %c2, %c0_77] : memref<18x18x4xbf16, #tpu.memory_space<vmem>>, vector<8x16x4xbf16>
      %c1_i32_78 = arith.constant 1 : i32
      %46 = arith.addi %36, %c1_i32_78 : i32
      %47 = arith.index_cast %46 : i32 to index
      %c0_79 = arith.constant 0 : index
      %c0_80 = arith.constant 0 : index
      %48 = vector.load %arg26[%47, %c0_79, %c0_80] : memref<18x18x4xbf16, #tpu.memory_space<vmem>>, vector<8x16x4xbf16>
      %c1_i32_81 = arith.constant 1 : i32
      %49 = arith.addi %36, %c1_i32_81 : i32
      %50 = arith.index_cast %49 : i32 to index
      %c1_82 = arith.constant 1 : index
      %c0_83 = arith.constant 0 : index
      %51 = vector.load %arg26[%50, %c1_82, %c0_83] : memref<18x18x4xbf16, #tpu.memory_space<vmem>>, vector<8x16x4xbf16>
      %c1_i32_84 = arith.constant 1 : i32
      %52 = arith.addi %36, %c1_i32_84 : i32
      %53 = arith.index_cast %52 : i32 to index
      %c2_85 = arith.constant 2 : index
      %c0_86 = arith.constant 0 : index
      %54 = vector.load %arg26[%53, %c2_85, %c0_86] : memref<18x18x4xbf16, #tpu.memory_space<vmem>>, vector<8x16x4xbf16>
      %c2_i32_87 = arith.constant 2 : i32
      %55 = arith.addi %36, %c2_i32_87 : i32
      %56 = arith.index_cast %55 : i32 to index
      %c0_88 = arith.constant 0 : index
      %c0_89 = arith.constant 0 : index
      %57 = vector.load %arg26[%56, %c0_88, %c0_89] : memref<18x18x4xbf16, #tpu.memory_space<vmem>>, vector<8x16x4xbf16>
      %c2_i32_90 = arith.constant 2 : i32
      %58 = arith.addi %36, %c2_i32_90 : i32
      %59 = arith.index_cast %58 : i32 to index
      %c1_91 = arith.constant 1 : index
      %c0_92 = arith.constant 0 : index
      %60 = vector.load %arg26[%59, %c1_91, %c0_92] : memref<18x18x4xbf16, #tpu.memory_space<vmem>>, vector<8x16x4xbf16>
      %c2_i32_93 = arith.constant 2 : i32
      %61 = arith.addi %36, %c2_i32_93 : i32
      %62 = arith.index_cast %61 : i32 to index
      %c2_94 = arith.constant 2 : index
      %c0_95 = arith.constant 0 : index
      %63 = vector.load %arg26[%62, %c2_94, %c0_95] : memref<18x18x4xbf16, #tpu.memory_space<vmem>>, vector<8x16x4xbf16>
      %64 = tpu.concatenate %39, %42, %45, %48, %51, %54, %57, %60, %63 in 2 : vector<8x16x4xbf16>, vector<8x16x4xbf16>, vector<8x16x4xbf16>, vector<8x16x4xbf16>, vector<8x16x4xbf16>, vector<8x16x4xbf16>, vector<8x16x4xbf16>, vector<8x16x4xbf16>, vector<8x16x4xbf16> -> vector<8x16x36xbf16>
      %c0_96 = arith.constant 0 : index
      %c0_97 = arith.constant 0 : index
      %c0_98 = arith.constant 0 : index
      %65 = vector.load %arg28[%c0_96, %c0_97, %c0_98] : memref<8x16x36xbf16, #tpu.memory_space<vmem>>, vector<8x16x36xbf16>
      tpu.vector_store %arg28[%c0_96, %c0_97, %c0_98], %64 {strides = array<i32>} : memref<8x16x36xbf16, #tpu.memory_space<vmem>>, vector<8x16x36xbf16>,
      %c0_99 = arith.constant 0 : index
      %c0_100 = arith.constant 0 : index
      %c0_101 = arith.constant 0 : index
      %66 = vector.load %arg28[%c0_99, %c0_100, %c0_101] : memref<8x16x36xbf16, #tpu.memory_space<vmem>>, vector<8x16x36xbf16>
      %67 = vector.shape_cast %66 : vector<8x16x36xbf16> to vector<128x36xbf16>
      %c0_102 = arith.constant 0 : index
      %c0_103 = arith.constant 0 : index
      %68 = vector.load %arg17[%c0_102, %c0_103] : memref<36x4xbf16, #tpu.memory_space<vmem>>, vector<36x4xbf16>
      %cst_104 = arith.constant dense<0.000000e+00> : vector<128x4xf32>
      %69 = tpu.matmul %67, %68, %cst_104 {dimension_numbers = #tpu.dot_dimension_numbers<[1], [0], [0], [1], [0, 0, 1, 1], [], []>} : vector<128x36xbf16>, vector<36x4xbf16>, vector<128x4xf32> -> vector<128x4xf32>
      %c0_105 = arith.constant 0 : index
      %c0_106 = arith.constant 0 : index
      %70 = vector.load %arg18[%c0_105, %c0_106] : memref<1x4xf32, #tpu.memory_space<vmem>>, vector<1x4xf32>
      %71 = vector.broadcast %70 : vector<1x4xf32> to vector<128x4xf32>
      %72 = arith.addf %69, %71 : vector<128x4xf32>
      %c0_107 = arith.constant 0 : index
      %c0_108 = arith.constant 0 : index
      %c0_109 = arith.constant 0 : index
      %73 = vector.load %arg28[%c0_107, %c0_108, %c0_109] : memref<8x16x36xbf16, #tpu.memory_space<vmem>>, vector<8x16x36xbf16>
      %74 = vector.shape_cast %73 : vector<8x16x36xbf16> to vector<128x36xbf16>
      %c0_110 = arith.constant 0 : index
      %c0_111 = arith.constant 0 : index
      %75 = vector.load %arg19[%c0_110, %c0_111] : memref<36x4xbf16, #tpu.memory_space<vmem>>, vector<36x4xbf16>
      %cst_112 = arith.constant dense<0.000000e+00> : vector<128x4xf32>
      %76 = tpu.matmul %74, %75, %cst_112 {dimension_numbers = #tpu.dot_dimension_numbers<[1], [0], [0], [1], [0, 0, 1, 1], [], []>} : vector<128x36xbf16>, vector<36x4xbf16>, vector<128x4xf32> -> vector<128x4xf32>
      %c0_113 = arith.constant 0 : index
      %c0_114 = arith.constant 0 : index
      %77 = vector.load %arg20[%c0_113, %c0_114] : memref<1x4xf32, #tpu.memory_space<vmem>>, vector<1x4xf32>
      %78 = vector.broadcast %77 : vector<1x4xf32> to vector<128x4xf32>
      %79 = arith.addf %76, %78 : vector<128x4xf32>
      %80 = arith.mulf %72, %79 : vector<128x4xf32>
      %81 = vector.shape_cast %80 : vector<128x4xf32> to vector<8x16x4xf32>
      %82 = arith.truncf %81 : vector<8x16x4xf32> to vector<8x16x4xbf16>
      %c1_i32_115 = arith.constant 1 : i32
      %83 = arith.addi %36, %c1_i32_115 : i32
      %84 = arith.index_cast %83 : i32 to index
      %c1_116 = arith.constant 1 : index
      %c0_117 = arith.constant 0 : index
      %85 = vector.load %arg25[%84, %c1_116, %c0_117] : memref<18x18x4xbf16, #tpu.memory_space<vmem>>, vector<8x16x4xbf16>
      tpu.vector_store %arg25[%84, %c1_116, %c0_117], %82 {strides = array<i32>} : memref<18x18x4xbf16, #tpu.memory_space<vmem>>, vector<8x16x4xbf16>,
    }
    %c2_i32_65 = arith.constant 2 : i32
    %c0_i32_66 = arith.constant 0 : i32
    %c2_i32_67 = arith.constant 2 : i32
    %34 = arith.addi %c0_i32_66, %c2_i32_67 : i32
    %c1_i32_68 = arith.constant 1 : i32
    scf.for %arg31 = %c0_i32_66 to %34 step %c1_i32_68  : i32 {
      %c8_i32 = arith.constant 8 : i32
      %35 = arith.muli %arg31, %c8_i32 : i32
      %36 = tpu.assume_multiple %35, 8 : i32
      %c0_i32_70 = arith.constant 0 : i32
      %37 = arith.addi %36, %c0_i32_70 : i32
      %38 = arith.index_cast %37 : i32 to index
      %c0_71 = arith.constant 0 : index
      %c0_72 = arith.constant 0 : index
      %39 = vector.load %arg25[%38, %c0_71, %c0_72] : memref<18x18x4xbf16, #tpu.memory_space<vmem>>, vector<8x16x4xbf16>
      %c0_i32_73 = arith.constant 0 : i32
      %40 = arith.addi %36, %c0_i32_73 : i32
      %41 = arith.index_cast %40 : i32 to index
      %c1_74 = arith.constant 1 : index
      %c0_75 = arith.constant 0 : index
      %42 = vector.load %arg25[%41, %c1_74, %c0_75] : memref<18x18x4xbf16, #tpu.memory_space<vmem>>, vector<8x16x4xbf16>
      %c0_i32_76 = arith.constant 0 : i32
      %43 = arith.addi %36, %c0_i32_76 : i32
      %44 = arith.index_cast %43 : i32 to index
      %c2 = arith.constant 2 : index
      %c0_77 = arith.constant 0 : index
      %45 = vector.load %arg25[%44, %c2, %c0_77] : memref<18x18x4xbf16, #tpu.memory_space<vmem>>, vector<8x16x4xbf16>
      %c1_i32_78 = arith.constant 1 : i32
      %46 = arith.addi %36, %c1_i32_78 : i32
      %47 = arith.index_cast %46 : i32 to index
      %c0_79 = arith.constant 0 : index
      %c0_80 = arith.constant 0 : index
      %48 = vector.load %arg25[%47, %c0_79, %c0_80] : memref<18x18x4xbf16, #tpu.memory_space<vmem>>, vector<8x16x4xbf16>
      %c1_i32_81 = arith.constant 1 : i32
      %49 = arith.addi %36, %c1_i32_81 : i32
      %50 = arith.index_cast %49 : i32 to index
      %c1_82 = arith.constant 1 : index
      %c0_83 = arith.constant 0 : index
      %51 = vector.load %arg25[%50, %c1_82, %c0_83] : memref<18x18x4xbf16, #tpu.memory_space<vmem>>, vector<8x16x4xbf16>
      %c1_i32_84 = arith.constant 1 : i32
      %52 = arith.addi %36, %c1_i32_84 : i32
      %53 = arith.index_cast %52 : i32 to index
      %c2_85 = arith.constant 2 : index
      %c0_86 = arith.constant 0 : index
      %54 = vector.load %arg25[%53, %c2_85, %c0_86] : memref<18x18x4xbf16, #tpu.memory_space<vmem>>, vector<8x16x4xbf16>
      %c2_i32_87 = arith.constant 2 : i32
      %55 = arith.addi %36, %c2_i32_87 : i32
      %56 = arith.index_cast %55 : i32 to index
      %c0_88 = arith.constant 0 : index
      %c0_89 = arith.constant 0 : index
      %57 = vector.load %arg25[%56, %c0_88, %c0_89] : memref<18x18x4xbf16, #tpu.memory_space<vmem>>, vector<8x16x4xbf16>
      %c2_i32_90 = arith.constant 2 : i32
      %58 = arith.addi %36, %c2_i32_90 : i32
      %59 = arith.index_cast %58 : i32 to index
      %c1_91 = arith.constant 1 : index
      %c0_92 = arith.constant 0 : index
      %60 = vector.load %arg25[%59, %c1_91, %c0_92] : memref<18x18x4xbf16, #tpu.memory_space<vmem>>, vector<8x16x4xbf16>
      %c2_i32_93 = arith.constant 2 : i32
      %61 = arith.addi %36, %c2_i32_93 : i32
      %62 = arith.index_cast %61 : i32 to index
      %c2_94 = arith.constant 2 : index
      %c0_95 = arith.constant 0 : index
      %63 = vector.load %arg25[%62, %c2_94, %c0_95] : memref<18x18x4xbf16, #tpu.memory_space<vmem>>, vector<8x16x4xbf16>
      %64 = tpu.concatenate %39, %42, %45, %48, %51, %54, %57, %60, %63 in 2 : vector<8x16x4xbf16>, vector<8x16x4xbf16>, vector<8x16x4xbf16>, vector<8x16x4xbf16>, vector<8x16x4xbf16>, vector<8x16x4xbf16>, vector<8x16x4xbf16>, vector<8x16x4xbf16>, vector<8x16x4xbf16> -> vector<8x16x36xbf16>
      %c0_96 = arith.constant 0 : index
      %c0_97 = arith.constant 0 : index
      %c0_98 = arith.constant 0 : index
      %65 = vector.load %arg28[%c0_96, %c0_97, %c0_98] : memref<8x16x36xbf16, #tpu.memory_space<vmem>>, vector<8x16x36xbf16>
      tpu.vector_store %arg28[%c0_96, %c0_97, %c0_98], %64 {strides = array<i32>} : memref<8x16x36xbf16, #tpu.memory_space<vmem>>, vector<8x16x36xbf16>,
      %c0_99 = arith.constant 0 : index
      %c0_100 = arith.constant 0 : index
      %c0_101 = arith.constant 0 : index
      %66 = vector.load %arg28[%c0_99, %c0_100, %c0_101] : memref<8x16x36xbf16, #tpu.memory_space<vmem>>, vector<8x16x36xbf16>
      %67 = vector.shape_cast %66 : vector<8x16x36xbf16> to vector<128x36xbf16>
      %c0_102 = arith.constant 0 : index
      %c0_103 = arith.constant 0 : index
      %68 = vector.load %arg21[%c0_102, %c0_103] : memref<36x4xbf16, #tpu.memory_space<vmem>>, vector<36x4xbf16>
      %cst_104 = arith.constant dense<0.000000e+00> : vector<128x4xf32>
      %69 = tpu.matmul %67, %68, %cst_104 {dimension_numbers = #tpu.dot_dimension_numbers<[1], [0], [0], [1], [0, 0, 1, 1], [], []>} : vector<128x36xbf16>, vector<36x4xbf16>, vector<128x4xf32> -> vector<128x4xf32>
      %c0_105 = arith.constant 0 : index
      %c0_106 = arith.constant 0 : index
      %70 = vector.load %arg22[%c0_105, %c0_106] : memref<1x4xf32, #tpu.memory_space<vmem>>, vector<1x4xf32>
      %71 = vector.broadcast %70 : vector<1x4xf32> to vector<128x4xf32>
      %72 = arith.addf %69, %71 : vector<128x4xf32>
      %c0_107 = arith.constant 0 : index
      %73 = arith.index_cast %36 : i32 to index
      %c0_108 = arith.constant 0 : index
      %c0_109 = arith.constant 0 : index
      %74 = vector.load %arg24[%c0_107, %73, %c0_108, %c0_109] : memref<1x16x16x4xf32, #tpu.memory_space<vmem>>, vector<1x8x16x4xf32>
      %75 = vector.shape_cast %74 : vector<1x8x16x4xf32> to vector<128x4xf32>
      %c0_110 = arith.constant 0 : index
      %c0_111 = arith.constant 0 : index
      %76 = vector.load %arg23[%c0_110, %c0_111] : memref<1x4xf32, #tpu.memory_space<vmem>>, vector<1x4xf32>
      %77 = vector.broadcast %76 : vector<1x4xf32> to vector<128x4xf32>
      %78 = arith.mulf %72, %77 : vector<128x4xf32>
      %79 = arith.addf %75, %78 : vector<128x4xf32>
      %80 = vector.shape_cast %79 : vector<128x4xf32> to vector<1x8x16x4xf32>
      %c0_112 = arith.constant 0 : index
      %81 = arith.index_cast %36 : i32 to index
      %c0_113 = arith.constant 0 : index
      %c0_114 = arith.constant 0 : index
      %82 = vector.load %arg24[%c0_112, %81, %c0_113, %c0_114] : memref<1x16x16x4xf32, #tpu.memory_space<vmem>>, vector<1x8x16x4xf32>
      tpu.vector_store %arg24[%c0_112, %81, %c0_113, %c0_114], %80 {strides = array<i32>} : memref<1x16x16x4xf32, #tpu.memory_space<vmem>>, vector<1x8x16x4xf32>,
    }
    %c2_i32_69 = arith.constant 2 : i32
    return
  }
  func.func @transform_0(%arg0: i32) -> (i32, i32, i32, i32) {
    %c0_i32 = arith.constant 0 : i32
    %c0_i32_0 = arith.constant 0 : i32
    %c0_i32_1 = arith.constant 0 : i32
    %c0_i32_2 = arith.constant 0 : i32
    return %arg0, %c0_i32, %c0_i32_0, %c0_i32_1 : i32, i32, i32, i32
  }
  func.func @transform_1(%arg0: i32) -> (i32, i32) {
    %c0_i32 = arith.constant 0 : i32
    %c0_i32_0 = arith.constant 0 : i32
    %c0_i32_1 = arith.constant 0 : i32
    return %c0_i32, %c0_i32_0 : i32, i32
  }
  func.func @transform_2(%arg0: i32) -> (i32, i32) {
    %c0_i32 = arith.constant 0 : i32
    %c0_i32_0 = arith.constant 0 : i32
    %c0_i32_1 = arith.constant 0 : i32
    return %c0_i32, %c0_i32_0 : i32, i32
  }
  func.func @transform_3(%arg0: i32) -> (i32, i32) {
    %c0_i32 = arith.constant 0 : i32
    %c0_i32_0 = arith.constant 0 : i32
    %c0_i32_1 = arith.constant 0 : i32
    return %c0_i32, %c0_i32_0 : i32, i32
  }
  func.func @transform_4(%arg0: i32) -> (i32, i32) {
    %c0_i32 = arith.constant 0 : i32
    %c0_i32_0 = arith.constant 0 : i32
    %c0_i32_1 = arith.constant 0 : i32
    return %c0_i32, %c0_i32_0 : i32, i32
  }
  func.func @transform_5(%arg0: i32) -> (i32, i32) {
    %c0_i32 = arith.constant 0 : i32
    %c0_i32_0 = arith.constant 0 : i32
    %c0_i32_1 = arith.constant 0 : i32
    return %c0_i32, %c0_i32_0 : i32, i32
  }
  func.func @transform_6(%arg0: i32) -> (i32, i32) {
    %c0_i32 = arith.constant 0 : i32
    %c0_i32_0 = arith.constant 0 : i32
    %c0_i32_1 = arith.constant 0 : i32
    return %c0_i32, %c0_i32_0 : i32, i32
  }
  func.func @transform_7(%arg0: i32) -> (i32, i32) {
    %c0_i32 = arith.constant 0 : i32
    %c0_i32_0 = arith.constant 0 : i32
    %c0_i32_1 = arith.constant 0 : i32
    return %c0_i32, %c0_i32_0 : i32, i32
  }
  func.func @transform_8(%arg0: i32) -> (i32, i32) {
    %c0_i32 = arith.constant 0 : i32
    %c0_i32_0 = arith.constant 0 : i32
    %c0_i32_1 = arith.constant 0 : i32
    return %c0_i32, %c0_i32_0 : i32, i32
  }
  func.func @transform_9(%arg0: i32) -> (i32, i32) {
    %c0_i32 = arith.constant 0 : i32
    %c0_i32_0 = arith.constant 0 : i32
    %c0_i32_1 = arith.constant 0 : i32
    return %c0_i32, %c0_i32_0 : i32, i32
  }
  func.func @transform_10(%arg0: i32) -> (i32, i32) {
    %c0_i32 = arith.constant 0 : i32
    %c0_i32_0 = arith.constant 0 : i32
    %c0_i32_1 = arith.constant 0 : i32
    return %c0_i32, %c0_i32_0 : i32, i32
  }
  func.func @transform_11(%arg0: i32) -> (i32, i32) {
    %c0_i32 = arith.constant 0 : i32
    %c0_i32_0 = arith.constant 0 : i32
    %c0_i32_1 = arith.constant 0 : i32
    return %c0_i32, %c0_i32_0 : i32, i32
  }
  func.func @transform_12(%arg0: i32) -> (i32, i32) {
    %c0_i32 = arith.constant 0 : i32
    %c0_i32_0 = arith.constant 0 : i32
    %c0_i32_1 = arith.constant 0 : i32
    return %c0_i32, %c0_i32_0 : i32, i32
  }
  func.func @transform_13(%arg0: i32) -> (i32, i32) {
    %c0_i32 = arith.constant 0 : i32
    %c0_i32_0 = arith.constant 0 : i32
    %c0_i32_1 = arith.constant 0 : i32
    return %c0_i32, %c0_i32_0 : i32, i32
  }
  func.func @transform_14(%arg0: i32) -> (i32, i32) {
    %c0_i32 = arith.constant 0 : i32
    %c0_i32_0 = arith.constant 0 : i32
    %c0_i32_1 = arith.constant 0 : i32
    return %c0_i32, %c0_i32_0 : i32, i32
  }
  func.func @transform_15(%arg0: i32) -> (i32, i32) {
    %c0_i32 = arith.constant 0 : i32
    %c0_i32_0 = arith.constant 0 : i32
    %c0_i32_1 = arith.constant 0 : i32
    return %c0_i32, %c0_i32_0 : i32, i32
  }
  func.func @transform_16(%arg0: i32) -> (i32, i32) {
    %c0_i32 = arith.constant 0 : i32
    %c0_i32_0 = arith.constant 0 : i32
    %c0_i32_1 = arith.constant 0 : i32
    return %c0_i32, %c0_i32_0 : i32, i32
  }
  func.func @transform_17(%arg0: i32) -> (i32, i32) {
    %c0_i32 = arith.constant 0 : i32
    %c0_i32_0 = arith.constant 0 : i32
    %c0_i32_1 = arith.constant 0 : i32
    return %c0_i32, %c0_i32_0 : i32, i32
  }
  func.func @transform_18(%arg0: i32) -> (i32, i32) {
    %c0_i32 = arith.constant 0 : i32
    %c0_i32_0 = arith.constant 0 : i32
    %c0_i32_1 = arith.constant 0 : i32
    return %c0_i32, %c0_i32_0 : i32, i32
  }
  func.func @transform_19(%arg0: i32) -> (i32, i32) {
    %c0_i32 = arith.constant 0 : i32
    %c0_i32_0 = arith.constant 0 : i32
    %c0_i32_1 = arith.constant 0 : i32
    return %c0_i32, %c0_i32_0 : i32, i32
  }
  func.func @transform_20(%arg0: i32) -> (i32, i32) {
    %c0_i32 = arith.constant 0 : i32
    %c0_i32_0 = arith.constant 0 : i32
    %c0_i32_1 = arith.constant 0 : i32
    return %c0_i32, %c0_i32_0 : i32, i32
  }
  func.func @transform_21(%arg0: i32) -> (i32, i32) {
    %c0_i32 = arith.constant 0 : i32
    %c0_i32_0 = arith.constant 0 : i32
    %c0_i32_1 = arith.constant 0 : i32
    return %c0_i32, %c0_i32_0 : i32, i32
  }
  func.func @transform_22(%arg0: i32) -> (i32, i32) {
    %c0_i32 = arith.constant 0 : i32
    %c0_i32_0 = arith.constant 0 : i32
    %c0_i32_1 = arith.constant 0 : i32
    return %c0_i32, %c0_i32_0 : i32, i32
  }
  func.func @transform_23(%arg0: i32) -> (i32, i32, i32, i32) {
    %c0_i32 = arith.constant 0 : i32
    %c0_i32_0 = arith.constant 0 : i32
    %c0_i32_1 = arith.constant 0 : i32
    %c0_i32_2 = arith.constant 0 : i32
    return %arg0, %c0_i32, %c0_i32_0, %c0_i32_1 : i32, i32, i32, i32
  }
}

</mosaic_0001>

<bundles_post_ra>
// kernel: tpu_custom_call.1
= control target key start
LH: loop header
LB: loop body
LE: loop exit
PB: predicated region body
PF: predicated region fallthrough
CT: control target
= control target key end

     0   :  { %s16434_s0 = inlined_call_operand.vmem [shape: f32[2,16,16,4], index: 0, kind: input, shape index: {}]   ;;  %s16435_s1 = inlined_call_operand.vmem [shape: f32[1,4], index: 1, kind: input, shape index: {}]   ;;  %s16436_s2 = inlined_call_operand.vmem [shape: f32[1,4], index: 2, kind: input, shape index: {}]   ;;  %s16437_s3 = inlined_call_operand.vmem [shape: bf16[36,8], index: 3, kind: input, shape index: {}]   ;;  %s16438_s4 = inlined_call_operand.vmem [shape: f32[1,8], index: 4, kind: input, shape index: {}]   ;;  %s16439_s5 = inlined_call_operand.vmem [shape: bf16[72,4], index: 5, kind: input, shape index: {}]   ;;  %s16440_s6 = inlined_call_operand.vmem [shape: f32[1,4], index: 6, kind: input, shape index: {}]   ;;  %s16441_s7 = inlined_call_operand.vmem [shape: bf16[72,4], index: 7, kind: input, shape index: {}]   ;;  %s16442_s8 = inlined_call_operand.vmem [shape: f32[1,4], index: 8, kind: input, shape index: {}]   ;;  %s16443_s9 = inlined_call_operand.vmem [shape: f32[4,4], index: 9, kind: input, shape index: {}]   ;;  %s16444_s10 = inlined_call_operand.vmem [shape: f32[1,4], index: 10, kind: input, shape index: {}]   ;;  %s16445_s11 = inlined_call_operand.vmem [shape: bf16[36,4], index: 11, kind: input, shape index: {}]   ;;  %s16446_s12 = inlined_call_operand.vmem [shape: f32[1,4], index: 12, kind: input, shape index: {}]   ;;  %s16447_s13 = inlined_call_operand.vmem [shape: f32[1,4], index: 13, kind: input, shape index: {}]   ;;  %s16448_s14 = inlined_call_operand.vmem [shape: f32[1,4], index: 14, kind: input, shape index: {}]   ;;  %s16449_s15 = inlined_call_operand.vmem [shape: f32[1,4], index: 15, kind: input, shape index: {}]   ;;  %s16450_s16 = inlined_call_operand.vmem [shape: bf16[36,4], index: 16, kind: input, shape index: {}]   ;;  %s16451_s17 = inlined_call_operand.vmem [shape: f32[1,4], index: 17, kind: input, shape index: {}]   ;;  %s16452_s18 = inlined_call_operand.vmem [shape: bf16[36,4], index: 18, kind: input, shape index: {}]   ;;  %s16453_s19 = inlined_call_operand.vmem [shape: f32[1,4], index: 19, kind: input, shape index: {}]   ;;  %s16454_s20 = inlined_call_operand.vmem [shape: bf16[36,4], index: 20, kind: input, shape index: {}]   ;;  %s16455_s21 = inlined_call_operand.vmem [shape: f32[1,4], index: 21, kind: input, shape index: {}]   ;;  %s16456_s22 = inlined_call_operand.vmem [shape: f32[1,4], index: 22, kind: input, shape index: {}]   ;;  %s16457_s23 = inlined_call_operand.vmem [shape: f32[2,16,16,4], index: 23, kind: output, shape index: {}]  }
   0x1   :  { %16496 = sst [smem:[#allocation9_spill]] %s16434_s0 }
   0x2   :  { %16497 = sst [smem:[#allocation10_spill]] %s16435_s1 }
   0x3   :  { %16498 = sst [smem:[#allocation11_spill]] %s16436_s2 }
   0x4   :  { %16499 = sst [smem:[#allocation12_spill]] %s16437_s3 }
   0x5   :  { %16500 = sst [smem:[#allocation13_spill]] %s16438_s4  ;;  %s11891_s4 = smov 0  }
   0x6   :  { %16501 = sst [smem:[#allocation14_spill]] %s16439_s5 }
   0x7   :  { %16502 = sst [smem:[#allocation15_spill]] %s16440_s6 }
   0x8   :  { %16503 = sst [smem:[#allocation16_spill]] %s16441_s7 }
   0x9   :  { %16504 = sst [smem:[#allocation17_spill]] %s16456_s22 }
   0xa   :  { %16505 = sst [smem:[#allocation18_spill]] %s16457_s23 }
   0xb LB: > { %16506 = sst [smem:[#allocation8_spill]] %s11694_s4  ;;  %s9838_s30 = sadd.s32 4294967295, %s11694_s4   ;;  %s11694_s4 = sphi %s11891_s4, %s33_s4  }
   0xc   : > { %p9842_p0 = scmp.ge.s32.totalorder %s11694_s4, 1  ;;  %p637_p1 = scmp.lt.s32.totalorder %s11694_s4, 3 }
   0xe   : > { %p638_p2 = pnand %p9842_p0, %p637_p1 }
   0xf   : > { %p701_p3 = scmp.lt.s32.totalorder (!%p638_p2), %s9838_s30, 1  ;;  %s16507_s1 = sld [smem:[#allocation9_spill]] (!%p638_p2) }
  0x10   : > { %641 = sbr.rel (%p638_p2) target bundleno = 3364 (0xd24), region = 112  ;;  %s16508_s23 = sld [smem:[#allocation18_spill]] (!%p638_p2) }
  0x11   : > { %s12162_s7 = smov (!%p638_p2), 0  }
  0x15   : > { %vm16468_vm0 = vcmask 27648   ;;  %v11720_v0 = vmov 0   ;;  %s16921_s30 = smov (!%p701_p3, %s9838_s30), 1  ;;  %vm16461_vm1 = vcmask 24576   ;;  %vm16462_vm2 = vsmask.f32 256 }
  0x16   : > { %713 = vst.msk [vmem:[#allocation2] sm:$0xf] %vm16468_vm0, %v11720_v0  ;;  %s10708_s24 = sshll.u32 %s16921_s30, 8  ;;  %vm11925_vm3 = vmand %vm16461_vm1, %vm16462_vm2  ;;  %v725_v2 = vld [vmem:[#allocation2 + $0xc] sm:$0x1]  ;;  %vm16463_vm6 = vcmask 60416  }
  0x17   : > { %714 = vst.msk [vmem:[#allocation2 + $0x4] sm:$0xf] %vm16468_vm0, %v11720_v0  ;;  %s11910_s26 = scalar_lea.vmem %s16507_s1, %s10708_s24  ;;  %s11915_s27 = scalar_lea.vmem %s16508_s23, %s10708_s24  ;;  %v728_v3 = vld [vmem:[#allocation2 + $0x18] sm:$0x1]  ;;  %v731_v4 = vld [vmem:[#allocation2 + $0x24] sm:$0x1] }
  0x18   : > { %718 = vst.msk [vmem:[#allocation2 + $0xcc] sm:$0xf] %vm16468_vm0, %v11720_v0  ;;  %v726_v5 = vsel %vm11925_vm3, 0, %v725_v2  ;;  %v734_v6 = vld [vmem:[#allocation2 + $0x30] sm:$0x1]  ;;  %v729_v7 = vsel %vm11925_vm3, 0, %v728_v3 }
  0x19   : > { %719 = vst.msk [vmem:[#allocation2 + $0xd0] sm:$0xf] %vm16468_vm0, %v11720_v0  ;;  %v737_v8 = vld [vmem:[#allocation2 + $0x3c] sm:$0x1]  ;;  %vm16464_vm4 = vsmask.f32 7938 }
  0x1a   : > { %823 = vst.msk [vmem:[#allocation3] sm:$0xf] %vm16468_vm0, %v11720_v0  ;;  %v732_v9 = vsel %vm11925_vm3, 0, %v731_v4  ;;  %v740_v10 = vld [vmem:[#allocation2 + $0x48] sm:$0x1]  ;;  %v735_v11 = vsel %vm11925_vm3, 0, %v734_v6  ;;  %vm11967_vm5 = vmand %vm16461_vm1, %vm16464_vm4 }
  0x1b   : > { %824 = vst.msk [vmem:[#allocation3 + $0x4] sm:$0xf] %vm16468_vm0, %v11720_v0  ;;  %v743_v12 = vld [vmem:[#allocation2 + $0x54] sm:$0x1]  ;;  %v738_v13 = vsel %vm11925_vm3, 0, %v737_v8  ;;  %v741_v15 = vsel %vm11925_vm3, 0, %v740_v10 }
  0x1c   : > { %827 = vst.msk [vmem:[#allocation3 + $0xcc] sm:$0xf] %vm16468_vm0, %v11720_v0  ;;  %v746_v14 = vld [vmem:[#allocation2 + $0x60] sm:$0x1]  ;;  %v749_v16 = vld [vmem:[#allocation2 + $0x6c] sm:$0x1] }
  0x1d   : > { %828 = vst.msk [vmem:[#allocation3 + $0xd0] sm:$0xf] %vm16468_vm0, %v11720_v0  ;;  %v744_v17 = vsel %vm11925_vm3, 0, %v743_v12  ;;  %v752_v18 = vld [vmem:[#allocation2 + $0x78] sm:$0x1]  ;;  %v747_v19 = vsel %vm11925_vm3, 0, %v746_v14 }
  0x1e   : > { %716 = vst.msk [vmem:[#allocation2 + $0x8] sm:$0x1] %vm16461_vm1, %v11720_v0  ;;  %v755_v20 = vld [vmem:[#allocation2 + $0x84] sm:$0x1]  ;;  %v750_v21 = vsel %vm11925_vm3, 0, %v749_v16  ;;  %v753_v23 = vsel %vm11925_vm3, 0, %v752_v18 }
  0x1f   : > { %720 = vst.msk [vmem:[#allocation2 + $0xd4] sm:$0x1] %vm16461_vm1, %v11720_v0  ;;  %v758_v22 = vld [vmem:[#allocation2 + $0x90] sm:$0x1]  ;;  %v761_v24 = vld [vmem:[#allocation2 + $0x9c] sm:$0x1] }
  0x20   : > { %825 = vst.msk [vmem:[#allocation3 + $0x8] sm:$0x1] %vm16461_vm1, %v11720_v0  ;;  %v756_v25 = vsel %vm11925_vm3, 0, %v755_v20  ;;  %v764_v26 = vld [vmem:[#allocation2 + $0xa8] sm:$0x1]  ;;  %v759_v27 = vsel %vm11925_vm3, 0, %v758_v22 }
  0x21   : > { %829 = vst.msk [vmem:[#allocation3 + $0xd4] sm:$0x1] %vm16461_vm1, %v11720_v0  ;;  %v767_v28 = vld [vmem:[#allocation2 + $0xb4] sm:$0x1]  ;;  %v762_v29 = vsel %vm11925_vm3, 0, %v761_v24  ;;  %v765_v32 = vsel %vm11925_vm3, 0, %v764_v26 }
  0x22   : > { %727 = vst [vmem:[#allocation2 + $0xc] sm:$0x1] %v726_v5  ;;  %v770_v30 = vld [vmem:[#allocation2 + $0xc0] sm:$0x1]  ;;  %v775_v33 = vld [vmem:[#allocation2 + $0x14] sm:$0x1] }
  0x23   : > { %730 = vst [vmem:[#allocation2 + $0x18] sm:$0x1] %v729_v7  ;;  %v768_v34 = vsel %vm11925_vm3, 0, %v767_v28  ;;  %v778_v35 = vld [vmem:[#allocation2 + $0x20] sm:$0x1]  ;;  %v771_v36 = vsel %vm11925_vm3, 0, %v770_v30 }
  0x24   : > { %733 = vst [vmem:[#allocation2 + $0x24] sm:$0x1] %v732_v9  ;;  %v781_v37 = vld [vmem:[#allocation2 + $0x2c] sm:$0x1]  ;;  %v776_v38 = vsel %vm11967_vm5, 0, %v775_v33  ;;  %v779_v40 = vsel %vm11967_vm5, 0, %v778_v35 }
  0x25   : > { %736 = vst [vmem:[#allocation2 + $0x30] sm:$0x1] %v735_v11  ;;  %v784_v39 = vld [vmem:[#allocation2 + $0x38] sm:$0x1]  ;;  %v787_v41 = vld [vmem:[#allocation2 + $0x44] sm:$0x1] }
  0x26   : > { %739 = vst [vmem:[#allocation2 + $0x3c] sm:$0x1] %v738_v13  ;;  %v782_v42 = vsel %vm11967_vm5, 0, %v781_v37  ;;  %v790_v43 = vld [vmem:[#allocation2 + $0x50] sm:$0x1]  ;;  %v785_v44 = vsel %vm11967_vm5, 0, %v784_v39 }
  0x27   : > { %742 = vst [vmem:[#allocation2 + $0x48] sm:$0x1] %v741_v15  ;;  %v793_v45 = vld [vmem:[#allocation2 + $0x5c] sm:$0x1]  ;;  %v788_v46 = vsel %vm11967_vm5, 0, %v787_v41  ;;  %v791_v48 = vsel %vm11967_vm5, 0, %v790_v43 }
  0x28   : > { %745 = vst [vmem:[#allocation2 + $0x54] sm:$0x1] %v744_v17  ;;  %v796_v47 = vld [vmem:[#allocation2 + $0x68] sm:$0x1]  ;;  %v799_v49 = vld [vmem:[#allocation2 + $0x74] sm:$0x1] }
  0x29   : > { %748 = vst [vmem:[#allocation2 + $0x60] sm:$0x1] %v747_v19  ;;  %v794_v50 = vsel %vm11967_vm5, 0, %v793_v45  ;;  %v802_v51 = vld [vmem:[#allocation2 + $0x80] sm:$0x1]  ;;  %v797_v52 = vsel %vm11967_vm5, 0, %v796_v47 }
  0x2a   : > { %751 = vst [vmem:[#allocation2 + $0x6c] sm:$0x1] %v750_v21  ;;  %v805_v53 = vld [vmem:[#allocation2 + $0x8c] sm:$0x1]  ;;  %v800_v54 = vsel %vm11967_vm5, 0, %v799_v49  ;;  %v803_v56 = vsel %vm11967_vm5, 0, %v802_v51 }
  0x2b   : > { %754 = vst [vmem:[#allocation2 + $0x78] sm:$0x1] %v753_v23  ;;  %v808_v55 = vld [vmem:[#allocation2 + $0x98] sm:$0x1]  ;;  %v811_v57 = vld [vmem:[#allocation2 + $0xa4] sm:$0x1] }
  0x2c   : > { %757 = vst [vmem:[#allocation2 + $0x84] sm:$0x1] %v756_v25  ;;  %v806_v58 = vsel %vm11967_vm5, 0, %v805_v53  ;;  %v814_v59 = vld [vmem:[#allocation2 + $0xb0] sm:$0x1]  ;;  %v809_v60 = vsel %vm11967_vm5, 0, %v808_v55 }
  0x2d   : > { %760 = vst [vmem:[#allocation2 + $0x90] sm:$0x1] %v759_v27  ;;  %v817_v61 = vld [vmem:[#allocation2 + $0xbc] sm:$0x1]  ;;  %v812_v62 = vsel %vm11967_vm5, 0, %v811_v57  ;;  %v815_v2 = vsel %vm11967_vm5, 0, %v814_v59 }
  0x2e   : > { %763 = vst [vmem:[#allocation2 + $0x9c] sm:$0x1] %v762_v29  ;;  %v820_v63 = vld [vmem:[#allocation2 + $0xc8] sm:$0x1]  ;;  %v831_v3 = vld [vmem:[#allocation3 + $0xc] sm:$0x1] }
  0x2f   : > { %766 = vst [vmem:[#allocation2 + $0xa8] sm:$0x1] %v765_v32  ;;  %v818_v4 = vsel %vm11967_vm5, 0, %v817_v61  ;;  %v834_v5 = vld [vmem:[#allocation3 + $0x18] sm:$0x1]  ;;  %v821_v6 = vsel %vm11967_vm5, 0, %v820_v63 }
  0x30   : > { %769 = vst [vmem:[#allocation2 + $0xb4] sm:$0x1] %v768_v34  ;;  %v837_v7 = vld [vmem:[#allocation3 + $0x24] sm:$0x1]  ;;  %v832_v8 = vsel %vm11925_vm3, 0, %v831_v3  ;;  %v835_v10 = vsel %vm11925_vm3, 0, %v834_v5 }
  0x31   : > { %772 = vst [vmem:[#allocation2 + $0xc0] sm:$0x1] %v771_v36  ;;  %v840_v9 = vld [vmem:[#allocation3 + $0x30] sm:$0x1]  ;;  %v843_v11 = vld [vmem:[#allocation3 + $0x3c] sm:$0x1] }
  0x32   : > { %777 = vst [vmem:[#allocation2 + $0x14] sm:$0x1] %v776_v38  ;;  %v838_v12 = vsel %vm11925_vm3, 0, %v837_v7  ;;  %v846_v13 = vld [vmem:[#allocation3 + $0x48] sm:$0x1]  ;;  %v841_v14 = vsel %vm11925_vm3, 0, %v840_v9 }
  0x33   : > { %780 = vst [vmem:[#allocation2 + $0x20] sm:$0x1] %v779_v40  ;;  %v849_v15 = vld [vmem:[#allocation3 + $0x54] sm:$0x1]  ;;  %v844_v16 = vsel %vm11925_vm3, 0, %v843_v11  ;;  %v847_v18 = vsel %vm11925_vm3, 0, %v846_v13 }
  0x34   : > { %783 = vst [vmem:[#allocation2 + $0x2c] sm:$0x1] %v782_v42  ;;  %v852_v17 = vld [vmem:[#allocation3 + $0x60] sm:$0x1]  ;;  %v855_v19 = vld [vmem:[#allocation3 + $0x6c] sm:$0x1] }
  0x35   : > { %786 = vst [vmem:[#allocation2 + $0x38] sm:$0x1] %v785_v44  ;;  %v850_v20 = vsel %vm11925_vm3, 0, %v849_v15  ;;  %v858_v21 = vld [vmem:[#allocation3 + $0x78] sm:$0x1]  ;;  %v853_v22 = vsel %vm11925_vm3, 0, %v852_v17 }
  0x36   : > { %789 = vst [vmem:[#allocation2 + $0x44] sm:$0x1] %v788_v46  ;;  %v861_v23 = vld [vmem:[#allocation3 + $0x84] sm:$0x1]  ;;  %v856_v24 = vsel %vm11925_vm3, 0, %v855_v19  ;;  %v859_v26 = vsel %vm11925_vm3, 0, %v858_v21 }
  0x37   : > { %792 = vst [vmem:[#allocation2 + $0x50] sm:$0x1] %v791_v48  ;;  %v864_v25 = vld [vmem:[#allocation3 + $0x90] sm:$0x1]  ;;  %v867_v27 = vld [vmem:[#allocation3 + $0x9c] sm:$0x1] }
  0x38   : > { %795 = vst [vmem:[#allocation2 + $0x5c] sm:$0x1] %v794_v50  ;;  %v862_v28 = vsel %vm11925_vm3, 0, %v861_v23  ;;  %v870_v29 = vld [vmem:[#allocation3 + $0xa8] sm:$0x1]  ;;  %v865_v30 = vsel %vm11925_vm3, 0, %v864_v25 }
  0x39   : > { %798 = vst [vmem:[#allocation2 + $0x68] sm:$0x1] %v797_v52  ;;  %v873_v32 = vld [vmem:[#allocation3 + $0xb4] sm:$0x1]  ;;  %v868_v33 = vsel %vm11925_vm3, 0, %v867_v27  ;;  %v871_v35 = vsel %vm11925_vm3, 0, %v870_v29 }
  0x3a   : > { %801 = vst [vmem:[#allocation2 + $0x74] sm:$0x1] %v800_v54  ;;  %v876_v34 = vld [vmem:[#allocation3 + $0xc0] sm:$0x1]  ;;  %v879_v36 = vld [vmem:[#allocation3 + $0x14] sm:$0x1] }
  0x3b   : > { %804 = vst [vmem:[#allocation2 + $0x80] sm:$0x1] %v803_v56  ;;  %v874_v37 = vsel %vm11925_vm3, 0, %v873_v32  ;;  %v882_v38 = vld [vmem:[#allocation3 + $0x20] sm:$0x1]  ;;  %v877_v39 = vsel %vm11925_vm3, 0, %v876_v34 }
  0x3c   : > { %807 = vst [vmem:[#allocation2 + $0x8c] sm:$0x1] %v806_v58  ;;  %v885_v40 = vld [vmem:[#allocation3 + $0x2c] sm:$0x1]  ;;  %v880_v41 = vsel %vm11967_vm5, 0, %v879_v36  ;;  %v883_v43 = vsel %vm11967_vm5, 0, %v882_v38 }
  0x3d   : > { %810 = vst [vmem:[#allocation2 + $0x98] sm:$0x1] %v809_v60  ;;  %v888_v42 = vld [vmem:[#allocation3 + $0x38] sm:$0x1]  ;;  %v891_v44 = vld [vmem:[#allocation3 + $0x44] sm:$0x1] }
  0x3e   : > { %813 = vst [vmem:[#allocation2 + $0xa4] sm:$0x1] %v812_v62  ;;  %v886_v45 = vsel %vm11967_vm5, 0, %v885_v40  ;;  %v894_v46 = vld [vmem:[#allocation3 + $0x50] sm:$0x1]  ;;  %v889_v47 = vsel %vm11967_vm5, 0, %v888_v42 }
  0x3f   : > { %816 = vst [vmem:[#allocation2 + $0xb0] sm:$0x1] %v815_v2  ;;  %v897_v48 = vld [vmem:[#allocation3 + $0x5c] sm:$0x1]  ;;  %v892_v49 = vsel %vm11967_vm5, 0, %v891_v44  ;;  %v895_v51 = vsel %vm11967_vm5, 0, %v894_v46 }
  0x40   : > { %819 = vst [vmem:[#allocation2 + $0xbc] sm:$0x1] %v818_v4  ;;  %v900_v50 = vld [vmem:[#allocation3 + $0x68] sm:$0x1]  ;;  %v903_v52 = vld [vmem:[#allocation3 + $0x74] sm:$0x1] }
  0x41   : > { %822 = vst [vmem:[#allocation2 + $0xc8] sm:$0x1] %v821_v6  ;;  %v898_v53 = vsel %vm11967_vm5, 0, %v897_v48  ;;  %v906_v54 = vld [vmem:[#allocation3 + $0x80] sm:$0x1]  ;;  %v901_v55 = vsel %vm11967_vm5, 0, %v900_v50 }
  0x42   : > { %833 = vst [vmem:[#allocation3 + $0xc] sm:$0x1] %v832_v8  ;;  %v909_v56 = vld [vmem:[#allocation3 + $0x8c] sm:$0x1]  ;;  %v904_v57 = vsel %vm11967_vm5, 0, %v903_v52  ;;  %v907_v59 = vsel %vm11967_vm5, 0, %v906_v54 }
  0x43   : > { %836 = vst [vmem:[#allocation3 + $0x18] sm:$0x1] %v835_v10  ;;  %v912_v58 = vld [vmem:[#allocation3 + $0x98] sm:$0x1]  ;;  %v915_v60 = vld [vmem:[#allocation3 + $0xa4] sm:$0x1] }
  0x44   : > { %839 = vst [vmem:[#allocation3 + $0x24] sm:$0x1] %v838_v12  ;;  %v910_v61 = vsel %vm11967_vm5, 0, %v909_v56  ;;  %v918_v62 = vld [vmem:[#allocation3 + $0xb0] sm:$0x1]  ;;  %v913_v63 = vsel %vm11967_vm5, 0, %v912_v58 }
  0x45   : > { %842 = vst [vmem:[#allocation3 + $0x30] sm:$0x1] %v841_v14  ;;  %v921_v2 = vld [vmem:[#allocation3 + $0xbc] sm:$0x1]  ;;  %v916_v3 = vsel %vm11967_vm5, 0, %v915_v60  ;;  %v919_v5 = vsel %vm11967_vm5, 0, %v918_v62 }
  0x46   : > { %845 = vst [vmem:[#allocation3 + $0x3c] sm:$0x1] %v844_v16  ;;  %v924_v4 = vld [vmem:[#allocation3 + $0xc8] sm:$0x1]  ;;  %v922_v6 = vsel %vm11967_vm5, 0, %v921_v2  ;;  %vm930_vm7 = vcmask 57344  }
  0x47   : > { %848 = vst [vmem:[#allocation3 + $0x48] sm:$0x1] %v847_v18  ;;  %v925_v7 = vsel %vm11967_vm5, 0, %v924_v4  ;;  %vm12077_vm8 = vmand %vm930_vm7, %vm16462_vm2  ;;  %v939_v9 = vld [vmem:[#allocation4 + $0xc] sm:$0x1] }
  0x48   : > { %851 = vst [vmem:[#allocation3 + $0x54] sm:$0x1] %v850_v20  ;;  %v942_v31 = vld [vmem:[#allocation4 + $0x18] sm:$0x1]  ;;  %v945_v10 = vld [vmem:[#allocation4 + $0x24] sm:$0x1]  ;;  %vm12119_vm9 = vmand %vm930_vm7, %vm16464_vm4 }
  0x49   : > { %854 = vst [vmem:[#allocation3 + $0x60] sm:$0x1] %v853_v22  ;;  %v940_v11 = vsel %vm12077_vm8, 0, %v939_v9  ;;  %v948_v12 = vld [vmem:[#allocation4 + $0x30] sm:$0x1]  ;;  %v943_v13 = vsel %vm12077_vm8, 0, %v942_v31 }
  0x4a   : > { %857 = vst [vmem:[#allocation3 + $0x6c] sm:$0x1] %v856_v24  ;;  %v951_v14 = vld [vmem:[#allocation4 + $0x3c] sm:$0x1]  ;;  %v946_v15 = vsel %vm12077_vm8, 0, %v945_v10  ;;  %v949_v17 = vsel %vm12077_vm8, 0, %v948_v12 }
  0x4b   : > { %860 = vst [vmem:[#allocation3 + $0x78] sm:$0x1] %v859_v26  ;;  %v954_v16 = vld [vmem:[#allocation4 + $0x48] sm:$0x1]  ;;  %v957_v18 = vld [vmem:[#allocation4 + $0x54] sm:$0x1] }
  0x4c   : > { %863 = vst [vmem:[#allocation3 + $0x84] sm:$0x1] %v862_v28  ;;  %v952_v19 = vsel %vm12077_vm8, 0, %v951_v14  ;;  %v960_v20 = vld [vmem:[#allocation4 + $0x60] sm:$0x1]  ;;  %v955_v21 = vsel %vm12077_vm8, 0, %v954_v16 }
  0x4d   : > { %866 = vst [vmem:[#allocation3 + $0x90] sm:$0x1] %v865_v30  ;;  %v963_v22 = vld [vmem:[#allocation4 + $0x6c] sm:$0x1]  ;;  %v966_v23 = vld [vmem:[#allocation4 + $0x78] sm:$0x1] }
  0x4e   : > { %869 = vst [vmem:[#allocation3 + $0x9c] sm:$0x1] %v868_v33  ;;  %v961_v24 = vsel %vm12077_vm8, 0, %v960_v20  ;;  %v969_v25 = vld [vmem:[#allocation4 + $0x84] sm:$0x1]  ;;  %v964_v26 = vsel %vm12077_vm8, 0, %v963_v22 }
  0x4f   : > { %872 = vst [vmem:[#allocation3 + $0xa8] sm:$0x1] %v871_v35  ;;  %v972_v27 = vld [vmem:[#allocation4 + $0x90] sm:$0x1]  ;;  %v967_v28 = vsel %vm12077_vm8, 0, %v966_v23  ;;  %v970_v30 = vsel %vm12077_vm8, 0, %v969_v25 }
  0x50   : > { %875 = vst [vmem:[#allocation3 + $0xb4] sm:$0x1] %v874_v37  ;;  %v975_v29 = vld [vmem:[#allocation4 + $0x9c] sm:$0x1]  ;;  %v978_v32 = vld [vmem:[#allocation4 + $0xa8] sm:$0x1] }
  0x51   : > { %878 = vst [vmem:[#allocation3 + $0xc0] sm:$0x1] %v877_v39  ;;  %v973_v33 = vsel %vm12077_vm8, 0, %v972_v27  ;;  %v981_v34 = vld [vmem:[#allocation4 + $0xb4] sm:$0x1]  ;;  %v976_v35 = vsel %vm12077_vm8, 0, %v975_v29 }
  0x52   : > { %881 = vst [vmem:[#allocation3 + $0x14] sm:$0x1] %v880_v41  ;;  %v984_v36 = vld [vmem:[#allocation4 + $0xc0] sm:$0x1]  ;;  %v979_v38 = vsel %vm12077_vm8, 0, %v978_v32  ;;  %v982_v40 = vsel %vm12077_vm8, 0, %v981_v34 }
  0x53   : > { %884 = vst [vmem:[#allocation3 + $0x20] sm:$0x1] %v883_v43  ;;  %v988_v39 = vld [vmem:[#allocation4 + $0x14] sm:$0x1]  ;;  %v991_v41 = vld [vmem:[#allocation4 + $0x20] sm:$0x1] }
  0x54   : > { %887 = vst [vmem:[#allocation3 + $0x2c] sm:$0x1] %v886_v45  ;;  %v985_v42 = vsel %vm12077_vm8, 0, %v984_v36  ;;  %v994_v43 = vld [vmem:[#allocation4 + $0x2c] sm:$0x1]  ;;  %v989_v44 = vsel %vm12119_vm9, 0, %v988_v39 }
  0x55   : > { %890 = vst [vmem:[#allocation3 + $0x38] sm:$0x1] %v889_v47  ;;  %v997_v45 = vld [vmem:[#allocation4 + $0x38] sm:$0x1]  ;;  %v992_v46 = vsel %vm12119_vm9, 0, %v991_v41  ;;  %v995_v48 = vsel %vm12119_vm9, 0, %v994_v43 }
  0x56   : > { %893 = vst [vmem:[#allocation3 + $0x44] sm:$0x1] %v892_v49  ;;  %v1000_v47 = vld [vmem:[#allocation4 + $0x44] sm:$0x1]  ;;  %v1003_v49 = vld [vmem:[#allocation4 + $0x50] sm:$0x1] }
  0x57   : > { %896 = vst [vmem:[#allocation3 + $0x50] sm:$0x1] %v895_v51  ;;  %v998_v50 = vsel %vm12119_vm9, 0, %v997_v45  ;;  %v1006_v51 = vld [vmem:[#allocation4 + $0x5c] sm:$0x1]  ;;  %v1001_v52 = vsel %vm12119_vm9, 0, %v1000_v47 }
  0x58   : > { %899 = vst [vmem:[#allocation3 + $0x5c] sm:$0x1] %v898_v53  ;;  %v1009_v53 = vld [vmem:[#allocation4 + $0x68] sm:$0x1]  ;;  %v1004_v54 = vsel %vm12119_vm9, 0, %v1003_v49  ;;  %v1007_v56 = vsel %vm12119_vm9, 0, %v1006_v51 }
  0x59   : > { %902 = vst [vmem:[#allocation3 + $0x68] sm:$0x1] %v901_v55  ;;  %v1012_v55 = vld [vmem:[#allocation4 + $0x74] sm:$0x1]  ;;  %v1010_v58 = vsel %vm12119_vm9, 0, %v1009_v53 }
  0x5a   : > { %905 = vst [vmem:[#allocation3 + $0x74] sm:$0x1] %v904_v57  ;;  %v1015_v57 = vld [vmem:[#allocation4 + $0x80] sm:$0x1]  ;;  %v1013_v60 = vsel %vm12119_vm9, 0, %v1012_v55 }
  0x5b   : > { %908 = vst [vmem:[#allocation3 + $0x80] sm:$0x1] %v907_v59  ;;  %v1018_v59 = vld [vmem:[#allocation4 + $0x8c] sm:$0x1]  ;;  %v1016_v62 = vsel %vm12119_vm9, 0, %v1015_v57 }
  0x5c   : > { %911 = vst [vmem:[#allocation3 + $0x8c] sm:$0x1] %v910_v61  ;;  %v1021_v61 = vld [vmem:[#allocation4 + $0x98] sm:$0x1]  ;;  %v1019_v2 = vsel %vm12119_vm9, 0, %v1018_v59 }
  0x5d   : > { %914 = vst [vmem:[#allocation3 + $0x98] sm:$0x1] %v913_v63  ;;  %v1024_v63 = vld [vmem:[#allocation4 + $0xa4] sm:$0x1]  ;;  %v1022_v4 = vsel %vm12119_vm9, 0, %v1021_v61 }
  0x5e   : > { %917 = vst [vmem:[#allocation3 + $0xa4] sm:$0x1] %v916_v3  ;;  %v1027_v3 = vld [vmem:[#allocation4 + $0xb0] sm:$0x1] }
  0x5f   : > { %920 = vst [vmem:[#allocation3 + $0xb0] sm:$0x1] %v919_v5  ;;  %v1030_v5 = vld [vmem:[#allocation4 + $0xbc] sm:$0x1]  ;;  %v1028_v9 = vsel %vm12119_vm9, 0, %v1027_v3 }
  0x60   : > { %923 = vst [vmem:[#allocation3 + $0xbc] sm:$0x1] %v922_v6  ;;  %v1025_v6 = vsel %vm12119_vm9, 0, %v1024_v63  ;;  %v1031_v31 = vsel %vm12119_vm9, 0, %v1030_v5 }
  0x61   : > { %926 = vst [vmem:[#allocation3 + $0xc8] sm:$0x1] %v925_v7  ;;  %v1033_v7 = vld [vmem:[#allocation4 + $0xc8] sm:$0x1] }
  0x62   : > { %928 = vst.msk [vmem:[#allocation4] sm:$0xf] %vm16463_vm6, %v11720_v0  ;;  %v1034_v10 = vsel %vm12119_vm9, 0, %v1033_v7 }
  0x63   : > { %929 = vst.msk [vmem:[#allocation4 + $0x4] sm:$0xf] %vm16463_vm6, %v11720_v0 }
  0x64   : > { %933 = vst.msk [vmem:[#allocation4 + $0xcc] sm:$0xf] %vm16463_vm6, %v11720_v0 }
  0x65   : > { %934 = vst.msk [vmem:[#allocation4 + $0xd0] sm:$0xf] %vm16463_vm6, %v11720_v0 }
  0x66   : > { %931 = vst.msk [vmem:[#allocation4 + $0x8] sm:$0x1] %vm930_vm7, %v11720_v0 }
  0x67   : > { %935 = vst.msk [vmem:[#allocation4 + $0xd4] sm:$0x1] %vm930_vm7, %v11720_v0  ;;  %v958_v0 = vsel %vm12077_vm8, 0, %v957_v18 }
  0x68   : > { %941 = vst [vmem:[#allocation4 + $0xc] sm:$0x1] %v940_v11  ;;  %v11721_v11 = vmov 0.0  }
  0x69   : > { %944 = vst [vmem:[#allocation4 + $0x18] sm:$0x1] %v943_v13 }
  0x6a   : > { %947 = vst [vmem:[#allocation4 + $0x24] sm:$0x1] %v946_v15 }
  0x6b   : > { %950 = vst [vmem:[#allocation4 + $0x30] sm:$0x1] %v949_v17 }
  0x6c   : > { %953 = vst [vmem:[#allocation4 + $0x3c] sm:$0x1] %v952_v19 }
  0x6d   : > { %956 = vst [vmem:[#allocation4 + $0x48] sm:$0x1] %v955_v21 }
  0x6e   : > { %959 = vst [vmem:[#allocation4 + $0x54] sm:$0x1] %v958_v0 }
  0x6f   : > { %962 = vst [vmem:[#allocation4 + $0x60] sm:$0x1] %v961_v24 }
  0x70   : > { %965 = vst [vmem:[#allocation4 + $0x6c] sm:$0x1] %v964_v26 }
  0x71   : > { %968 = vst [vmem:[#allocation4 + $0x78] sm:$0x1] %v967_v28 }
  0x72   : > { %971 = vst [vmem:[#allocation4 + $0x84] sm:$0x1] %v970_v30 }
  0x73   : > { %974 = vst [vmem:[#allocation4 + $0x90] sm:$0x1] %v973_v33 }
  0x74   : > { %977 = vst [vmem:[#allocation4 + $0x9c] sm:$0x1] %v976_v35 }
  0x75   : > { %980 = vst [vmem:[#allocation4 + $0xa8] sm:$0x1] %v979_v38 }
  0x76   : > { %983 = vst [vmem:[#allocation4 + $0xb4] sm:$0x1] %v982_v40 }
  0x77   : > { %986 = vst [vmem:[#allocation4 + $0xc0] sm:$0x1] %v985_v42 }
  0x78   : > { %990 = vst [vmem:[#allocation4 + $0x14] sm:$0x1] %v989_v44 }
  0x79   : > { %993 = vst [vmem:[#allocation4 + $0x20] sm:$0x1] %v992_v46 }
  0x7a   : > { %996 = vst [vmem:[#allocation4 + $0x2c] sm:$0x1] %v995_v48 }
  0x7b   : > { %999 = vst [vmem:[#allocation4 + $0x38] sm:$0x1] %v998_v50 }
  0x7c   : > { %1002 = vst [vmem:[#allocation4 + $0x44] sm:$0x1] %v1001_v52 }
  0x7d   : > { %1005 = vst [vmem:[#allocation4 + $0x50] sm:$0x1] %v1004_v54 }
  0x7e   : > { %1008 = vst [vmem:[#allocation4 + $0x5c] sm:$0x1] %v1007_v56 }
  0x7f   : > { %1011 = vst [vmem:[#allocation4 + $0x68] sm:$0x1] %v1010_v58 }
  0x80   : > { %1014 = vst [vmem:[#allocation4 + $0x74] sm:$0x1] %v1013_v60 }
  0x81   : > { %1017 = vst [vmem:[#allocation4 + $0x80] sm:$0x1] %v1016_v62 }
  0x82   : > { %1020 = vst [vmem:[#allocation4 + $0x8c] sm:$0x1] %v1019_v2 }
  0x83   : > { %1023 = vst [vmem:[#allocation4 + $0x98] sm:$0x1] %v1022_v4 }
  0x84   : > { %1026 = vst [vmem:[#allocation4 + $0xa4] sm:$0x1] %v1025_v6 }
  0x85   : > { %1029 = vst [vmem:[#allocation4 + $0xb0] sm:$0x1] %v1028_v9 }
  0x86   : > { %1032 = vst [vmem:[#allocation4 + $0xbc] sm:$0x1] %v1031_v31 }
  0x87   : > { %1035 = vst [vmem:[#allocation4 + $0xc8] sm:$0x1] %v1034_v10 }
  0x88   : > { %1036 = vst.msk [vmem:[#allocation7] sm:$0x1] %vm16461_vm1, %v11721_v11 }
  0x89 LB: >> { %s10710_s28 = sshll.u32 %s11698_s7, 7  ;;  %vm16465_vm10 = vcmask 31744   ;;  %v11722_v44 = vmov 4.0   ;;  %s16517_s30 = sld [smem:[#allocation10_spill]]  ;;  %vm16519_vm4 = vsmask.f32 7938  ;;  %s11698_s7 = sphi %s12162_s7, %s1042_s7  }
  0x8a   : >> { %s12169_s29 = scalar_lea.vmem %s11910_s26, %s10710_s28  ;;  %11403 = vrcp.f32 %v11722_v44  ;;  %s16518_s5 = sld [smem:[#allocation11_spill]]  ;;  %vm16522_vm2 = vsmask.f32 256 }
  0x8b   : >> { %v12172_v12 = vld [vmem:[%s12169_s29 + $0x20] sm:$0xff]  ;;  %v1048_v13 = vld [vmem:[%s12169_s29 + $0x10] sm:$0xff]  ;;  %v12181_v18 = vld [vmem:[%s12169_s29 + $0x28] sm:$0xff]  ;;  %s9850_s1 = smul.u32 96, %s11698_s7  ;;  %s1042_s7 = sadd.s32 1, %s11698_s7  }
  0x8c   : >> { %v1046_v14 = vld [vmem:[%s12169_s29] sm:$0xff]  ;;  %v1075_v15 = vsel %vm16465_vm10, %v12172_v12, 0.0  ;;  %v1069_v16 = vsel %vm16465_vm10, %v1048_v13, 0.0  ;;  %v12184_v19 = vld [vmem:[%s12169_s29 + $0x18] sm:$0xff]  ;;  %v12187_v20 = vld [vmem:[%s12169_s29 + $0x8] sm:$0xff]  ;;  %v1078_v21 = vsel %vm16465_vm10, %v12181_v18, 0.0 }
  0x8d   : >> { %v1063_v17 = vsel %vm16465_vm10, %v1046_v14, 0.0  ;;  %1076 = vadd.xlane.f32.xlu2 %v1075_v15  ;;  %1070 = vadd.xlane.f32.xlu1 %v1069_v16  ;;  %v1072_v22 = vsel %vm16465_vm10, %v12184_v19, 0.0  ;;  %v1066_v0 = vsel %vm16465_vm10, %v12187_v20, 0.0  ;;  %v12196_v23 = vld [vmem:[%s12169_s29 + $0x40] sm:$0xff]  ;;  %v12199_v24 = vld [vmem:[%s12169_s29 + $0x38] sm:$0xff]  ;;  %v12202_v25 = vld [vmem:[%s12169_s29 + $0x30] sm:$0xff] }
  0x8e   : >> { %1064 = vadd.xlane.f32.xlu0 %v1063_v17  ;;  %v1087_v26 = vsel %vm16465_vm10, %v12196_v23, 0.0  ;;  %v1084_v27 = vsel %vm16465_vm10, %v12199_v24, 0.0  ;;  %v1081_v28 = vsel %vm16465_vm10, %v12202_v25, 0.0  ;;  %v12211_v29 = vld [vmem:[%s12169_s29 + $0x58] sm:$0xff]  ;;  %v12214_v30 = vld [vmem:[%s12169_s29 + $0x50] sm:$0xff]  ;;  %v12217_v32 = vld [vmem:[%s12169_s29 + $0x48] sm:$0xff] }
  0x8f   : >> { %v1096_v33 = vsel %vm16465_vm10, %v12211_v29, 0.0  ;;  %v1093_v34 = vsel %vm16465_vm10, %v12214_v30, 0.0  ;;  %v1090_v35 = vsel %vm16465_vm10, %v12217_v32, 0.0  ;;  %v12226_v36 = vld [vmem:[%s12169_s29 + $0x70] sm:$0xff]  ;;  %v12229_v37 = vld [vmem:[%s12169_s29 + $0x68] sm:$0xff]  ;;  %v12232_v38 = vld [vmem:[%s12169_s29 + $0x60] sm:$0xff] }
  0x90   : >> { %v1105_v39 = vsel %vm16465_vm10, %v12226_v36, 0.0  ;;  %v1102_v40 = vsel %vm16465_vm10, %v12229_v37, 0.0  ;;  %v1099_v41 = vsel %vm16465_vm10, %v12232_v38, 0.0  ;;  %v12241_v42 = vld [vmem:[%s12169_s29 + $0x78] sm:$0xff]  ;;  %v11404_v45 = vpop.eup %11403  ;;  %s12467_s2 = scalar_lea.vmem [#allocation2], %s9850_s1  ;;  %p1039_p4 = scmp.ge.s32.totalorder %s1042_s7, 2  }
  0x91   : >> { %v1108_v43 = vsel %vm16465_vm10, %v12241_v42, 0.0  ;;  %v1112_v46 = vmul.f32 4.0, %v11404_v45  ;;  %vm1116_vm11 = vweird.f32 %v11404_v45  ;;  %s12792_s6 = smov (%p1039_p4), 0  }
  0x93   : >> { %v1113_v47 = vsub.f32 1.0, %v1112_v46 }
  0x95   : >> { %1079 = vadd.xlane.f32.xlu2 %v1078_v21  ;;  %1073 = vadd.xlane.f32.xlu1 %v1072_v22  ;;  %v1114_v48 = vmul.f32 %v11404_v45, %v1113_v47 }
  0x96   : >> { %1067 = vadd.xlane.f32.xlu0 %v1066_v0 }
  0x97   : >> { %v1115_v49 = vadd.f32 %v11404_v45, %v1114_v48 }
  0x99   : >> { %v12245_v50 = vsel %vm1116_vm11, %v11404_v45, %v1115_v49 }
  0x9d   : >> { %1088 = vadd.xlane.f32.xlu2 %v1087_v26  ;;  %1085 = vadd.xlane.f32.xlu1 %v1084_v27 }
  0x9e   : >> { %1082 = vadd.xlane.f32.xlu0 %v1081_v28 }
  0xa5   : >> { %1097 = vadd.xlane.f32.xlu2 %v1096_v33  ;;  %1094 = vadd.xlane.f32.xlu1 %v1093_v34 }
  0xa6   : >> { %1091 = vadd.xlane.f32.xlu0 %v1090_v35 }
  0xad   : >> { %1106 = vadd.xlane.f32.xlu2 %v1105_v39  ;;  %1103 = vadd.xlane.f32.xlu1 %v1102_v40 }
  0xae   : >> { %1100 = vadd.xlane.f32.xlu0 %v1099_v41 }
  0xb6   : >> { %1109 = vadd.xlane.f32.xlu0 %v1108_v43 }
 0x100   : >> { %v1077_v51 = vpop.xlane.xlu2 %1076  ;;  %v1071_v52 = vpop.xlane.xlu1 %1070 }
 0x101   : >> { %v1120_v53 = vmul.f32 %v12245_v50, %v1071_v52  ;;  %v1065_v54 = vpop.xlane.xlu0 %1064  ;;  %v1122_v9 = vmul.f32 %v12245_v50, %v1077_v51 }
 0x102   : >> { %v1118_v55 = vmul.f32 %v12245_v50, %v1065_v54 }
 0x103   : >> { %v12249_v56 = vsub.f32 %v1048_v13, %v1120_v53  ;;  %v12281_v16 = vsub.f32 %v12172_v12, %v1122_v9 }
 0x104   : >> { %v12251_v57 = vsub.f32 %v1046_v14, %v1118_v55 }
 0x105   : >> { %v1152_v58 = vmul.f32 %v12249_v56, %v12249_v56  ;;  %v1154_v27 = vmul.f32 %v12281_v16, %v12281_v16 }
 0x106   : >> { %v1150_v59 = vmul.f32 %v12251_v57, %v12251_v57 }
 0x107   : >> { %v1172_v60 = vsel %vm16465_vm10, %v1152_v58, 0.0 }
 0x108   : >> { %v1080_v61 = vpop.xlane.xlu2 %1079  ;;  %v1074_v62 = vpop.xlane.xlu1 %1073  ;;  %1173 = vadd.xlane.f32.xlu0 %v1172_v60  ;;  %v1166_v63 = vsel %vm16465_vm10, %v1150_v59, 0.0 }
 0x109   : >> { %v1123_v2 = vmul.f32 %v12245_v50, %v1080_v61  ;;  %v1121_v3 = vmul.f32 %v12245_v50, %v1074_v62  ;;  %1167 = vadd.xlane.f32.xlu1 %v1166_v63  ;;  %v1068_v4 = vpop.xlane.xlu0 %1067 }
 0x10a   : >> { %v1119_v5 = vmul.f32 %v12245_v50, %v1068_v4 }
 0x10b   : >> { %v12263_v6 = vsub.f32 %v12181_v18, %v1123_v2  ;;  %v12266_v7 = vsub.f32 %v12184_v19, %v1121_v3 }
 0x10c   : >> { %v12270_v31 = vsub.f32 %v12187_v20, %v1119_v5 }
 0x10d   : >> { %v1155_v10 = vmul.f32 %v12263_v6, %v12263_v6  ;;  %v1153_v11 = vmul.f32 %v12266_v7, %v12266_v7 }
 0x10e   : >> { %v1151_v13 = vmul.f32 %v12270_v31, %v12270_v31 }
 0x10f   : >> { %v1181_v14 = vsel %vm16465_vm10, %v1155_v10, 0.0  ;;  %v1175_v15 = vsel %vm16465_vm10, %v1153_v11, 0.0 }
 0x110   : >> { %v1089_v17 = vpop.xlane.xlu2 %1088  ;;  %1182 = vadd.xlane.f32.xlu0 %v1181_v14  ;;  %v1169_v18 = vsel %vm16465_vm10, %v1151_v13, 0.0  ;;  %v1086_v19 = vpop.xlane.xlu1 %1085 }
 0x111   : >> { %v1126_v20 = vmul.f32 %v12245_v50, %v1089_v17  ;;  %1176 = vadd.xlane.f32.xlu1 %v1175_v15  ;;  %1170 = vadd.xlane.f32.xlu2 %v1169_v18  ;;  %v1083_v21 = vpop.xlane.xlu0 %1082  ;;  %v1125_v0 = vmul.f32 %v12245_v50, %v1086_v19 }
 0x112   : >> { %v1124_v22 = vmul.f32 %v12245_v50, %v1083_v21 }
 0x113   : >> { %v12288_v26 = vsub.f32 %v12196_v23, %v1126_v20  ;;  %v12298_v33 = vsub.f32 %v12199_v24, %v1125_v0  ;;  %v1178_v23 = vsel %vm16465_vm10, %v1154_v27, 0.0 }
 0x114   : >> { %v12291_v12 = vsub.f32 %v12202_v25, %v1124_v22 }
 0x115   : >> { %v1158_v28 = vmul.f32 %v12288_v26, %v12288_v26  ;;  %v1157_v45 = vmul.f32 %v12298_v33, %v12298_v33 }
 0x116   : >> { %v1156_v34 = vmul.f32 %v12291_v12, %v12291_v12 }
 0x117   : >> { %v1190_v35 = vsel %vm16465_vm10, %v1158_v28, 0.0  ;;  %v1187_v51 = vsel %vm16465_vm10, %v1157_v45, 0.0 }
 0x118   : >> { %v1098_v39 = vpop.xlane.xlu2 %1097  ;;  %1191 = vadd.xlane.f32.xlu0 %v1190_v35  ;;  %v1184_v25 = vsel %vm16465_vm10, %v1156_v34, 0.0  ;;  %v1095_v40 = vpop.xlane.xlu1 %1094 }
 0x119   : >> { %v1129_v41 = vmul.f32 %v12245_v50, %v1098_v39  ;;  %1179 = vadd.xlane.f32.xlu2 %v1178_v23  ;;  %1185 = vadd.xlane.f32.xlu1 %v1184_v25  ;;  %v1092_v43 = vpop.xlane.xlu0 %1091  ;;  %v1128_v44 = vmul.f32 %v12245_v50, %v1095_v40 }
 0x11a   : >> { %v1127_v24 = vmul.f32 %v12245_v50, %v1092_v43 }
 0x11b   : >> { %v12311_v46 = vsub.f32 %v12211_v29, %v1129_v41  ;;  %v12319_v49 = vsub.f32 %v12214_v30, %v1128_v44 }
 0x11c   : >> { %v12314_v47 = vsub.f32 %v12217_v32, %v1127_v24 }
 0x11d   : >> { %v1161_v48 = vmul.f32 %v12311_v46, %v12311_v46  ;;  %v1160_v60 = vmul.f32 %v12319_v49, %v12319_v49 }
 0x11e   : >> { %v1159_v52 = vmul.f32 %v12314_v47, %v12314_v47 }
 0x11f   : >> { %v1199_v53 = vsel %vm16465_vm10, %v1161_v48, 0.0  ;;  %v1196_v3 = vsel %vm16465_vm10, %v1160_v60, 0.0 }
 0x120   : >> { %v1107_v54 = vpop.xlane.xlu2 %1106  ;;  %1200 = vadd.xlane.f32.xlu0 %v1199_v53  ;;  %v1193_v29 = vsel %vm16465_vm10, %v1159_v52, 0.0  ;;  %v1104_v55 = vpop.xlane.xlu1 %1103 }
 0x121   : >> { %v1132_v32 = vmul.f32 %v12245_v50, %v1107_v54  ;;  %1188 = vadd.xlane.f32.xlu2 %v1187_v51  ;;  %1194 = vadd.xlane.f32.xlu1 %v1193_v29  ;;  %v1101_v58 = vpop.xlane.xlu0 %1100  ;;  %v1131_v59 = vmul.f32 %v12245_v50, %v1104_v55 }
 0x122   : >> { %v1130_v30 = vmul.f32 %v12245_v50, %v1101_v58 }
 0x123   : >> { %v12332_v61 = vsub.f32 %v12226_v36, %v1132_v32  ;;  %v12340_v2 = vsub.f32 %v12229_v37, %v1131_v59 }
 0x124   : >> { %v12335_v62 = vsub.f32 %v12232_v38, %v1130_v30 }
 0x125   : >> { %v1164_v63 = vmul.f32 %v12332_v61, %v12332_v61  ;;  %v1163_v10 = vmul.f32 %v12340_v2, %v12340_v2 }
 0x126   : >> { %v1162_v4 = vmul.f32 %v12335_v62, %v12335_v62 }
 0x127   : >> { %v1208_v5 = vsel %vm16465_vm10, %v1164_v63, 0.0  ;;  %v1205_v11 = vsel %vm16465_vm10, %v1163_v10, 0.0 }
 0x128   : >> { %1209 = vadd.xlane.f32.xlu0 %v1208_v5  ;;  %v1202_v36 = vsel %vm16465_vm10, %v1162_v4, 0.0  ;;  %v12387_v4 = vld [vmem:[%s16517_s30] ss:$0 sm:$0xff] }
 0x129   : >> { %1197 = vadd.xlane.f32.xlu2 %v1196_v3  ;;  %1203 = vadd.xlane.f32.xlu1 %v1202_v36  ;;  %v1110_v38 = vpop.xlane.xlu0 %1109 }
 0x12a   : >> { %v1133_v9 = vmul.f32 %v12245_v50, %v1110_v38 }
 0x12c   : >> { %v12351_v37 = vsub.f32 %v12241_v42, %v1133_v9 }
 0x12e   : >> { %v1165_v13 = vmul.f32 %v12351_v37, %v12351_v37 }
 0x130   : >> { %v1211_v14 = vsel %vm16465_vm10, %v1165_v13, 0.0 }
 0x131   : >> { %1206 = vadd.xlane.f32.xlu2 %v1205_v11  ;;  %1212 = vadd.xlane.f32.xlu1 %v1211_v14  ;;  %v12403_v14 = vld [vmem:[%s16518_s5] ss:$0 sm:$0xff] }
 0x17b   : >> { %v1174_v15 = vpop.xlane.xlu0 %1173 }
 0x17c   : >> { %v1168_v17 = vpop.xlane.xlu1 %1167  ;;  %v1216_v18 = vmul.f32 %v1174_v15, %v12245_v50 }
 0x17d   : >> { %v1214_v19 = vmul.f32 %v1168_v17, %v12245_v50 }
 0x17e   : >> { %v1232_v20 = vadd.f32 1e-06, %v1216_v18 }
 0x17f   : >> { %v1230_v21 = vadd.f32 1e-06, %v1214_v19 }
 0x180   : >> { %11405 = vrsqrt.f32 %v1232_v20  ;;  %vm1272_vm15 = vweird.f32 %v1232_v20 }
 0x181   : >> { %11407 = vrsqrt.f32 %v1230_v21  ;;  %vm1252_vm13 = vweird.f32 %v1230_v21 }
 0x183   : >> { %v1183_v42 = vpop.xlane.xlu0 %1182 }
 0x184   : >> { %v1177_v22 = vpop.xlane.xlu1 %1176  ;;  %v1171_v0 = vpop.xlane.xlu2 %1170  ;;  %v1219_v27 = vmul.f32 %v1183_v42, %v12245_v50 }
 0x185   : >> { %v1217_v28 = vmul.f32 %v1177_v22, %v12245_v50  ;;  %v1215_v34 = vmul.f32 %v1171_v0, %v12245_v50 }
 0x186   : >> { %v11406_v35 = vpop.eup %11405  ;;  %v12362_v39 = vadd.f32 1e-06, %v1219_v27 }
 0x187   : >> { %v11408_v23 = vpop.eup %11407  ;;  %v1267_v25 = vmul.f32 %v11406_v35, %v1232_v20  ;;  %v12364_v40 = vadd.f32 1e-06, %v1217_v28  ;;  %v12366_v41 = vadd.f32 1e-06, %v1215_v34  ;;  %vm1273_vm12 = vweird.f32 %v11406_v35 }
 0x188   : >> { %v1247_v43 = vmul.f32 %v11408_v23, %v1230_v21  ;;  %11409 = vrsqrt.f32 %v12362_v39  ;;  %vm1253_vm14 = vweird.f32 %v11408_v23  ;;  %vm1302_vm5 = vweird.f32 %v12362_v39  ;;  %vm1274_vm7 = vmor %vm1272_vm15, %vm1273_vm12 }
 0x189   : >> { %v1268_v24 = vmul.f32 %v11406_v35, %v1267_v25  ;;  %11411 = vrsqrt.f32 %v12364_v40  ;;  %vm1254_vm9 = vmor %vm1252_vm13, %vm1253_vm14  ;;  %vm1282_vm11 = vweird.f32 %v12364_v40  ;;  %vm1262_vm12 = vweird.f32 %v12366_v41 }
 0x18a   : >> { %v1248_v44 = vmul.f32 %v11408_v23, %v1247_v43  ;;  %11413 = vrsqrt.f32 %v12366_v41 }
 0x18b   : >> { %v1269_v45 = vmul.f32 0.5, %v1268_v24  ;;  %v1192_v55 = vpop.xlane.xlu0 %1191 }
 0x18c   : >> { %v1249_v48 = vmul.f32 0.5, %v1248_v44  ;;  %v1180_v51 = vpop.xlane.xlu2 %1179  ;;  %v1186_v52 = vpop.xlane.xlu1 %1185  ;;  %v1222_v9 = vmul.f32 %v1192_v55, %v12245_v50 }
 0x18d   : >> { %v1270_v53 = vsub.f32 1.5, %v1269_v45  ;;  %v1218_v54 = vmul.f32 %v1180_v51, %v12245_v50  ;;  %v1220_v29 = vmul.f32 %v1186_v52, %v12245_v50 }
 0x18e   : >> { %v12373_v32 = vpop.eup %11409  ;;  %v1250_v58 = vsub.f32 1.5, %v1249_v48  ;;  %v12413_v0 = vadd.f32 1e-06, %v1222_v9 }
 0x18f   : >> { %v12375_v30 = vpop.eup %11411  ;;  %v1271_v59 = vmul.f32 %v11406_v35, %v1270_v53  ;;  %v1297_v60 = vmul.f32 %v12373_v32, %v12362_v39  ;;  %v12380_v63 = vadd.f32 1e-06, %v1218_v54  ;;  %v12392_v38 = vadd.f32 1e-06, %v1220_v29 }
 0x190   : >> { %v12382_v3 = vpop.eup %11413  ;;  %v1251_v5 = vmul.f32 %v11408_v23, %v1250_v58  ;;  %v1277_v36 = vmul.f32 %v12375_v30, %v12364_v40  ;;  %vm1303_vm13 = vweird.f32 %v12373_v32  ;;  %vm1283_vm14 = vweird.f32 %v12375_v30 }
 0x191   : >> { %v1275_v10 = vsel %vm1274_vm7, %v11406_v35, %v1271_v59  ;;  %v1257_v11 = vmul.f32 %v12382_v3, %v12366_v41  ;;  %v1298_v13 = vmul.f32 %v12373_v32, %v1297_v60  ;;  %11415 = vrsqrt.f32 %v12380_v63  ;;  %vm1304_vm7 = vmor %vm1302_vm5, %vm1303_vm13 }
 0x192   : >> { %v1255_v15 = vsel %vm1254_vm9, %v11408_v23, %v1251_v5  ;;  %v1408_v17 = vmul.f32 %v1275_v10, %v12249_v56  ;;  %v1278_v18 = vmul.f32 %v12375_v30, %v1277_v36  ;;  %11417 = vrsqrt.f32 %v12392_v38  ;;  %vm1284_vm9 = vmor %vm1282_vm11, %vm1283_vm14 }
 0x193   : >> { %v1406_v19 = vmul.f32 %v1255_v15, %v12251_v57  ;;  %v1258_v20 = vmul.f32 %v12382_v3, %v1257_v11  ;;  %v1299_v21 = vmul.f32 0.5, %v1298_v13  ;;  %vm1263_vm15 = vweird.f32 %v12382_v3  ;;  %v9856_v15 = vld [vmem:[%s12467_s2 + $0x18] sm:$0xf] }
 0x194   : >> { %v1428_v42 = vmul.f32 %v12387_v4, %v1408_v17  ;;  %v1279_v22 = vmul.f32 0.5, %v1278_v18  ;;  %v1189_v56 = vpop.xlane.xlu2 %1188  ;;  %v1195_v57 = vpop.xlane.xlu1 %1194  ;;  %11419 = vrsqrt.f32 %v12413_v0  ;;  %vm1264_vm5 = vmor %vm1262_vm12, %vm1263_vm15  ;;  %vm1479_vm11 = vsmask.f32 4368 }
 0x195   : >> { %v1426_v27 = vmul.f32 %v12387_v4, %v1406_v19  ;;  %v1259_v28 = vmul.f32 0.5, %v1258_v20  ;;  %v1300_v34 = vsub.f32 1.5, %v1299_v21  ;;  %v1221_v25 = vmul.f32 %v1189_v56, %v12245_v50  ;;  %vm12459_vm12 = vmand %vm16468_vm0, %vm16519_vm4  ;;  %v9851_v19 = vld [vmem:[%s12467_s2 + $0xc] sm:$0xf] }
 0x196   : >> { %v1448_v35 = vadd.f32 %v12403_v14, %v1428_v42  ;;  %v1280_v23 = vsub.f32 1.5, %v1279_v22  ;;  %v12431_v52 = vmul.f32 %v1195_v57, %v12245_v50  ;;  %vm1292_vm13 = vweird.f32 %v12380_v63  ;;  %vm12515_vm1 = vmor %vm16522_vm2, %vm1479_vm11 }
 0x197   : >> { %v1446_v43 = vadd.f32 %v12403_v14, %v1426_v27  ;;  %v1260_v24 = vsub.f32 1.5, %v1259_v28  ;;  %v1301_v44 = vmul.f32 %v12373_v32, %v1300_v34  ;;  %v12424_v45 = vpop.eup %11415  ;;  %v12447_v60 = vadd.f32 1e-06, %v1221_v25 }
 0x198   : >> { %v1464_v48 = vpack.c.bf16 %v1448_v35, %v1448_v35  ;;  %v1281_v51 = vmul.f32 %v12375_v30, %v1280_v23  ;;  %v1287_v55 = vmul.f32 %v12424_v45, %v12380_v63  ;;  %v12439_v58 = vpop.eup %11417  ;;  %vm1293_vm14 = vweird.f32 %v12424_v45 }
 0x199   : >> { %v1462_v53 = vpack.c.bf16 %v1446_v43, %v1446_v43  ;;  %v1261_v54 = vmul.f32 %v12382_v3, %v1260_v24  ;;  %v1305_v29 = vsel %vm1304_vm7, %v12373_v32, %v1301_v44  ;;  %v1307_v17 = vmul.f32 %v12439_v58, %v12392_v38 }
 0x19a   : >> { %v1499_v39 = vshrl.u32 %v1464_v48, 16  ;;  %v1285_v59 = vsel %vm1284_vm9, %v12375_v30, %v1281_v51  ;;  %v1411_v40 = vmul.f32 %v1305_v29, %v12263_v6  ;;  %v1502_v32 = vshll.u32 %v1464_v48, 16  ;;  %v1201_v30 = vpop.xlane.xlu0 %1200  ;;  %v12473_v18 = vpop.eup %11419 }
 0x19b   : >> { %v1482_v5 = vshrl.u32 %v1462_v53, 16  ;;  %v1409_v36 = vmul.f32 %v1285_v59, %v12266_v7  ;;  %v1265_v9 = vsel %vm1264_vm5, %v12382_v3, %v1261_v54  ;;  %v1288_v6 = vmul.f32 %v12424_v45, %v1287_v55  ;;  %vm1294_vm5 = vmor %vm1292_vm13, %vm1293_vm14 }
 0x19c   : >> { %v12452_v10 = vrot.slane %v1499_v39, 7  ;;  %v1407_v41 = vmul.f32 %v1265_v9, %v12270_v31  ;;  %v1431_v11 = vmul.f32 %v12387_v4, %v1411_v40  ;;  %v1485_v3 = vshll.u32 %v1462_v53, 16 }
 0x19d   : >> { %v12463_v7 = vrot.slane %v1482_v5, 7  ;;  %v1429_v31 = vmul.f32 %v12387_v4, %v1409_v36  ;;  %v12480_v22 = vmul.f32 %v1201_v30, %v12245_v50  ;;  %v1289_v28 = vmul.f32 0.5, %v1288_v6  ;;  %v9864_v30 = vld [vmem:[%s12467_s2 + $0x2c] sm:$0x1]  ;;  %v9859_v6 = vld [vmem:[%s12467_s2 + $0x20] sm:$0x1] }
 0x19e   : >> { %v1504_v20 = vor.u32 %v1502_v32, %v12452_v10  ;;  %v1427_v21 = vmul.f32 %v12387_v4, %v1407_v41  ;;  %v1451_v42 = vadd.f32 %v12403_v14, %v1431_v11  ;;  %vm1312_vm15 = vweird.f32 %v12392_v38 }
 0x19f   : >> { %v1487_v56 = vor.u32 %v1485_v3, %v12463_v7  ;;  %v1449_v27 = vadd.f32 %v12403_v14, %v1429_v31  ;;  %v1308_v23 = vmul.f32 %v12439_v58, %v1307_v17  ;;  %v1505_v43 = vrot.slane %v12452_v10, 4  ;;  %v9854_v31 = vld [vmem:[%s12467_s2 + $0x14] sm:$0x1] }
 0x1a0   : >> { %v1654_v34 = vsel %vm12459_vm12, %v1504_v20, %v9856_v15  ;;  %v1447_v57 = vadd.f32 %v12403_v14, %v1427_v21  ;;  %v12489_v35 = vpack.c.bf16 %v1451_v42, %v1451_v42  ;;  %v1290_v44 = vsub.f32 1.5, %v1289_v28 }
 0x1a1   : >> { %v1647_v25 = vsel %vm12459_vm12, %v1487_v56, %v9851_v19  ;;  %9857 = vst [vmem:[%s12467_s2 + $0x18] sm:$0xf] %v1654_v34  ;;  %v1465_v24 = vpack.c.bf16 %v1449_v27, %v1449_v27  ;;  %vm1332_vm7 = vweird.f32 %v12413_v0  ;;  %v1488_v48 = vrot.slane %v12463_v7, 4 }
 0x1a2   : >> { %9852 = vst [vmem:[%s12467_s2 + $0xc] sm:$0xf] %v1647_v25  ;;  %v1463_v51 = vpack.c.bf16 %v1447_v57, %v1447_v57  ;;  %v1524_v53 = vshrl.u32 %v12489_v35, 16  ;;  %v1309_v54 = vmul.f32 0.5, %v1308_v23  ;;  %v1291_v55 = vmul.f32 %v12424_v45, %v1290_v44  ;;  %v1198_v57 = vpop.xlane.xlu2 %1197 }
 0x1a3   : >> { %v1507_v29 = vshrl.u32 %v1465_v24, 16  ;;  %vm1313_vm9 = vweird.f32 %v12439_v58  ;;  %v1327_v39 = vmul.f32 %v12473_v18, %v12413_v0  ;;  %v1510_v59 = vshll.u32 %v1465_v24, 16  ;;  %v1204_v24 = vpop.xlane.xlu1 %1203  ;;  %v1210_v0 = vpop.xlane.xlu0 %1209 }
 0x1a4   : >> { %v1490_v40 = vshrl.u32 %v1463_v51, 16  ;;  %v12504_v5 = vrot.slane %v1524_v53, 7  ;;  %v1310_v32 = vsub.f32 1.5, %v1309_v54  ;;  %v1493_v9 = vshll.u32 %v1463_v51, 16  ;;  %vm1314_vm11 = vmor %vm1312_vm15, %vm1313_vm9 }
 0x1a5   : >> { %v1509_v36 = vrot.slane %v1507_v29, 7  ;;  %v1295_v10 = vsel %vm1294_vm5, %v12424_v45, %v1291_v55  ;;  %v1328_v41 = vmul.f32 %v12473_v18, %v1327_v39  ;;  %vm1333_vm13 = vweird.f32 %v12473_v18 }
 0x1a6   : >> { %v1492_v7 = vrot.slane %v1490_v40, 7  ;;  %v1531_v63 = vrot.slane %v12504_v5, 4  ;;  %v1410_v3 = vmul.f32 %v1295_v10, %v12281_v16  ;;  %v1311_v17 = vmul.f32 %v12439_v58, %v1310_v32  ;;  %vm1334_vm14 = vmor %vm1332_vm7, %vm1333_vm13  ;;  %v9861_v10 = vld [vmem:[%s12467_s2 + $0x24] sm:$0xf] }
 0x1a7   : >> { %v1512_v15 = vor.u32 %v1510_v59, %v1509_v36  ;;  %v1514_v45 = vrot.slane %v1509_v36, 4  ;;  %v1329_v19 = vmul.f32 0.5, %v1328_v41  ;;  %11421 = vrsqrt.f32 %v12447_v60 }
 0x1a8   : >> { %v1495_v20 = vor.u32 %v1493_v9, %v1492_v7  ;;  %v1497_v21 = vrot.slane %v1492_v7, 4  ;;  %v1665_v42 = vsel %vm11925_vm3, %v1531_v63, %v9864_v30  ;;  %v1430_v56 = vmul.f32 %v12387_v4, %v1410_v3 }
 0x1a9   : >> { %v1513_v16 = vsel %vm12515_vm1, %v1505_v43, %v1512_v15  ;;  %v1658_v27 = vsel %vm11925_vm3, %v1514_v45, %v9859_v6  ;;  %9865 = vst [vmem:[%s12467_s2 + $0x2c] sm:$0x1] %v1665_v42  ;;  %v1315_v28 = vsel %vm1314_vm11, %v12439_v58, %v1311_v17  ;;  %v1330_v34 = vsub.f32 1.5, %v1329_v19  ;;  %v9866_v42 = vld [vmem:[%s12467_s2 + $0x30] sm:$0xf] }
 0x1aa   : >> { %9858 = vst.msk [vmem:[%s12467_s2 + $0x1c] sm:$0xf] %vm16468_vm0, %v1513_v16  ;;  %v1496_v23 = vsel %vm12515_vm1, %v1488_v48, %v1495_v20  ;;  %v1651_v38 = vsel %vm11925_vm3, %v1497_v21, %v9854_v31  ;;  %v1450_v25 = vadd.f32 %v12403_v14, %v1430_v56  ;;  %v1412_v43 = vmul.f32 %v1315_v28, %v12291_v12  ;;  %v1207_v31 = vpop.xlane.xlu2 %1206 }
 0x1ab   : >> { %9860 = vst [vmem:[%s12467_s2 + $0x20] sm:$0x1] %v1658_v27  ;;  %v1331_v44 = vmul.f32 %v12473_v18, %v1330_v34  ;;  %v12550_v58 = vadd.f32 1e-06, %v12431_v52  ;;  %v12560_v12 = vadd.f32 1e-06, %v12480_v22  ;;  %v1224_v53 = vmul.f32 %v1198_v57, %v12245_v50 }
 0x1ac   : >> { %9853 = vst.msk [vmem:[%s12467_s2 + $0x10] sm:$0xf] %vm16468_vm0, %v1496_v23  ;;  %v1466_v51 = vpack.c.bf16 %v1450_v25, %v1450_v25  ;;  %v1432_v48 = vmul.f32 %v12387_v4, %v1412_v43  ;;  %v1226_v52 = vmul.f32 %v1204_v24, %v12245_v50  ;;  %v1527_v59 = vshll.u32 %v12489_v35, 16 }
 0x1ad   : >> { %9855 = vst [vmem:[%s12467_s2 + $0x14] sm:$0x1] %v1651_v38  ;;  %v1335_v54 = vsel %vm1334_vm14, %v12473_v18, %v1331_v44  ;;  %11423 = vrsqrt.f32 %v12550_v58  ;;  %v12571_v22 = vadd.f32 1e-06, %v1224_v53  ;;  %v12576_v30 = vpop.eup %11421  ;;  %vm1322_vm15 = vweird.f32 %v12447_v60 }
 0x1ae   : >> { %v1516_v29 = vshrl.u32 %v1466_v51, 16  ;;  %v1452_v55 = vadd.f32 %v12403_v14, %v1432_v48  ;;  %v1414_v39 = vmul.f32 %v1335_v54, %v12288_v26  ;;  %11425 = vrsqrt.f32 %v12560_v12 }
 0x1af   : >> { %v12573_v40 = vadd.f32 1e-06, %v1226_v52  ;;  %v1519_v32 = vshll.u32 %v1466_v51, 16  ;;  %11427 = vrsqrt.f32 %v12571_v22  ;;  %v1228_v26 = vmul.f32 %v1210_v0, %v12245_v50 }
 0x1b0   : >> { %v1518_v18 = vrot.slane %v1516_v29, 7  ;;  %v1468_v36 = vpack.c.bf16 %v1452_v55, %v1452_v55  ;;  %v1434_v9 = vmul.f32 %v12387_v4, %v1414_v39  ;;  %v1529_v35 = vor.u32 %v1527_v59, %v12504_v5  ;;  %v9871_v55 = vld [vmem:[%s12467_s2 + $0x3c] sm:$0xf] }
 0x1b1   : >> { %v1317_v45 = vmul.f32 %v12576_v30, %v12447_v60  ;;  %11429 = vrsqrt.f32 %v12573_v40  ;;  %vm1342_vm7 = vweird.f32 %v12550_v58  ;;  %vm1362_vm9 = vweird.f32 %v12560_v12 }
 0x1b2   : >> { %v1521_v41 = vor.u32 %v1519_v32, %v1518_v18  ;;  %v1522_v6 = vrot.slane %v1518_v18, 4  ;;  %v1533_v7 = vshrl.u32 %v1468_v36, 16  ;;  %v1536_v3 = vshll.u32 %v1468_v36, 16 }
 0x1b3   : >> { %v12582_v63 = vpop.eup %11423  ;;  %v1454_v15 = vadd.f32 %v12403_v14, %v1434_v9  ;;  %v1318_v16 = vmul.f32 %v12576_v30, %v1317_v45  ;;  %v12604_v27 = vadd.f32 1e-06, %v1228_v26  ;;  %v1227_v23 = vmul.f32 %v1207_v31, %v12245_v50 }
 0x1b4   : >> { %v1530_v5 = vsel %vm12515_vm1, %v1522_v6, %v1529_v35  ;;  %v1661_v17 = vsel %vm12459_vm12, %v1521_v41, %v9861_v10  ;;  %v12593_v19 = vrot.slane %v1533_v7, 7  ;;  %v1337_v20 = vmul.f32 %v12582_v63, %v12550_v58  ;;  %v12598_v21 = vpop.eup %11425 }
 0x1b5   : >> { %9862 = vst [vmem:[%s12467_s2 + $0x24] sm:$0xf] %v1661_v17  ;;  %v1470_v56 = vpack.c.bf16 %v1454_v15, %v1454_v15  ;;  %v1357_v57 = vmul.f32 %v12598_v21, %v12560_v12  ;;  %v12613_v38 = vpop.eup %11427  ;;  %v1319_v43 = vmul.f32 0.5, %v1318_v16  ;;  %vm1323_vm5 = vweird.f32 %v12576_v30 }
 0x1b6   : >> { %9863 = vst.msk [vmem:[%s12467_s2 + $0x28] sm:$0xf] %vm16468_vm0, %v1530_v5  ;;  %v1538_v28 = vor.u32 %v1536_v3, %v12593_v19  ;;  %v1338_v34 = vmul.f32 %v12582_v63, %v1337_v20  ;;  %vm1343_vm13 = vweird.f32 %v12582_v63  ;;  %v1347_v48 = vmul.f32 %v12613_v38, %v12571_v22  ;;  %vm1324_vm6 = vmor %vm1322_vm15, %vm1323_vm5 }
 0x1b7   : >> { %v1550_v25 = vshrl.u32 %v1470_v56, 16  ;;  %v1358_v51 = vmul.f32 %v12598_v21, %v1357_v57  ;;  %vm1352_vm11 = vweird.f32 %v12571_v22  ;;  %v12623_v53 = vpop.eup %11429  ;;  %v1553_v52 = vshll.u32 %v1470_v56, 16  ;;  %vm1344_vm4 = vmor %vm1342_vm7, %vm1343_vm13 }
 0x1b8   : >> { %v1668_v24 = vsel %vm12459_vm12, %v1538_v28, %v9866_v42  ;;  %v1339_v44 = vmul.f32 0.5, %v1338_v34  ;;  %v1320_v29 = vsub.f32 1.5, %v1319_v43  ;;  %11431 = vrsqrt.f32 %v12604_v27 }
 0x1b9   : >> { %9867 = vst [vmem:[%s12467_s2 + $0x30] sm:$0xf] %v1668_v24  ;;  %v12626_v54 = vrot.slane %v1550_v25, 7  ;;  %v1359_v0 = vmul.f32 0.5, %v1358_v51  ;;  %v1348_v59 = vmul.f32 %v12613_v38, %v1347_v48  ;;  %v1367_v18 = vmul.f32 %v12623_v53, %v12573_v40 }
 0x1ba   : >> { %v1340_v39 = vsub.f32 1.5, %v1339_v44  ;;  %v1539_v32 = vrot.slane %v12593_v19, 4  ;;  %v1321_v9 = vmul.f32 %v12576_v30, %v1320_v29  ;;  %vm1363_vm14 = vweird.f32 %v12598_v21 }
 0x1bb   : >> { %v1555_v36 = vor.u32 %v1553_v52, %v12626_v54  ;;  %vm1372_vm2 = vweird.f32 %v12573_v40  ;;  %v1360_v26 = vsub.f32 1.5, %v1359_v0  ;;  %v1349_v35 = vmul.f32 0.5, %v1348_v59 }
 0x1bc   : >> { %v1341_v10 = vmul.f32 %v12582_v63, %v1340_v39  ;;  %v1368_v41 = vmul.f32 %v12623_v53, %v1367_v18  ;;  %v1325_v7 = vsel %vm1324_vm6, %v12576_v30, %v1321_v9  ;;  %vm1353_vm10 = vweird.f32 %v12613_v38  ;;  %vm1364_vm6 = vmor %vm1362_vm9, %vm1363_vm14 }
 0x1bd   : >> { %v1675_v6 = vsel %vm12459_vm12, %v1555_v36, %v9871_v55  ;;  %v12652_v60 = vadd.f32 1e-06, %v1227_v23  ;;  %v1413_v3 = vmul.f32 %v1325_v7, %v12298_v33  ;;  %v1361_v45 = vmul.f32 %v12598_v21, %v1360_v26  ;;  %v1213_v33 = vpop.xlane.xlu1 %1212 }
 0x1be   : >> { %9872 = vst [vmem:[%s12467_s2 + $0x3c] sm:$0xf] %v1675_v6  ;;  %v1345_v15 = vsel %vm1344_vm4, %v12582_v63, %v1341_v10  ;;  %v1350_v31 = vsub.f32 1.5, %v1349_v35  ;;  %v12658_v5 = vpop.eup %11431  ;;  %v1556_v30 = vrot.slane %v12626_v54, 4  ;;  %v1369_v58 = vmul.f32 0.5, %v1368_v41  ;;  %vm1354_vm4 = vmor %vm1352_vm11, %vm1353_vm10 }
 0x1bf   : >> { %v1415_v17 = vmul.f32 %v1345_v15, %v12314_v47  ;;  %11433 = vrsqrt.f32 %v12652_v60  ;;  %v1433_v63 = vmul.f32 %v12387_v4, %v1413_v3  ;;  %v1365_v20 = vsel %vm1364_vm6, %v12598_v21, %v1361_v45  ;;  %v9869_v35 = vld [vmem:[%s12467_s2 + $0x38] sm:$0x1]  ;;  %v9874_v45 = vld [vmem:[%s12467_s2 + $0x44] sm:$0x1] }
 0x1c0   : >> { %v1351_v42 = vmul.f32 %v12613_v38, %v1350_v31  ;;  %v1387_v56 = vmul.f32 %v12658_v5, %v12604_v27  ;;  %v1417_v16 = vmul.f32 %v1365_v20, %v12311_v46  ;;  %v1370_v12 = vsub.f32 1.5, %v1369_v58 }
 0x1c1   : >> { %v1435_v47 = vmul.f32 %v12387_v4, %v1415_v17  ;;  %vm1373_vm15 = vweird.f32 %v12623_v53  ;;  %v1453_v28 = vadd.f32 %v12403_v14, %v1433_v63  ;;  %v1229_v57 = vmul.f32 %v1213_v33, %v12245_v50 }
 0x1c2   : >> { %v1355_v21 = vsel %vm1354_vm4, %v12613_v38, %v1351_v42  ;;  %v1388_v34 = vmul.f32 %v12658_v5, %v1387_v56  ;;  %v1437_v46 = vmul.f32 %v12387_v4, %v1417_v16  ;;  %v1371_v22 = vmul.f32 %v12623_v53, %v1370_v12  ;;  %vm1374_vm10 = vmor %vm1372_vm2, %vm1373_vm15  ;;  %v9879_v56 = vld [vmem:[%s12467_s2 + $0x50] sm:$0x1] }
 0x1c3   : >> { %v1455_v23 = vadd.f32 %v12403_v14, %v1435_v47  ;;  %v1416_v25 = vmul.f32 %v1355_v21, %v12319_v49  ;;  %v1469_v43 = vpack.c.bf16 %v1453_v28, %v1453_v28  ;;  %vm1392_vm7 = vweird.f32 %v12604_v27 }
 0x1c4   : >> { %v1389_v24 = vmul.f32 0.5, %v1388_v34  ;;  %vm1393_vm9 = vweird.f32 %v12658_v5  ;;  %v1457_v51 = vadd.f32 %v12403_v14, %v1437_v46  ;;  %v1375_v49 = vsel %vm1374_vm10, %v12623_v53, %v1371_v22 }
 0x1c5   : >> { %v12691_v38 = vpop.eup %11433  ;;  %v1471_v44 = vpack.c.bf16 %v1455_v23, %v1455_v23  ;;  %v1436_v48 = vmul.f32 %v12387_v4, %v1416_v25  ;;  %v1541_v52 = vshrl.u32 %v1469_v43, 16  ;;  %v1418_v29 = vmul.f32 %v1375_v49, %v12335_v62  ;;  %vm12707_vm2 = vmor %vm1392_vm7, %vm1393_vm9 }
 0x1c6   : >> { %v1390_v40 = vsub.f32 1.5, %v1389_v24  ;;  %v12697_v55 = vadd.f32 1e-06, %v1229_v57  ;;  %v1544_v39 = vshll.u32 %v1469_v43, 16  ;;  %v1473_v59 = vpack.c.bf16 %v1457_v51, %v1457_v51  ;;  %v9881_v24 = vld [vmem:[%s12467_s2 + $0x54] sm:$0xf] }
 0x1c7   : >> { %v1558_v0 = vshrl.u32 %v1471_v44, 16  ;;  %v1456_v18 = vadd.f32 %v12403_v14, %v1436_v48  ;;  %v1543_v36 = vrot.slane %v1541_v52, 7  ;;  %v1561_v9 = vshll.u32 %v1471_v44, 16 }
 0x1c8   : >> { %v1438_v10 = vmul.f32 %v12387_v4, %v1418_v29  ;;  %v1391_v26 = vmul.f32 %v12658_v5, %v1390_v40  ;;  %v1575_v41 = vshrl.u32 %v1473_v59, 16  ;;  %v1377_v7 = vmul.f32 %v12691_v38, %v12652_v60 }
 0x1c9   : >> { %v1560_v53 = vrot.slane %v1558_v0, 7  ;;  %v1472_v62 = vpack.c.bf16 %v1456_v18, %v1456_v18  ;;  %v1546_v3 = vor.u32 %v1544_v39, %v1543_v36  ;;  %v1548_v15 = vrot.slane %v1543_v36, 4 }
 0x1ca   : >> { %v1458_v31 = vadd.f32 %v12403_v14, %v1438_v10  ;;  %v1395_v17 = vsel %vm12707_vm2, %v12658_v5, %v1391_v26  ;;  %v1577_v33 = vrot.slane %v1575_v41, 7  ;;  %v1578_v47 = vshll.u32 %v1473_v59, 16  ;;  %v9886_v41 = vld [vmem:[%s12467_s2 + $0x60] sm:$0xf] }
 0x1cb   : >> { %v1563_v58 = vor.u32 %v1561_v9, %v1560_v53  ;;  %v1565_v27 = vrot.slane %v1560_v53, 4  ;;  %v1567_v63 = vshrl.u32 %v1472_v62, 16  ;;  %v1547_v20 = vsel %vm12515_vm1, %v1539_v32, %v1546_v3 }
 0x1cc   : >> { %v1672_v42 = vsel %vm11925_vm3, %v1548_v15, %v9869_v35  ;;  %v1474_v16 = vpack.c.bf16 %v1458_v31, %v1458_v31  ;;  %9868 = vst.msk [vmem:[%s12467_s2 + $0x34] sm:$0xf] %vm16468_vm0, %v1547_v20  ;;  %v1582_v12 = vrot.slane %v1577_v33, 4  ;;  %v1570_v32 = vshll.u32 %v1472_v62, 16 }
 0x1cd   : >> { %v1564_v5 = vsel %vm12515_vm1, %v1556_v30, %v1563_v58  ;;  %v1679_v19 = vsel %vm11925_vm3, %v1565_v27, %v9874_v45  ;;  %9870 = vst [vmem:[%s12467_s2 + $0x38] sm:$0x1] %v1672_v42  ;;  %v1580_v28 = vor.u32 %v1578_v47, %v1577_v33  ;;  %v1569_v21 = vrot.slane %v1567_v63, 7  ;;  %v9876_v30 = vld [vmem:[%s12467_s2 + $0x48] sm:$0xf] }
 0x1ce   : >> { %v1584_v34 = vshrl.u32 %v1474_v16, 16  ;;  %v1420_v57 = vmul.f32 %v1395_v17, %v12332_v61  ;;  %9873 = vst.msk [vmem:[%s12467_s2 + $0x40] sm:$0xf] %vm16468_vm0, %v1564_v5  ;;  %v1686_v54 = vsel %vm11925_vm3, %v1582_v12, %v9879_v56  ;;  %v1587_v23 = vshll.u32 %v1474_v16, 16  ;;  %v9884_v33 = vld [vmem:[%s12467_s2 + $0x5c] sm:$0x1] }
 0x1cf   : >> { %v1378_v46 = vmul.f32 %v12691_v38, %v1377_v7  ;;  %11435 = vrsqrt.f32 %v12697_v55  ;;  %9875 = vst [vmem:[%s12467_s2 + $0x44] sm:$0x1] %v1679_v19  ;;  %v1572_v25 = vor.u32 %v1570_v32, %v1569_v21  ;;  %v1573_v22 = vrot.slane %v1569_v21, 4  ;;  %v9889_v12 = vld [vmem:[%s12467_s2 + $0x68] sm:$0x1] }
 0x1d0   : >> { %v1586_v43 = vrot.slane %v1584_v34, 7  ;;  %v1440_v61 = vmul.f32 %v12387_v4, %v1420_v57  ;;  %9880 = vst [vmem:[%s12467_s2 + $0x50] sm:$0x1] %v1686_v54  ;;  %vm1383_vm5 = vweird.f32 %v12691_v38  ;;  %vm1382_vm13 = vweird.f32 %v12652_v60 }
 0x1d1   : >> { %v1379_v44 = vmul.f32 0.5, %v1378_v46  ;;  %v1581_v51 = vsel %vm12515_vm1, %v1573_v22, %v1580_v28  ;;  %v1682_v48 = vsel %vm12459_vm12, %v1572_v25, %v9876_v30  ;;  %vm1384_vm11 = vmor %vm1382_vm13, %vm1383_vm5  ;;  %vm1402_vm6 = vweird.f32 %v12697_v55 }
 0x1d2   : >> { %v1589_v49 = vor.u32 %v1587_v23, %v1586_v43  ;;  %9877 = vst [vmem:[%s12467_s2 + $0x48] sm:$0xf] %v1682_v48  ;;  %v1460_v52 = vadd.f32 %v12403_v14, %v1440_v61  ;;  %v1590_v20 = vrot.slane %v1586_v43, 4 }
 0x1d3   : >> { %v1380_v29 = vsub.f32 1.5, %v1379_v44  ;;  %9878 = vst.msk [vmem:[%s12467_s2 + $0x4c] sm:$0xf] %vm16468_vm0, %v1581_v51 }
 0x1d4   : >> { %v1689_v40 = vsel %vm12459_vm12, %v1589_v49, %v9881_v24  ;;  %v1476_v0 = vpack.c.bf16 %v1460_v52, %v1460_v52 }
 0x1d5   : >> { %v11436_v39 = vpop.eup %11435  ;;  %9882 = vst [vmem:[%s12467_s2 + $0x54] sm:$0xf] %v1689_v40  ;;  %v1381_v59 = vmul.f32 %v12691_v38, %v1380_v29 }
 0x1d6   : >> { %v1397_v18 = vmul.f32 %v11436_v39, %v12697_v55  ;;  %v1601_v36 = vshrl.u32 %v1476_v0, 16  ;;  %v1604_v53 = vshll.u32 %v1476_v0, 16  ;;  %vm1403_vm14 = vweird.f32 %v11436_v39 }
 0x1d7   : >> { %v1385_v9 = vsel %vm1384_vm11, %v12691_v38, %v1381_v59  ;;  %vm1404_vm4 = vmor %vm1402_vm6, %vm1403_vm14 }
 0x1d8   : >> { %v1419_v10 = vmul.f32 %v1385_v9, %v12340_v2  ;;  %v1398_v26 = vmul.f32 %v11436_v39, %v1397_v18  ;;  %v1603_v35 = vrot.slane %v1601_v36, 7 }
 0x1da   : >> { %v1439_v62 = vmul.f32 %v12387_v4, %v1419_v10  ;;  %v1399_v6 = vmul.f32 0.5, %v1398_v26  ;;  %v1606_v7 = vor.u32 %v1604_v53, %v1603_v35  ;;  %v1607_v32 = vrot.slane %v1603_v35, 4 }
 0x1dc   : >> { %v1459_v60 = vadd.f32 %v12403_v14, %v1439_v62  ;;  %v1400_v3 = vsub.f32 1.5, %v1399_v6  ;;  %v1696_v15 = vsel %vm12459_vm12, %v1606_v7, %v9886_v41 }
 0x1dd   : >> { %9887 = vst [vmem:[%s12467_s2 + $0x60] sm:$0xf] %v1696_v15 }
 0x1de   : >> { %v1475_v38 = vpack.c.bf16 %v1459_v60, %v1459_v60  ;;  %v1401_v45 = vmul.f32 %v11436_v39, %v1400_v3 }
 0x1e0   : >> { %v1592_v2 = vshrl.u32 %v1475_v38, 16  ;;  %v1405_v31 = vsel %vm1404_vm4, %v11436_v39, %v1401_v45  ;;  %v1595_v27 = vshll.u32 %v1475_v38, 16 }
 0x1e1   : >> { %v1421_v17 = vmul.f32 %v1405_v31, %v12351_v37 }
 0x1e2   : >> { %v1594_v58 = vrot.slane %v1592_v2, 7 }
 0x1e3   : >> { %v1441_v63 = vmul.f32 %v12387_v4, %v1421_v17 }
 0x1e4   : >> { %v1597_v42 = vor.u32 %v1595_v27, %v1594_v58  ;;  %v1599_v56 = vrot.slane %v1594_v58, 4 }
 0x1e5   : >> { %v1461_v47 = vadd.f32 %v12403_v14, %v1441_v63 }
 0x1e6   : >> { %v1598_v55 = vsel %vm12515_vm1, %v1590_v20, %v1597_v42  ;;  %v1693_v16 = vsel %vm11925_vm3, %v1599_v56, %v9884_v33 }
 0x1e7   : >> { %9883 = vst.msk [vmem:[%s12467_s2 + $0x58] sm:$0xf] %vm16468_vm0, %v1598_v55  ;;  %v1477_v37 = vpack.c.bf16 %v1461_v47, %v1461_v47 }
 0x1e8   : >> { %9885 = vst [vmem:[%s12467_s2 + $0x5c] sm:$0x1] %v1693_v16 }
 0x1e9   : >> { %v1609_v5 = vshrl.u32 %v1477_v37, 16  ;;  %v1612_v4 = vshll.u32 %v1477_v37, 16 }
 0x1eb   : >> { %v1611_v19 = vrot.slane %v1609_v5, 7 }
 0x1ed   : >> { %v1614_v28 = vor.u32 %v1612_v4, %v1611_v19  ;;  %v1616_v21 = vrot.slane %v1611_v19, 4  ;;  %1041 = sbr.rel (!%p1039_p4) target bundleno = 137 (0x89), region = 214 }
 0x1ef   : >> { %v1615_v14 = vsel %vm12515_vm1, %v1607_v32, %v1614_v28  ;;  %v1700_v34 = vsel %vm11925_vm3, %v1616_v21, %v9889_v12 }
 0x1f0   : >> { %9888 = vst.msk [vmem:[%s12467_s2 + $0x64] sm:$0xf] %vm16468_vm0, %v1615_v14 }
 0x1f1   : >> { %9890 = vst [vmem:[%s12467_s2 + $0x68] sm:$0x1] %v1700_v34 }
 0x1f2 LB: >> { %s16466_s28 = smul.u32 96, %s11702_s6  ;;  %vm2017_vm15 = vcmask 1046528   ;;  %vm16469_vm10 = vsmask.f32 7424  ;;  %s11723_s7 = smov 8   ;;  %vm16467_vm7 = vcmask 1041408   ;;  %s11702_s6 = sphi %s12792_s6, %s1707_s6  }
 0x1f3   : >> { %s11724_s3 = smov 4   ;;  %s11725_s0 = smov 12   ;;  %vm2587_vm9 = vcmask 64512   ;;  %vm16528_vm2 = vcmask 31744   ;;  %vm16493_vm13 = vcmask 97280   ;;  %vm2621_vm11 = vcmask 130048  }
 0x1f4   : >> { %s12800_s29 = scalar_lea.vmem [#allocation2], %s16466_s28  ;;  %s11726_s30 = smov 16   ;;  %vm16529_vm5 = vmmov %vm16528_vm2  ;;  %vm16492_vm14 = vcmask 162816   ;;  %vm2655_vm6 = vcmask 195584   ;;  %vm16494_vm4 = vcmask 261120   ;;  %vm16530_vm0 = vcmask 31744  }
 0x1f5   : >> { %s11727_s24 = smov 20   ;;  %s11728_s25 = smov 24  }
 0x1f6   : >> { %s11729_s5 = smov 28   ;;  %s11730_s1 = smov 32  }
 0x1f7   : >> { %s16527_s28 = sld [smem:[#allocation12_spill]] }
 0x1f8   : >> { %v11033_v57 = vld [vmem:[%s12800_s29 + $0x30] sm:$0xf0]  ;;  %v1732_v54 = vld [vmem:[%s12800_s29 + $0x38] sm:$0x1]  ;;  %v11034_v30 = vld [vmem:[%s12800_s29 + $0x30] sm:$0xe] }
 0x1f9   : >> { %v1868_v23 = vunpack.c.l.b16 %v1732_v54  ;;  %v11035_v46 = vor.u32 %v11034_v30, %v11033_v57  ;;  %v12806_v25 = vld [vmem:[%s12800_s29 + $0x30] sm:$0xff]   ;;  %v11036_v22 = vld [vmem:[%s12800_s29 + $0x48] sm:$0xf0]  ;;  %v11037_v44 = vld [vmem:[%s12800_s29 + $0x48] sm:$0xe] }
 0x1fa   : >> { %v1734_v43 = vld [vmem:[%s12800_s29 + $0x50] sm:$0x1]  ;;  %v1930_v61 = vshrl.u32 %v12806_v25, 16  ;;  %v1932_v24 = vshll.u32 %v12806_v25, 16  ;;  %v12814_v48 = vld [vmem:[%s12800_s29 + $0x48] sm:$0xff]   ;;  %v9908_v49 = vld [vmem:[%s12800_s29 + $0x54] sm:$0xff]   ;;  %v11038_v39 = vor.u32 %v11037_v44, %v11036_v22 }
 0x1fb   : >> { %v1870_v51 = vunpack.c.l.b16 %v1734_v43  ;;  %v12818_v52 = vld [vmem:[%s12800_s29 + $0x54] sm:$0xf0]  ;;  %v1876_v29 = vpack.c.b16 %v1868_v23, %v1868_v23  ;;  %v2030_v40 = vrot.slane %v11035_v46, 1  ;;  %v1956_v18 = vshll.u32 %v12814_v48, 16  ;;  %v9918_v36 = vld [vmem:[%s12800_s29 + $0x5c] sm:$0x1] }
 0x1fc   : >> { %v1934_v0 = vrot.slane %v1932_v24, 1  ;;  %v9904_v26 = vld [vmem:[%s12800_s29 + $0x3c] sm:$0xff]   ;;  %v1954_v41 = vshrl.u32 %v12814_v48, 16  ;;  %v2128_v3 = vunpack.c.l.b16 %v9918_v36  ;;  %v9916_v15 = vld [vmem:[%s12800_s29 + $0x44] sm:$0x1]  ;;  %v2036_v38 = vrot.slane %v11038_v39, 1 }
 0x1fd   : >> { %v1878_v59 = vpack.c.b16 %v1870_v51, %v1870_v51  ;;  %v2031_v9 = vrot.slane %v1876_v29, 1  ;;  %v1937_v10 = vshll.u32 %v1876_v29, 16  ;;  %v11484_v35 = vld [vmem:[%s12800_s29 + $0x3c] sm:$0xf0]  ;;  %v1958_v62 = vrot.slane %v1956_v18, 1  ;;  %2106 = vrot.lane.b32.xlu2 %v9904_v26, %s11725_s0  ;;  %v12849_v22 = vld [vmem:[%s12800_s29 + $0x18] sm:$0xff]  }
 0x1fe   : >> { %v12824_v53 = vor.u32 %v1934_v0, %v1930_v61  ;;  %v2136_v31 = vpack.c.b16 %v2128_v3, %v2128_v3  ;;  %v2213_v17 = vshll.u32 %v9908_v49, 16  ;;  %v2126_v58 = vunpack.c.l.b16 %v9916_v15  ;;  %v11485_v20 = vld [vmem:[%s12800_s29 + $0x3c] sm:$0xe]  ;;  %v11488_v4 = vld [vmem:[%s12800_s29 + $0x54] sm:$0xe]  ;;  %v12854_v51 = vld [vmem:[%s12800_s29] sm:$0xff]  }
 0x1ff   : >> { %v1961_v6 = vshll.u32 %v1878_v59, 16  ;;  %v2032_v7 = vsel %vm2017_vm15, %v2030_v40, %v2031_v9  ;;  %v1939_v60 = vrot.slane %v1937_v10, 1  ;;  %v2037_v2 = vrot.slane %v1878_v59, 1  ;;  %v1730_v21 = vld [vmem:[%s12800_s29 + $0x20] sm:$0x1] }
 0x200   : >> { %2050 = vrot.lane.b32.xlu1 %v2032_v7, %s11723_s7  ;;  %v12833_v27 = vor.u32 %v1958_v62, %v1954_v41  ;;  %v2134_v63 = vpack.c.b16 %v2126_v58, %v2126_v58  ;;  %v2211_v56 = vshrl.u32 %v9908_v49, 16  ;;  %v2215_v47 = vrot.slane %v2213_v17, 1  ;;  %v1728_v54 = vld [vmem:[%s12800_s29 + $0x8] sm:$0x1]  ;;  %v9950_v29 = vld [vmem:[%s12800_s29 + $0x50] sm:$0x1] }
 0x201   : >> { %v1940_v45 = vsel %vm16469_vm10, %v12824_v53, %v1939_v60  ;;  %v1963_v33 = vrot.slane %v1961_v6, 1  ;;  %v2038_v42 = vsel %vm2017_vm15, %v2036_v38, %v2037_v2  ;;  %v2218_v55 = vshll.u32 %v2136_v31, 16  ;;  %v9952_v9 = vld [vmem:[%s12800_s29 + $0x68] sm:$0x1]  ;;  %v12870_v60 = vld [vmem:[%s12800_s29 + $0x60] sm:$0xff]  }
 0x202   : >> { %1985 = vrot.lane.b32.xlu0 %v1940_v45, %s11724_s3  ;;  %v2189_v16 = vshll.u32 %v9904_v26, 16  ;;  %v2187_v5 = vshrl.u32 %v9904_v26, 16  ;;  %v2194_v19 = vshll.u32 %v2134_v63, 16  ;;  %v2216_v32 = vor.u32 %v2215_v47, %v2211_v56  ;;  %v11027_v2 = vld [vmem:[%s12800_s29] sm:$0xf0] }
 0x203   : >> { %v1964_v37 = vsel %vm16469_vm10, %v12833_v27, %v1963_v33  ;;  %v2220_v28 = vrot.slane %v2218_v55, 1  ;;  %v11486_v57 = vor.u32 %v11485_v20, %v11484_v35  ;;  %v1866_v23 = vunpack.c.l.b16 %v1730_v21  ;;  %v12889_v55 = vld [vmem:[%s12800_s29 + $0xc] sm:$0xff]  }
 0x204   : >> { %v2191_v12 = vrot.slane %v2189_v16, 1  ;;  %v2196_v34 = vrot.slane %v2194_v19, 1  ;;  %v11489_v46 = vor.u32 %v11488_v4, %v12818_v52  ;;  %v2287_v24 = vrot.slane %v2134_v63, 1  ;;  %v12892_v16 = vld [vmem:[%s12800_s29 + $0xc] sm:$0xf0] }
 0x205   : >> { %v2221_v30 = vsel %vm16469_vm10, %v2216_v32, %v2220_v28  ;;  %2110 = vrot.lane.b32.xlu2 %v9908_v49, %s11725_s0  ;;  %v2286_v61 = vrot.slane %v11486_v57, 1  ;;  %v1864_v44 = vunpack.c.l.b16 %v1728_v54  ;;  %v12857_v40 = vpack.c.b16 %v1866_v23, %v1866_v23  ;;  %v11031_v32 = vld [vmem:[%s12800_s29 + $0x18] sm:$0xe]  ;;  %v9912_v57 = vld [vmem:[%s12800_s29 + $0x14] sm:$0x1] }
 0x206   : >> { %v2192_v14 = vor.u32 %v2191_v12, %v2187_v5  ;;  %v1908_v49 = vshll.u32 %v12849_v22, 16  ;;  %v2292_v52 = vrot.slane %v11489_v46, 1  ;;  %v2293_v39 = vrot.slane %v2136_v31, 1  ;;  %v11028_v31 = vld [vmem:[%s12800_s29] sm:$0xe] }
 0x207   : >> { %v2288_v0 = vsel %vm2017_vm15, %v2286_v61, %v2287_v24  ;;  %v1872_v59 = vpack.c.b16 %v1864_v44, %v1864_v44  ;;  %v1884_v18 = vshll.u32 %v12854_v51, 16  ;;  %v2382_v36 = vunpack.c.l.b16 %v9950_v29  ;;  %v11030_v12 = vld [vmem:[%s12800_s29 + $0x18] sm:$0xf0]  ;;  %v11057_v61 = vld [vmem:[%s12800_s29 + $0x48] sm:$0xf0] }
 0x208   : >> { %2054 = vrot.lane.b32.xlu1 %v2038_v42, %s11723_s7  ;;  %v2197_v43 = vsel %vm16469_vm10, %v2192_v14, %v2196_v34  ;;  %v1906_v10 = vshrl.u32 %v12849_v22, 16  ;;  %v1910_v26 = vrot.slane %v1908_v49, 1  ;;  %v1913_v35 = vshll.u32 %v12857_v40, 16  ;;  %v11060_v14 = vld [vmem:[%s12800_s29 + $0x60] sm:$0xf0] }
 0x209   : >> { %v2294_v41 = vsel %vm2017_vm15, %v2292_v52, %v2293_v39  ;;  %v1882_v62 = vshrl.u32 %v12854_v51, 16  ;;  %v1886_v6 = vrot.slane %v1884_v18, 1  ;;  %v1889_v7 = vshll.u32 %v1872_v59, 16  ;;  %v11061_v34 = vld [vmem:[%s12800_s29 + $0x60] sm:$0xe]  ;;  %v9900_v49 = vld [vmem:[%s12800_s29 + $0x24] sm:$0xff]  }
 0x20a   : >> { %1989 = vrot.lane.b32.xlu0 %v1964_v37, %s11724_s3  ;;  %v2384_v3 = vunpack.c.l.b16 %v9952_v9  ;;  %v12872_v15 = vpack.c.b16 %v2382_v36, %v2382_v36  ;;  %v12876_v38 = vor.u32 %v1910_v26, %v1906_v10  ;;  %v1915_v45 = vrot.slane %v1913_v35, 1  ;;  %v11058_v24 = vld [vmem:[%s12800_s29 + $0x48] sm:$0xe]  ;;  %v9914_v35 = vld [vmem:[%s12800_s29 + $0x2c] sm:$0x1] }
 0x20b   : >> { %v2469_v17 = vshll.u32 %v12870_v60, 16  ;;  %v1887_v58 = vor.u32 %v1886_v6, %v1882_v62  ;;  %v1891_v33 = vrot.slane %v1889_v7, 1  ;;  %v11029_v56 = vor.u32 %v11028_v31, %v11027_v2  ;;  %v11490_v52 = vld [vmem:[%s12800_s29 + $0x24] sm:$0xf0]  ;;  %v11491_v31 = vld [vmem:[%s12800_s29 + $0x24] sm:$0xe] }
 0x20c   : >> { %v2392_v63 = vpack.c.b16 %v2384_v3, %v2384_v3  ;;  %v2450_v20 = vshll.u32 %v12872_v15, 16  ;;  %v1916_v42 = vsel %vm16469_vm10, %v12876_v38, %v1915_v45  ;;  %v2467_v47 = vshrl.u32 %v12870_v60, 16 }
 0x20d   : >> { %2306 = vrot.lane.b32.xlu2 %v2288_v0, %s11727_s24  ;;  %v1892_v37 = vsel %vm16469_vm10, %v1887_v58, %v1891_v33  ;;  %v2471_v5 = vrot.slane %v2469_v17, 1  ;;  %v2018_v28 = vrot.slane %v11029_v56, 1  ;;  %v2019_v21 = vrot.slane %v1872_v59, 1 }
 0x20e   : >> { %v2474_v19 = vshll.u32 %v2392_v63, 16  ;;  %v2452_v4 = vrot.slane %v2450_v20, 1  ;;  %v11032_v46 = vor.u32 %v11031_v32, %v11030_v12  ;;  %v2122_v29 = vunpack.c.l.b16 %v9912_v57  ;;  %v9948_v57 = vld [vmem:[%s12800_s29 + $0x38] sm:$0x1] }
 0x20f   : >> { %v12902_v54 = vor.u32 %v2471_v5, %v2467_v47  ;;  %v2020_v44 = vsel %vm2017_vm15, %v2018_v28, %v2019_v21  ;;  %v11059_v0 = vor.u32 %v11058_v24, %v11057_v61  ;;  %v2025_v18 = vrot.slane %v12857_v40, 1  ;;  %v12941_v61 = vld [vmem:[%s12800_s29 + $0x3c] sm:$0xff]  }
 0x210   : >> { %2246 = vrot.lane.b32.xlu1 %v2221_v30, %s11726_s30  ;;  %v2476_v30 = vrot.slane %v2474_v19, 1  ;;  %v2453_v23 = vsel %vm16469_vm10, %v12833_v27, %v2452_v4  ;;  %v2024_v59 = vrot.slane %v11032_v46, 1  ;;  %v2549_v9 = vrot.slane %v2392_v63, 1  ;;  %v11496_v24 = vld [vmem:[%s12800_s29 + $0x3c] sm:$0xf0] }
 0x211   : >> { %v2130_v10 = vpack.c.b16 %v2122_v29, %v2122_v29  ;;  %v2141_v26 = vshll.u32 %v12889_v55, 16  ;;  %v2543_v62 = vrot.slane %v12872_v15, 1  ;;  %v2139_v40 = vshrl.u32 %v12889_v55, 16  ;;  %v11494_v15 = vld [vmem:[%s12800_s29 + $0xc] sm:$0xe]  ;;  %v12946_v29 = vld [vmem:[%s12800_s29 + $0x54] sm:$0xff]  }
 0x212   : >> { %2242 = vrot.lane.b32.xlu0 %v2197_v43, %s11726_s30  ;;  %v11062_v43 = vor.u32 %v11061_v34, %v11060_v14  ;;  %v2477_v39 = vsel %vm16469_vm10, %v12902_v54, %v2476_v30  ;;  %v2026_v6 = vsel %vm2017_vm15, %v2024_v59, %v2025_v18  ;;  %v2124_v2 = vunpack.c.l.b16 %v9914_v35  ;;  %v11055_v59 = vld [vmem:[%s12800_s29 + $0x30] sm:$0xe]  ;;  %v11051_v18 = vld [vmem:[%s12800_s29 + $0x18] sm:$0xf0] }
 0x213   : >> { %v2143_v3 = vrot.slane %v2141_v26, 1  ;;  %v2146_v45 = vshll.u32 %v2130_v10, 16  ;;  %v2165_v58 = vshll.u32 %v9900_v49, 16  ;;  %v2163_v56 = vshrl.u32 %v9900_v49, 16  ;;  %v1735_v26 = vld [vmem:[%s12800_s29 + $0x5c] sm:$0x1] }
 0x214   : >> { %v2548_v36 = vrot.slane %v11062_v43, 1  ;;  %v2132_v20 = vpack.c.b16 %v2124_v2, %v2124_v2  ;;  %v11492_v19 = vor.u32 %v11491_v31, %v11490_v52  ;;  %v11495_v12 = vor.u32 %v11494_v15, %v12892_v16 }
 0x215   : >> { %2366 = vrot.lane.b32.xlu2 %v12870_v60, %s11728_s25  ;;  %v2144_v33 = vor.u32 %v2143_v3, %v2139_v40  ;;  %v2148_v63 = vrot.slane %v2146_v45, 1  ;;  %v2167_v47 = vrot.slane %v2165_v58, 1  ;;  %v2380_v43 = vunpack.c.l.b16 %v9948_v57 }
 0x216   : >> { %v2550_v7 = vsel %vm2017_vm15, %v2548_v36, %v2549_v9  ;;  %v2280_v21 = vrot.slane %v11492_v19, 1  ;;  %v2281_v14 = vrot.slane %v2132_v20, 1  ;;  %v2274_v30 = vrot.slane %v11495_v12, 1  ;;  %v1733_v36 = vld [vmem:[%s12800_s29 + $0x44] sm:$0x1] }
 0x217   : >> { %v2149_v5 = vsel %vm16469_vm10, %v2144_v33, %v2148_v63  ;;  %v2168_v32 = vor.u32 %v2167_v47, %v2163_v56  ;;  %v11052_v9 = vld [vmem:[%s12800_s29 + $0x18] sm:$0xe]  ;;  %v1871_v40 = vunpack.c.l.b16 %v1735_v26  ;;  %v1944_v45 = vshll.u32 %v12941_v61, 16 }
 0x218   : >> { %2362 = vrot.lane.b32.xlu1 %v12814_v48, %s11728_s25  ;;  %v2282_v16 = vsel %vm2017_vm15, %v2280_v21, %v2281_v14  ;;  %v1968_v63 = vshll.u32 %v12946_v29, 16  ;;  %v1966_v12 = vshrl.u32 %v12946_v29, 16 }
 0x219   : >> { %v1879_v33 = vpack.c.b16 %v1871_v40, %v1871_v40  ;;  %v1946_v56 = vrot.slane %v1944_v45, 1  ;;  %v12997_v40 = vld [vmem:[%s12800_s29 + $0x54] sm:$0xf0]  ;;  %v11048_v45 = vld [vmem:[%s12800_s29 + $0x60] sm:$0xf0] }
 0x21a   : >> { %2310 = vrot.lane.b32.xlu0 %v2294_v41, %s11727_s24  ;;  %v2542_v41 = vrot.slane %v11059_v0, 1  ;;  %v2388_v0 = vpack.c.b16 %v2380_v43, %v2380_v43  ;;  %v9919_v43 = vld [vmem:[%s12800_s29 + $0x68] sm:$0x1] }
 0x21c   : >> { %v2544_v17 = vsel %vm2017_vm15, %v2542_v41, %v2543_v62  ;;  %v1869_v62 = vunpack.c.l.b16 %v1733_v36  ;;  %v2537_v31 = vrot.slane %v2388_v0, 1  ;;  %v11046_v36 = vld [vmem:[%s12800_s29 + $0x48] sm:$0xe] }
 0x21d   : >> { %2498 = vrot.lane.b32.xlu2 %v2453_v23, %s11729_s5  ;;  %v2275_v23 = vrot.slane %v2130_v10, 1  ;;  %v2426_v10 = vshll.u32 %v2388_v0, 16 }
 0x21f   : >> { %v2428_v3 = vrot.slane %v2426_v10, 1 }
 0x220   : >> { %1981 = vrot.lane.b32.xlu1 %v1916_v42, %s11724_s3  ;;  %v9946_v42 = vld [vmem:[%s12800_s29 + $0x20] sm:$0x1] }
 0x221   : >> { %v2378_v4 = vunpack.c.l.b16 %v9946_v42  ;;  %v1942_v42 = vshrl.u32 %v12941_v61, 16 }
 0x222   : >> { %1977 = vrot.lane.b32.xlu0 %v1892_v37, %s11724_s3  ;;  %v2170_v37 = vshll.u32 %v2132_v20, 16  ;;  %v2429_v20 = vsel %vm16469_vm10, %v12824_v53, %v2428_v3 }
 0x223   : >> { %v2386_v34 = vpack.c.b16 %v2378_v4, %v2378_v4  ;;  %v1947_v21 = vor.u32 %v1946_v56, %v1942_v42 }
 0x224   : >> { %v2172_v28 = vrot.slane %v2170_v37, 1  ;;  %v11500_v37 = vld [vmem:[%s12800_s29 + $0x54] sm:$0xe] }
 0x225   : >> { %2046 = vrot.lane.b32.xlu2 %v2026_v6, %s11723_s7  ;;  %v2402_v46 = vshll.u32 %v2386_v34, 16  ;;  %v11053_v6 = vor.u32 %v11052_v9, %v11051_v18  ;;  %v2531_v15 = vrot.slane %v2386_v34, 1 }
 0x227   : >> { %v2404_v52 = vrot.slane %v2402_v46, 1  ;;  %v2530_v58 = vrot.slane %v11053_v6, 1 }
 0x228   : >> { %2042 = vrot.lane.b32.xlu1 %v2020_v44, %s11723_s7  ;;  %v2276_v44 = vsel %vm2017_vm15, %v2274_v30, %v2275_v23  ;;  %v9917_v30 = vld [vmem:[%s12800_s29 + $0x50] sm:$0x1] }
 0x229   : >> { %v2405_v35 = vsel %vm16469_vm10, %v12876_v38, %v2404_v52  ;;  %v2532_v4 = vsel %vm2017_vm15, %v2530_v58, %v2531_v15  ;;  %v2129_v52 = vunpack.c.l.b16 %v9919_v43  ;;  %v1729_v15 = vld [vmem:[%s12800_s29 + $0x14] sm:$0x1] }
 0x22a   : >> { %2502 = vrot.lane.b32.xlu0 %v2477_v39, %s11729_s5  ;;  %v11054_v39 = vld [vmem:[%s12800_s29 + $0x30] sm:$0xf0] }
 0x22b   : >> { %v11056_v41 = vor.u32 %v11055_v59, %v11054_v39  ;;  %v2040_v59 = vrot.slane %v1879_v33, 1  ;;  %v2137_v9 = vpack.c.b16 %v2129_v52, %v2129_v52 }
 0x22d   : >> { %2098 = vrot.lane.b32.xlu2 %v12889_v55, %s11725_s0  ;;  %v2173_v55 = vsel %vm16469_vm10, %v2168_v32, %v2172_v28  ;;  %v2536_v2 = vrot.slane %v11056_v41, 1  ;;  %v1970_v32 = vrot.slane %v1968_v63, 1  ;;  %v1973_v28 = vshll.u32 %v1879_v33, 16  ;;  %v12992_v41 = vld [vmem:[%s12800_s29 + $0xc] sm:$0xf0] }
 0x22e   : >> { %v2230_v6 = vshll.u32 %v2137_v9, 16 }
 0x22f   : >> { %v1971_v23 = vor.u32 %v1970_v32, %v1966_v12 }
 0x230   : >> { %2566 = vrot.lane.b32.xlu1 %v2550_v7, %s11730_s1  ;;  %v11497_v7 = vld [vmem:[%s12800_s29 + $0x3c] sm:$0xe]  ;;  %v2232_v56 = vrot.slane %v2230_v6, 1  ;;  %v11506_v6 = vld [vmem:[%s12800_s29 + $0xc] sm:$0xe] }
 0x231   : >> { %v11498_v19 = vor.u32 %v11497_v7, %v11496_v24  ;;  %v9940_v7 = vld [vmem:[%s12800_s29 + $0x54] sm:$0xff]  }
 0x232   : >> { %2562 = vrot.lane.b32.xlu0 %v2544_v17, %s11730_s1  ;;  %v1877_v17 = vpack.c.b16 %v1869_v62, %v1869_v62 }
 0x233   : >> { %v2033_v34 = vrot.slane %v11498_v19, 1 }
 0x234   : >> { %v1949_v47 = vshll.u32 %v1877_v17, 16  ;;  %v2034_v57 = vrot.slane %v1877_v17, 1  ;;  %v13005_v17 = vld [vmem:[%s12800_s29 + $0x24] sm:$0xf0] }
 0x235   : >> { %2238 = vrot.lane.b32.xlu2 %v2173_v55, %s11726_s30  ;;  %v1975_v55 = vrot.slane %v1973_v28, 1  ;;  %v2296_v28 = vrot.slane %v2137_v9, 1  ;;  %v11503_v9 = vld [vmem:[%s12800_s29 + $0x24] sm:$0xe] }
 0x236   : >> { %v1951_v14 = vrot.slane %v1949_v47, 1  ;;  %v2035_v24 = vsel %vm2017_vm15, %v2033_v34, %v2034_v57 }
 0x237   : >> { %v1976_v39 = vsel %vm16469_vm10, %v1971_v23, %v1975_v55  ;;  %v2457_v23 = vshll.u32 %v9940_v7, 16 }
 0x238   : >> { %2234 = vrot.lane.b32.xlu1 %v2149_v5, %s11726_s30  ;;  %v2538_v5 = vsel %vm2017_vm15, %v2536_v2, %v2537_v31  ;;  %v11049_v2 = vld [vmem:[%s12800_s29 + $0x60] sm:$0xe]  ;;  %v13002_v31 = vld [vmem:[%s12800_s29 + $0x24] sm:$0xff]  }
 0x239   : >> { %v11050_v42 = vor.u32 %v11049_v2, %v11048_v45 }
 0x23a   : >> { %2102 = vrot.lane.b32.xlu0 %v9900_v49, %s11725_s0  ;;  %v11499_v49 = vld [vmem:[%s12800_s29 + $0x54] sm:$0xf0] }
 0x23b   : >> { %v11501_v46 = vor.u32 %v11500_v37, %v11499_v49  ;;  %v11045_v49 = vld [vmem:[%s12800_s29 + $0x48] sm:$0xf0]  ;;  %v2295_v32 = vrot.slane %v11050_v42, 1 }
 0x23c   : >> { %v11047_v62 = vor.u32 %v11046_v36, %v11045_v49  ;;  %v1731_v37 = vld [vmem:[%s12800_s29 + $0x2c] sm:$0x1] }
 0x23d   : >> { %2354 = vrot.lane.b32.xlu2 %v12849_v22, %s11728_s25  ;;  %v2039_v0 = vrot.slane %v11501_v46, 1 }
 0x23e   : >> { %v2289_v33 = vrot.slane %v11047_v62, 1 }
 0x23f   : >> { %v2041_v10 = vsel %vm2017_vm15, %v2039_v0, %v2040_v59  ;;  %v2459_v0 = vrot.slane %v2457_v23, 1 }
 0x240   : >> { %2302 = vrot.lane.b32.xlu1 %v2282_v16, %s11727_s24  ;;  %v1952_v16 = vsel %vm16469_vm10, %v1947_v21, %v1951_v14  ;;  %v1867_v21 = vunpack.c.l.b16 %v1731_v37  ;;  %v2233_v14 = vsel %vm16469_vm10, %v12902_v54, %v2232_v56  ;;  %v1920_v54 = vshll.u32 %v13002_v31, 16 }
 0x242   : >> { %2298 = vrot.lane.b32.xlu0 %v2276_v44, %s11727_s24  ;;  %v2127_v44 = vunpack.c.l.b16 %v9917_v30  ;;  %v9953_v30 = vld [vmem:[%s12800_s29 + $0x74] sm:$0x1]  ;;  %v1875_v46 = vpack.c.b16 %v1867_v21, %v1867_v21  ;;  %v1922_v49 = vrot.slane %v1920_v54, 1 }
 0x243   : >> { %v2385_v52 = vunpack.c.l.b16 %v9953_v30 }
 0x244   : >> { %v2135_v18 = vpack.c.b16 %v2127_v44, %v2127_v44  ;;  %v1925_v36 = vshll.u32 %v1875_v46, 16  ;;  %v2028_v23 = vrot.slane %v1875_v46, 1 }
 0x245   : >> { %2494 = vrot.lane.b32.xlu2 %v2429_v20, %s11729_s5  ;;  %v9951_v20 = vld [vmem:[%s12800_s29 + $0x5c] sm:$0x1] }
 0x246   : >> { %v2206_v26 = vshll.u32 %v2135_v18, 16  ;;  %v2290_v63 = vrot.slane %v2135_v18, 1  ;;  %v2383_v12 = vunpack.c.l.b16 %v9951_v20  ;;  %v1918_v18 = vshrl.u32 %v13002_v31, 16 }
 0x247   : >> { %v1927_v20 = vrot.slane %v1925_v36, 1 }
 0x248   : >> { %2490 = vrot.lane.b32.xlu1 %v2405_v35, %s11729_s5  ;;  %v12989_v35 = vld [vmem:[%s12800_s29 + $0xc] sm:$0xff]   ;;  %v2208_v3 = vrot.slane %v2206_v26, 1  ;;  %v2291_v19 = vsel %vm2017_vm15, %v2289_v33, %v2290_v63  ;;  %v13033_v55 = vpack.c.b16 %v2383_v12, %v2383_v12  ;;  %v1923_v63 = vor.u32 %v1922_v49, %v1918_v18 }
 0x249   : >> { %v1894_v43 = vshrl.u32 %v12989_v35, 16 }
 0x24a   : >> { %2358 = vrot.lane.b32.xlu0 %v12806_v25, %s11728_s25  ;;  %v2209_v47 = vsel %vm16469_vm10, %v12833_v27, %v2208_v3  ;;  %v1896_v27 = vshll.u32 %v12989_v35, 16  ;;  %v2462_v59 = vshll.u32 %v13033_v55, 16  ;;  %v13045_v3 = vpack.c.b16 %v2385_v52, %v2385_v52 }
 0x24b   : >> { %v2546_v49 = vrot.slane %v13033_v55, 1 }
 0x24c   : >> { %v2486_v37 = vshll.u32 %v13045_v3, 16  ;;  %v2552_v55 = vrot.slane %v13045_v3, 1 }
 0x24d   : >> { %1987 = vrot.lane.b32.xlu2 %v1952_v16, %s11724_s3  ;;  %v2297_v16 = vsel %vm2017_vm15, %v2295_v32, %v2296_v28  ;;  %v11504_v32 = vor.u32 %v11503_v9, %v13005_v17  ;;  %v1928_v28 = vsel %vm16469_vm10, %v1923_v63, %v1927_v20  ;;  %v2799_v9 = vld [vmem:[%s16527_s28 + $0x10] sm:$0x3]  ;;  %v13100_v20 = vld [vmem:[%s12800_s29 + $0x3c] sm:$0xff]  }
 0x24f   : >> { %v2027_v30 = vrot.slane %v11504_v32, 1  ;;  %v11040_v32 = vld [vmem:[%s12800_s29 + $0x18] sm:$0xe] }
 0x250   : >> { %2558 = vrot.lane.b32.xlu1 %v2538_v5, %s11730_s1  ;;  %v1865_v5 = vunpack.c.l.b16 %v1729_v15  ;;  %v2464_v15 = vrot.slane %v2462_v59, 1 }
 0x252   : >> { %2554 = vrot.lane.b32.xlu0 %v2532_v4, %s11730_s1  ;;  %v13021_v4 = vld [vmem:[%s12800_s29 + $0x6c] sm:$0xf0]  ;;  %v13026_v34 = vpack.c.b16 %v1865_v5, %v1865_v5 }
 0x254   : >> { %v1901_v44 = vshll.u32 %v13026_v34, 16 }
 0x255   : >> { %2056 = vrot.lane.b32.xlu2 %v2041_v10, %s11723_s7 }
 0x256   : >> { %v1903_v62 = vrot.slane %v1901_v44, 1 }
 0x257   : >> { %v13009_v58 = vpop.permute.xlu2 %2106 }
 0x258   : >> { %2052 = vrot.lane.b32.xlu1 %v2035_v24, %s11723_s7  ;;  %v1898_v24 = vrot.slane %v1896_v27, 1  ;;  %v11512_v27 = vld [vmem:[%s12800_s29 + $0x6c] sm:$0xe] }
 0x259   : >> { %v11513_v59 = vor.u32 %v11512_v27, %v13021_v4  ;;  %v2853_v4 = vunpack.c.l.b16 %v2799_v9  ;;  %v9949_v27 = vld [vmem:[%s12800_s29 + $0x44] sm:$0x1]  ;;  %v2433_v9 = vshll.u32 %v13100_v20, 16 }
 0x25a   : >> { %1991 = vrot.lane.b32.xlu0 %v1976_v39, %s11724_s3  ;;  %v2455_v39 = vshrl.u32 %v9940_v7, 16  ;;  %v1899_v26 = vor.u32 %v1898_v24, %v1894_v43 }
 0x25b   : >> { %v2856_v63 = vpack.c.b16 %v2853_v4, %v2853_v4 }
 0x25c   : >> { %v2460_v2 = vor.u32 %v2459_v0, %v2455_v39  ;;  %v1904_v42 = vsel %vm16469_vm10, %v1899_v26, %v1903_v62  ;;  %v9913_v39 = vld [vmem:[%s12800_s29 + $0x20] sm:$0x1]  ;;  %v2029_v0 = vsel %vm2017_vm15, %v2027_v30, %v2028_v23  ;;  %v2551_v26 = vrot.slane %v11513_v59, 1  ;;  %v11042_v23 = vld [vmem:[%s12800_s29 + $0x30] sm:$0xf0] }
 0x25d   : >> { %2244 = vrot.lane.b32.xlu2 %v2209_v47, %s11726_s30  ;;  %v2886_v3 = vsel %vm16467_vm7, %v2856_v63, 0  ;;  %v11515_v63 = vld [vmem:[%s12800_s29 + $0x24] sm:$0xe]  ;;  %vm16470_vm7 = vcmask 293888  }
 0x25e   : >> { %v2465_v12 = vsel %vm16469_vm10, %v2460_v2, %v2464_v15  ;;  %11253 = vmatpush.bf16.msra.mxu3 %v2886_v3  ;;  %11252 = vmatpush.bf16.msra.mxu2 %v2886_v3 }
 0x25f   : >> { %v13030_v57 = vpop.permute.xlu2 %2110  ;;  %11251 = vmatpush.bf16.msra.mxu1 %v2886_v3  ;;  %2893 = vmatpush.bf16.msra.mxu0 %v2886_v3  ;;  %v2431_v3 = vshrl.u32 %v13100_v20, 16 }
 0x260   : >> { %2112 = vrot.lane.b32.xlu1 %v12870_v60, %s11725_s0  ;;  %v9944_v60 = vld [vmem:[%s12800_s29 + $0x6c] sm:$0xff]  }
 0x261   : >> { %v2481_v10 = vshll.u32 %v9944_v60, 16  ;;  %v2479_v56 = vshrl.u32 %v9944_v60, 16 }
 0x262   : >> { %2108 = vrot.lane.b32.xlu0 %v12814_v48, %s11725_s0 }
 0x263   : >> { %v2483_v47 = vrot.slane %v2481_v10, 1 }
 0x265   : >> { %2312 = vrot.lane.b32.xlu2 %v2297_v16, %s11727_s24  ;;  %v2484_v21 = vor.u32 %v2483_v47, %v2479_v56  ;;  %v9915_v16 = vld [vmem:[%s12800_s29 + $0x38] sm:$0x1]  ;;  %v2553_v56 = vsel %vm2017_vm15, %v2551_v26, %v2552_v55 }
 0x266   : >> { %v2125_v52 = vunpack.c.l.b16 %v9915_v16  ;;  %v11043_v16 = vld [vmem:[%s12800_s29 + $0x30] sm:$0xe] }
 0x267   : >> { %v13048_v45 = vpop.permute.xlu2 %2306 }
 0x268   : >> { %2308 = vrot.lane.b32.xlu1 %v2291_v19, %s11727_s24  ;;  %v11509_v19 = vld [vmem:[%s12800_s29 + $0x54] sm:$0xe]  ;;  %v13085_v36 = vpack.c.b16 %v2125_v52, %v2125_v52  ;;  %v2381_v52 = vunpack.c.l.b16 %v9949_v27 }
 0x269   : >> { %v11510_v24 = vor.u32 %v11509_v19, %v12997_v40 }
 0x26a   : >> { %2248 = vrot.lane.b32.xlu0 %v2233_v14, %s11726_s30  ;;  %v2182_v15 = vshll.u32 %v13085_v36, 16  ;;  %v2284_v26 = vrot.slane %v13085_v36, 1 }
 0x26b   : >> { %v2545_v18 = vrot.slane %v11510_v24, 1  ;;  %v9947_v24 = vld [vmem:[%s12800_s29 + $0x2c] sm:$0x1] }
 0x26c   : >> { %v2379_v59 = vunpack.c.l.b16 %v9947_v24 }
 0x26d   : >> { %1979 = vrot.lane.b32.xlu2 %v1904_v42, %s11724_s3  ;;  %v2547_v62 = vsel %vm2017_vm15, %v2545_v18, %v2546_v49  ;;  %v13103_v42 = vld [vmem:[%s12800_s29 + $0x3c] sm:$0xf0] }
 0x26f   : >> { %v13064_v14 = vpop.permute.xlu2 %2366 }
 0x270   : >> { %2368 = vrot.lane.b32.xlu1 %v9944_v60, %s11728_s25  ;;  %v2488_v60 = vrot.slane %v2486_v37, 1  ;;  %v2184_v37 = vrot.slane %v2182_v15, 1 }
 0x272   : >> { %v13050_v33 = vpop.permute.xlu1 %2050  ;;  %2364 = vrot.lane.b32.xlu0 %v9940_v7, %s11728_s25  ;;  %v11507_v7 = vor.u32 %v11506_v6, %v12992_v41  ;;  %v2022_v41 = vrot.slane %v13026_v34, 1  ;;  %v2489_v43 = vsel %vm16469_vm10, %v2484_v21, %v2488_v60  ;;  %v2123_v34 = vunpack.c.l.b16 %v9913_v39  ;;  %v9932_v21 = vld [vmem:[%s12800_s29 + $0x24] sm:$0xff]  }
 0x273   : >> { %v13121_v60 = vld [vmem:[%s12800_s29 + $0x24] sm:$0xf0]  ;;  %v10720_v39 = vld [vmem:[%s16527_s28] sm:$0xff]  ;;  %v2409_v55 = vshll.u32 %v9932_v21, 16 }
 0x274   : >> { %v13055_v5 = vpop.permute.xlu0 %1985  ;;  %v2021_v17 = vrot.slane %v11507_v7, 1  ;;  %v2131_v6 = vpack.c.b16 %v2123_v34, %v2123_v34  ;;  %v10721_v7 = vld [vmem:[%s16527_s28 + $0x8] sm:$0xff]  ;;  %v13141_v34 = vpack.c.b16 %v2381_v52, %v2381_v52 }
 0x275   : >> { %2504 = vrot.lane.b32.xlu2 %v2489_v43, %s11729_s5  ;;  %11256 = vmatpush.bf16.msra.mxu3 %v10721_v7  ;;  %v2185_v43 = vsel %vm16469_vm10, %v12824_v53, %v2184_v37  ;;  %v2580_v37 = vsel %vm16528_vm2, %v12806_v25, %v13055_v5  ;;  %vm16491_vm2 = vcmask 228352  }
 0x276   : >> { %v2023_v46 = vsel %vm2017_vm15, %v2021_v17, %v2022_v41  ;;  %v2158_v47 = vshll.u32 %v2131_v6, 16  ;;  %11255 = vmatpush.bf16.msra.mxu2 %v10721_v7  ;;  %11254 = vmatpush.bf16.msra.mxu1 %v10721_v7  ;;  %v2278_v49 = vrot.slane %v2131_v6, 1 }
 0x277   : >> { %v13083_v40 = vpop.permute.xlu2 %2498  ;;  %2894 = vmatpush.bf16.msra.mxu0 %v10721_v7  ;;  %v2411_v7 = vrot.slane %v2409_v55, 1 }
 0x278   : >> { %2500 = vrot.lane.b32.xlu1 %v2465_v12, %s11729_s5  ;;  %v11039_v12 = vld [vmem:[%s12800_s29 + $0x18] sm:$0xf0]  ;;  %v2160_v30 = vrot.slane %v2158_v47, 1  ;;  %v2438_v47 = vshll.u32 %v13141_v34, 16 }
 0x279   : >> { %v11041_v17 = vor.u32 %v11040_v32, %v11039_v12  ;;  %11259 = vmatpush.bf16.msra.mxu3 %v10720_v39  ;;  %v2407_v32 = vshrl.u32 %v9932_v21, 16 }
 0x27a   : >> { %v13068_v54 = vpop.permute.xlu1 %2054  ;;  %1983 = vrot.lane.b32.xlu0 %v1928_v28, %s11724_s3  ;;  %11258 = vmatpush.bf16.msra.mxu2 %v10720_v39 }
 0x27b   : >> { %v2277_v18 = vrot.slane %v11041_v17, 1  ;;  %11257 = vmatpush.bf16.msra.mxu1 %v10720_v39  ;;  %2895 = vmatpush.bf16.msra.mxu0 %v10720_v39  ;;  %v2412_v17 = vor.u32 %v2411_v7, %v2407_v32 }
 0x27c   : >> { %v13074_v44 = vpop.permute.xlu0 %1989 }
 0x27d   : >> { %2564 = vrot.lane.b32.xlu2 %v2547_v62, %s11730_s1  ;;  %v2387_v62 = vpack.c.b16 %v2379_v59, %v2379_v59  ;;  %v2279_v6 = vsel %vm2017_vm15, %v2277_v18, %v2278_v49  ;;  %v2584_v36 = vsel %vm16529_vm5, %v12814_v48, %v13074_v44  ;;  %v2440_v44 = vrot.slane %v2438_v47, 1 }
 0x27e   : >> { %v2601_v5 = vsel %vm2587_vm9, %v2584_v36, %v13068_v54  ;;  %vm16490_vm5 = vcmask 289792  }
 0x27f   : >> { %v13109_v19 = vpop.permute.xlu2 %2046  ;;  %v2414_v27 = vshll.u32 %v2387_v62, 16  ;;  %v2618_v24 = vsel %vm16493_vm13, %v2601_v5, %v13030_v57  ;;  %v2534_v59 = vrot.slane %v2387_v62, 1 }
 0x280   : >> { %2048 = vrot.lane.b32.xlu1 %v2029_v0, %s11723_s7  ;;  %v11044_v0 = vor.u32 %v11043_v16, %v11042_v23  ;;  %v11518_v23 = vld [vmem:[%s12800_s29 + $0x3c] sm:$0xe] }
 0x282   : >> { %v13090_v10 = vpop.permute.xlu1 %2246  ;;  %2044 = vrot.lane.b32.xlu0 %v2023_v46, %s11723_s7  ;;  %v2161_v46 = vsel %vm16469_vm10, %v12876_v38, %v2160_v30  ;;  %v2283_v38 = vrot.slane %v11044_v0, 1 }
 0x283   : >> { %v2635_v54 = vsel %vm2621_vm11, %v2618_v24, %v13090_v10 }
 0x284   : >> { %v13095_v2 = vpop.permute.xlu0 %2242  ;;  %v2285_v12 = vsel %vm2017_vm15, %v2283_v38, %v2284_v26 }
 0x285   : >> { %2104 = vrot.lane.b32.xlu2 %v12806_v25, %s11725_s0  ;;  %v2597_v25 = vsel %vm2587_vm9, %v2580_v37, %v13050_v33 }
 0x286   : >> { %v2614_v33 = vsel %vm16493_vm13, %v2597_v25, %v13009_v58  ;;  %v11519_v58 = vor.u32 %v11518_v23, %v13103_v42 }
 0x287   : >> { %v13139_v53 = vpop.permute.xlu2 %2098  ;;  %v2631_v39 = vsel %vm2621_vm11, %v2614_v33, %v13095_v2 }
 0x288   : >> { %2100 = vrot.lane.b32.xlu1 %v12849_v22, %s11725_s0  ;;  %v2648_v10 = vsel %vm16492_vm14, %v2631_v39, %v13048_v45  ;;  %v2540_v45 = vrot.slane %v13141_v34, 1 }
 0x28a   : >> { %v13116_v28 = vpop.permute.xlu1 %2362  ;;  %2568 = vrot.lane.b32.xlu0 %v2553_v56, %s11730_s1  ;;  %v2435_v56 = vrot.slane %v2433_v9, 1  ;;  %v2539_v9 = vrot.slane %v11519_v58, 1 }
 0x28b   : >> { %v2665_v18 = vsel %vm2655_vm6, %v2648_v10, %v13116_v28 }
 0x28c   : >> { %v13126_v41 = vpop.permute.xlu0 %2310  ;;  %v2436_v48 = vor.u32 %v2435_v56, %v2431_v3  ;;  %v2682_v26 = vsel %vm16491_vm2, %v2665_v18, %v13083_v40  ;;  %v2541_v47 = vsel %vm2017_vm15, %v2539_v9, %v2540_v45 }
 0x28d   : >> { %2300 = vrot.lane.b32.xlu2 %v2279_v6, %s11727_s24 }
 0x28e   : >> { %v2441_v0 = vsel %vm16469_vm10, %v2436_v48, %v2440_v44 }
 0x28f   : >> { %v13163_v30 = vpop.permute.xlu2 %2238 }
 0x290   : >> { %2240 = vrot.lane.b32.xlu1 %v2185_v43, %s11726_s30  ;;  %v2416_v43 = vrot.slane %v2414_v27, 1 }
 0x292   : >> { %v13144_v4 = vpop.permute.xlu1 %1981  ;;  %2236 = vrot.lane.b32.xlu0 %v2161_v46, %s11726_s30  ;;  %v2417_v57 = vsel %vm16469_vm10, %v2412_v17, %v2416_v43  ;;  %vm16531_vm10 = vmmov %vm16530_vm0  ;;  %s16534_s30 = sld [smem:[#allocation13_spill]] }
 0x293   : >> { %v2576_v5 = vsel %vm16530_vm0, %v12849_v22, %v13144_v4 }
 0x294   : >> { %v13149_v15 = vpop.permute.xlu0 %1977  ;;  %v2593_v44 = vsel %vm2587_vm9, %v2576_v5, %v13109_v19 }
 0x295   : >> { %2360 = vrot.lane.b32.xlu2 %v13100_v20, %s11728_s25  ;;  %v2572_v17 = vsel %vm16531_vm10, %v12854_v51, %v13149_v15  ;;  %vm16532_vm10 = vmmov %vm16530_vm0 }
 0x297   : >> { %v2355_v2 = vpop.permute.xlu2 %2354 }
 0x298   : >> { %2356 = vrot.lane.b32.xlu1 %v9932_v21, %s11728_s25  ;;  %v11516_v21 = vor.u32 %v11515_v63, %v13121_v60  ;;  %v2652_v60 = vsel %vm16492_vm14, %v2635_v54, %v13126_v41 }
 0x299   : >> { %v2669_v20 = vsel %vm2655_vm6, %v2652_v60, %v13064_v14 }
 0x29a   : >> { %v13170_v16 = vpop.permute.xlu1 %2042  ;;  %2304 = vrot.lane.b32.xlu0 %v2285_v12, %s11727_s24  ;;  %v2533_v46 = vrot.slane %v11516_v21, 1  ;;  %s16539_s24 = smul.u32 96, %s11702_s6  ;;  %s1707_s6 = sadd.s32 1, %s11702_s6  }
 0x29b   : >> { %v2589_v24 = vsel %vm2587_vm9, %v2572_v17, %v13170_v16  ;;  %p1704_p5 = scmp.ge.s32.totalorder %s1707_s6, 2  }
 0x29c   : >> { %v2503_v52 = vpop.permute.xlu0 %2502  ;;  %v2535_v38 = vsel %vm2017_vm15, %v2533_v46, %v2534_v59  ;;  %v2606_v22 = vsel %vm16493_vm13, %v2589_v24, %v13139_v53  ;;  %s13309_s25 = scalar_lea.vmem [#allocation4], %s16539_s24 }
 0x29d   : >> { %v2686_v41 = vsel %vm16491_vm2, %v2669_v20, %v2503_v52  ;;  %2556 = vrot.lane.b32.xlu2 %v2535_v38, %s11730_s1 }
 0x29f   : >> { %v2495_v36 = vpop.permute.xlu2 %2494 }
 0x2a0   : >> { %2496 = vrot.lane.b32.xlu1 %v2441_v0, %s11729_s5 }
 0x2a2   : >> { %v2567_v49 = vpop.permute.xlu1 %2566  ;;  %2492 = vrot.lane.b32.xlu0 %v2417_v57, %s11729_s5  ;;  %s13424_s5 = smov (%p1704_p5), 0  }
 0x2a3   : >> { %v2703_v42 = vsel %vm16494_vm4, %v2686_v41, %v2567_v49 }
 0x2a4   : >> { %v2726_v28 = vunpack.c.l.b16 %v2703_v42  ;;  %v2727_v55 = vunpack.c.h.b16 %v2703_v42  ;;  %v2563_v62 = vpop.permute.xlu0 %2562 }
 0x2a5   : >> { %v2699_v14 = vsel %vm16494_vm4, %v2682_v26, %v2563_v62 }
 0x2a6   : >> { %v2742_v6 = vpack.c.b16 %v2726_v28, %v2726_v28  ;;  %v2743_v63 = vpack.c.b16 %v2727_v55, %v2727_v55  ;;  %v2722_v3 = vunpack.c.l.b16 %v2699_v14  ;;  %v2723_v56 = vunpack.c.h.b16 %v2699_v14 }
 0x2a7   : >> { %v1988_v7 = vpop.permute.xlu2 %1987 }
 0x2a8   : >> { %2775 = vst.msk [vmem:[#allocation5 + $0x30] sm:$0xf] %vm16490_vm5, %v2742_v6  ;;  %v2738_v34 = vpack.c.b16 %v2722_v3, %v2722_v3  ;;  %v2739_v37 = vpack.c.b16 %v2723_v56, %v2723_v56 }
 0x2a9   : >> { %2776 = vst.msk [vmem:[#allocation5 + $0x34] sm:$0xf] %vm16490_vm5, %v2743_v63  ;;  %v2582_v63 = vsel %vm16530_vm0, %v12941_v61, %v1988_v7 }
 0x2aa   : >> { %2771 = vst.msk [vmem:[#allocation5 + $0x20] sm:$0xf] %vm16490_vm5, %v2738_v34  ;;  %v2235_v40 = vpop.permute.xlu1 %2234  ;;  %2560 = vrot.lane.b32.xlu0 %v2541_v47, %s11730_s1 }
 0x2ab   : >> { %2772 = vst.msk [vmem:[#allocation5 + $0x24] sm:$0xf] %vm16490_vm5, %v2739_v37  ;;  %v2623_v19 = vsel %vm2621_vm11, %v2606_v22, %v2235_v40 }
 0x2ac   : >> { %v2103_v12 = vpop.permute.xlu0 %2102 }
 0x2ad   : >> { %v2610_v43 = vsel %vm16493_vm13, %v2593_v44, %v2103_v12 }
 0x2ae   : >> { %v2627_v52 = vsel %vm2621_vm11, %v2610_v43, %v13163_v30 }
 0x2af   : >> { %v13216_v48 = vpop.permute.xlu2 %2056 }
 0x2b0   : >> { %v10718_v32 = vld [vmem:[#allocation5 + $0x30] sm:$0xff] }
 0x2b1   : >> { %10008 = vmatmul.msk.bf16.vlgmr.msra.gmra.mxu3 %vm16470_vm7, %v10718_v32 }
 0x2b2   : >> { %v2303_v27 = vpop.permute.xlu1 %2302  ;;  %v10716_v23 = vld [vmem:[#allocation5 + $0x20] sm:$0xff] }
 0x2b3   : >> { %10006 = vmatmul.msk.bf16.vlgmr.msra.gmra.mxu2 %vm16470_vm7, %v10716_v23  ;;  %v2644_v4 = vsel %vm16492_vm14, %v2627_v52, %v2303_v27 }
 0x2b4   : >> { %v2299_v25 = vpop.permute.xlu0 %2298 }
 0x2b5   : >> { %v2640_v51 = vsel %vm16492_vm14, %v2623_v19, %v2299_v25 }
 0x2b6   : >> { %v2657_v16 = vsel %vm2655_vm6, %v2640_v51, %v2355_v2 }
 0x2b7   : >> { %v2245_v15 = vpop.permute.xlu2 %2244 }
 0x2ba   : >> { %v2491_v21 = vpop.permute.xlu1 %2490 }
 0x2bb   : >> { %v2674_v30 = vsel %vm16491_vm2, %v2657_v16, %v2491_v21 }
 0x2bc   : >> { %v2359_v33 = vpop.permute.xlu0 %2358 }
 0x2bd   : >> { %v2661_v54 = vsel %vm2655_vm6, %v2644_v4, %v2359_v33 }
 0x2be   : >> { %v2678_v0 = vsel %vm16491_vm2, %v2661_v54, %v2495_v36 }
 0x2bf   : >> { %v2313_v42 = vpop.permute.xlu2 %2312 }
 0x2c2   : >> { %v2559_v39 = vpop.permute.xlu1 %2558 }
 0x2c3   : >> { %v2695_v60 = vsel %vm16494_vm4, %v2678_v0, %v2559_v39 }
 0x2c4   : >> { %v2718_v57 = vunpack.c.l.b16 %v2695_v60  ;;  %v2719_v53 = vunpack.c.h.b16 %v2695_v60  ;;  %v2555_v58 = vpop.permute.xlu0 %2554 }
 0x2c5   : >> { %v2691_v46 = vsel %vm16494_vm4, %v2674_v30, %v2555_v58 }
 0x2c6   : >> { %v2734_v59 = vpack.c.b16 %v2718_v57, %v2718_v57  ;;  %v2735_v10 = vpack.c.b16 %v2719_v53, %v2719_v53  ;;  %v2714_v18 = vunpack.c.l.b16 %v2691_v46  ;;  %v2715_v20 = vunpack.c.h.b16 %v2691_v46 }
 0x2c7   : >> { %v1980_v55 = vpop.permute.xlu2 %1979 }
 0x2c8   : >> { %2767 = vst.msk [vmem:[#allocation5 + $0x10] sm:$0xf] %vm16490_vm5, %v2734_v59  ;;  %v2730_v41 = vpack.c.b16 %v2714_v18, %v2714_v18  ;;  %v2731_v49 = vpack.c.b16 %v2715_v20, %v2715_v20 }
 0x2c9   : >> { %2768 = vst.msk [vmem:[#allocation5 + $0x14] sm:$0xf] %vm16490_vm5, %v2735_v10  ;;  %v2574_v10 = vsel %vm16530_vm0, %v12989_v35, %v1980_v55 }
 0x2ca   : >> { %2763 = vst.msk [vmem:[#allocation5] sm:$0xf] %vm16490_vm5, %v2730_v41  ;;  %v2053_v2 = vpop.permute.xlu1 %2052 }
 0x2cb   : >> { %2764 = vst.msk [vmem:[#allocation5 + $0x4] sm:$0xf] %vm16490_vm5, %v2731_v49  ;;  %v2599_v56 = vsel %vm2587_vm9, %v2582_v63, %v2053_v2 }
 0x2cc   : >> { %v1992_v9 = vpop.permute.xlu0 %1991 }
 0x2cd   : >> { %v2586_v17 = vsel %vm16532_vm10, %v12946_v29, %v1992_v9  ;;  %vm16533_vm10 = vmmov %vm16530_vm0  ;;  %vm16535_vm0 = vsmask.f32 7938 }
 0x2ce   : >> { %v2603_v21 = vsel %vm2587_vm9, %v2586_v17, %v13216_v48 }
 0x2cf   : >> { %v2505_v6 = vpop.permute.xlu2 %2504 }
 0x2d0   : >> { %v10714_v45 = vld [vmem:[#allocation5 + $0x10] sm:$0xff] }
 0x2d1   : >> { %10004 = vmatmul.msk.bf16.vlgmr.msra.gmra.mxu1 %vm16470_vm7, %v10714_v45 }
 0x2d2   : >> { %v2113_v38 = vpop.permute.xlu1 %2112  ;;  %v10712_v26 = vld [vmem:[#allocation5] sm:$0xff] }
 0x2d3   : >> { %10002 = vmatmul.msk.bf16.vlgmr.msra.gmra.mxu0 %vm16470_vm7, %v10712_v26  ;;  %v2620_v24 = vsel %vm16493_vm13, %v2603_v21, %v2113_v38 }
 0x2d4   : >> { %v2109_v28 = vpop.permute.xlu0 %2108 }
 0x2d5   : >> { %v2616_v34 = vsel %vm16493_vm13, %v2599_v56, %v2109_v28 }
 0x2d6   : >> { %v2633_v37 = vsel %vm2621_vm11, %v2616_v34, %v2245_v15 }
 0x2d7   : >> { %v2565_v40 = vpop.permute.xlu2 %2564 }
 0x2da   : >> { %v2309_v62 = vpop.permute.xlu1 %2308 }
 0x2db   : >> { %v2650_v36 = vsel %vm16492_vm14, %v2633_v37, %v2309_v62 }
 0x2dc   : >> { %v2249_v14 = vpop.permute.xlu0 %2248 }
 0x2dd   : >> { %v2637_v52 = vsel %vm2621_vm11, %v2620_v24, %v2249_v14 }
 0x2de   : >> { %v2654_v4 = vsel %vm16492_vm14, %v2637_v52, %v2313_v42 }
 0x2df   : >> { %v2105_v22 = vpop.permute.xlu2 %2104 }
 0x2e2   : >> { %v2369_v3 = vpop.permute.xlu1 %2368 }
 0x2e3   : >> { %v2671_v19 = vsel %vm2655_vm6, %v2654_v4, %v2369_v3 }
 0x2e4   : >> { %v2365_v47 = vpop.permute.xlu0 %2364  ;;  %v2688_v51 = vsel %vm16491_vm2, %v2671_v19, %v2505_v6  ;;  %v10042_v19 = vld [vmem:[%s13309_s25 + $0x54] sm:$0xf] }
 0x2e5   : >> { %v2667_v12 = vsel %vm2655_vm6, %v2650_v36, %v2365_v47 }
 0x2e7   : >> { %v2301_v16 = vpop.permute.xlu2 %2300 }
 0x2ea   : >> { %v2501_v32 = vpop.permute.xlu1 %2500 }
 0x2eb   : >> { %v2684_v27 = vsel %vm16491_vm2, %v2667_v12, %v2501_v32 }
 0x2ec   : >> { %v2701_v23 = vsel %vm16494_vm4, %v2684_v27, %v2565_v40  ;;  %v1984_v25 = vpop.permute.xlu0 %1983 }
 0x2ed   : >> { %v2724_v61 = vunpack.c.l.b16 %v2701_v23  ;;  %v2725_v7 = vunpack.c.h.b16 %v2701_v23  ;;  %v2578_v2 = vsel %vm16533_vm10, %v13002_v31, %v1984_v25  ;;  %vm16536_vm10 = vcmask 60416  }
 0x2ef   : >> { %v2740_v5 = vpack.c.b16 %v2724_v61, %v2724_v61  ;;  %v2741_v44 = vpack.c.b16 %v2725_v7, %v2725_v7  ;;  %v2361_v58 = vpop.permute.xlu2 %2360  ;;  %v13297_v61 = vld [vmem:[%s16534_s30] ss:$0 sm:$0xff] }
 0x2f1   : >> { %2773 = vst.msk [vmem:[#allocation5 + $0x28] sm:$0xf] %vm16490_vm5, %v2740_v5 }
 0x2f2   : >> { %2774 = vst.msk [vmem:[#allocation5 + $0x2c] sm:$0xf] %vm16490_vm5, %v2741_v44  ;;  %v2049_v43 = vpop.permute.xlu1 %2048 }
 0x2f3   : >> { %v2595_v42 = vsel %vm2587_vm9, %v2578_v2, %v2049_v43 }
 0x2f4   : >> { %v2045_v33 = vpop.permute.xlu0 %2044  ;;  %v2612_v28 = vsel %vm16493_vm13, %v2595_v42, %v2105_v22 }
 0x2f5   : >> { %v2591_v18 = vsel %vm2587_vm9, %v2574_v10, %v2045_v33 }
 0x2f7   : >> { %v2557_v45 = vpop.permute.xlu2 %2556 }
 0x2f9   : >> { %v10717_v54 = vld [vmem:[#allocation5 + $0x28] sm:$0xff] }
 0x2fa   : >> { %v2101_v29 = vpop.permute.xlu1 %2100  ;;  %10007 = vmatmul.msk.bf16.gmra.mxu2 %vm16470_vm7, %v10717_v54 }
 0x2fb   : >> { %v2608_v20 = vsel %vm16493_vm13, %v2591_v18, %v2101_v29  ;;  %v10045_v18 = vld [vmem:[%s13309_s25 + $0x5c] sm:$0x1] }
 0x2fc   : >> { %v2569_v15 = vpop.permute.xlu0 %2568 }
 0x2fd   : >> { %v2705_v39 = vsel %vm16494_vm4, %v2688_v51, %v2569_v15 }
 0x2fe   : >> { %v2728_v48 = vunpack.c.l.b16 %v2705_v39  ;;  %v2729_v0 = vunpack.c.h.b16 %v2705_v39 }
 0x300   : >> { %v2744_v60 = vpack.c.b16 %v2728_v48, %v2728_v48  ;;  %v2745_v30 = vpack.c.b16 %v2729_v0, %v2729_v0  ;;  %v10032_v48 = vld [vmem:[%s13309_s25 + $0x3c] sm:$0xf] }
 0x302   : >> { %2777 = vst.msk [vmem:[#allocation5 + $0x38] sm:$0xf] %vm16490_vm5, %v2744_v60  ;;  %v2241_v53 = vpop.permute.xlu1 %2240 }
 0x303   : >> { %2778 = vst.msk [vmem:[#allocation5 + $0x3c] sm:$0xf] %vm16490_vm5, %v2745_v30  ;;  %v2629_v62 = vsel %vm2621_vm11, %v2612_v28, %v2241_v53 }
 0x304   : >> { %v2237_v57 = vpop.permute.xlu0 %2236 }
 0x305   : >> { %v2625_v49 = vsel %vm2621_vm11, %v2608_v20, %v2237_v57 }
 0x306   : >> { %v2642_v9 = vsel %vm16492_vm14, %v2625_v49, %v2301_v16 }
 0x30a   : >> { %v10719_v46 = vld [vmem:[#allocation5 + $0x38] sm:$0xff]  ;;  %v2357_v41 = vpop.permute.xlu1 %2356 }
 0x30b   : >> { %10009 = vmatmul.msk.bf16.gmra.mxu3 %vm16470_vm7, %v10719_v46  ;;  %v2659_v38 = vsel %vm2655_vm6, %v2642_v9, %v2357_v41 }
 0x30c   : >> { %v2305_v59 = vpop.permute.xlu0 %2304 }
 0x30d   : >> { %v2646_v31 = vsel %vm16492_vm14, %v2629_v62, %v2305_v59 }
 0x30e   : >> { %v2663_v47 = vsel %vm2655_vm6, %v2646_v31, %v2361_v58 }
 0x312   : >> { %v2497_v63 = vpop.permute.xlu1 %2496 }
 0x313   : >> { %v2680_v34 = vsel %vm16491_vm2, %v2663_v47, %v2497_v63 }
 0x314   : >> { %v2493_v26 = vpop.permute.xlu0 %2492 }
 0x315   : >> { %v2676_v35 = vsel %vm16491_vm2, %v2659_v38, %v2493_v26  ;;  %v10035_v26 = vld [vmem:[%s13309_s25 + $0x44] sm:$0x1] }
 0x316   : >> { %v2693_v55 = vsel %vm16494_vm4, %v2676_v35, %v2557_v45 }
 0x317   : >> { %v2716_v14 = vunpack.c.l.b16 %v2693_v55  ;;  %v2717_v6 = vunpack.c.h.b16 %v2693_v55 }
 0x319   : >> { %v2732_v3 = vpack.c.b16 %v2716_v14, %v2716_v14  ;;  %v2733_v56 = vpack.c.b16 %v2717_v6, %v2717_v6 }
 0x31b   : >> { %2765 = vst.msk [vmem:[#allocation5 + $0x8] sm:$0xf] %vm16490_vm5, %v2732_v3 }
 0x31c   : >> { %2766 = vst.msk [vmem:[#allocation5 + $0xc] sm:$0xf] %vm16490_vm5, %v2733_v56  ;;  %v2561_v37 = vpop.permute.xlu0 %2560 }
 0x31d   : >> { %v2697_v36 = vsel %vm16494_vm4, %v2680_v34, %v2561_v37 }
 0x31e   : >> { %v2720_v40 = vunpack.c.l.b16 %v2697_v36  ;;  %v2721_v12 = vunpack.c.h.b16 %v2697_v36 }
 0x320   : >> { %v2736_v32 = vpack.c.b16 %v2720_v40, %v2720_v40  ;;  %v2737_v27 = vpack.c.b16 %v2721_v12, %v2721_v12  ;;  %v10022_v12 = vld [vmem:[%s13309_s25 + $0x24] sm:$0xf] }
 0x322   : >> { %2769 = vst.msk [vmem:[#allocation5 + $0x18] sm:$0xf] %vm16490_vm5, %v2736_v32 }
 0x323   : >> { %2770 = vst.msk [vmem:[#allocation5 + $0x1c] sm:$0xf] %vm16490_vm5, %v2737_v27  ;;  %v10713_v23 = vld [vmem:[#allocation5 + $0x8] sm:$0xff] }
 0x324   : >> { %10003 = vmatmul.msk.bf16.gmra.mxu0 %vm16470_vm7, %v10713_v23 }
 0x32a   : >> { %v10715_v25 = vld [vmem:[#allocation5 + $0x18] sm:$0xff] }
 0x32b   : >> { %10005 = vmatmul.msk.bf16.gmra.mxu1 %vm16470_vm7, %v10715_v25  ;;  %vm13303_vm7 = vmand %vm16536_vm10, %vm16535_vm0 }
 0x32c   : >> { %vm16540_vm0 = vmmov %vm16536_vm10 }
 0x32d   : >> { %vm16541_vm10 = vmmov %vm16540_vm0 }
 0x334   : >> { %v2927_v7 = vpop.f32.mrf.mxu3 }
 0x335   : >> { %v2928_v5 = vadd.f32 %v13297_v61, %v2927_v7 }
 0x336   : >> { %v2917_v44 = vpop.f32.mrf.mxu2 }
 0x337   : >> { %v2949_v17 = vpack.c.bf16 %v2928_v5, %v2928_v5  ;;  %v2918_v43 = vadd.f32 %v13297_v61, %v2917_v44  ;;  %v10012_v5 = vld [vmem:[%s13309_s25 + $0xc] sm:$0xf] }
 0x339   : >> { %v3058_v21 = vshrl.u32 %v2949_v17, 16  ;;  %v2945_v24 = vpack.c.bf16 %v2918_v43, %v2918_v43  ;;  %v3061_v52 = vshll.u32 %v2949_v17, 16 }
 0x33b   : >> { %v3060_v33 = vrot.slane %v3058_v21, 7  ;;  %v3024_v22 = vshrl.u32 %v2945_v24, 16  ;;  %v3027_v15 = vshll.u32 %v2945_v24, 16 }
 0x33c   : >> { %v2929_v54 = vpop.f32.mrf.mxu3 }
 0x33d   : >> { %v3063_v29 = vor.u32 %v3061_v52, %v3060_v33  ;;  %v3026_v51 = vrot.slane %v3024_v22, 7  ;;  %v2930_v39 = vadd.f32 %v13297_v61, %v2929_v54  ;;  %v3064_v41 = vrot.slane %v3060_v33, 4 }
 0x33e   : >> { %v2919_v0 = vpop.f32.mrf.mxu2 }
 0x33f   : >> { %v3162_v16 = vsel %vm13303_vm7, %v3063_v29, %v10042_v19  ;;  %v3029_v60 = vor.u32 %v3027_v15, %v3026_v51  ;;  %v2950_v30 = vpack.c.bf16 %v2930_v39, %v2930_v39  ;;  %v2920_v57 = vadd.f32 %v13297_v61, %v2919_v0  ;;  %v10025_v29 = vld [vmem:[%s13309_s25 + $0x2c] sm:$0x1] }
 0x340   : >> { %10043 = vst [vmem:[%s13309_s25 + $0x54] sm:$0xf] %v3162_v16  ;;  %v3030_v35 = vrot.slane %v3026_v51, 4 }
 0x341   : >> { %v3148_v53 = vsel %vm13303_vm7, %v3029_v60, %v10032_v48  ;;  %v3066_v58 = vshrl.u32 %v2950_v30, 16  ;;  %v2946_v46 = vpack.c.bf16 %v2920_v57, %v2920_v57  ;;  %v3069_v10 = vshll.u32 %v2950_v30, 16  ;;  %v10015_v57 = vld [vmem:[%s13309_s25 + $0x14] sm:$0x1] }
 0x342   : >> { %10033 = vst [vmem:[%s13309_s25 + $0x3c] sm:$0xf] %v3148_v53 }
 0x343   : >> { %v3068_v59 = vrot.slane %v3066_v58, 7  ;;  %v3032_v20 = vshrl.u32 %v2946_v46, 16  ;;  %v3035_v9 = vshll.u32 %v2946_v46, 16 }
 0x345   : >> { %v3071_v49 = vor.u32 %v3069_v10, %v3068_v59  ;;  %v3073_v2 = vrot.slane %v3068_v59, 4  ;;  %v3034_v42 = vrot.slane %v3032_v20, 7 }
 0x347   : >> { %v3072_v45 = vsel %vm12515_vm1, %v3064_v41, %v3071_v49  ;;  %v3166_v38 = vsel %vm12077_vm8, %v3073_v2, %v10045_v18  ;;  %v3037_v28 = vor.u32 %v3035_v9, %v3034_v42  ;;  %v3039_v55 = vrot.slane %v3034_v42, 4  ;;  %v10037_v9 = vld [vmem:[%s13309_s25 + $0x48] sm:$0xf] }
 0x348   : >> { %10044 = vst.msk [vmem:[%s13309_s25 + $0x58] sm:$0xf] %vm16540_vm0, %v3072_v45 }
 0x349   : >> { %10046 = vst [vmem:[%s13309_s25 + $0x5c] sm:$0x1] %v3166_v38  ;;  %v3038_v62 = vsel %vm12515_vm1, %v3030_v35, %v3037_v28  ;;  %v3152_v14 = vsel %vm12077_vm8, %v3039_v55, %v10035_v26 }
 0x34a   : >> { %10034 = vst.msk [vmem:[%s13309_s25 + $0x40] sm:$0xf] %vm16541_vm10, %v3038_v62  ;;  %vm16542_vm10 = vmmov %vm16540_vm0 }
 0x34b   : >> { %10036 = vst [vmem:[%s13309_s25 + $0x44] sm:$0x1] %v3152_v14 }
 0x34e   : >> { %v2907_v6 = vpop.f32.mrf.mxu1 }
 0x34f   : >> { %v2908_v31 = vadd.f32 %v13297_v61, %v2907_v6  ;;  %v10040_v6 = vld [vmem:[%s13309_s25 + $0x50] sm:$0x1] }
 0x350   : >> { %v2897_v63 = vpop.f32.mrf.mxu0 }
 0x351   : >> { %v2941_v3 = vpack.c.bf16 %v2908_v31, %v2908_v31  ;;  %v2898_v56 = vadd.f32 %v13297_v61, %v2897_v63 }
 0x353   : >> { %v2990_v47 = vshrl.u32 %v2941_v3, 16  ;;  %v2937_v34 = vpack.c.bf16 %v2898_v56, %v2898_v56  ;;  %v2993_v36 = vshll.u32 %v2941_v3, 16 }
 0x355   : >> { %v2992_v37 = vrot.slane %v2990_v47, 7  ;;  %v2956_v40 = vshrl.u32 %v2937_v34, 16  ;;  %v2959_v25 = vshll.u32 %v2937_v34, 16 }
 0x356   : >> { %v2909_v32 = vpop.f32.mrf.mxu1 }
 0x357   : >> { %v2995_v27 = vor.u32 %v2993_v36, %v2992_v37  ;;  %v2958_v23 = vrot.slane %v2956_v40, 7  ;;  %v2910_v7 = vadd.f32 %v13297_v61, %v2909_v32  ;;  %v2996_v15 = vrot.slane %v2992_v37, 4 }
 0x358   : >> { %v2899_v44 = vpop.f32.mrf.mxu0 }
 0x359   : >> { %v3134_v17 = vsel %vm13303_vm7, %v2995_v27, %v10022_v12  ;;  %v2961_v43 = vor.u32 %v2959_v25, %v2958_v23  ;;  %v2942_v21 = vpack.c.bf16 %v2910_v7, %v2910_v7  ;;  %v2900_v24 = vadd.f32 %v13297_v61, %v2899_v44  ;;  %v10047_v27 = vld [vmem:[%s13309_s25 + $0x60] sm:$0xf] }
 0x35a   : >> { %10023 = vst [vmem:[%s13309_s25 + $0x24] sm:$0xf] %v3134_v17  ;;  %v2962_v53 = vrot.slane %v2958_v23, 4 }
 0x35b   : >> { %v3120_v33 = vsel %vm13303_vm7, %v2961_v43, %v10012_v5  ;;  %v2998_v52 = vshrl.u32 %v2942_v21, 16  ;;  %v2938_v22 = vpack.c.bf16 %v2900_v24, %v2900_v24  ;;  %v3001_v54 = vshll.u32 %v2942_v21, 16  ;;  %v10050_v24 = vld [vmem:[%s13309_s25 + $0x68] sm:$0x1] }
 0x35c   : >> { %10013 = vst [vmem:[%s13309_s25 + $0xc] sm:$0xf] %v3120_v33 }
 0x35d   : >> { %v3000_v19 = vrot.slane %v2998_v52, 7  ;;  %v2964_v51 = vshrl.u32 %v2938_v22, 16  ;;  %v2967_v16 = vshll.u32 %v2938_v22, 16 }
 0x35f   : >> { %v3003_v39 = vor.u32 %v3001_v54, %v3000_v19  ;;  %v3005_v48 = vrot.slane %v3000_v19, 4  ;;  %v2966_v0 = vrot.slane %v2964_v51, 7 }
 0x361   : >> { %v3004_v60 = vsel %vm12515_vm1, %v2996_v15, %v3003_v39  ;;  %v3138_v30 = vsel %vm12077_vm8, %v3005_v48, %v10025_v29  ;;  %v2969_v58 = vor.u32 %v2967_v16, %v2966_v0  ;;  %v2971_v46 = vrot.slane %v2966_v0, 4 }
 0x362   : >> { %10024 = vst.msk [vmem:[%s13309_s25 + $0x28] sm:$0xf] %vm16540_vm0, %v3004_v60  ;;  %v10017_v60 = vld [vmem:[%s13309_s25 + $0x18] sm:$0xf] }
 0x363   : >> { %10026 = vst [vmem:[%s13309_s25 + $0x2c] sm:$0x1] %v3138_v30  ;;  %v2970_v59 = vsel %vm12515_vm1, %v2962_v53, %v2969_v58  ;;  %v3124_v10 = vsel %vm12077_vm8, %v2971_v46, %v10015_v57 }
 0x364   : >> { %10014 = vst.msk [vmem:[%s13309_s25 + $0x10] sm:$0xf] %vm16542_vm10, %v2970_v59  ;;  %vm16543_vm10 = vmmov %vm16540_vm0 }
 0x365   : >> { %10016 = vst [vmem:[%s13309_s25 + $0x14] sm:$0x1] %v3124_v10 }
 0x37d   : >> { %v2922_v18 = vpop.f32.mrf.mxu2 }
 0x37e   : >> { %v2923_v20 = vadd.f32 %v13297_v61, %v2922_v18 }
 0x380   : >> { %v2947_v41 = vpack.c.bf16 %v2923_v20, %v2923_v20 }
 0x382   : >> { %v3041_v49 = vshrl.u32 %v2947_v41, 16  ;;  %v3044_v42 = vshll.u32 %v2947_v41, 16 }
 0x384   : >> { %v3043_v2 = vrot.slane %v3041_v49, 7 }
 0x385   : >> { %v2924_v45 = vpop.f32.mrf.mxu2 }
 0x386   : >> { %v3046_v38 = vor.u32 %v3044_v42, %v3043_v2  ;;  %v2925_v26 = vadd.f32 %v13297_v61, %v2924_v45  ;;  %v3047_v31 = vrot.slane %v3043_v2, 4  ;;  %v10027_v2 = vld [vmem:[%s13309_s25 + $0x30] sm:$0xf] }
 0x388   : >> { %v3155_v35 = vsel %vm13303_vm7, %v3046_v38, %v10037_v9  ;;  %v2948_v28 = vpack.c.bf16 %v2925_v26, %v2925_v26  ;;  %v10020_v26 = vld [vmem:[%s13309_s25 + $0x20] sm:$0x1] }
 0x389   : >> { %10038 = vst [vmem:[%s13309_s25 + $0x48] sm:$0xf] %v3155_v35 }
 0x38a   : >> { %v3049_v55 = vshrl.u32 %v2948_v28, 16  ;;  %v3052_v14 = vshll.u32 %v2948_v28, 16 }
 0x38c   : >> { %v3051_v62 = vrot.slane %v3049_v55, 7 }
 0x38e   : >> { %v3054_v63 = vor.u32 %v3052_v14, %v3051_v62  ;;  %v3056_v3 = vrot.slane %v3051_v62, 4  ;;  %v2932_v56 = vpop.f32.mrf.mxu3 }
 0x38f   : >> { %v2933_v47 = vadd.f32 %v13297_v61, %v2932_v56 }
 0x390   : >> { %v3055_v34 = vsel %vm12515_vm1, %v3047_v31, %v3054_v63  ;;  %v3159_v37 = vsel %vm12077_vm8, %v3056_v3, %v10040_v6 }
 0x391   : >> { %10039 = vst.msk [vmem:[%s13309_s25 + $0x4c] sm:$0xf] %vm16540_vm0, %v3055_v34  ;;  %v2951_v36 = vpack.c.bf16 %v2933_v47, %v2933_v47  ;;  %v10030_v47 = vld [vmem:[%s13309_s25 + $0x38] sm:$0x1] }
 0x392   : >> { %10041 = vst [vmem:[%s13309_s25 + $0x50] sm:$0x1] %v3159_v37 }
 0x393   : >> { %v3075_v40 = vshrl.u32 %v2951_v36, 16  ;;  %v3078_v32 = vshll.u32 %v2951_v36, 16 }
 0x395   : >> { %v3077_v12 = vrot.slane %v3075_v40, 7 }
 0x396   : >> { %v2934_v23 = vpop.f32.mrf.mxu3 }
 0x397   : >> { %v3080_v25 = vor.u32 %v3078_v32, %v3077_v12  ;;  %v2935_v7 = vadd.f32 %v13297_v61, %v2934_v23  ;;  %v3081_v33 = vrot.slane %v3077_v12, 4 }
 0x399   : >> { %v3169_v5 = vsel %vm13303_vm7, %v3080_v25, %v10047_v27  ;;  %v2952_v44 = vpack.c.bf16 %v2935_v7, %v2935_v7 }
 0x39a   : >> { %10048 = vst [vmem:[%s13309_s25 + $0x60] sm:$0xf] %v3169_v5 }
 0x39b   : >> { %v3083_v17 = vshrl.u32 %v2952_v44, 16  ;;  %v3086_v21 = vshll.u32 %v2952_v44, 16 }
 0x39d   : >> { %v3085_v43 = vrot.slane %v3083_v17, 7 }
 0x39f   : >> { %v3088_v52 = vor.u32 %v3086_v21, %v3085_v43  ;;  %v3090_v22 = vrot.slane %v3085_v43, 4 }
 0x3a1   : >> { %v3089_v19 = vsel %vm12515_vm1, %v3081_v33, %v3088_v52  ;;  %v3173_v54 = vsel %vm12077_vm8, %v3090_v22, %v10050_v24  ;;  %v2902_v29 = vpop.f32.mrf.mxu0 }
 0x3a2   : >> { %10049 = vst.msk [vmem:[%s13309_s25 + $0x64] sm:$0xf] %vm16543_vm10, %v3089_v19  ;;  %v2903_v51 = vadd.f32 %v13297_v61, %v2902_v29 }
 0x3a3   : >> { %10051 = vst [vmem:[%s13309_s25 + $0x68] sm:$0x1] %v3173_v54 }
 0x3a4   : >> { %v2939_v15 = vpack.c.bf16 %v2903_v51, %v2903_v51 }
 0x3a6   : >> { %v2973_v39 = vshrl.u32 %v2939_v15, 16  ;;  %v2976_v0 = vshll.u32 %v2939_v15, 16 }
 0x3a8   : >> { %v2975_v48 = vrot.slane %v2973_v39, 7  ;;  %v2912_v16 = vpop.f32.mrf.mxu1 }
 0x3a9   : >> { %v2913_v30 = vadd.f32 %v13297_v61, %v2912_v16  ;;  %v2904_v57 = vpop.f32.mrf.mxu0 }
 0x3aa   : >> { %v2978_v53 = vor.u32 %v2976_v0, %v2975_v48  ;;  %v2905_v58 = vadd.f32 %v13297_v61, %v2904_v57  ;;  %v2979_v28 = vrot.slane %v2975_v48, 4 }
 0x3ab   : >> { %v2943_v46 = vpack.c.bf16 %v2913_v30, %v2913_v30 }
 0x3ac   : >> { %v3127_v59 = vsel %vm13303_vm7, %v2978_v53, %v10017_v60  ;;  %v2940_v10 = vpack.c.bf16 %v2905_v58, %v2905_v58 }
 0x3ad   : >> { %10018 = vst [vmem:[%s13309_s25 + $0x18] sm:$0xf] %v3127_v59  ;;  %v3007_v18 = vshrl.u32 %v2943_v46, 16  ;;  %v3010_v49 = vshll.u32 %v2943_v46, 16 }
 0x3ae   : >> { %v2981_v20 = vshrl.u32 %v2940_v10, 16  ;;  %v2984_v9 = vshll.u32 %v2940_v10, 16 }
 0x3af   : >> { %v3009_v41 = vrot.slane %v3007_v18, 7 }
 0x3b0   : >> { %v2983_v42 = vrot.slane %v2981_v20, 7  ;;  %v2914_v45 = vpop.f32.mrf.mxu1 }
 0x3b1   : >> { %v3012_v38 = vor.u32 %v3010_v49, %v3009_v41  ;;  %v2915_v35 = vadd.f32 %v13297_v61, %v2914_v45  ;;  %v3013_v34 = vrot.slane %v3009_v41, 4 }
 0x3b2   : >> { %v2986_v55 = vor.u32 %v2984_v9, %v2983_v42  ;;  %v2988_v62 = vrot.slane %v2983_v42, 4 }
 0x3b3   : >> { %v3141_v14 = vsel %vm13303_vm7, %v3012_v38, %v10027_v2  ;;  %v2944_v6 = vpack.c.bf16 %v2915_v35, %v2915_v35  ;;  %vm16544_vm7 = vmmov %vm16540_vm0 }
 0x3b4   : >> { %10028 = vst [vmem:[%s13309_s25 + $0x30] sm:$0xf] %v3141_v14  ;;  %v2987_v31 = vsel %vm12515_vm1, %v2979_v28, %v2986_v55  ;;  %v3131_v63 = vsel %vm12077_vm8, %v2988_v62, %v10020_v26 }
 0x3b5   : >> { %10019 = vst.msk [vmem:[%s13309_s25 + $0x1c] sm:$0xf] %vm16540_vm0, %v2987_v31  ;;  %v3015_v3 = vshrl.u32 %v2944_v6, 16  ;;  %v3018_v56 = vshll.u32 %v2944_v6, 16 }
 0x3b6   : >> { %10021 = vst [vmem:[%s13309_s25 + $0x20] sm:$0x1] %v3131_v63 }
 0x3b7   : >> { %v3017_v61 = vrot.slane %v3015_v3, 7 }
 0x3b9   : >> { %v3020_v4 = vor.u32 %v3018_v56, %v3017_v61  ;;  %v3022_v37 = vrot.slane %v3017_v61, 4  ;;  %1706 = sbr.rel (!%p1704_p5) target bundleno = 498 (0x1f2), region = 225 }
 0x3bb   : >> { %v3021_v36 = vsel %vm12515_vm1, %v3013_v34, %v3020_v4  ;;  %v3145_v40 = vsel %vm12077_vm8, %v3022_v37, %v10030_v47 }
 0x3bc   : >> { %10029 = vst.msk [vmem:[%s13309_s25 + $0x34] sm:$0xf] %vm16544_vm7, %v3021_v36 }
 0x3bd   : >> { %10031 = vst [vmem:[%s13309_s25 + $0x38] sm:$0x1] %v3145_v40 }
 0x3be LB: >> { %s16471_s1 = smul.u32 96, %s11706_s5  ;;  %s16482_s6 = smov 48   ;;  %vm16545_vm8 = vsmask.f32 7424  ;;  %vm4162_vm5 = vcmask 523264   ;;  %vm4235_vm14 = vcmask 584704   ;;  %s11706_s5 = sphi %s13424_s5, %s3180_s5  }
 0x3bf   : >> { %s16472_s3 = smov 24   ;;  %s16474_s7 = smov 16   ;;  %vm16546_vm10 = vmmov %vm16545_vm8  ;;  %vm16570_vm2 = vsmask.f32 7424  ;;  %vm4348_vm13 = vcmask 588800  }
 0x3c0   : >> { %s13432_s2 = scalar_lea.vmem [#allocation4], %s16471_s1  ;;  %s16486_s29 = smov 64   ;;  %vm16547_vm0 = vmmov %vm16545_vm8 }
 0x3c1   : >> { %s16476_s0 = smov 8   ;;  %s16480_s30 = smov 40   ;;  %vm16548_vm7 = vmmov %vm16547_vm0 }
 0x3c2   : >> { %s16484_s24 = smov 32   ;;  %s16478_s25 = smov 56  }
 0x3c3   : >> { %s16559_s1 = smov 40   ;;  %s16563_s23 = smov 64  }
 0x3c4   : >> { %v10057_v8 = vld [vmem:[%s13432_s2 + $0xc] sm:$0xff]   ;;  %v11074_v32 = vld [vmem:[%s13432_s2] sm:$0xf0]  ;;  %v3201_v27 = vld [vmem:[%s13432_s2 + $0x8] sm:$0x1]  ;;  %s16565_s28 = smov 16  }
 0x3c5   : >> { %v13436_v12 = vld [vmem:[%s13432_s2 + $0xc] sm:$0xf0]  ;;  %v11075_v23 = vld [vmem:[%s13432_s2] sm:$0xe]  ;;  %v3337_v25 = vunpack.c.l.b16 %v3201_v27  ;;  %v11098_v7 = vld [vmem:[%s13432_s2 + $0x18] sm:$0xf0]  ;;  %3571 = vrot.lane.b32.xlu1 %v10057_v8, %s16472_s3 }
 0x3c6   : >> { %v10107_v5 = vld [vmem:[%s13432_s2 + $0x20] sm:$0x1]  ;;  %v11076_v44 = vor.u32 %v11075_v23, %v11074_v32  ;;  %v11099_v17 = vld [vmem:[%s13432_s2 + $0x18] sm:$0xe]  ;;  %v10073_v24 = vld [vmem:[%s13432_s2 + $0x14] sm:$0x1] }
 0x3c7   : >> { %v3851_v43 = vunpack.c.l.b16 %v10107_v5  ;;  %v13445_v21 = vld [vmem:[%s13432_s2] sm:$0xff]   ;;  %v3345_v33 = vpack.c.b16 %v3337_v25, %v3337_v25  ;;  %v11100_v52 = vor.u32 %v11099_v17, %v11098_v7  ;;  %v13449_v22 = vld [vmem:[%s13432_s2 + $0x18] sm:$0xff]   ;;  %v3595_v51 = vunpack.c.l.b16 %v10073_v24  ;;  %v11521_v2 = vld [vmem:[%s13432_s2 + $0xc] sm:$0xe]  ;;  %s16566_s4 = smov 32   ;;  %s16567_s22 = smov 24  }
 0x3c8   : >> { %v3491_v19 = vrot.slane %v11076_v44, 1  ;;  %v3357_v29 = vshll.u32 %v13445_v21, 16  ;;  %3827 = vrot.lane.b32.xlu2 %v13449_v22, %s16482_s6  ;;  %v3355_v48 = vshrl.u32 %v13445_v21, 16  ;;  %v3614_v57 = vshll.u32 %v10057_v8, 16  ;;  %v3205_v10 = vld [vmem:[%s13432_s2 + $0x38] sm:$0x1] }
 0x3c9   : >> { %v3859_v54 = vpack.c.b16 %v3851_v43, %v3851_v43  ;;  %v3492_v15 = vrot.slane %v3345_v33, 1  ;;  %v4003_v39 = vrot.slane %v11100_v52, 1  ;;  %v3362_v0 = vshll.u32 %v3345_v33, 16  ;;  %v10065_v26 = vld [vmem:[%s13432_s2 + $0x3c] sm:$0xff]   ;;  %v13469_v31 = vld [vmem:[%s13432_s2 + $0x30] sm:$0xff]  }
 0x3ca   : >> { %v3359_v60 = vrot.slane %v3357_v29, 1  ;;  %v3603_v30 = vpack.c.b16 %v3595_v51, %v3595_v51  ;;  %v3870_v58 = vshll.u32 %v13449_v22, 16  ;;  %v3612_v20 = vshrl.u32 %v10057_v8, 16  ;;  %v11523_v35 = vld [vmem:[%s13432_s2 + $0x3c] sm:$0xf0]  ;;  %v13482_v32 = vld [vmem:[%s13432_s2 + $0xc] sm:$0xff]  }
 0x3cb   : >> { %v4004_v16 = vrot.slane %v3859_v54, 1  ;;  %v3493_v53 = vsel %vm2017_vm15, %v3491_v19, %v3492_v15  ;;  %v3364_v59 = vrot.slane %v3362_v0, 1  ;;  %v3616_v41 = vrot.slane %v3614_v57, 1  ;;  %v10077_v63 = vld [vmem:[%s13432_s2 + $0x44] sm:$0x1] }
 0x3cc   : >> { %3515 = vrot.lane.b32.xlu0 %v3493_v53, %s16474_s7  ;;  %v3360_v46 = vor.u32 %v3359_v60, %v3355_v48  ;;  %v3619_v49 = vshll.u32 %v3603_v30, 16  ;;  %v3868_v42 = vshrl.u32 %v13449_v22, 16  ;;  %v3872_v9 = vrot.slane %v3870_v58, 1  ;;  %v11080_v56 = vld [vmem:[%s13432_s2 + $0x30] sm:$0xf0] }
 0x3cd   : >> { %v4005_v18 = vsel %vm2017_vm15, %v4003_v39, %v4004_v16  ;;  %v3875_v38 = vshll.u32 %v3859_v54, 16  ;;  %v3341_v28 = vunpack.c.l.b16 %v3205_v10  ;;  %v3617_v55 = vor.u32 %v3616_v41, %v3612_v20  ;;  %v11081_v47 = vld [vmem:[%s13432_s2 + $0x30] sm:$0xe]  ;;  %v11524_v44 = vld [vmem:[%s13432_s2 + $0x3c] sm:$0xe]  ;;  %v13504_v10 = vld [vmem:[%s13432_s2 + $0x48] sm:$0xff]  }
 0x3ce   : >> { %4027 = vrot.lane.b32.xlu1 %v4005_v18, %s16486_s29  ;;  %v3365_v45 = vsel %vm16545_vm8, %v3360_v46, %v3364_v59  ;;  %v3621_v62 = vrot.slane %v3619_v49, 1  ;;  %v11522_v14 = vor.u32 %v11521_v2, %v13436_v12  ;;  %v3748_v6 = vrot.slane %v3603_v30, 1  ;;  %v11526_v27 = vld [vmem:[%s13432_s2 + $0xc] sm:$0xf0]  ;;  %v3202_v54 = vld [vmem:[%s13432_s2 + $0x14] sm:$0x1]  ;;  %vm16549_vm8 = vmmov %vm16547_vm0 }
 0x3cf   : >> { %v13473_v3 = vor.u32 %v3872_v9, %v3868_v42  ;;  %v3877_v61 = vrot.slane %v3875_v38, 1  ;;  %v3349_v34 = vpack.c.b16 %v3341_v28, %v3341_v28  ;;  %v3403_v36 = vshrl.u32 %v13469_v31, 16  ;;  %v10111_v51 = vld [vmem:[%s13432_s2 + $0x50] sm:$0x1]  ;;  %v11527_v0 = vld [vmem:[%s13432_s2 + $0xc] sm:$0xe] }
 0x3d0   : >> { %v3747_v4 = vrot.slane %v11522_v14, 1  ;;  %v3622_v37 = vsel %vm16546_vm10, %v3617_v55, %v3621_v62  ;;  %v3405_v40 = vshll.u32 %v13469_v31, 16  ;;  %v3599_v12 = vunpack.c.l.b16 %v10077_v63  ;;  %v10074_v53 = vld [vmem:[%s13432_s2 + $0x20] sm:$0x1]  ;;  %v13511_v28 = vld [vmem:[%s13432_s2 + $0x24] sm:$0xff]   ;;  %vm16550_vm10 = vmmov %vm16547_vm0 }
 0x3d1   : >> { %v3410_v23 = vshll.u32 %v3349_v34, 16  ;;  %v11082_v25 = vor.u32 %v11081_v47, %v11080_v56  ;;  %v3878_v5 = vsel %vm16547_vm0, %v13473_v3, %v3877_v61  ;;  %v3662_v24 = vshll.u32 %v10065_v26, 16  ;;  %v13514_v55 = vld [vmem:[%s13432_s2 + $0x24] sm:$0xf0] }
 0x3d2   : >> { %v3749_v8 = vsel %vm2017_vm15, %v3747_v4, %v3748_v6  ;;  %v3407_v7 = vrot.slane %v3405_v40, 1  ;;  %v3607_v33 = vpack.c.b16 %v3599_v12, %v3599_v12  ;;  %v3504_v19 = vrot.slane %v3349_v34, 1  ;;  %v10108_v40 = vld [vmem:[%s13432_s2 + $0x2c] sm:$0x1] }
 0x3d3   : >> { %3771 = vrot.lane.b32.xlu2 %v3749_v8, %s16480_s30  ;;  %v3412_v17 = vrot.slane %v3410_v23, 1  ;;  %v3503_v52 = vrot.slane %v11082_v25, 1  ;;  %v3660_v15 = vshrl.u32 %v10065_v26, 16  ;;  %v3664_v39 = vrot.slane %v3662_v24, 1 }
 0x3d4   : >> { %3450 = vrot.lane.b32.xlu0 %v3365_v45, %s16476_s0  ;;  %v13490_v43 = vor.u32 %v3407_v7, %v3403_v36  ;;  %v3667_v48 = vshll.u32 %v3607_v33, 16  ;;  %v3338_v16 = vunpack.c.l.b16 %v3202_v54  ;;  %v11525_v60 = vor.u32 %v11524_v44, %v11523_v35  ;;  %v11105_v36 = vld [vmem:[%s13432_s2 + $0x48] sm:$0xe]  ;;  %v13535_v54 = vld [vmem:[%s13432_s2 + $0x3c] sm:$0xff]  }
 0x3d5   : >> { %v3855_v30 = vunpack.c.l.b16 %v10111_v51  ;;  %v3505_v57 = vsel %vm2017_vm15, %v3503_v52, %v3504_v19  ;;  %v3665_v58 = vor.u32 %v3664_v39, %v3660_v15  ;;  %v3369_v59 = vshll.u32 %v13482_v32, 16  ;;  %v11086_v51 = vld [vmem:[%s13432_s2 + $0x18] sm:$0xf0]  ;;  %v11087_v15 = vld [vmem:[%s13432_s2 + $0x18] sm:$0xe] }
 0x3d6   : >> { %3707 = vrot.lane.b32.xlu1 %v3622_v37, %s16484_s24  ;;  %v3413_v29 = vsel %vm16548_vm7, %v13490_v43, %v3412_v17  ;;  %v3669_v46 = vrot.slane %v3667_v48, 1  ;;  %v3918_v18 = vshll.u32 %v13504_v10, 16  ;;  %v3346_v20 = vpack.c.b16 %v3338_v16, %v3338_v16  ;;  %v11104_v37 = vld [vmem:[%s13432_s2 + $0x48] sm:$0xf0]  ;;  %v3206_v39 = vld [vmem:[%s13432_s2 + $0x44] sm:$0x1]  ;;  %vm16551_vm7 = vmmov %vm16547_vm0 }
 0x3d7   : >> { %v3759_v41 = vrot.slane %v11525_v60, 1  ;;  %v3760_v49 = vrot.slane %v3607_v33, 1  ;;  %v3863_v2 = vpack.c.b16 %v3855_v30, %v3855_v30  ;;  %v3596_v42 = vunpack.c.l.b16 %v10074_v53  ;;  %v11530_v53 = vld [vmem:[%s13432_s2 + $0x24] sm:$0xe] }
 0x3d8   : >> { %v3670_v9 = vsel %vm16549_vm8, %v3665_v58, %v3669_v46  ;;  %v3367_v45 = vshrl.u32 %v13482_v32, 16  ;;  %v3371_v38 = vrot.slane %v3369_v59, 1  ;;  %v11528_v35 = vor.u32 %v11527_v0, %v11526_v27  ;;  %v11533_v58 = vld [vmem:[%s13432_s2 + $0x3c] sm:$0xe]  ;;  %vm16552_vm8 = vmmov %vm16547_vm0 }
 0x3d9   : >> { %v3916_v62 = vshrl.u32 %v13504_v10, 16  ;;  %v3920_v14 = vrot.slane %v3918_v18, 1  ;;  %v3761_v6 = vsel %vm2017_vm15, %v3759_v41, %v3760_v49  ;;  %v3923_v63 = vshll.u32 %v3863_v2, 16 }
 0x3da   : >> { %v3604_v61 = vpack.c.b16 %v3596_v42, %v3596_v42  ;;  %v3372_v56 = vor.u32 %v3371_v38, %v3367_v45  ;;  %v3494_v34 = vrot.slane %v11528_v35, 1  ;;  %v3495_v4 = vrot.slane %v3346_v20, 1  ;;  %v10101_v35 = vld [vmem:[%s13432_s2 + $0x54] sm:$0xff]  }
 0x3db   : >> { %3458 = vrot.lane.b32.xlu2 %v3413_v29, %s16476_s0  ;;  %v13525_v8 = vor.u32 %v3920_v14, %v3916_v62  ;;  %v3925_v12 = vrot.slane %v3923_v63, 1  ;;  %v11106_v25 = vor.u32 %v11105_v36, %v11104_v37  ;;  %v4016_v33 = vrot.slane %v3863_v2, 1  ;;  %v11532_v29 = vld [vmem:[%s13432_s2 + $0x3c] sm:$0xf0]  ;;  %v13559_v62 = vld [vmem:[%s13432_s2 + $0x54] sm:$0xf0] }
 0x3dc   : >> { %3963 = vrot.lane.b32.xlu0 %v3878_v5, %s16478_s25  ;;  %v3631_v27 = vshll.u32 %v3604_v61, 16  ;;  %v3496_v7 = vsel %vm2017_vm15, %v3494_v34, %v3495_v4  ;;  %v3852_v5 = vunpack.c.l.b16 %v10108_v40  ;;  %v3882_v19 = vshll.u32 %v13511_v28, 16  ;;  %v11092_v34 = vld [vmem:[%s13432_s2 + $0x48] sm:$0xf0]  ;;  %v11093_v4 = vld [vmem:[%s13432_s2 + $0x48] sm:$0xe] }
 0x3dd   : >> { %v3926_v44 = vsel %vm16547_vm0, %v13525_v8, %v3925_v12  ;;  %v4015_v24 = vrot.slane %v11106_v25, 1  ;;  %v11088_v0 = vor.u32 %v11087_v15, %v11086_v51  ;;  %v3880_v60 = vshrl.u32 %v13511_v28, 16  ;;  %v10112_v37 = vld [vmem:[%s13432_s2 + $0x5c] sm:$0x1] }
 0x3de   : >> { %3579 = vrot.lane.b32.xlu1 %v10065_v26, %s16472_s3  ;;  %v3374_v26 = vshll.u32 %v3346_v20, 16  ;;  %v3633_v17 = vrot.slane %v3631_v27, 1  ;;  %v3860_v52 = vpack.c.b16 %v3852_v5, %v3852_v5  ;;  %v3884_v30 = vrot.slane %v3882_v19, 1  ;;  %v3203_v5 = vld [vmem:[%s13432_s2 + $0x20] sm:$0x1] }
 0x3df   : >> { %v4017_v48 = vsel %vm2017_vm15, %v4015_v24, %v4016_v33  ;;  %v3342_v46 = vunpack.c.l.b16 %v3206_v39  ;;  %v3750_v59 = vrot.slane %v11088_v0, 1  ;;  %v3751_v18 = vrot.slane %v3604_v61, 1 }
 0x3e0   : >> { %v3376_v47 = vrot.slane %v3374_v26, 1  ;;  %v3634_v16 = vsel %vm16551_vm7, %v13473_v3, %v3633_v17  ;;  %v3885_v20 = vor.u32 %v3884_v30, %v3880_v60  ;;  %v3417_v2 = vshll.u32 %v13535_v54, 16  ;;  %v10078_v26 = vld [vmem:[%s13432_s2 + $0x50] sm:$0x1]  ;;  %v11538_v60 = vld [vmem:[%s13432_s2 + $0x24] sm:$0xf0]  ;;  %vm16554_vm7 = vmmov %vm16547_vm0 }
 0x3e1   : >> { %v3350_v49 = vpack.c.b16 %v3342_v46, %v3342_v46  ;;  %v3752_v42 = vsel %vm2017_vm15, %v3750_v59, %v3751_v18  ;;  %v11534_v38 = vor.u32 %v11533_v58, %v11532_v29  ;;  %v3415_v14 = vshrl.u32 %v13535_v54, 16  ;;  %v11077_v59 = vld [vmem:[%s13432_s2 + $0x18] sm:$0xf0]  ;;  %v11078_v18 = vld [vmem:[%s13432_s2 + $0x18] sm:$0xe] }
 0x3e2   : >> { %v3377_v23 = vsel %vm16550_vm10, %v3372_v56, %v3376_v47  ;;  %v3600_v63 = vunpack.c.l.b16 %v10078_v26  ;;  %v4007_v61 = vrot.slane %v3860_v52, 1  ;;  %v11094_v25 = vor.u32 %v11093_v4, %v11092_v34  ;;  %vm16553_vm10 = vmmov %vm16547_vm0  ;;  %v13601_v4 = vld [vmem:[%s13432_s2 + $0x54] sm:$0xff]  }
 0x3e3   : >> { %3715 = vrot.lane.b32.xlu2 %v3670_v9, %s16484_s24  ;;  %v11531_v9 = vor.u32 %v11530_v53, %v13514_v55  ;;  %v3506_v56 = vrot.slane %v11534_v38, 1  ;;  %v3507_v47 = vrot.slane %v3350_v49, 1  ;;  %v3930_v19 = vshll.u32 %v10101_v35, 16  ;;  %v11536_v53 = vld [vmem:[%s13432_s2 + $0x54] sm:$0xe] }
 0x3e4   : >> { %3523 = vrot.lane.b32.xlu0 %v3505_v57, %s16474_s7  ;;  %v3887_v57 = vshll.u32 %v3860_v52, 16  ;;  %v3608_v12 = vpack.c.b16 %v3600_v63, %v3600_v63  ;;  %v3762_v24 = vrot.slane %v11094_v25, 1  ;;  %v3928_v39 = vshrl.u32 %v10101_v35, 16  ;;  %v3207_v38 = vld [vmem:[%s13432_s2 + $0x50] sm:$0x1] }
 0x3e5   : >> { %v4006_v55 = vrot.slane %v11531_v9, 1  ;;  %v11539_v9 = vld [vmem:[%s13432_s2 + $0x24] sm:$0xe]  ;;  %v10079_v25 = vld [vmem:[%s13432_s2 + $0x5c] sm:$0x1] }
 0x3e6   : >> { %3835 = vrot.lane.b32.xlu1 %v13504_v10, %s16482_s6  ;;  %v3889_v41 = vrot.slane %v3887_v57, 1  ;;  %v3679_v17 = vshll.u32 %v3608_v12, 16  ;;  %v3763_v33 = vrot.slane %v3608_v12, 1 }
 0x3e7   : >> { %v4008_v27 = vsel %vm2017_vm15, %v4006_v55, %v4007_v61 }
 0x3e8   : >> { %v3890_v45 = vsel %vm16552_vm8, %v3885_v20, %v3889_v41  ;;  %v3681_v29 = vrot.slane %v3679_v17, 1  ;;  %v3764_v15 = vsel %vm2017_vm15, %v3762_v24, %v3763_v33  ;;  %v10075_v20 = vld [vmem:[%s13432_s2 + $0x2c] sm:$0x1]  ;;  %vm16555_vm8 = vmmov %vm16547_vm0  ;;  %v11102_v24 = vld [vmem:[%s13432_s2 + $0x30] sm:$0xe]  ;;  %v3601_v33 = vunpack.c.l.b16 %v10079_v25 }
 0x3ea   : >> { %v3682_v30 = vsel %vm16547_vm0, %v13525_v8, %v3681_v29 }
 0x3eb   : >> { %3452 = vrot.lane.b32.xlu2 %v3377_v23, %s16476_s0  ;;  %v3508_v23 = vsel %vm2017_vm15, %v3506_v56, %v3507_v47 }
 0x3ec   : >> { %3779 = vrot.lane.b32.xlu0 %v3761_v6, %s16480_s30  ;;  %v3419_v6 = vrot.slane %v3417_v2, 1  ;;  %v3597_v2 = vunpack.c.l.b16 %v10075_v20 }
 0x3ee   : >> { %3517 = vrot.lane.b32.xlu1 %v3496_v7, %s16474_s7  ;;  %v3420_v36 = vor.u32 %v3419_v6, %v3415_v14  ;;  %v3856_v7 = vunpack.c.l.b16 %v10112_v37  ;;  %v3605_v6 = vpack.c.b16 %v3597_v2, %v3597_v2  ;;  %v11540_v37 = vor.u32 %v11539_v9, %v11538_v60  ;;  %v3204_v2 = vld [vmem:[%s13432_s2 + $0x2c] sm:$0x1] }
 0x3f0   : >> { %v3864_v52 = vpack.c.b16 %v3856_v7, %v3856_v7  ;;  %v3643_v34 = vshll.u32 %v3605_v6, 16  ;;  %v3753_v7 = vrot.slane %v11540_v37, 1 }
 0x3f2   : >> { %v3935_v0 = vshll.u32 %v3864_v52, 16  ;;  %v4019_v55 = vrot.slane %v3864_v52, 1 }
 0x3f3   : >> { %4035 = vrot.lane.b32.xlu2 %v4017_v48, %s16486_s29  ;;  %v3932_v48 = vrot.slane %v3930_v19, 1 }
 0x3f4   : >> { %3971 = vrot.lane.b32.xlu0 %v3926_v44, %s16478_s25  ;;  %v3937_v46 = vrot.slane %v3935_v0, 1  ;;  %v13625_v0 = vld [vmem:[%s13432_s2 + $0x24] sm:$0xff]  }
 0x3f5   : >> { %v3933_v58 = vor.u32 %v3932_v48, %v3928_v39 }
 0x3f6   : >> { %3709 = vrot.lane.b32.xlu1 %v3634_v16, %s16484_s24  ;;  %v10061_v16 = vld [vmem:[%s13432_s2 + $0x24] sm:$0xff]  }
 0x3f7   : >> { %v3636_v56 = vshrl.u32 %v10061_v16, 16 }
 0x3fb   : >> { %3773 = vrot.lane.b32.xlu2 %v3752_v42, %s16480_s30  ;;  %v11537_v42 = vor.u32 %v11536_v53, %v13559_v62  ;;  %v3343_v62 = vunpack.c.l.b16 %v3207_v38  ;;  %v3684_v38 = vshrl.u32 %v13601_v4, 16 }
 0x3fc   : >> { %3573 = vrot.lane.b32.xlu0 %v13449_v22, %s16472_s3  ;;  %v3422_v22 = vshll.u32 %v3350_v49, 16  ;;  %v11079_v49 = vor.u32 %v11078_v18, %v11077_v59  ;;  %v3686_v59 = vshll.u32 %v13601_v4, 16 }
 0x3fd   : >> { %v4018_v63 = vrot.slane %v11537_v42, 1  ;;  %v13607_v12 = vpack.c.b16 %v3343_v62, %v3343_v62  ;;  %v11542_v62 = vld [vmem:[%s13432_s2 + $0x54] sm:$0xe] }
 0x3fe   : >> { %3965 = vrot.lane.b32.xlu1 %v3890_v45, %s16478_s25  ;;  %v3424_v40 = vrot.slane %v3422_v22, 1  ;;  %v3497_v26 = vrot.slane %v11079_v49, 1  ;;  %v3638_v22 = vshll.u32 %v10061_v16, 16  ;;  %v11083_v49 = vld [vmem:[%s13432_s2 + $0x48] sm:$0xf0] }
 0x3ff   : >> { %v3434_v17 = vshll.u32 %v13607_v12, 16 }
 0x400   : >> { %v3425_v44 = vsel %vm16553_vm10, %v3420_v36, %v3424_v40  ;;  %v3640_v47 = vrot.slane %v3638_v22, 1  ;;  %v4020_v40 = vsel %vm2017_vm15, %v4018_v63, %v4019_v55  ;;  %vm16556_vm10 = vmmov %vm16547_vm0  ;;  %vm4373_vm0 = vcmask 1043456  }
 0x401   : >> { %v3436_v60 = vrot.slane %v3434_v17, 1  ;;  %v3688_v22 = vrot.slane %v3686_v59, 1  ;;  %v3340_v63 = vunpack.c.l.b16 %v3204_v2  ;;  %v11107_v59 = vld [vmem:[%s13432_s2 + $0x60] sm:$0xf0] }
 0x403   : >> { %4029 = vrot.lane.b32.xlu2 %v4008_v27, %s16486_s29  ;;  %v3641_v27 = vor.u32 %v3640_v47, %v3636_v56  ;;  %v3437_v42 = vsel %vm16554_vm7, %v13525_v8, %v3436_v60  ;;  %v3510_v56 = vrot.slane %v13607_v12, 1  ;;  %v3689_v47 = vor.u32 %v3688_v22, %v3684_v38  ;;  %v10113_v12 = vld [vmem:[%s13432_s2 + $0x68] sm:$0x1]  ;;  %v11545_v60 = vld [vmem:[%s13432_s2 + $0x24] sm:$0xe] }
 0x404   : >> { %3829 = vrot.lane.b32.xlu0 %v13511_v28, %s16482_s6  ;;  %v3339_v28 = vunpack.c.l.b16 %v3203_v5  ;;  %v3754_v5 = vrot.slane %v3605_v6, 1  ;;  %v13661_v37 = vpack.c.b16 %v3340_v63, %v3340_v63 }
 0x406   : >> { %3525 = vrot.lane.b32.xlu1 %v3508_v23, %s16474_s7  ;;  %v3347_v51 = vpack.c.b16 %v3339_v28, %v3339_v28  ;;  %v3645_v23 = vrot.slane %v3643_v34, 1  ;;  %v11101_v28 = vld [vmem:[%s13432_s2 + $0x30] sm:$0xf0]  ;;  %v3755_v48 = vsel %vm2017_vm15, %v3753_v7, %v3754_v5 }
 0x408   : >> { %v3386_v57 = vshll.u32 %v3347_v51, 16  ;;  %v3498_v14 = vrot.slane %v3347_v51, 1  ;;  %v3646_v52 = vsel %vm16556_vm10, %v3641_v27, %v3645_v23  ;;  %vm16564_vm10 = vmmov %vm16554_vm7 }
 0x40a   : >> { %v3388_v41 = vrot.slane %v3386_v57, 1  ;;  %v3499_v61 = vsel %vm2017_vm15, %v3497_v26, %v3498_v14 }
 0x40b   : >> { %3581 = vrot.lane.b32.xlu2 %v13504_v10, %s16472_s3  ;;  %v3938_v10 = vsel %vm16554_vm7, %v3933_v58, %v3937_v46  ;;  %v13635_v46 = vpack.c.b16 %v3601_v33, %v3601_v33 }
 0x40c   : >> { %3460 = vrot.lane.b32.xlu0 %v3425_v44, %s16476_s0  ;;  %v3389_v45 = vsel %vm16555_vm8, %v13473_v3, %v3388_v41  ;;  %v13604_v3 = vld [vmem:[%s13432_s2 + $0x54] sm:$0xf0]  ;;  %vm16560_vm8 = vmmov %vm16554_vm7 }
 0x40d   : >> { %v3691_v6 = vshll.u32 %v13635_v46, 16  ;;  %v11543_v7 = vor.u32 %v11542_v62, %v13604_v3  ;;  %v13686_v3 = vld [vmem:[%s13432_s2 + $0x60] sm:$0xff]  }
 0x40e   : >> { %3781 = vrot.lane.b32.xlu1 %v3764_v15, %s16480_s30  ;;  %s16558_s30 = sld [smem:[#allocation16_spill]] }
 0x40f   : >> { %v3693_v34 = vrot.slane %v3691_v6, 1 }
 0x411   : >> { %v3694_v5 = vsel %vm16564_vm10, %v3689_v47, %v3693_v34  ;;  %v3501_v47 = vrot.slane %v13661_v37, 1  ;;  %vm4111_vm10 = vcmask 326656  }
 0x413   : >> { %3837 = vrot.lane.b32.xlu2 %v10101_v35, %s16482_s6  ;;  %v10109_v35 = vld [vmem:[%s13432_s2 + $0x38] sm:$0x1] }
 0x414   : >> { %3717 = vrot.lane.b32.xlu0 %v3682_v30, %s16484_s24  ;;  %v3853_v36 = vunpack.c.l.b16 %v10109_v35  ;;  %v4434_v51 = vld [vmem:[%s16558_s30 + $0x20] sm:$0xf]  ;;  %v11103_v30 = vor.u32 %v11102_v24, %v11101_v28  ;;  %v10738_v8 = vld [vmem:[%s16558_s30 + $0x18] sm:$0xff]  ;;  %v10737_v23 = vld [vmem:[%s16558_s30 + $0x10] sm:$0xff]  ;;  %v3398_v28 = vshll.u32 %v13661_v37, 16 }
 0x415   : >> { %v4456_v39 = vunpack.c.l.b16 %v4434_v51  ;;  %v10736_v33 = vld [vmem:[%s16558_s30 + $0x8] sm:$0xff]  ;;  %v3766_v51 = vrot.slane %v13635_v46, 1  ;;  %v11108_v46 = vld [vmem:[%s13432_s2 + $0x60] sm:$0xe]  ;;  %v13738_v37 = vld [vmem:[%s13432_s2 + $0x54] sm:$0xf0] }
 0x416   : >> { %3973 = vrot.lane.b32.xlu1 %v3938_v10, %s16478_s25  ;;  %v3861_v44 = vpack.c.b16 %v3853_v36, %v3853_v36  ;;  %v11084_v10 = vld [vmem:[%s13432_s2 + $0x48] sm:$0xe]  ;;  %v4009_v9 = vrot.slane %v11103_v30, 1  ;;  %v3393_v36 = vshll.u32 %v13625_v0, 16 }
 0x417   : >> { %v4461_v58 = vpack.c.b16 %v4456_v39, %v4456_v39  ;;  %v11085_v14 = vor.u32 %v11084_v10, %v11083_v49  ;;  %v3400_v39 = vrot.slane %v3398_v28, 1  ;;  %v10076_v49 = vld [vmem:[%s13432_s2 + $0x38] sm:$0x1] }
 0x418   : >> { %v3899_v19 = vshll.u32 %v3861_v44, 16  ;;  %v3395_v17 = vrot.slane %v3393_v36, 1 }
 0x419   : >> { %v4467_v41 = vsel %vm4373_vm0, %v4461_v58, 0 }
 0x41a   : >> { %v3901_v18 = vrot.slane %v3899_v19, 1  ;;  %4472 = vmatpush.bf16.msra.mxu1 %v4467_v41  ;;  %11265 = vmatpush.bf16.msra.mxu3 %v4467_v41  ;;  %v3942_v19 = vshll.u32 %v13686_v3, 16 }
 0x41b   : >> { %3519 = vrot.lane.b32.xlu2 %v3499_v61, %s16474_s7  ;;  %s16557_s7 = sld [smem:[#allocation14_spill]]  ;;  %v3509_v61 = vrot.slane %v11085_v14, 1  ;;  %v11547_v14 = vld [vmem:[%s13432_s2 + $0x3c] sm:$0xf0] }
 0x41c   : >> { %3454 = vrot.lane.b32.xlu0 %v3389_v45, %s16476_s0  ;;  %v4010_v45 = vrot.slane %v3861_v44, 1  ;;  %v3902_v26 = vsel %vm16560_vm8, %v13490_v43, %v3901_v18  ;;  %v3391_v44 = vshrl.u32 %v13625_v0, 16  ;;  %v3944_v41 = vrot.slane %v3942_v19, 1  ;;  %vm16569_vm8 = vmmov %vm16554_vm7 }
 0x41d   : >> { %v3511_v25 = vsel %vm2017_vm15, %v3509_v61, %v3510_v56  ;;  %v11090_v61 = vld [vmem:[%s13432_s2 + $0x30] sm:$0xe] }
 0x41e   : >> { %3575 = vrot.lane.b32.xlu1 %v10061_v16, %s16472_s3  ;;  %v13628_v16 = vld [vmem:[%s13432_s2 + $0x24] sm:$0xf0]  ;;  %v4011_v35 = vsel %vm2017_vm15, %v4009_v9, %v4010_v45  ;;  %4473 = vmatpush.bf16.msra.mxu1 %v10738_v8  ;;  %v11109_v45 = vor.u32 %v11108_v46, %v11107_v59 }
 0x41f   : >> { %11266 = vmatpush.bf16.msra.mxu3 %v10738_v8  ;;  %v11546_v38 = vor.u32 %v11545_v60, %v13628_v16  ;;  %v3208_v60 = vld [vmem:[%s13432_s2 + $0x5c] sm:$0x1] }
 0x420   : >> { %v4021_v63 = vrot.slane %v11109_v45, 1  ;;  %v11551_v45 = vld [vmem:[%s13432_s2 + $0x54] sm:$0xe] }
 0x421   : >> { %v4276_v29 = vld [vmem:[%s16557_s7 + $0x20] sm:$0xf]  ;;  %v10734_v55 = vld [vmem:[%s16557_s7 + $0x18] sm:$0xff]  ;;  %v10733_v27 = vld [vmem:[%s16557_s7 + $0x10] sm:$0xff]  ;;  %v3500_v56 = vrot.slane %v11546_v38, 1 }
 0x422   : >> { %v4338_v15 = vunpack.c.l.b16 %v4276_v29  ;;  %v13631_v57 = vpop.permute.xlu2 %3827  ;;  %4474 = vmatpush.bf16.msra.mxu1 %v10737_v23  ;;  %v10732_v24 = vld [vmem:[%s16557_s7 + $0x8] sm:$0xff]  ;;  %v3765_v29 = vrot.slane %v11543_v7, 1  ;;  %v10731_v30 = vld [vmem:[%s16557_s7] sm:$0xff]  ;;  %v11548_v7 = vld [vmem:[%s13432_s2 + $0x3c] sm:$0xe] }
 0x423   : >> { %3711 = vrot.lane.b32.xlu2 %v3646_v52, %s16484_s24  ;;  %s16561_s24 = smov 56   ;;  %11267 = vmatpush.bf16.msra.mxu3 %v10737_v23  ;;  %v3857_v52 = vunpack.c.l.b16 %v10113_v12  ;;  %v10110_v12 = vld [vmem:[%s13432_s2 + $0x44] sm:$0x1]  ;;  %v3502_v28 = vsel %vm2017_vm15, %v3500_v56, %v3501_v47 }
 0x424   : >> { %4037 = vrot.lane.b32.xlu0 %v4020_v40, %s16486_s29  ;;  %v4343_v53 = vpack.c.b16 %v4338_v15, %v4338_v15  ;;  %s16562_s29 = smov 8   ;;  %v3396_v15 = vor.u32 %v3395_v17, %v3391_v44  ;;  %v3767_v10 = vsel %vm2017_vm15, %v3765_v29, %v3766_v51  ;;  %v13735_v17 = vld [vmem:[%s13432_s2 + $0x54] sm:$0xff]  }
 0x425   : >> { %v3865_v18 = vpack.c.b16 %v3857_v52, %v3857_v52  ;;  %v3439_v56 = vshrl.u32 %v13735_v17, 16 }
 0x426   : >> { %3831 = vrot.lane.b32.xlu1 %v13469_v31, %s16482_s6  ;;  %v4375_v20 = vsel %vm4373_vm0, %v4343_v53, 0  ;;  %4475 = vmatpush.bf16.msra.mxu1 %v10736_v33  ;;  %v10735_v53 = vld [vmem:[%s16558_s30] sm:$0xff]  ;;  %v3401_v9 = vsel %vm16554_vm7, %v3396_v15, %v3400_v39  ;;  %s16568_s6 = smov 48   ;;  %vm4128_vm7 = vcmask 392192  }
 0x427   : >> { %4380 = vmatpush.bf16.msra.mxu0 %v4375_v20  ;;  %11260 = vmatpush.bf16.msra.mxu2 %v4375_v20  ;;  %v3940_v20 = vshrl.u32 %v13686_v3, 16  ;;  %v3947_v2 = vshll.u32 %v3865_v18, 16 }
 0x428   : >> { %11268 = vmatpush.bf16.msra.mxu3 %v10736_v33 }
 0x429   : >> { %v13716_v22 = vor.u32 %v3944_v41, %v3940_v20  ;;  %v3949_v6 = vrot.slane %v3947_v2, 1  ;;  %v3344_v41 = vunpack.c.l.b16 %v3208_v60 }
 0x42a   : >> { %4476 = vmatpush.bf16.msra.mxu1 %v10735_v53 }
 0x42b   : >> { %3967 = vrot.lane.b32.xlu2 %v3902_v26, %s16561_s24  ;;  %4381 = vmatpush.bf16.msra.mxu0 %v10734_v55  ;;  %v13713_v26 = vld [vmem:[%s13432_s2 + $0x3c] sm:$0xff]   ;;  %v3950_v34 = vsel %vm16569_vm8, %v13716_v22, %v3949_v6  ;;  %vm4145_vm8 = vcmask 457728  }
 0x42c   : >> { %3775 = vrot.lane.b32.xlu0 %v3755_v48, %s16559_s1  ;;  %11261 = vmatpush.bf16.msra.mxu2 %v10734_v55  ;;  %v4022_v55 = vrot.slane %v3865_v18, 1  ;;  %v3906_v39 = vshll.u32 %v13713_v26, 16  ;;  %v11549_v18 = vor.u32 %v11548_v7, %v11547_v14  ;;  %v13775_v7 = vld [vmem:[%s13432_s2 + $0x6c] sm:$0xf0] }
 0x42d   : >> { %v13664_v40 = vpop.permute.xlu2 %3771  ;;  %11269 = vmatpush.bf16.msra.mxu3 %v10735_v53 }
 0x42e   : >> { %3462 = vrot.lane.b32.xlu1 %v3437_v42, %s16562_s29  ;;  %v3908_v2 = vrot.slane %v3906_v39, 1  ;;  %v4012_v38 = vrot.slane %v11549_v18, 1  ;;  %v11554_v18 = vld [vmem:[%s13432_s2 + $0x6c] sm:$0xe] }
 0x42f   : >> { %4382 = vmatpush.bf16.msra.mxu0 %v10733_v27 }
 0x430   : >> { %11262 = vmatpush.bf16.msra.mxu2 %v10733_v27  ;;  %v4023_v27 = vsel %vm2017_vm15, %v4021_v63, %v4022_v55 }
 0x433   : >> { %3527 = vrot.lane.b32.xlu2 %v3511_v25, %s16565_s28  ;;  %4383 = vmatpush.bf16.msra.mxu0 %v10732_v24 }
 0x434   : >> { %4031 = vrot.lane.b32.xlu0 %v4011_v35, %s16563_s23  ;;  %11263 = vmatpush.bf16.msra.mxu2 %v10732_v24  ;;  %v11089_v35 = vld [vmem:[%s13432_s2 + $0x30] sm:$0xf0]  ;;  %v3854_v24 = vunpack.c.l.b16 %v10110_v12  ;;  %v11552_v12 = vor.u32 %v11551_v45, %v13738_v37 }
 0x435   : >> { %v13692_v48 = vpop.permute.xlu2 %3458  ;;  %v11091_v23 = vor.u32 %v11090_v61, %v11089_v35  ;;  %v10080_v61 = vld [vmem:[%s13432_s2 + $0x68] sm:$0x1] }
 0x436   : >> { %3719 = vrot.lane.b32.xlu1 %v3694_v5, %s16566_s4  ;;  %v3862_v53 = vpack.c.b16 %v3854_v24, %v3854_v24 }
 0x437   : >> { %v3572_v58 = vpop.permute.xlu1 %3571  ;;  %4384 = vmatpush.bf16.msra.mxu0 %v10731_v30  ;;  %v3756_v33 = vrot.slane %v11091_v23, 1  ;;  %v3602_v23 = vunpack.c.l.b16 %v10080_v61 }
 0x438   : >> { %11264 = vmatpush.bf16.msra.mxu2 %v10731_v30  ;;  %v4013_v14 = vrot.slane %v3862_v53, 1 }
 0x43b   : >> { %3783 = vrot.lane.b32.xlu2 %v3767_v10, %s16559_s1 }
 0x43c   : >> { %3583 = vrot.lane.b32.xlu0 %v13601_v4, %s16567_s22  ;;  %v3598_v4 = vunpack.c.l.b16 %v10076_v49 }
 0x43d   : >> { %v13718_v8 = vpop.permute.xlu2 %3715 }
 0x43e   : >> { %v3516_v42 = vpop.permute.xlu0 %3515  ;;  %3456 = vrot.lane.b32.xlu1 %v3401_v9, %s16562_s29  ;;  %v3606_v16 = vpack.c.b16 %v3598_v4, %v3598_v4  ;;  %v3911_v9 = vshll.u32 %v3862_v53, 16  ;;  %v3441_v4 = vshll.u32 %v13735_v17, 16 }
 0x440   : >> { %v4028_v62 = vpop.permute.xlu1 %4027  ;;  %v3655_v44 = vshll.u32 %v3606_v16, 16  ;;  %v3757_v52 = vrot.slane %v3606_v16, 1  ;;  %v3913_v16 = vrot.slane %v3911_v9, 1  ;;  %v3443_v47 = vrot.slane %v3441_v4, 1 }
 0x442   : >> { %v3657_v15 = vrot.slane %v3655_v44, 1  ;;  %v3758_v46 = vsel %vm2017_vm15, %v3756_v33, %v3757_v52  ;;  %v3610_v52 = vpack.c.b16 %v3602_v23, %v3602_v23 }
 0x443   : >> { %3975 = vrot.lane.b32.xlu2 %v3950_v34, %s16561_s24 }
 0x444   : >> { %3839 = vrot.lane.b32.xlu0 %v13686_v3, %s16568_s6  ;;  %v3658_v10 = vsel %vm16570_vm2, %v13490_v43, %v3657_v15  ;;  %v11096_v15 = vld [vmem:[%s13432_s2 + $0x60] sm:$0xe]  ;;  %v3703_v60 = vshll.u32 %v3610_v52, 16  ;;  %v3769_v9 = vrot.slane %v3610_v52, 1 }
 0x446   : >> { %v3451_v36 = vpop.permute.xlu0 %3450  ;;  %4039 = vrot.lane.b32.xlu1 %v4023_v27, %s16563_s23  ;;  %v4014_v27 = vsel %vm2017_vm15, %v4012_v38, %v4013_v14 }
 0x447   : >> { %v4045_v25 = vsel %vm2587_vm9, %v13445_v21, %v3451_v36  ;;  %v13742_v21 = vpop.permute.xlu2 %3452 }
 0x448   : >> { %v4062_v5 = vsel %vm2621_vm11, %v4045_v25, %v3516_v42  ;;  %v3708_v19 = vpop.permute.xlu1 %3707  ;;  %v10105_v25 = vld [vmem:[%s13432_s2 + $0x6c] sm:$0xff]  }
 0x449   : >> { %v4079_v29 = vsel %vm2655_vm6, %v4062_v5, %v3572_v58  ;;  %v4053_v5 = vsel %vm2587_vm9, %v13469_v31, %v13692_v48  ;;  %v3952_v4 = vshrl.u32 %v10105_v25, 16 }
 0x44a   : >> { %v4096_v51 = vsel %vm16494_vm4, %v4079_v29, %v3708_v19 }
 0x44b   : >> { %v4113_v30 = vsel %vm4111_vm10, %v4096_v51, %v13664_v40  ;;  %v3904_v40 = vshrl.u32 %v13713_v26, 16  ;;  %3577 = vrot.lane.b32.xlu2 %v13469_v31, %s16567_s22  ;;  %v10114_v31 = vld [vmem:[%s13432_s2 + $0x74] sm:$0x1]  ;;  %v11095_v51 = vld [vmem:[%s13432_s2 + $0x60] sm:$0xf0] }
 0x44c   : >> { %3521 = vrot.lane.b32.xlu0 %v3502_v28, %s16565_s28  ;;  %v4130_v59 = vsel %vm4128_vm7, %v4113_v30, %v13631_v57  ;;  %v3444_v28 = vor.u32 %v3443_v47, %v3439_v56 }
 0x44d   : >> { %v3909_v35 = vor.u32 %v3908_v2, %v3904_v40 }
 0x44e   : >> { %v3964_v58 = vpop.permute.xlu0 %3963  ;;  %3777 = vrot.lane.b32.xlu1 %v3758_v46, %s16559_s1 }
 0x44f   : >> { %v4147_v20 = vsel %vm4145_vm8, %v4130_v59, %v3964_v58  ;;  %v13764_v6 = vpop.permute.xlu2 %4035  ;;  %v3914_v44 = vsel %vm16570_vm2, %v3909_v35, %v3913_v16  ;;  %v3858_v59 = vunpack.c.l.b16 %v10114_v31  ;;  %v11097_v58 = vor.u32 %v11096_v15, %v11095_v51 }
 0x450   : >> { %v4164_v49 = vsel %vm4162_vm5, %v4147_v20, %v4028_v62  ;;  %v3580_v55 = vpop.permute.xlu1 %3579  ;;  %v3352_v62 = vpack.c.b16 %v3344_v41, %v3344_v41  ;;  %v3705_v20 = vrot.slane %v3703_v60, 1  ;;  %v3954_v41 = vshll.u32 %v10105_v25, 16 }
 0x451   : >> { %v4187_v42 = vunpack.c.l.b16 %v4164_v49  ;;  %v4188_v57 = vunpack.c.h.b16 %v4164_v49 }
 0x452   : >> { %v3446_v34 = vshll.u32 %v3352_v62, 16  ;;  %v3513_v29 = vrot.slane %v3352_v62, 1  ;;  %v3706_v45 = vsel %vm16570_vm2, %v13716_v22, %v3705_v20  ;;  %v11555_v62 = vor.u32 %v11554_v18, %v13775_v7 }
 0x453   : >> { %v4203_v43 = vpack.c.b16 %v4187_v42, %v4187_v42  ;;  %v4204_v63 = vpack.c.b16 %v4188_v57, %v4188_v57  ;;  %3833 = vrot.lane.b32.xlu2 %v13713_v26, %s16568_s6  ;;  %v3512_v26 = vrot.slane %v11552_v12, 1  ;;  %v3866_v42 = vpack.c.b16 %v3858_v59, %v3858_v59 }
 0x454   : >> { %3713 = vrot.lane.b32.xlu0 %v3658_v10, %s16566_s4  ;;  %v3448_v24 = vrot.slane %v3446_v34, 1  ;;  %v3768_v57 = vrot.slane %v11097_v58, 1 }
 0x455   : >> { %4236 = vst.msk [vmem:[#allocation6] sm:$0xf] %vm4235_vm14, %v4203_v43  ;;  %v3514_v46 = vsel %vm2017_vm15, %v3512_v26, %v3513_v29  ;;  %v3959_v38 = vshll.u32 %v3866_v42, 16 }
 0x456   : >> { %4237 = vst.msk [vmem:[#allocation6 + $0x4] sm:$0xf] %vm4235_vm14, %v4204_v63  ;;  %v3524_v36 = vpop.permute.xlu0 %3523  ;;  %4033 = vrot.lane.b32.xlu1 %v4014_v27, %s16563_s23  ;;  %v3449_v39 = vsel %vm16570_vm2, %v3444_v28, %v3448_v24  ;;  %v4025_v27 = vrot.slane %v3866_v42, 1 }
 0x457   : >> { %v13784_v37 = vpop.permute.xlu2 %3773  ;;  %v4070_v19 = vsel %vm2621_vm11, %v4053_v5, %v3524_v36  ;;  %v3961_v16 = vrot.slane %v3959_v38, 1  ;;  %v4047_v36 = vsel %vm2587_vm9, %v13482_v32, %v13742_v21 }
 0x458   : >> { %v3836_v33 = vpop.permute.xlu1 %3835  ;;  %v4087_v53 = vsel %vm2655_vm6, %v4070_v19, %v3580_v55  ;;  %v3770_v55 = vsel %vm2017_vm15, %v3768_v57, %v3769_v9 }
 0x459   : >> { %v4104_v49 = vsel %vm16494_vm4, %v4087_v53, %v13718_v8 }
 0x45b   : >> { %3464 = vrot.lane.b32.xlu2 %v3449_v39, %s16562_s29  ;;  %s16572_s29 = smul.u32 96, %s11706_s5  ;;  %s3180_s5 = sadd.s32 1, %s11706_s5  }
 0x45c   : >> { %3969 = vrot.lane.b32.xlu0 %v3914_v44, %s16561_s24  ;;  %p3177_p6 = scmp.ge.s32.totalorder %s3180_s5, 2  }
 0x45d   : >> { %v10723_v48 = vld [vmem:[#allocation6] sm:$0xff]  ;;  %s11740_s5 = smov (%p3177_p6), 12  }
 0x45e   : >> { %v3780_v30 = vpop.permute.xlu0 %3779  ;;  %10171 = vmatmul.msk.bf16.vlgmr.msra.gmra.mxu0 %vm4348_vm13, %v10723_v48  ;;  %10195 = vmatmul.msk.bf16.vlgmr.msra.gmra.mxu1 %vm4348_vm13, %v10723_v48 }
 0x45f   : >> { %3585 = vrot.lane.b32.xlu1 %v13686_v3, %s16567_s22  ;;  %v4121_v10 = vsel %vm4111_vm10, %v4104_v49, %v3780_v30  ;;  %v4030_v2 = vpop.permute.xlu2 %4029  ;;  %v3956_v3 = vrot.slane %v3954_v41, 1  ;;  %s11741_s22 = smov (%p3177_p6), 4  }
 0x460   : >> { %v3518_v40 = vpop.permute.xlu1 %3517  ;;  %v4138_v14 = vsel %vm4128_vm7, %v4121_v10, %v3836_v33 }
 0x461   : >> { %v3957_v22 = vor.u32 %v3956_v3, %v3952_v4  ;;  %v4064_v7 = vsel %vm2621_vm11, %v4047_v36, %v3518_v40  ;;  %v11440_v4 = vld [vmem:[%s13432_s2 + $0x18] sm:$0xff]  }
 0x463   : >> { %3721 = vrot.lane.b32.xlu2 %v3706_v45, %s16566_s4  ;;  %v3962_v12 = vsel %vm16570_vm2, %v3957_v22, %v3961_v16  ;;  %s16571_s4 = sld [smem:[#allocation15_spill]] }
 0x464   : >> { %3529 = vrot.lane.b32.xlu0 %v3514_v46, %s16565_s28  ;;  %s11744_s28 = smov (%p3177_p6), 8  }
 0x466   : >> { %v3972_v43 = vpop.permute.xlu0 %3971 }
 0x467   : >> { %v4155_v8 = vsel %vm4145_vm8, %v4138_v14, %v3972_v43  ;;  %3841 = vrot.lane.b32.xlu1 %v10105_v25, %s16568_s6  ;;  %v3582_v23 = vpop.permute.xlu2 %3581  ;;  %s11739_s6 = smov (%p3177_p6), 20  }
 0x468   : >> { %v4172_v63 = vsel %vm4162_vm5, %v4155_v8, %v13764_v6  ;;  %v3710_v34 = vpop.permute.xlu1 %3709  ;;  %v4024_v6 = vrot.slane %v11555_v62, 1 }
 0x469   : >> { %v4195_v35 = vunpack.c.l.b16 %v4172_v63  ;;  %v4196_v61 = vunpack.c.h.b16 %v4172_v63 }
 0x46a   : >> { %v4026_v32 = vsel %vm2017_vm15, %v4024_v6, %v4025_v27 }
 0x46b   : >> { %v4211_v56 = vpack.c.b16 %v4195_v35, %v4195_v35  ;;  %v4212_v47 = vpack.c.b16 %v4196_v61, %v4196_v61  ;;  %3977 = vrot.lane.b32.xlu2 %v3962_v12, %s16561_s24  ;;  %s13913_s24 = scalar_lea.vmem [#allocation2], %s16572_s29  ;;  %s11746_s29 = smov (%p3177_p6), 28  }
 0x46c   : >> { %3785 = vrot.lane.b32.xlu0 %v3770_v55, %s16559_s1 }
 0x46d   : >> { %4244 = vst.msk [vmem:[#allocation6 + $0x20] sm:$0xf] %vm4235_vm14, %v4211_v56 }
 0x46e   : >> { %4245 = vst.msk [vmem:[#allocation6 + $0x24] sm:$0xf] %vm4235_vm14, %v4212_v47  ;;  %v3574_v25 = vpop.permute.xlu0 %3573 }
 0x46f   : >> { %v4081_v5 = vsel %vm2655_vm6, %v4064_v7, %v3574_v25  ;;  %v3838_v19 = vpop.permute.xlu2 %3837 }
 0x470   : >> { %v4098_v21 = vsel %vm16494_vm4, %v4081_v5, %v3710_v34  ;;  %v3966_v44 = vpop.permute.xlu1 %3965 }
 0x471   : >> { %v4115_v24 = vsel %vm4111_vm10, %v4098_v21, %v13784_v37 }
 0x474   : >> { %4041 = vrot.lane.b32.xlu0 %v4026_v32, %s16563_s23  ;;  %v11441_v32 = vld [vmem:[%s13432_s2 + $0x48] sm:$0xff]   ;;  %s11742_s23 = smov (%p3177_p6), 24   ;;  %s11745_s2 = smov (%p3177_p6), 32  }
 0x475   : >> { %v10727_v28 = vld [vmem:[#allocation6 + $0x20] sm:$0xff] }
 0x476   : >> { %v3830_v33 = vpop.permute.xlu0 %3829  ;;  %10175 = vmatmul.msk.bf16.vlgmr.msra.gmra.mxu2 %vm4348_vm13, %v10727_v28  ;;  %10199 = vmatmul.msk.bf16.vlgmr.msra.gmra.mxu3 %vm4348_vm13, %v10727_v28 }
 0x477   : >> { %v4132_v52 = vsel %vm4128_vm7, %v4115_v24, %v3830_v33  ;;  %v3520_v60 = vpop.permute.xlu2 %3519 }
 0x478   : >> { %v4149_v26 = vsel %vm4145_vm8, %v4132_v52, %v3966_v44  ;;  %v3526_v51 = vpop.permute.xlu1 %3525 }
 0x479   : >> { %v4166_v29 = vsel %vm4162_vm5, %v4149_v26, %v4030_v2 }
 0x47a   : >> { %v4189_v31 = vunpack.c.l.b16 %v4166_v29  ;;  %v4190_v48 = vunpack.c.h.b16 %v4166_v29 }
 0x47c   : >> { %v4205_v15 = vpack.c.b16 %v4189_v31, %v4189_v31  ;;  %v4206_v39 = vpack.c.b16 %v4190_v48, %v4190_v48 }
 0x47e   : >> { %4238 = vst.msk [vmem:[#allocation6 + $0x8] sm:$0xf] %vm4235_vm14, %v4205_v15  ;;  %v3461_v37 = vpop.permute.xlu0 %3460 }
 0x47f   : >> { %4239 = vst.msk [vmem:[#allocation6 + $0xc] sm:$0xf] %vm4235_vm14, %v4206_v39  ;;  %v4055_v58 = vsel %vm2587_vm9, %v13535_v54, %v3461_v37  ;;  %v3712_v20 = vpop.permute.xlu2 %3711 }
 0x480   : >> { %v3782_v30 = vpop.permute.xlu1 %3781  ;;  %v4072_v46 = vsel %vm2621_vm11, %v4055_v58, %v3526_v51 }
 0x481   : >> { %v4089_v41 = vsel %vm2655_vm6, %v4072_v46, %v3582_v23 }
 0x486   : >> { %v3718_v53 = vpop.permute.xlu0 %3717  ;;  %v10724_v59 = vld [vmem:[#allocation6 + $0x8] sm:$0xff] }
 0x487   : >> { %10172 = vmatmul.msk.bf16.gmra.mxu0 %vm4348_vm13, %v10724_v59  ;;  %10196 = vmatmul.msk.bf16.gmra.mxu1 %vm4348_vm13, %v10724_v59  ;;  %v4106_v10 = vsel %vm16494_vm4, %v4089_v41, %v3718_v53  ;;  %v3968_v42 = vpop.permute.xlu2 %3967 }
 0x488   : >> { %v3974_v18 = vpop.permute.xlu1 %3973  ;;  %v4123_v40 = vsel %vm4111_vm10, %v4106_v10, %v3782_v30 }
 0x489   : >> { %v4140_v54 = vsel %vm4128_vm7, %v4123_v40, %v3838_v19 }
 0x48a   : >> { %v4157_v57 = vsel %vm4145_vm8, %v4140_v54, %v3974_v18 }
 0x48e   : >> { %v3455_v49 = vpop.permute.xlu0 %3454 }
 0x48f   : >> { %v4049_v3 = vsel %vm2587_vm9, %v11440_v4, %v3455_v49  ;;  %v3528_v35 = vpop.permute.xlu2 %3527 }
 0x490   : >> { %v3576_v2 = vpop.permute.xlu1 %3575  ;;  %v4066_v63 = vsel %vm2621_vm11, %v4049_v3, %v3520_v60 }
 0x491   : >> { %v4083_v62 = vsel %vm2655_vm6, %v4066_v63, %v3576_v2 }
 0x492   : >> { %v4100_v22 = vsel %vm16494_vm4, %v4083_v62, %v3712_v20 }
 0x496   : >> { %v4038_v9 = vpop.permute.xlu0 %4037 }
 0x497   : >> { %v4174_v45 = vsel %vm4162_vm5, %v4157_v57, %v4038_v9  ;;  %v3784_v23 = vpop.permute.xlu2 %3783 }
 0x498   : >> { %v4197_v38 = vunpack.c.l.b16 %v4174_v45  ;;  %v4198_v14 = vunpack.c.h.b16 %v4174_v45  ;;  %v3832_v55 = vpop.permute.xlu1 %3831 }
 0x49a   : >> { %v4213_v43 = vpack.c.b16 %v4197_v38, %v4197_v38  ;;  %v4214_v8 = vpack.c.b16 %v4198_v14, %v4198_v14 }
 0x49c   : >> { %4246 = vst.msk [vmem:[#allocation6 + $0x28] sm:$0xf] %vm4235_vm14, %v4213_v43 }
 0x49d   : >> { %4247 = vst.msk [vmem:[#allocation6 + $0x2c] sm:$0xf] %vm4235_vm14, %v4214_v8 }
 0x49e   : >> { %v3776_v61 = vpop.permute.xlu0 %3775 }
 0x49f   : >> { %v4117_v16 = vsel %vm4111_vm10, %v4100_v22, %v3776_v61  ;;  %v3976_v52 = vpop.permute.xlu2 %3975  ;;  %v13894_v22 = vld [vmem:[%s16571_s4] ss:$0 sm:$0xff]  ;;  %s11743_s4 = smov (%p3177_p6), 16  }
 0x4a0   : >> { %v4134_v56 = vsel %vm4128_vm7, %v4117_v16, %v3832_v55  ;;  %v3463_v47 = vpop.permute.xlu1 %3462  ;;  %v13899_v16 = vld [vmem:[%s16442_s8] ss:$0 sm:$0xff] }
 0x4a1   : >> { %v4151_v36 = vsel %vm4145_vm8, %v4134_v56, %v3968_v42  ;;  %v4057_v21 = vsel %vm2587_vm9, %v11441_v32, %v3463_v47 }
 0x4a2   : >> { %v4074_v28 = vsel %vm2621_vm11, %v4057_v21, %v3528_v35 }
 0x4a4   : >> { %v10728_v34 = vld [vmem:[#allocation6 + $0x28] sm:$0xff] }
 0x4a5   : >> { %10176 = vmatmul.msk.bf16.gmra.mxu2 %vm4348_vm13, %v10728_v34  ;;  %10200 = vmatmul.msk.bf16.gmra.mxu3 %vm4348_vm13, %v10728_v34 }
 0x4a6   : >> { %v4032_v6 = vpop.permute.xlu0 %4031 }
 0x4a7   : >> { %v4168_v27 = vsel %vm4162_vm5, %v4151_v36, %v4032_v6  ;;  %v3578_v37 = vpop.permute.xlu2 %3577 }
 0x4a8   : >> { %v4191_v12 = vunpack.c.l.b16 %v4168_v27  ;;  %v4192_v25 = vunpack.c.h.b16 %v4168_v27  ;;  %v3720_v44 = vpop.permute.xlu1 %3719 }
 0x4aa   : >> { %v4207_v7 = vpack.c.b16 %v4191_v12, %v4191_v12  ;;  %v4208_v5 = vpack.c.b16 %v4192_v25, %v4192_v25 }
 0x4ac   : >> { %4240 = vst.msk [vmem:[#allocation6 + $0x10] sm:$0xf] %vm4235_vm14, %v4207_v7 }
 0x4ad   : >> { %4241 = vst.msk [vmem:[#allocation6 + $0x14] sm:$0xf] %vm4235_vm14, %v4208_v5 }
 0x4ae   : >> { %v3584_v24 = vpop.permute.xlu0 %3583 }
 0x4af   : >> { %v4091_v33 = vsel %vm2655_vm6, %v4074_v28, %v3584_v24  ;;  %v3834_v49 = vpop.permute.xlu2 %3833 }
 0x4b0   : >> { %v3457_v19 = vpop.permute.xlu1 %3456  ;;  %v4108_v26 = vsel %vm16494_vm4, %v4091_v33, %v3720_v44 }
 0x4b1   : >> { %v4125_v48 = vsel %vm4111_vm10, %v4108_v26, %v3784_v23  ;;  %v4051_v18 = vsel %vm2587_vm9, %v13625_v0, %v3457_v19 }
 0x4b4   : >> { %v10725_v29 = vld [vmem:[#allocation6 + $0x10] sm:$0xff] }
 0x4b5   : >> { %10173 = vmatmul.msk.bf16.gmra.mxu0 %vm4348_vm13, %v10725_v29  ;;  %10197 = vmatmul.msk.bf16.gmra.mxu1 %vm4348_vm13, %v10725_v29  ;;  %v10205_v29 = vld [vmem:[%s13913_s24 + $0xc] sm:$0xf] }
 0x4b6   : >> { %v3840_v31 = vpop.permute.xlu0 %3839 }
 0x4b7   : >> { %v4142_v51 = vsel %vm4128_vm7, %v4125_v48, %v3840_v31  ;;  %v3465_v4 = vpop.permute.xlu2 %3464 }
 0x4b8   : >> { %v4159_v15 = vsel %vm4145_vm8, %v4142_v51, %v3976_v52  ;;  %v4040_v39 = vpop.permute.xlu1 %4039  ;;  %v4059_v63 = vsel %vm2587_vm9, %v13735_v17, %v3465_v4 }
 0x4b9   : >> { %v4176_v60 = vsel %vm4162_vm5, %v4159_v15, %v4040_v39 }
 0x4ba   : >> { %v4199_v30 = vunpack.c.l.b16 %v4176_v60  ;;  %v4200_v53 = vunpack.c.h.b16 %v4176_v60 }
 0x4bc   : >> { %v4215_v58 = vpack.c.b16 %v4199_v30, %v4199_v30  ;;  %v4216_v46 = vpack.c.b16 %v4200_v53, %v4200_v53 }
 0x4be   : >> { %v3522_v59 = vpop.permute.xlu0 %3521  ;;  %4248 = vst.msk [vmem:[#allocation6 + $0x30] sm:$0xf] %vm4235_vm14, %v4215_v58 }
 0x4bf   : >> { %4249 = vst.msk [vmem:[#allocation6 + $0x34] sm:$0xf] %vm4235_vm14, %v4216_v46  ;;  %v4068_v41 = vsel %vm2621_vm11, %v4051_v18, %v3522_v59  ;;  %v3722_v61 = vpop.permute.xlu2 %3721 }
 0x4c0   : >> { %v3778_v20 = vpop.permute.xlu1 %3777  ;;  %v4085_v40 = vsel %vm2655_vm6, %v4068_v41, %v3578_v37 }
 0x4c6   : >> { %v3714_v10 = vpop.permute.xlu0 %3713  ;;  %v10729_v42 = vld [vmem:[#allocation6 + $0x30] sm:$0xff] }
 0x4c7   : >> { %v4102_v2 = vsel %vm16494_vm4, %v4085_v40, %v3714_v10  ;;  %10177 = vmatmul.msk.bf16.gmra.mxu2 %vm4348_vm13, %v10729_v42  ;;  %10201 = vmatmul.msk.bf16.gmra.mxu3 %vm4348_vm13, %v10729_v42  ;;  %v3978_v44 = vpop.permute.xlu2 %3977  ;;  %v10208_v40 = vld [vmem:[%s13913_s24 + $0x14] sm:$0x1] }
 0x4c8   : >> { %v4119_v54 = vsel %vm4111_vm10, %v4102_v2, %v3778_v20  ;;  %v4034_v0 = vpop.permute.xlu1 %4033 }
 0x4c9   : >> { %v4136_v57 = vsel %vm4128_vm7, %v4119_v54, %v3834_v49 }
 0x4ce   : >> { %v3970_v9 = vpop.permute.xlu0 %3969 }
 0x4cf   : >> { %v4153_v45 = vsel %vm4145_vm8, %v4136_v57, %v3970_v9 }
 0x4d0   : >> { %v4170_v3 = vsel %vm4162_vm5, %v4153_v45, %v4034_v0 }
 0x4d1   : >> { %v4193_v38 = vunpack.c.l.b16 %v4170_v3  ;;  %v4194_v14 = vunpack.c.h.b16 %v4170_v3  ;;  %v3586_v62 = vpop.permute.xlu1 %3585 }
 0x4d3   : >> { %v4209_v43 = vpack.c.b16 %v4193_v38, %v4193_v38  ;;  %v4210_v8 = vpack.c.b16 %v4194_v14, %v4194_v14 }
 0x4d5   : >> { %4242 = vst.msk [vmem:[#allocation6 + $0x18] sm:$0xf] %vm4235_vm14, %v4209_v43 }
 0x4d6   : >> { %4243 = vst.msk [vmem:[#allocation6 + $0x1c] sm:$0xf] %vm4235_vm14, %v4210_v8  ;;  %v3530_v55 = vpop.permute.xlu0 %3529 }
 0x4d7   : >> { %v4076_v35 = vsel %vm2621_vm11, %v4059_v63, %v3530_v55 }
 0x4d8   : >> { %v4093_v56 = vsel %vm2655_vm6, %v4076_v35, %v3586_v62 }
 0x4d9   : >> { %v4110_v23 = vsel %vm16494_vm4, %v4093_v56, %v3722_v61  ;;  %v3842_v7 = vpop.permute.xlu1 %3841 }
 0x4db   : >> { %v4386_v47 = vpop.f32.mrf.mxu0  ;;  %v4478_v34 = vpop.f32.mrf.mxu1 }
 0x4dc   : >> { %v4387_v17 = vadd.f32 %v13894_v22, %v4386_v47  ;;  %v4479_v36 = vadd.f32 %v13899_v16, %v4478_v34  ;;  %v10225_v47 = vld [vmem:[%s13913_s24 + $0x3c] sm:$0xf] }
 0x4dd   : >> { %v10726_v6 = vld [vmem:[#allocation6 + $0x18] sm:$0xff] }
 0x4de   : >> { %v3786_v27 = vpop.permute.xlu0 %3785  ;;  %v4518_v12 = vmul.f32 %v4479_v36, %v4387_v17  ;;  %10174 = vmatmul.msk.bf16.gmra.mxu0 %vm4348_vm13, %v10726_v6  ;;  %10198 = vmatmul.msk.bf16.gmra.mxu1 %vm4348_vm13, %v10726_v6 }
 0x4df   : >> { %v4127_v25 = vsel %vm4111_vm10, %v4110_v23, %v3786_v27  ;;  %vm16573_vm10 = vcmask 31744  }
 0x4e0   : >> { %v4575_v5 = vpack.c.bf16 %v4518_v12, %v4518_v12  ;;  %v4144_v21 = vsel %vm4128_vm7, %v4127_v25, %v3842_v7  ;;  %v4536_v30 = vsel %vm16573_vm10, %v4518_v12, 0.0  ;;  %vm16574_vm7 = vmmov %vm16573_vm10 }
 0x4e1   : >> { %v4161_v31 = vsel %vm4145_vm8, %v4144_v21, %v3978_v44  ;;  %vm16578_vm8 = vmmov %vm16574_vm7 }
 0x4e2   : >> { %v4594_v32 = vshrl.u32 %v4575_v5, 16  ;;  %v4597_v52 = vshll.u32 %v4575_v5, 16 }
 0x4e3   : >> { %v4388_v28 = vpop.f32.mrf.mxu0  ;;  %v4480_v24 = vpop.f32.mrf.mxu1 }
 0x4e4   : >> { %v4596_v33 = vrot.slane %v4594_v32, 7  ;;  %v4389_v19 = vadd.f32 %v13894_v22, %v4388_v28  ;;  %v4481_v26 = vadd.f32 %v13899_v16, %v4480_v24 }
 0x4e6   : >> { %v4042_v48 = vpop.permute.xlu0 %4041  ;;  %v4599_v51 = vor.u32 %v4597_v52, %v4596_v33  ;;  %v4519_v15 = vmul.f32 %v4481_v26, %v4389_v19  ;;  %v4600_v2 = vrot.slane %v4596_v33, 4  ;;  %v10228_v33 = vld [vmem:[%s13913_s24 + $0x44] sm:$0x1] }
 0x4e7   : >> { %v4178_v39 = vsel %vm4162_vm5, %v4161_v31, %v4042_v48  ;;  %vm16575_vm5 = vcmask 27648  }
 0x4e8   : >> { %v4201_v37 = vunpack.c.l.b16 %v4178_v39  ;;  %v4202_v60 = vunpack.c.h.b16 %v4178_v39  ;;  %v4758_v53 = vsel %vm12459_vm12, %v4599_v51, %v10205_v29  ;;  %v4537_v59 = vsel %vm16574_vm7, %v4519_v15, 0.0  ;;  %vm16579_vm2 = vmmov %vm16575_vm5 }
 0x4e9   : >> { %v4576_v58 = vpack.c.bf16 %v4519_v15, %v4519_v15  ;;  %10206 = vst [vmem:[%s13913_s24 + $0xc] sm:$0xf] %v4758_v53  ;;  %v4538_v46 = vadd.f32 %v4537_v59, %v4536_v30  ;;  %v10210_v53 = vld [vmem:[%s13913_s24 + $0x18] sm:$0xf]  ;;  %vm16580_vm10 = vmmov %vm16579_vm2 }
 0x4ea   : >> { %v4217_v18 = vpack.c.b16 %v4201_v37, %v4201_v37  ;;  %v4218_v20 = vpack.c.b16 %v4202_v60, %v4202_v60 }
 0x4eb   : >> { %v4602_v41 = vshrl.u32 %v4576_v58, 16  ;;  %v4605_v10 = vshll.u32 %v4576_v58, 16 }
 0x4ec   : >> { %4250 = vst.msk [vmem:[#allocation6 + $0x38] sm:$0xf] %vm4235_vm14, %v4217_v18 }
 0x4ed   : >> { %v4604_v49 = vrot.slane %v4602_v41, 7  ;;  %4251 = vst.msk [vmem:[#allocation6 + $0x3c] sm:$0xf] %vm4235_vm14, %v4218_v20  ;;  %vm16577_vm14 = vmmov %vm16575_vm5 }
 0x4ef   : >> { %v4607_v42 = vor.u32 %v4605_v10, %v4604_v49  ;;  %v4609_v54 = vrot.slane %v4604_v49, 4 }
 0x4f1   : >> { %v4608_v0 = vsel %vm12515_vm1, %v4600_v2, %v4607_v42  ;;  %v4762_v57 = vsel %vm11925_vm3, %v4609_v54, %v10208_v40  ;;  %v10213_v2 = vld [vmem:[%s13913_s24 + $0x20] sm:$0x1] }
 0x4f2   : >> { %10207 = vst.msk [vmem:[%s13913_s24 + $0x10] sm:$0xf] %vm16575_vm5, %v4608_v0  ;;  %vm16582_vm5 = vmmov %vm16578_vm8 }
 0x4f3   : >> { %10209 = vst [vmem:[%s13913_s24 + $0x14] sm:$0x1] %v4762_v57 }
 0x4f4   : >> { %v10730_v9 = vld [vmem:[#allocation6 + $0x38] sm:$0xff] }
 0x4f5   : >> { %10178 = vmatmul.msk.bf16.gmra.mxu2 %vm4348_vm13, %v10730_v9  ;;  %10202 = vmatmul.msk.bf16.gmra.mxu3 %vm4348_vm13, %v10730_v9  ;;  %vm16576_vm13 = vmmov %vm16574_vm7 }
 0x4f6   : >> { %vm16581_vm7 = vmmov %vm16579_vm2 }
 0x4f9   : >> { %v4406_v45 = vpop.f32.mrf.mxu2  ;;  %v4498_v4 = vpop.f32.mrf.mxu3 }
 0x4fa   : >> { %v4407_v3 = vadd.f32 %v13894_v22, %v4406_v45  ;;  %v4499_v38 = vadd.f32 %v13899_v16, %v4498_v4 }
 0x4fc   : >> { %v13937_v14 = vmul.f32 %v4499_v38, %v4407_v3 }
 0x4fe   : >> { %v4583_v43 = vpack.c.bf16 %v13937_v14, %v13937_v14 }
 0x500   : >> { %v4662_v8 = vshrl.u32 %v4583_v43, 16  ;;  %v4665_v35 = vshll.u32 %v4583_v43, 16 }
 0x501   : >> { %v4408_v63 = vpop.f32.mrf.mxu2  ;;  %v4500_v55 = vpop.f32.mrf.mxu3 }
 0x502   : >> { %v4664_v62 = vrot.slane %v4662_v8, 7  ;;  %v4409_v61 = vadd.f32 %v13894_v22, %v4408_v63  ;;  %v4501_v56 = vadd.f32 %v13899_v16, %v4500_v55 }
 0x504   : >> { %v4667_v34 = vor.u32 %v4665_v35, %v4664_v62  ;;  %v13944_v17 = vmul.f32 %v4501_v56, %v4409_v61  ;;  %v4391_v36 = vpop.f32.mrf.mxu0  ;;  %v4483_v6 = vpop.f32.mrf.mxu1  ;;  %v4668_v19 = vrot.slane %v4664_v62, 4 }
 0x505   : >> { %v4392_v27 = vadd.f32 %v13894_v22, %v4391_v36  ;;  %v4484_v23 = vadd.f32 %v13899_v16, %v4483_v6 }
 0x506   : >> { %v4786_v12 = vsel %vm12459_vm12, %v4667_v34, %v10225_v47  ;;  %v4584_v25 = vpack.c.bf16 %v13944_v17, %v13944_v17  ;;  %v10230_v34 = vld [vmem:[%s13913_s24 + $0x48] sm:$0xf] }
 0x507   : >> { %10226 = vst [vmem:[%s13913_s24 + $0x3c] sm:$0xf] %v4786_v12  ;;  %v4520_v7 = vmul.f32 %v4484_v23, %v4392_v27 }
 0x508   : >> { %v4670_v5 = vshrl.u32 %v4584_v25, 16  ;;  %v4673_v28 = vshll.u32 %v4584_v25, 16 }
 0x509   : >> { %v4539_v32 = vsel %vm16576_vm13, %v4520_v7, 0.0  ;;  %v4577_v21 = vpack.c.bf16 %v4520_v7, %v4520_v7  ;;  %vm16583_vm13 = vmmov %vm16582_vm5 }
 0x50a   : >> { %v4672_v44 = vrot.slane %v4670_v5, 7  ;;  %v4540_v24 = vadd.f32 %v4539_v32, %v4538_v46 }
 0x50b   : >> { %v4611_v52 = vshrl.u32 %v4577_v21, 16  ;;  %v4614_v15 = vshll.u32 %v4577_v21, 16 }
 0x50c   : >> { %v4675_v26 = vor.u32 %v4673_v28, %v4672_v44  ;;  %v4677_v29 = vrot.slane %v4672_v44, 4  ;;  %v4393_v31 = vpop.f32.mrf.mxu0  ;;  %v4485_v48 = vpop.f32.mrf.mxu1 }
 0x50d   : >> { %v4613_v51 = vrot.slane %v4611_v52, 7  ;;  %v4394_v39 = vadd.f32 %v13894_v22, %v4393_v31  ;;  %v4486_v37 = vadd.f32 %v13899_v16, %v4485_v48  ;;  %v10233_v52 = vld [vmem:[%s13913_s24 + $0x50] sm:$0x1] }
 0x50e   : >> { %v4676_v60 = vsel %vm12515_vm1, %v4668_v19, %v4675_v26  ;;  %v4790_v30 = vsel %vm11925_vm3, %v4677_v29, %v10228_v33 }
 0x50f   : >> { %10227 = vst.msk [vmem:[%s13913_s24 + $0x40] sm:$0xf] %vm16577_vm14, %v4676_v60  ;;  %v4616_v59 = vor.u32 %v4614_v15, %v4613_v51  ;;  %v4521_v58 = vmul.f32 %v4486_v37, %v4394_v39  ;;  %v4617_v42 = vrot.slane %v4613_v51, 4  ;;  %vm16584_vm14 = vmmov %vm16579_vm2 }
 0x510   : >> { %10229 = vst [vmem:[%s13913_s24 + $0x44] sm:$0x1] %v4790_v30 }
 0x511   : >> { %v4765_v46 = vsel %vm12459_vm12, %v4616_v59, %v10210_v53  ;;  %v4541_v18 = vsel %vm16578_vm8, %v4521_v58, 0.0  ;;  %v4578_v20 = vpack.c.bf16 %v4521_v58, %v4521_v58  ;;  %v10215_v53 = vld [vmem:[%s13913_s24 + $0x24] sm:$0xf]  ;;  %vm16585_vm8 = vmmov %vm16582_vm5 }
 0x512   : >> { %10211 = vst [vmem:[%s13913_s24 + $0x18] sm:$0xf] %v4765_v46  ;;  %v13969_v41 = vadd.f32 %v4541_v18, %v4540_v24 }
 0x513   : >> { %v4619_v49 = vshrl.u32 %v4578_v20, 16  ;;  %v4622_v40 = vshll.u32 %v4578_v20, 16 }
 0x515   : >> { %v4621_v10 = vrot.slane %v4619_v49, 7 }
 0x517   : >> { %v4624_v54 = vor.u32 %v4622_v40, %v4621_v10  ;;  %v4626_v0 = vrot.slane %v4621_v10, 4  ;;  %v10218_v40 = vld [vmem:[%s13913_s24 + $0x2c] sm:$0x1] }
 0x519   : >> { %v4625_v57 = vsel %vm12515_vm1, %v4617_v42, %v4624_v54  ;;  %v4769_v9 = vsel %vm11925_vm3, %v4626_v0, %v10213_v2 }
 0x51a   : >> { %10212 = vst.msk [vmem:[%s13913_s24 + $0x1c] sm:$0xf] %vm16579_vm2, %v4625_v57  ;;  %vm16586_vm2 = vmmov %vm16582_vm5 }
 0x51b   : >> { %10214 = vst [vmem:[%s13913_s24 + $0x20] sm:$0x1] %v4769_v9 }
 0x528   : >> { %v4411_v45 = vpop.f32.mrf.mxu2  ;;  %v4503_v4 = vpop.f32.mrf.mxu3 }
 0x529   : >> { %v4412_v3 = vadd.f32 %v13894_v22, %v4411_v45  ;;  %v4504_v38 = vadd.f32 %v13899_v16, %v4503_v4 }
 0x52b   : >> { %v13981_v43 = vmul.f32 %v4504_v38, %v4412_v3 }
 0x52d   : >> { %v4585_v8 = vpack.c.bf16 %v13981_v43, %v13981_v43 }
 0x52f   : >> { %v4679_v63 = vshrl.u32 %v4585_v8, 16  ;;  %v4682_v61 = vshll.u32 %v4585_v8, 16 }
 0x530   : >> { %v4413_v55 = vpop.f32.mrf.mxu2  ;;  %v4505_v62 = vpop.f32.mrf.mxu3 }
 0x531   : >> { %v4681_v35 = vrot.slane %v4679_v63, 7  ;;  %v4414_v56 = vadd.f32 %v13894_v22, %v4413_v55  ;;  %v4506_v47 = vadd.f32 %v13899_v16, %v4505_v62 }
 0x532   : >> { %v4396_v36 = vpop.f32.mrf.mxu0  ;;  %v4488_v6 = vpop.f32.mrf.mxu1 }
 0x533   : >> { %v4684_v27 = vor.u32 %v4682_v61, %v4681_v35  ;;  %v13988_v23 = vmul.f32 %v4506_v47, %v4414_v56  ;;  %v4397_v12 = vadd.f32 %v13894_v22, %v4396_v36  ;;  %v4489_v25 = vadd.f32 %v13899_v16, %v4488_v6 }
 0x534   : >> { %v4685_v33 = vrot.slane %v4681_v35, 4 }
 0x535   : >> { %v4793_v7 = vsel %vm12459_vm12, %v4684_v27, %v10230_v34  ;;  %v4586_v5 = vpack.c.bf16 %v13988_v23, %v13988_v23  ;;  %v13997_v32 = vmul.f32 %v4489_v25, %v4397_v12  ;;  %v10235_v34 = vld [vmem:[%s13913_s24 + $0x54] sm:$0xf] }
 0x536   : >> { %10231 = vst [vmem:[%s13913_s24 + $0x48] sm:$0xf] %v4793_v7 }
 0x537   : >> { %v4687_v21 = vshrl.u32 %v4586_v5, 16  ;;  %v4579_v44 = vpack.c.bf16 %v13997_v32, %v13997_v32  ;;  %v4690_v24 = vshll.u32 %v4586_v5, 16 }
 0x539   : >> { %v4689_v28 = vrot.slane %v4687_v21, 7  ;;  %v4628_v19 = vshrl.u32 %v4579_v44, 16  ;;  %v4631_v37 = vshll.u32 %v4579_v44, 16 }
 0x53a   : >> { %v4398_v26 = vpop.f32.mrf.mxu0  ;;  %v4490_v29 = vpop.f32.mrf.mxu1 }
 0x53b   : >> { %v4692_v31 = vor.u32 %v4690_v24, %v4689_v28  ;;  %v4694_v48 = vrot.slane %v4689_v28, 4  ;;  %v4399_v51 = vadd.f32 %v13894_v22, %v4398_v26  ;;  %v4491_v15 = vadd.f32 %v13899_v16, %v4490_v29 }
 0x53c   : >> { %v4630_v39 = vrot.slane %v4628_v19, 7  ;;  %v10238_v19 = vld [vmem:[%s13913_s24 + $0x5c] sm:$0x1] }
 0x53d   : >> { %v4693_v60 = vsel %vm12515_vm1, %v4685_v33, %v4692_v31  ;;  %v4797_v30 = vsel %vm11925_vm3, %v4694_v48, %v10233_v52  ;;  %v4523_v59 = vmul.f32 %v4491_v15, %v4399_v51  ;;  %v4543_v52 = vsel %vm16582_vm5, %v13997_v32, 0.0  ;;  %vm16589_vm5 = vmmov %vm16586_vm2 }
 0x53e   : >> { %10232 = vst.msk [vmem:[%s13913_s24 + $0x4c] sm:$0xf] %vm16580_vm10, %v4693_v60  ;;  %v4633_v58 = vor.u32 %v4631_v37, %v4630_v39  ;;  %v4634_v2 = vrot.slane %v4630_v39, 4  ;;  %v4544_v60 = vadd.f32 %v4543_v52, %v13969_v41  ;;  %vm16587_vm10 = vmmov %vm16586_vm2 }
 0x53f   : >> { %10234 = vst [vmem:[%s13913_s24 + $0x50] sm:$0x1] %v4797_v30  ;;  %v4580_v46 = vpack.c.bf16 %v4523_v59, %v4523_v59  ;;  %v4545_v51 = vsel %vm16583_vm13, %v4523_v59, 0.0  ;;  %vm16590_vm13 = vmmov %vm16586_vm2 }
 0x540   : >> { %v4772_v18 = vsel %vm12459_vm12, %v4633_v58, %v10215_v53 }
 0x541   : >> { %10216 = vst [vmem:[%s13913_s24 + $0x24] sm:$0xf] %v4772_v18  ;;  %v4636_v20 = vshrl.u32 %v4580_v46, 16  ;;  %v4639_v10 = vshll.u32 %v4580_v46, 16 }
 0x543   : >> { %v4638_v49 = vrot.slane %v4636_v20, 7  ;;  %v4546_v20 = vadd.f32 %v4545_v51, %v4544_v60 }
 0x545   : >> { %v4641_v42 = vor.u32 %v4639_v10, %v4638_v49  ;;  %v4643_v54 = vrot.slane %v4638_v49, 4  ;;  %v10220_v49 = vld [vmem:[%s13913_s24 + $0x30] sm:$0xf] }
 0x547   : >> { %v4642_v0 = vsel %vm12515_vm1, %v4634_v2, %v4641_v42  ;;  %v4776_v57 = vsel %vm11925_vm3, %v4643_v54, %v10218_v40 }
 0x548   : >> { %10217 = vst.msk [vmem:[%s13913_s24 + $0x28] sm:$0xf] %vm16581_vm7, %v4642_v0  ;;  %vm16588_vm7 = vmmov %vm16586_vm2 }
 0x549   : >> { %10219 = vst [vmem:[%s13913_s24 + $0x2c] sm:$0x1] %v4776_v57  ;;  %v4551_v57 = vsel %vm16587_vm10, %v13937_v14, 0.0  ;;  %v4557_v14 = vsel %vm16590_vm13, %v13988_v23, 0.0  ;;  %vm16592_vm10 = vmmov %vm16586_vm2  ;;  %vm16595_vm13 = vcmask 24576  }
 0x54a   : >> { %v4416_v9 = vpop.f32.mrf.mxu2  ;;  %v4508_v45 = vpop.f32.mrf.mxu3 }
 0x54b   : >> { %v4417_v4 = vadd.f32 %v13894_v22, %v4416_v9  ;;  %v4509_v3 = vadd.f32 %v13899_v16, %v4508_v45 }
 0x54d   : >> { %v14025_v38 = vmul.f32 %v4509_v3, %v4417_v4  ;;  %v4553_v4 = vsel %vm16588_vm7, %v13944_v17, 0.0  ;;  %vm16593_vm7 = vmmov %vm16586_vm2 }
 0x54f   : >> { %v4587_v8 = vpack.c.bf16 %v14025_v38, %v14025_v38 }
 0x551   : >> { %v4696_v63 = vshrl.u32 %v4587_v8, 16  ;;  %v4699_v61 = vshll.u32 %v4587_v8, 16 }
 0x552   : >> { %v4418_v55 = vpop.f32.mrf.mxu2  ;;  %v4510_v62 = vpop.f32.mrf.mxu3 }
 0x553   : >> { %v4698_v35 = vrot.slane %v4696_v63, 7  ;;  %v4419_v56 = vadd.f32 %v13894_v22, %v4418_v55  ;;  %v4511_v47 = vadd.f32 %v13899_v16, %v4510_v62  ;;  %v10223_v55 = vld [vmem:[%s13913_s24 + $0x38] sm:$0x1]  ;;  %v4555_v62 = vsel %vm16589_vm5, %v13981_v43, 0.0  ;;  %vm16594_vm5 = vmmov %vm16584_vm14 }
 0x555   : >> { %v4701_v36 = vor.u32 %v4699_v61, %v4698_v35  ;;  %v14032_v6 = vmul.f32 %v4511_v47, %v4419_v56  ;;  %v4702_v26 = vrot.slane %v4698_v35, 4 }
 0x557   : >> { %v4800_v27 = vsel %vm12459_vm12, %v4701_v36, %v10235_v34  ;;  %v4588_v12 = vpack.c.bf16 %v14032_v6, %v14032_v6 }
 0x558   : >> { %10236 = vst [vmem:[%s13913_s24 + $0x54] sm:$0xf] %v4800_v27 }
 0x559   : >> { %v4704_v5 = vshrl.u32 %v4588_v12, 16  ;;  %v4707_v24 = vshll.u32 %v4588_v12, 16 }
 0x55b   : >> { %v4401_v25 = vpop.f32.mrf.mxu0  ;;  %v4493_v7 = vpop.f32.mrf.mxu1  ;;  %v4706_v28 = vrot.slane %v4704_v5, 7 }
 0x55c   : >> { %v4402_v21 = vadd.f32 %v13894_v22, %v4401_v25  ;;  %v4494_v44 = vadd.f32 %v13899_v16, %v4493_v7 }
 0x55d   : >> { %v4709_v29 = vor.u32 %v4707_v24, %v4706_v28  ;;  %v4711_v31 = vrot.slane %v4706_v28, 4  ;;  %v4561_v28 = vsel %vm16586_vm2, %v14032_v6, 0.0 }
 0x55e   : >> { %v4524_v33 = vmul.f32 %v4494_v44, %v4402_v21 }
 0x55f   : >> { %v4710_v15 = vsel %vm12515_vm1, %v4702_v26, %v4709_v29  ;;  %v4804_v39 = vsel %vm11925_vm3, %v4711_v31, %v10238_v19 }
 0x560   : >> { %v4581_v48 = vpack.c.bf16 %v4524_v33, %v4524_v33  ;;  %10237 = vst.msk [vmem:[%s13913_s24 + $0x58] sm:$0xf] %vm16584_vm14, %v4710_v15  ;;  %v4547_v32 = vsel %vm16585_vm8, %v4524_v33, 0.0  ;;  %vm16591_vm8 = vmmov %vm16586_vm2 }
 0x561   : >> { %10239 = vst [vmem:[%s13913_s24 + $0x5c] sm:$0x1] %v4804_v39  ;;  %v4548_v41 = vadd.f32 %v4547_v32, %v4546_v20  ;;  %v4559_v23 = vsel %vm16591_vm8, %v14025_v38, 0.0  ;;  %v10240_v38 = vld [vmem:[%s13913_s24 + $0x60] sm:$0xf]  ;;  %vm16598_vm8 = vcmask (%p3177_p6), 97280  }
 0x562   : >> { %v4645_v37 = vshrl.u32 %v4581_v48, 16  ;;  %v4648_v46 = vshll.u32 %v4581_v48, 16 }
 0x563   : >> { %v4403_v30 = vpop.f32.mrf.mxu0  ;;  %v4495_v53 = vpop.f32.mrf.mxu1 }
 0x564   : >> { %v4647_v58 = vrot.slane %v4645_v37, 7  ;;  %v4404_v59 = vadd.f32 %v13894_v22, %v4403_v30  ;;  %v4496_v18 = vadd.f32 %v13899_v16, %v4495_v53 }
 0x566   : >> { %v4650_v10 = vor.u32 %v4648_v46, %v4647_v58  ;;  %v4525_v40 = vmul.f32 %v4496_v18, %v4404_v59  ;;  %v4651_v35 = vrot.slane %v4647_v58, 4  ;;  %v10243_v46 = vld [vmem:[%s13913_s24 + $0x68] sm:$0x1] }
 0x568   : >> { %v4779_v2 = vsel %vm12459_vm12, %v4650_v10, %v10220_v49  ;;  %v4549_v42 = vsel %vm16586_vm2, %v4525_v40, 0.0  ;;  %v4582_v54 = vpack.c.bf16 %v4525_v40, %v4525_v40  ;;  %vm16599_vm2 = vcmask (%p3177_p6), 162816  }
 0x569   : >> { %10221 = vst [vmem:[%s13913_s24 + $0x30] sm:$0xf] %v4779_v2  ;;  %v4550_v0 = vadd.f32 %v4549_v42, %v4548_v41  ;;  %v4534_v42 = vld [vmem:[#allocation7] sm:$0x1] }
 0x56a   : >> { %v4653_v9 = vshrl.u32 %v4582_v54, 16  ;;  %v4656_v8 = vshll.u32 %v4582_v54, 16 }
 0x56b   : >> { %v4552_v45 = vadd.f32 %v4551_v57, %v4550_v0  ;;  %v4815_v57 = vld [vmem:[%s16443_s9] sm:$0xf] (%p3177_p6) }
 0x56c   : >> { %v4655_v3 = vrot.slane %v4653_v9, 7  ;;  %10245 = vmatpush.msk.msra.mxu0 (%p3177_p6), %vm4373_vm0, %v4815_v57 }
 0x56d   : >> { %v4554_v63 = vadd.f32 %v4553_v4, %v4552_v45  ;;  %v4816_v4 = vld [vmem:[%s16444_s10] sm:$0x1] (%p3177_p6) }
 0x56e   : >> { %v4658_v61 = vor.u32 %v4656_v8, %v4655_v3  ;;  %v4660_v56 = vrot.slane %v4655_v3, 4 }
 0x56f   : >> { %v4556_v47 = vadd.f32 %v4555_v62, %v4554_v63 }
 0x570   : >> { %v4659_v34 = vsel %vm12515_vm1, %v4651_v35, %v4658_v61  ;;  %v4783_v17 = vsel %vm11925_vm3, %v4660_v56, %v10223_v55 }
 0x571   : >> { %10222 = vst.msk [vmem:[%s13913_s24 + $0x34] sm:$0xf] %vm16584_vm14, %v4659_v34  ;;  %v4558_v36 = vadd.f32 %v4557_v14, %v4556_v47  ;;  %vm16596_vm14 = vcmask (%p3177_p6), 31744  }
 0x572   : >> { %10224 = vst [vmem:[%s13913_s24 + $0x38] sm:$0x1] %v4783_v17  ;;  %vm16597_vm0 = vmmov (%p3177_p6), %vm16596_vm14 }
 0x573   : >> { %v4560_v21 = vadd.f32 %v4559_v23, %v4558_v36 }
 0x575   : >> { %v4562_v48 = vadd.f32 %v4561_v28, %v4560_v21 }
 0x578   : >> { %v4421_v27 = vpop.f32.mrf.mxu2  ;;  %v4513_v12 = vpop.f32.mrf.mxu3 }
 0x579   : >> { %v4422_v43 = vadd.f32 %v13894_v22, %v4421_v27  ;;  %v4514_v25 = vadd.f32 %v13899_v16, %v4513_v12 }
 0x57b   : >> { %v4532_v7 = vmul.f32 %v4514_v25, %v4422_v43 }
 0x57d   : >> { %v4589_v5 = vpack.c.bf16 %v4532_v7, %v4532_v7  ;;  %v4563_v24 = vsel %vm16592_vm10, %v4532_v7, 0.0  ;;  %vm16600_vm10 = vcmask (%p3177_p6), 228352  }
 0x57e   : >> { %v4564_v39 = vadd.f32 %v4563_v24, %v4562_v48 }
 0x57f   : >> { %v4713_v44 = vshrl.u32 %v4589_v5, 16  ;;  %v4716_v26 = vshll.u32 %v4589_v5, 16 }
 0x580   : >> { %v4423_v33 = vpop.f32.mrf.mxu2  ;;  %v4515_v52 = vpop.f32.mrf.mxu3 }
 0x581   : >> { %v4715_v19 = vrot.slane %v4713_v44, 7  ;;  %v4424_v29 = vadd.f32 %v13894_v22, %v4423_v33  ;;  %v4516_v31 = vadd.f32 %v13899_v16, %v4515_v52 }
 0x583   : >> { %v4718_v51 = vor.u32 %v4716_v26, %v4715_v19  ;;  %v4533_v15 = vmul.f32 %v4516_v31, %v4424_v29  ;;  %v4719_v59 = vrot.slane %v4715_v19, 4 }
 0x585   : >> { %v4807_v6 = vsel %vm12459_vm12, %v4718_v51, %v10240_v38  ;;  %v4565_v37 = vsel %vm16593_vm7, %v4533_v15, 0.0  ;;  %v4590_v60 = vpack.c.bf16 %v4533_v15, %v4533_v15 }
 0x586   : >> { %10241 = vst [vmem:[%s13913_s24 + $0x60] sm:$0xf] %v4807_v6  ;;  %v4566_v32 = vadd.f32 %v4565_v37, %v4564_v39 }
 0x587   : >> { %v4721_v30 = vshrl.u32 %v4590_v60, 16  ;;  %v4724_v16 = vshll.u32 %v4590_v60, 16 }
 0x588   : >> { %v4567_v22 = vrot.slane %v4566_v32, 4 }
 0x589   : >> { %v4723_v53 = vrot.slane %v4721_v30, 7 }
 0x58a   : >> { %v4568_v58 = vadd.f32 %v4567_v22, %v4566_v32 }
 0x58b   : >> { %v4726_v18 = vor.u32 %v4724_v16, %v4723_v53  ;;  %v4728_v20 = vrot.slane %v4723_v53, 4 }
 0x58c   : >> { %v4569_v49 = vrot.slane %v4568_v58, 2 }
 0x58d   : >> { %v4727_v10 = vsel %vm12515_vm1, %v4719_v59, %v4726_v18  ;;  %v4811_v40 = vsel %vm11925_vm3, %v4728_v20, %v10243_v46 }
 0x58e   : >> { %v4570_v41 = vadd.f32 %v4569_v49, %v4568_v58  ;;  %10242 = vst.msk [vmem:[%s13913_s24 + $0x64] sm:$0xf] %vm16594_vm5, %v4727_v10 }
 0x58f   : >> { %10244 = vst [vmem:[%s13913_s24 + $0x68] sm:$0x1] %v4811_v40  ;;  %s14121_s24 = smov (%p3177_p6), 0  }
 0x590   : >> { %v4571_v2 = vrot.slane %v4570_v41, 1 }
 0x592   : >> { %v4572_v54 = vadd.f32 %v4571_v2, %v4570_v41  ;;  %3179 = sbr.rel (!%p3177_p6) target bundleno = 958 (0x3be), region = 236 }
 0x594   : >> { %v4573_v0 = vadd.f32 %v4572_v54, %v4534_v42 }
 0x596   : >> { %4574 = vst.msk [vmem:[#allocation7] sm:$0x1] %vm16595_vm13, %v4573_v0 }
 0x59d   : > { %v4813_v9 = vld [vmem:[#allocation7] sm:$0x1] }
 0x59e   : > { %v4814_v45 = vmul.f32 0.00390625, %v4813_v9 }
 0x5a0   : > { %10246 = vmatmul.msk.f32.vlgmr.msra.gmra.mxu0 %vm16596_vm14, %v4814_v45 }
 0x61d   : > { %v4842_v3 = vpop.f32.mrf.mxu0 }
 0x61e   : > { %v4843_v8 = vadd.f32 %v4842_v3, %v4816_v4 }
 0x620   : > { %4858 = vrot.lane.b32.xlu2 %v4843_v8, %s11739_s6  ;;  %4852 = vrot.lane.b32.xlu1 %v4843_v8, %s11740_s5 }
 0x621   : > { %4846 = vrot.lane.b32.xlu0 %v4843_v8, %s11741_s22 }
 0x628   : > { %4861 = vrot.lane.b32.xlu2 %v4843_v8, %s11742_s23  ;;  %4855 = vrot.lane.b32.xlu1 %v4843_v8, %s11743_s4 }
 0x629   : > { %4849 = vrot.lane.b32.xlu0 %v4843_v8, %s11744_s28 }
 0x630   : > { %4867 = vrot.lane.b32.xlu1 %v4843_v8, %s11745_s2 }
 0x631   : > { %4864 = vrot.lane.b32.xlu0 %v4843_v8, %s11746_s29 }
 0x67a   : > { %v4859_v62 = vpop.permute.xlu2 %4858 }
 0x682   : > { %v4862_v36 = vpop.permute.xlu2 %4861 }
 0x692   : > { %v4853_v63 = vpop.permute.xlu1 %4852 }
 0x693   : > { %v4847_v55 = vpop.permute.xlu0 %4846 }
 0x694   : > { %v4870_v61 = vsel %vm16597_vm0, %v4843_v8, %v4847_v55 }
 0x69a   : > { %v4856_v35 = vpop.permute.xlu1 %4855 }
 0x69b   : > { %v4850_v56 = vpop.permute.xlu0 %4849 }
 0x69c   : > { %v4872_v47 = vsel %vm2587_vm9, %v4870_v61, %v4850_v56 }
 0x69d   : > { %v4874_v14 = vsel %vm16598_vm8, %v4872_v47, %v4853_v63 }
 0x69e   : > { %v4876_v34 = vsel %vm2621_vm11, %v4874_v14, %v4856_v35 }
 0x69f   : > { %v4878_v17 = vsel %vm16599_vm2, %v4876_v34, %v4859_v62 }
 0x6a0   : > { %v4880_v12 = vsel %vm2655_vm6, %v4878_v17, %v4862_v36 }
 0x6a2   : > { %v4868_v27 = vpop.permute.xlu1 %4867 }
 0x6a3   : > { %v4865_v43 = vpop.permute.xlu0 %4864 }
 0x6a4   : > { %v4882_v25 = vsel %vm16600_vm10, %v4880_v12, %v4865_v43 }
 0x6a5   : > { %v14119_v7 = vsel %vm16494_vm4, %v4882_v25, %v4868_v27 }
 0x6a6 LB: >> { %s10739_s1 = smul.u32 96, %s11710_s24  ;;  %s11747_s0 = smov 8   ;;  %vm16601_vm7 = vsmask.f32 7424  ;;  %vm16631_vm4 = vcmask 261120   ;;  %s11710_s24 = sphi %s14121_s24, %s4890_s24  }
 0x6a7   : >> { %s11748_s25 = smov 4   ;;  %s11749_s6 = smov 12   ;;  %vm16602_vm5 = vmmov %vm16601_vm7 }
 0x6a8   : >> { %s14129_s3 = scalar_lea.vmem [#allocation2], %s10739_s1  ;;  %vm16603_vm13 = vmmov %vm16602_vm5  ;;  %s11750_s5 = smov 16  }
 0x6a9   : >> { %v11127_v23 = vld [vmem:[%s14129_s3 + $0x30] sm:$0xf0]  ;;  %v4915_v5 = vld [vmem:[%s14129_s3 + $0x38] sm:$0x1]  ;;  %v11128_v21 = vld [vmem:[%s14129_s3 + $0x30] sm:$0xe] }
 0x6aa   : >> { %v5051_v44 = vunpack.c.l.b16 %v4915_v5  ;;  %v11129_v28 = vor.u32 %v11128_v21, %v11127_v23  ;;  %v14135_v24 = vld [vmem:[%s14129_s3 + $0x30] sm:$0xff]   ;;  %v11130_v33 = vld [vmem:[%s14129_s3 + $0x48] sm:$0xf0]  ;;  %v11131_v29 = vld [vmem:[%s14129_s3 + $0x48] sm:$0xe]  ;;  %s11751_s22 = smov 20  }
 0x6ab   : >> { %v4917_v52 = vld [vmem:[%s14129_s3 + $0x50] sm:$0x1]  ;;  %v5113_v19 = vshrl.u32 %v14135_v24, 16  ;;  %v5115_v26 = vshll.u32 %v14135_v24, 16  ;;  %v14143_v48 = vld [vmem:[%s14129_s3 + $0x48] sm:$0xff]   ;;  %v10264_v38 = vld [vmem:[%s14129_s3 + $0x54] sm:$0xff]   ;;  %v11132_v6 = vor.u32 %v11131_v29, %v11130_v33 }
 0x6ac   : >> { %v5053_v31 = vunpack.c.l.b16 %v4917_v52  ;;  %v14147_v51 = vld [vmem:[%s14129_s3 + $0x54] sm:$0xf0]  ;;  %v5059_v15 = vpack.c.b16 %v5051_v44, %v5051_v44  ;;  %v5213_v39 = vrot.slane %v11129_v28, 1  ;;  %v5139_v32 = vshll.u32 %v14143_v48, 16  ;;  %v10274_v30 = vld [vmem:[%s14129_s3 + $0x5c] sm:$0x1]  ;;  %vm16604_vm14 = vmmov %vm16602_vm5 }
 0x6ad   : >> { %v5117_v37 = vrot.slane %v5115_v26, 1  ;;  %v10260_v16 = vld [vmem:[%s14129_s3 + $0x3c] sm:$0xff]   ;;  %v5137_v59 = vshrl.u32 %v14143_v48, 16  ;;  %v5311_v40 = vunpack.c.l.b16 %v10274_v30  ;;  %v10272_v41 = vld [vmem:[%s14129_s3 + $0x44] sm:$0x1]  ;;  %v5219_v2 = vrot.slane %v11132_v6, 1  ;;  %vm16605_vm0 = vmmov %vm16602_vm5 }
 0x6ae   : >> { %v5061_v60 = vpack.c.b16 %v5053_v31, %v5053_v31  ;;  %v5214_v22 = vrot.slane %v5059_v15, 1  ;;  %v5120_v53 = vshll.u32 %v5059_v15, 16  ;;  %v11556_v58 = vld [vmem:[%s14129_s3 + $0x3c] sm:$0xf0]  ;;  %v5141_v18 = vrot.slane %v5139_v32, 1  ;;  %5289 = vrot.lane.b32.xlu2 %v10260_v16, %s11749_s6  ;;  %v14178_v33 = vld [vmem:[%s14129_s3 + $0x18] sm:$0xff]   ;;  %vm16606_vm8 = vmmov %vm16605_vm0 }
 0x6af   : >> { %v14153_v46 = vor.u32 %v5117_v37, %v5113_v19  ;;  %v5319_v0 = vpack.c.b16 %v5311_v40, %v5311_v40  ;;  %v5396_v57 = vshll.u32 %v10264_v38, 16  ;;  %v5309_v9 = vunpack.c.l.b16 %v10272_v41  ;;  %v11557_v8 = vld [vmem:[%s14129_s3 + $0x3c] sm:$0xe]  ;;  %v11560_v34 = vld [vmem:[%s14129_s3 + $0x54] sm:$0xe]  ;;  %v14183_v31 = vld [vmem:[%s14129_s3] sm:$0xff]  }
 0x6b0   : >> { %v5144_v20 = vshll.u32 %v5061_v60, 16  ;;  %v5215_v49 = vsel %vm2017_vm15, %v5213_v39, %v5214_v22  ;;  %v5122_v10 = vrot.slane %v5120_v53, 1  ;;  %v5220_v54 = vrot.slane %v5061_v60, 1  ;;  %v4913_v12 = vld [vmem:[%s14129_s3 + $0x20] sm:$0x1]  ;;  %s11752_s23 = smov 24   ;;  %vm16607_vm2 = vmmov %vm16605_vm0 }
 0x6b1   : >> { %5233 = vrot.lane.b32.xlu1 %v5215_v49, %s11747_s0  ;;  %v14162_v45 = vor.u32 %v5141_v18, %v5137_v59  ;;  %v5317_v3 = vpack.c.b16 %v5309_v9, %v5309_v9  ;;  %v5394_v55 = vshrl.u32 %v10264_v38, 16  ;;  %v5398_v62 = vrot.slane %v5396_v57, 1  ;;  %v4911_v5 = vld [vmem:[%s14129_s3 + $0x8] sm:$0x1]  ;;  %v10306_v15 = vld [vmem:[%s14129_s3 + $0x50] sm:$0x1]  ;;  %vm16608_vm10 = vmmov %vm16605_vm0 }
 0x6b2   : >> { %v5123_v42 = vsel %vm16601_vm7, %v14153_v46, %v5122_v10  ;;  %v5146_v4 = vrot.slane %v5144_v20, 1  ;;  %v5221_v63 = vsel %vm2017_vm15, %v5219_v2, %v5220_v54  ;;  %v5401_v35 = vshll.u32 %v5319_v0, 16  ;;  %v10308_v22 = vld [vmem:[%s14129_s3 + $0x68] sm:$0x1]  ;;  %v14199_v10 = vld [vmem:[%s14129_s3 + $0x60] sm:$0xff]   ;;  %s11753_s4 = smov 28   ;;  %vm16609_vm7 = vmmov %vm16605_vm0 }
 0x6b3   : >> { %5168 = vrot.lane.b32.xlu0 %v5123_v42, %s11748_s25  ;;  %v5372_v61 = vshll.u32 %v10260_v16, 16  ;;  %v5370_v47 = vshrl.u32 %v10260_v16, 16  ;;  %v5377_v14 = vshll.u32 %v5317_v3, 16  ;;  %v5399_v36 = vor.u32 %v5398_v62, %v5394_v55  ;;  %v11121_v54 = vld [vmem:[%s14129_s3] sm:$0xf0]  ;;  %s11754_s28 = smov 32  }
 0x6b4   : >> { %v5147_v56 = vsel %vm16602_vm5, %v14162_v45, %v5146_v4  ;;  %v5403_v27 = vrot.slane %v5401_v35, 1  ;;  %v11558_v23 = vor.u32 %v11557_v8, %v11556_v58  ;;  %v5049_v44 = vunpack.c.l.b16 %v4913_v12  ;;  %v14218_v35 = vld [vmem:[%s14129_s3 + $0xc] sm:$0xff]   ;;  %vm16610_vm5 = vmmov %vm16605_vm0 }
 0x6b5   : >> { %v5374_v17 = vrot.slane %v5372_v61, 1  ;;  %v5379_v25 = vrot.slane %v5377_v14, 1  ;;  %v11561_v28 = vor.u32 %v11560_v34, %v14147_v51  ;;  %v5470_v26 = vrot.slane %v5317_v3, 1  ;;  %v14221_v61 = vld [vmem:[%s14129_s3 + $0xc] sm:$0xf0] }
 0x6b6   : >> { %v5404_v21 = vsel %vm16603_vm13, %v5399_v36, %v5403_v27  ;;  %5293 = vrot.lane.b32.xlu2 %v10264_v38, %s11749_s6  ;;  %v5469_v19 = vrot.slane %v11558_v23, 1  ;;  %v5047_v29 = vunpack.c.l.b16 %v4911_v5  ;;  %v14186_v39 = vpack.c.b16 %v5049_v44, %v5049_v44  ;;  %v11125_v36 = vld [vmem:[%s14129_s3 + $0x18] sm:$0xe]  ;;  %v10268_v23 = vld [vmem:[%s14129_s3 + $0x14] sm:$0x1]  ;;  %vm16611_vm13 = vmmov %vm16605_vm0 }
 0x6b7   : >> { %v5375_v43 = vor.u32 %v5374_v17, %v5370_v47  ;;  %v5091_v38 = vshll.u32 %v14178_v33, 16  ;;  %v5475_v51 = vrot.slane %v11561_v28, 1  ;;  %v5476_v6 = vrot.slane %v5319_v0, 1  ;;  %v11122_v0 = vld [vmem:[%s14129_s3] sm:$0xe] }
 0x6b8   : >> { %v5471_v37 = vsel %vm2017_vm15, %v5469_v19, %v5470_v26  ;;  %v5055_v60 = vpack.c.b16 %v5047_v29, %v5047_v29  ;;  %v5067_v32 = vshll.u32 %v14183_v31, 16  ;;  %v5565_v30 = vunpack.c.l.b16 %v10306_v15  ;;  %v11124_v17 = vld [vmem:[%s14129_s3 + $0x18] sm:$0xf0]  ;;  %v11151_v19 = vld [vmem:[%s14129_s3 + $0x48] sm:$0xf0] }
 0x6b9   : >> { %5237 = vrot.lane.b32.xlu1 %v5221_v63, %s11747_s0  ;;  %v5380_v52 = vsel %vm16604_vm14, %v5375_v43, %v5379_v25  ;;  %v5089_v53 = vshrl.u32 %v14178_v33, 16  ;;  %v5093_v16 = vrot.slane %v5091_v38, 1  ;;  %v5096_v58 = vshll.u32 %v14186_v39, 16  ;;  %v11154_v43 = vld [vmem:[%s14129_s3 + $0x60] sm:$0xf0]  ;;  %vm16612_vm14 = vmmov %vm16605_vm0 }
 0x6ba   : >> { %v5477_v59 = vsel %vm2017_vm15, %v5475_v51, %v5476_v6  ;;  %v5065_v18 = vshrl.u32 %v14183_v31, 16  ;;  %v5069_v20 = vrot.slane %v5067_v32, 1  ;;  %v5072_v49 = vshll.u32 %v5055_v60, 16  ;;  %v11155_v25 = vld [vmem:[%s14129_s3 + $0x60] sm:$0xe]  ;;  %v10256_v38 = vld [vmem:[%s14129_s3 + $0x24] sm:$0xff]  }
 0x6bb   : >> { %5172 = vrot.lane.b32.xlu0 %v5147_v56, %s11748_s25  ;;  %v5567_v40 = vunpack.c.l.b16 %v10308_v22  ;;  %v14201_v41 = vpack.c.b16 %v5565_v30, %v5565_v30  ;;  %v14205_v2 = vor.u32 %v5093_v16, %v5089_v53  ;;  %v5098_v42 = vrot.slane %v5096_v58, 1  ;;  %v11152_v26 = vld [vmem:[%s14129_s3 + $0x48] sm:$0xe]  ;;  %v10270_v58 = vld [vmem:[%s14129_s3 + $0x2c] sm:$0x1] }
 0x6bc   : >> { %v5652_v57 = vshll.u32 %v14199_v10, 16  ;;  %v5070_v9 = vor.u32 %v5069_v20, %v5065_v18  ;;  %v5074_v4 = vrot.slane %v5072_v49, 1  ;;  %v11123_v55 = vor.u32 %v11122_v0, %v11121_v54  ;;  %v11562_v51 = vld [vmem:[%s14129_s3 + $0x24] sm:$0xf0]  ;;  %v11563_v0 = vld [vmem:[%s14129_s3 + $0x24] sm:$0xe] }
 0x6bd   : >> { %v5575_v3 = vpack.c.b16 %v5567_v40, %v5567_v40  ;;  %v5633_v8 = vshll.u32 %v14201_v41, 16  ;;  %v5099_v63 = vsel %vm16605_vm0, %v14205_v2, %v5098_v42  ;;  %v5650_v62 = vshrl.u32 %v14199_v10, 16 }
 0x6be   : >> { %5489 = vrot.lane.b32.xlu2 %v5471_v37, %s11751_s22  ;;  %v5075_v56 = vsel %vm16606_vm8, %v5070_v9, %v5074_v4  ;;  %v5654_v47 = vrot.slane %v5652_v57, 1  ;;  %v5201_v27 = vrot.slane %v11123_v55, 1  ;;  %v5202_v12 = vrot.slane %v5055_v60, 1  ;;  %vm16613_vm8 = vmmov %vm16605_vm0 }
 0x6bf   : >> { %v5657_v14 = vshll.u32 %v5575_v3, 16  ;;  %v5635_v34 = vrot.slane %v5633_v8, 1  ;;  %v11126_v28 = vor.u32 %v11125_v36, %v11124_v17  ;;  %v5305_v15 = vunpack.c.l.b16 %v10268_v23  ;;  %v10304_v23 = vld [vmem:[%s14129_s3 + $0x38] sm:$0x1] }
 0x6c0   : >> { %v14231_v5 = vor.u32 %v5654_v47, %v5650_v62  ;;  %v5203_v29 = vsel %vm2017_vm15, %v5201_v27, %v5202_v12  ;;  %v11153_v37 = vor.u32 %v11152_v26, %v11151_v19  ;;  %v5208_v32 = vrot.slane %v14186_v39, 1  ;;  %v14270_v19 = vld [vmem:[%s14129_s3 + $0x3c] sm:$0xff]  }
 0x6c1   : >> { %5429 = vrot.lane.b32.xlu1 %v5404_v21, %s11750_s5  ;;  %v5659_v21 = vrot.slane %v5657_v14, 1  ;;  %v5636_v44 = vsel %vm16607_vm2, %v14162_v45, %v5635_v34  ;;  %v5207_v60 = vrot.slane %v11126_v28, 1  ;;  %v5732_v22 = vrot.slane %v5575_v3, 1  ;;  %v11568_v26 = vld [vmem:[%s14129_s3 + $0x3c] sm:$0xf0]  ;;  %vm16614_vm2 = vmmov %vm16605_vm0 }
 0x6c2   : >> { %v5313_v53 = vpack.c.b16 %v5305_v15, %v5305_v15  ;;  %v5324_v16 = vshll.u32 %v14218_v35, 16  ;;  %v5726_v18 = vrot.slane %v14201_v41, 1  ;;  %v5322_v39 = vshrl.u32 %v14218_v35, 16  ;;  %v11566_v41 = vld [vmem:[%s14129_s3 + $0xc] sm:$0xe]  ;;  %v14275_v15 = vld [vmem:[%s14129_s3 + $0x54] sm:$0xff]  }
 0x6c3   : >> { %5425 = vrot.lane.b32.xlu0 %v5380_v52, %s11750_s5  ;;  %v11156_v52 = vor.u32 %v11155_v25, %v11154_v43  ;;  %v5660_v6 = vsel %vm16608_vm10, %v14231_v5, %v5659_v21  ;;  %v5209_v20 = vsel %vm2017_vm15, %v5207_v60, %v5208_v32  ;;  %v5307_v54 = vunpack.c.l.b16 %v10270_v58  ;;  %v11149_v60 = vld [vmem:[%s14129_s3 + $0x30] sm:$0xe]  ;;  %v11145_v32 = vld [vmem:[%s14129_s3 + $0x18] sm:$0xf0]  ;;  %vm16615_vm10 = vmmov %vm16605_vm0 }
 0x6c4   : >> { %v5326_v40 = vrot.slane %v5324_v16, 1  ;;  %v5329_v42 = vshll.u32 %v5313_v53, 16  ;;  %v5348_v9 = vshll.u32 %v10256_v38, 16  ;;  %v5346_v55 = vshrl.u32 %v10256_v38, 16  ;;  %v4918_v16 = vld [vmem:[%s14129_s3 + $0x5c] sm:$0x1] }
 0x6c5   : >> { %v5731_v30 = vrot.slane %v11156_v52, 1  ;;  %v5315_v8 = vpack.c.b16 %v5307_v54, %v5307_v54  ;;  %v11564_v14 = vor.u32 %v11563_v0, %v11562_v51  ;;  %v11567_v17 = vor.u32 %v11566_v41, %v14221_v61 }
 0x6c6   : >> { %5549 = vrot.lane.b32.xlu2 %v14199_v10, %s11752_s23  ;;  %v5327_v4 = vor.u32 %v5326_v40, %v5322_v39  ;;  %v5331_v3 = vrot.slane %v5329_v42, 1  ;;  %v5350_v62 = vrot.slane %v5348_v9, 1  ;;  %v5563_v52 = vunpack.c.l.b16 %v10304_v23 }
 0x6c7   : >> { %v5733_v49 = vsel %vm2017_vm15, %v5731_v30, %v5732_v22  ;;  %v5463_v12 = vrot.slane %v11564_v14, 1  ;;  %v5464_v43 = vrot.slane %v5315_v8, 1  ;;  %v5457_v21 = vrot.slane %v11567_v17, 1  ;;  %v4916_v30 = vld [vmem:[%s14129_s3 + $0x44] sm:$0x1] }
 0x6c8   : >> { %v5332_v47 = vsel %vm16609_vm7, %v5327_v4, %v5331_v3  ;;  %v5351_v36 = vor.u32 %v5350_v62, %v5346_v55  ;;  %v11146_v22 = vld [vmem:[%s14129_s3 + $0x18] sm:$0xe]  ;;  %v5054_v39 = vunpack.c.l.b16 %v4918_v16  ;;  %v5127_v42 = vshll.u32 %v14270_v19, 16  ;;  %vm16616_vm7 = vmmov %vm16605_vm0 }
 0x6c9   : >> { %5545 = vrot.lane.b32.xlu1 %v14143_v48, %s11752_s23  ;;  %v5465_v61 = vsel %vm2017_vm15, %v5463_v12, %v5464_v43  ;;  %v5151_v3 = vshll.u32 %v14275_v15, 16  ;;  %v5149_v17 = vshrl.u32 %v14275_v15, 16 }
 0x6ca   : >> { %v5062_v4 = vpack.c.b16 %v5054_v39, %v5054_v39  ;;  %v5129_v55 = vrot.slane %v5127_v42, 1  ;;  %v14326_v39 = vld [vmem:[%s14129_s3 + $0x54] sm:$0xf0]  ;;  %v11142_v42 = vld [vmem:[%s14129_s3 + $0x60] sm:$0xf0] }
 0x6cb   : >> { %5493 = vrot.lane.b32.xlu0 %v5477_v59, %s11751_s22  ;;  %v5725_v59 = vrot.slane %v11153_v37, 1  ;;  %v5571_v37 = vpack.c.b16 %v5563_v52, %v5563_v52  ;;  %v10275_v52 = vld [vmem:[%s14129_s3 + $0x68] sm:$0x1] }
 0x6cd   : >> { %v5727_v57 = vsel %vm2017_vm15, %v5725_v59, %v5726_v18  ;;  %v5052_v18 = vunpack.c.l.b16 %v4916_v30  ;;  %v5720_v0 = vrot.slane %v5571_v37, 1  ;;  %v11140_v30 = vld [vmem:[%s14129_s3 + $0x48] sm:$0xe] }
 0x6ce   : >> { %5681 = vrot.lane.b32.xlu2 %v5636_v44, %s11753_s4  ;;  %v5458_v44 = vrot.slane %v5313_v53, 1  ;;  %v5609_v53 = vshll.u32 %v5571_v37, 16 }
 0x6d0   : >> { %v5611_v40 = vrot.slane %v5609_v53, 1 }
 0x6d1   : >> { %5164 = vrot.lane.b32.xlu1 %v5099_v63, %s11748_s25  ;;  %v10302_v63 = vld [vmem:[%s14129_s3 + $0x20] sm:$0x1] }
 0x6d2   : >> { %v5561_v34 = vunpack.c.l.b16 %v10302_v63  ;;  %v5125_v63 = vshrl.u32 %v14270_v19, 16 }
 0x6d3   : >> { %5160 = vrot.lane.b32.xlu0 %v5075_v56, %s11748_s25  ;;  %v5353_v56 = vshll.u32 %v5315_v8, 16  ;;  %v5612_v8 = vsel %vm16612_vm14, %v14153_v46, %v5611_v40  ;;  %vm16619_vm14 = vmmov %vm16605_vm0 }
 0x6d4   : >> { %v5569_v25 = vpack.c.b16 %v5561_v34, %v5561_v34  ;;  %v5130_v12 = vor.u32 %v5129_v55, %v5125_v63 }
 0x6d5   : >> { %v5355_v27 = vrot.slane %v5353_v56, 1  ;;  %v11572_v56 = vld [vmem:[%s14129_s3 + $0x54] sm:$0xe] }
 0x6d6   : >> { %5229 = vrot.lane.b32.xlu2 %v5209_v20, %s11747_s0  ;;  %v5585_v28 = vshll.u32 %v5569_v25, 16  ;;  %v11147_v20 = vor.u32 %v11146_v22, %v11145_v32  ;;  %v5714_v41 = vrot.slane %v5569_v25, 1 }
 0x6d8   : >> { %v5587_v51 = vrot.slane %v5585_v28, 1  ;;  %v5713_v9 = vrot.slane %v11147_v20, 1 }
 0x6d9   : >> { %5225 = vrot.lane.b32.xlu1 %v5203_v29, %s11747_s0  ;;  %v5459_v29 = vsel %vm2017_vm15, %v5457_v21, %v5458_v44  ;;  %v10273_v21 = vld [vmem:[%s14129_s3 + $0x50] sm:$0x1] }
 0x6da   : >> { %v5588_v58 = vsel %vm16611_vm13, %v14205_v2, %v5587_v51  ;;  %v5715_v34 = vsel %vm2017_vm15, %v5713_v9, %v5714_v41  ;;  %v5312_v51 = vunpack.c.l.b16 %v10275_v52  ;;  %v4912_v41 = vld [vmem:[%s14129_s3 + $0x14] sm:$0x1]  ;;  %vm16618_vm13 = vmmov %vm16605_vm0 }
 0x6db   : >> { %5685 = vrot.lane.b32.xlu0 %v5660_v6, %s11753_s4  ;;  %v11148_v6 = vld [vmem:[%s14129_s3 + $0x30] sm:$0xf0] }
 0x6dc   : >> { %v11150_v59 = vor.u32 %v11149_v60, %v11148_v6  ;;  %v5223_v60 = vrot.slane %v5062_v4, 1  ;;  %v5320_v22 = vpack.c.b16 %v5312_v51, %v5312_v51 }
 0x6de   : >> { %5281 = vrot.lane.b32.xlu2 %v14218_v35, %s11749_s6  ;;  %v5356_v35 = vsel %vm16610_vm5, %v5351_v36, %v5355_v27  ;;  %v5719_v54 = vrot.slane %v11150_v59, 1  ;;  %v5153_v36 = vrot.slane %v5151_v3, 1  ;;  %v5156_v27 = vshll.u32 %v5062_v4, 16  ;;  %v14321_v59 = vld [vmem:[%s14129_s3 + $0xc] sm:$0xf0]  ;;  %vm16617_vm5 = vmmov %vm16605_vm0 }
 0x6df   : >> { %v5413_v20 = vshll.u32 %v5320_v22, 16 }
 0x6e0   : >> { %v5154_v44 = vor.u32 %v5153_v36, %v5149_v17 }
 0x6e1   : >> { %5749 = vrot.lane.b32.xlu1 %v5733_v49, %s11754_s28  ;;  %v11569_v49 = vld [vmem:[%s14129_s3 + $0x3c] sm:$0xe]  ;;  %v5415_v55 = vrot.slane %v5413_v20, 1 }
 0x6e2   : >> { %v11570_v14 = vor.u32 %v11569_v49, %v11568_v26  ;;  %v10296_v49 = vld [vmem:[%s14129_s3 + $0x54] sm:$0xff]  }
 0x6e3   : >> { %5745 = vrot.lane.b32.xlu0 %v5727_v57, %s11754_s28  ;;  %v5060_v57 = vpack.c.b16 %v5052_v18, %v5052_v18 }
 0x6e4   : >> { %v5216_v25 = vrot.slane %v11570_v14, 1 }
 0x6e5   : >> { %v5132_v62 = vshll.u32 %v5060_v57, 16  ;;  %v5217_v23 = vrot.slane %v5060_v57, 1  ;;  %v14334_v57 = vld [vmem:[%s14129_s3 + $0x24] sm:$0xf0] }
 0x6e6   : >> { %5421 = vrot.lane.b32.xlu2 %v5356_v35, %s11750_s5  ;;  %v5158_v35 = vrot.slane %v5156_v27, 1  ;;  %v5479_v27 = vrot.slane %v5320_v22, 1  ;;  %v11575_v22 = vld [vmem:[%s14129_s3 + $0x24] sm:$0xe] }
 0x6e7   : >> { %v5134_v43 = vrot.slane %v5132_v62, 1  ;;  %v5218_v26 = vsel %vm2017_vm15, %v5216_v25, %v5217_v23 }
 0x6e8   : >> { %v5159_v6 = vsel %vm16613_vm8, %v5154_v44, %v5158_v35  ;;  %v5640_v35 = vshll.u32 %v10296_v49, 16  ;;  %vm16621_vm8 = vmmov %vm16614_vm2 }
 0x6e9   : >> { %5417 = vrot.lane.b32.xlu1 %v5332_v47, %s11750_s5  ;;  %v5721_v47 = vsel %vm2017_vm15, %v5719_v54, %v5720_v0  ;;  %v11143_v54 = vld [vmem:[%s14129_s3 + $0x60] sm:$0xe]  ;;  %v14331_v0 = vld [vmem:[%s14129_s3 + $0x24] sm:$0xff]  }
 0x6ea   : >> { %v11144_v63 = vor.u32 %v11143_v54, %v11142_v42 }
 0x6eb   : >> { %5285 = vrot.lane.b32.xlu0 %v10256_v38, %s11749_s6  ;;  %v11571_v38 = vld [vmem:[%s14129_s3 + $0x54] sm:$0xf0] }
 0x6ec   : >> { %v11573_v28 = vor.u32 %v11572_v56, %v11571_v38  ;;  %v11139_v38 = vld [vmem:[%s14129_s3 + $0x48] sm:$0xf0]  ;;  %v5478_v36 = vrot.slane %v11144_v63, 1 }
 0x6ed   : >> { %v11141_v18 = vor.u32 %v11140_v30, %v11139_v38  ;;  %v4914_v56 = vld [vmem:[%s14129_s3 + $0x2c] sm:$0x1] }
 0x6ee   : >> { %5537 = vrot.lane.b32.xlu2 %v14178_v33, %s11752_s23  ;;  %v5222_v37 = vrot.slane %v11573_v28, 1 }
 0x6ef   : >> { %v5472_v4 = vrot.slane %v11141_v18, 1  ;;  %v11578_v18 = vld [vmem:[%s14129_s3 + $0xc] sm:$0xe] }
 0x6f0   : >> { %v5224_v53 = vsel %vm2017_vm15, %v5222_v37, %v5223_v60  ;;  %v5642_v37 = vrot.slane %v5640_v35, 1 }
 0x6f1   : >> { %5485 = vrot.lane.b32.xlu1 %v5465_v61, %s11751_s22  ;;  %v5135_v61 = vsel %vm16605_vm0, %v5130_v12, %v5134_v43  ;;  %v5050_v12 = vunpack.c.l.b16 %v4914_v56  ;;  %v5416_v43 = vsel %vm16615_vm10, %v14231_v5, %v5415_v55  ;;  %v5103_v5 = vshll.u32 %v14331_v0, 16 }
 0x6f2   : >> { %vm16620_vm0 = vcmask 1041408   ;;  %vm16622_vm10 = vcmask 31744  }
 0x6f3   : >> { %5481 = vrot.lane.b32.xlu0 %v5459_v29, %s11751_s22  ;;  %v5310_v29 = vunpack.c.l.b16 %v10273_v21  ;;  %v10309_v21 = vld [vmem:[%s14129_s3 + $0x74] sm:$0x1]  ;;  %v5058_v28 = vpack.c.b16 %v5050_v12, %v5050_v12  ;;  %v5105_v38 = vrot.slane %v5103_v5, 1 }
 0x6f4   : >> { %v5568_v51 = vunpack.c.l.b16 %v10309_v21 }
 0x6f5   : >> { %v5318_v32 = vpack.c.b16 %v5310_v29, %v5310_v29  ;;  %v5108_v30 = vshll.u32 %v5058_v28, 16  ;;  %v5211_v35 = vrot.slane %v5058_v28, 1 }
 0x6f6   : >> { %5677 = vrot.lane.b32.xlu2 %v5612_v8, %s11753_s4  ;;  %v10307_v8 = vld [vmem:[%s14129_s3 + $0x5c] sm:$0x1]  ;;  %v14374_v20 = vpack.c.b16 %v5568_v51, %v5568_v51 }
 0x6f7   : >> { %v5389_v16 = vshll.u32 %v5318_v32, 16  ;;  %v5473_v3 = vrot.slane %v5318_v32, 1  ;;  %v5566_v17 = vunpack.c.l.b16 %v10307_v8  ;;  %v5101_v32 = vshrl.u32 %v14331_v0, 16 }
 0x6f8   : >> { %v5110_v8 = vrot.slane %v5108_v30, 1  ;;  %v5669_v56 = vshll.u32 %v14374_v20, 16 }
 0x6f9   : >> { %5673 = vrot.lane.b32.xlu1 %v5588_v58, %s11753_s4  ;;  %v14318_v58 = vld [vmem:[%s14129_s3 + $0xc] sm:$0xff]   ;;  %v5391_v40 = vrot.slane %v5389_v16, 1  ;;  %v5474_v14 = vsel %vm2017_vm15, %v5472_v4, %v5473_v3  ;;  %v14362_v44 = vpack.c.b16 %v5566_v17, %v5566_v17  ;;  %v5106_v3 = vor.u32 %v5105_v38, %v5101_v32 }
 0x6fa   : >> { %v5077_v52 = vshrl.u32 %v14318_v58, 16 }
 0x6fb   : >> { %5541 = vrot.lane.b32.xlu0 %v14135_v24, %s11752_s23  ;;  %v5392_v62 = vsel %vm16614_vm2, %v14162_v45, %v5391_v40  ;;  %v5079_v45 = vshll.u32 %v14318_v58, 16  ;;  %v5645_v60 = vshll.u32 %v14362_v44, 16  ;;  %v5729_v38 = vrot.slane %v14362_v44, 1 }
 0x6fe   : >> { %5170 = vrot.lane.b32.xlu2 %v5135_v61, %s11748_s25  ;;  %v5480_v61 = vsel %vm2017_vm15, %v5478_v36, %v5479_v27  ;;  %v11576_v36 = vor.u32 %v11575_v22, %v14334_v57  ;;  %v5111_v27 = vsel %vm16618_vm13, %v5106_v3, %v5110_v8  ;;  %v14429_v3 = vld [vmem:[%s14129_s3 + $0x3c] sm:$0xff]  }
 0x700   : >> { %v5210_v21 = vrot.slane %v11576_v36, 1  ;;  %v11134_v36 = vld [vmem:[%s14129_s3 + $0x18] sm:$0xe] }
 0x701   : >> { %5741 = vrot.lane.b32.xlu1 %v5721_v47, %s11754_s28  ;;  %v5048_v47 = vunpack.c.l.b16 %v4912_v41  ;;  %v5647_v41 = vrot.slane %v5645_v60, 1 }
 0x703   : >> { %5737 = vrot.lane.b32.xlu0 %v5715_v34, %s11754_s28  ;;  %v14350_v34 = vld [vmem:[%s14129_s3 + $0x6c] sm:$0xf0]  ;;  %v14355_v25 = vpack.c.b16 %v5048_v47, %v5048_v47 }
 0x705   : >> { %v5084_v29 = vshll.u32 %v14355_v25, 16 }
 0x706   : >> { %5239 = vrot.lane.b32.xlu2 %v5224_v53, %s11747_s0 }
 0x707   : >> { %v5086_v16 = vrot.slane %v5084_v29, 1 }
 0x708   : >> { %v14338_v9 = vpop.permute.xlu2 %5289 }
 0x709   : >> { %5235 = vrot.lane.b32.xlu1 %v5218_v26, %s11747_s0  ;;  %v5081_v26 = vrot.slane %v5079_v45, 1  ;;  %v11584_v45 = vld [vmem:[%s14129_s3 + $0x6c] sm:$0xe] }
 0x70a   : >> { %v11585_v60 = vor.u32 %v11584_v45, %v14350_v34 }
 0x70b   : >> { %5174 = vrot.lane.b32.xlu0 %v5159_v6, %s11748_s25  ;;  %v5638_v6 = vshrl.u32 %v10296_v49, 16  ;;  %v5082_v53 = vor.u32 %v5081_v26, %v5077_v52 }
 0x70d   : >> { %v5643_v54 = vor.u32 %v5642_v37, %v5638_v6  ;;  %v5087_v63 = vsel %vm16616_vm7, %v5082_v53, %v5086_v16  ;;  %v10269_v6 = vld [vmem:[%s14129_s3 + $0x20] sm:$0x1]  ;;  %v5212_v37 = vsel %vm2017_vm15, %v5210_v21, %v5211_v35  ;;  %v5734_v53 = vrot.slane %v11585_v60, 1  ;;  %v11136_v21 = vld [vmem:[%s14129_s3 + $0x30] sm:$0xf0]  ;;  %vm16623_vm7 = vmmov %vm16622_vm10 }
 0x70e   : >> { %5427 = vrot.lane.b32.xlu2 %v5392_v62, %s11750_s5  ;;  %v5735_v16 = vrot.slane %v14374_v20, 1  ;;  %v14432_v20 = vld [vmem:[%s14129_s3 + $0x3c] sm:$0xf0]  ;;  %v11137_v35 = vld [vmem:[%s14129_s3 + $0x30] sm:$0xe] }
 0x70f   : >> { %v5648_v17 = vsel %vm16617_vm5, %v5643_v54, %v5647_v41  ;;  %vm16624_vm5 = vcmask 97280  }
 0x710   : >> { %v14359_v23 = vpop.permute.xlu2 %5293  ;;  %vm16625_vm13 = vmmov %vm16624_vm5 }
 0x711   : >> { %5295 = vrot.lane.b32.xlu1 %v14199_v10, %s11749_s6  ;;  %v10300_v10 = vld [vmem:[%s14129_s3 + $0x6c] sm:$0xff]  }
 0x712   : >> { %v5664_v40 = vshll.u32 %v10300_v10, 16  ;;  %v5662_v55 = vshrl.u32 %v10300_v10, 16 }
 0x713   : >> { %5291 = vrot.lane.b32.xlu0 %v14143_v48, %s11749_s6 }
 0x714   : >> { %v5666_v62 = vrot.slane %v5664_v40, 1 }
 0x716   : >> { %5495 = vrot.lane.b32.xlu2 %v5480_v61, %s11751_s22  ;;  %v5667_v12 = vor.u32 %v5666_v62, %v5662_v55  ;;  %v10271_v61 = vld [vmem:[%s14129_s3 + $0x38] sm:$0x1] }
 0x717   : >> { %v5308_v51 = vunpack.c.l.b16 %v10271_v61 }
 0x718   : >> { %v14377_v42 = vpop.permute.xlu2 %5489 }
 0x719   : >> { %5491 = vrot.lane.b32.xlu1 %v5474_v14, %s11751_s22  ;;  %v11581_v14 = vld [vmem:[%s14129_s3 + $0x54] sm:$0xe]  ;;  %v14414_v30 = vpack.c.b16 %v5308_v51, %v5308_v51 }
 0x71a   : >> { %v11582_v26 = vor.u32 %v11581_v14, %v14326_v39 }
 0x71b   : >> { %5431 = vrot.lane.b32.xlu0 %v5416_v43, %s11750_s5  ;;  %v5365_v54 = vshll.u32 %v14414_v30, 16 }
 0x71c   : >> { %v5728_v32 = vrot.slane %v11582_v26, 1  ;;  %v10303_v26 = vld [vmem:[%s14129_s3 + $0x2c] sm:$0x1] }
 0x71d   : >> { %v5367_v62 = vrot.slane %v5365_v54, 1  ;;  %v5562_v60 = vunpack.c.l.b16 %v10303_v26 }
 0x71e   : >> { %5162 = vrot.lane.b32.xlu2 %v5087_v63, %s11748_s25  ;;  %v5730_v34 = vsel %vm2017_vm15, %v5728_v32, %v5729_v38  ;;  %v5736_v63 = vsel %vm2017_vm15, %v5734_v53, %v5735_v16  ;;  %v5616_v53 = vshll.u32 %v14429_v3, 16 }
 0x720   : >> { %v14393_v43 = vpop.permute.xlu2 %5549 }
 0x721   : >> { %5551 = vrot.lane.b32.xlu1 %v10300_v10, %s11752_s23  ;;  %v5671_v10 = vrot.slane %v5669_v56, 1 }
 0x723   : >> { %v14379_v4 = vpop.permute.xlu1 %5233  ;;  %5547 = vrot.lane.b32.xlu0 %v10296_v49, %s11752_s23  ;;  %v11579_v49 = vor.u32 %v11578_v18, %v14321_v59  ;;  %v5205_v59 = vrot.slane %v14355_v25, 1  ;;  %v5672_v52 = vsel %vm16619_vm14, %v5667_v12, %v5671_v10  ;;  %v5306_v25 = vunpack.c.l.b16 %v10269_v6  ;;  %v5975_v18 = vld [vmem:[%s16445_s11 + $0x10] sm:$0x3]  ;;  %v14447_v12 = vld [vmem:[%s14129_s3 + $0x24] sm:$0xf0]  ;;  %v10748_v6 = vld [vmem:[%s16445_s11] sm:$0xff] }
 0x724   : >> { %v6029_v41 = vunpack.c.l.b16 %v5975_v18  ;;  %v10305_v10 = vld [vmem:[%s14129_s3 + $0x44] sm:$0x1]  ;;  %vm16626_vm14 = vmmov %vm16614_vm2 }
 0x725   : >> { %v14384_v47 = vpop.permute.xlu0 %5168  ;;  %v5204_v57 = vrot.slane %v11579_v49, 1  ;;  %v5314_v44 = vpack.c.b16 %v5306_v25, %v5306_v25  ;;  %v5564_v51 = vunpack.c.l.b16 %v10305_v10 }
 0x726   : >> { %5687 = vrot.lane.b32.xlu2 %v5672_v52, %s11753_s4  ;;  %v6032_v8 = vpack.c.b16 %v6029_v41, %v6029_v41  ;;  %v5368_v52 = vsel %vm16621_vm8, %v14153_v46, %v5367_v62  ;;  %vm16628_vm8 = vmmov %vm16614_vm2 }
 0x727   : >> { %v5206_v28 = vsel %vm2017_vm15, %v5204_v57, %v5205_v59  ;;  %v5341_v55 = vshll.u32 %v5314_v44, 16  ;;  %v10749_v57 = vld [vmem:[%s16445_s11 + $0x8] sm:$0xff]  ;;  %v5461_v38 = vrot.slane %v5314_v44, 1  ;;  %v14468_v25 = vpack.c.b16 %v5564_v51, %v5564_v51 }
 0x728   : >> { %v14412_v39 = vpop.permute.xlu2 %5681  ;;  %v6062_v14 = vsel %vm16620_vm0, %v6032_v8, 0  ;;  %v5570_v44 = vpack.c.b16 %v5562_v60, %v5562_v60  ;;  %v11587_v8 = vld [vmem:[%s14129_s3 + $0x24] sm:$0xe]  ;;  %vm16627_vm0 = vcmask 162816  }
 0x729   : >> { %5683 = vrot.lane.b32.xlu1 %v5648_v17, %s11753_s4  ;;  %v11133_v17 = vld [vmem:[%s14129_s3 + $0x18] sm:$0xf0]  ;;  %11272 = vmatpush.bf16.msra.mxu3 %v6062_v14  ;;  %v5343_v45 = vrot.slane %v5341_v55, 1  ;;  %v5618_v55 = vrot.slane %v5616_v53, 1  ;;  %v5621_v62 = vshll.u32 %v14468_v25, 16  ;;  %v11588_v26 = vor.u32 %v11587_v8, %v14447_v12 }
 0x72a   : >> { %11271 = vmatpush.bf16.msra.mxu2 %v6062_v14  ;;  %11270 = vmatpush.bf16.msra.mxu1 %v6062_v14  ;;  %v11135_v61 = vor.u32 %v11134_v36, %v11133_v17 }
 0x72b   : >> { %v14397_v5 = vpop.permute.xlu1 %5237  ;;  %5166 = vrot.lane.b32.xlu0 %v5111_v27, %s11748_s25  ;;  %v10288_v27 = vld [vmem:[%s14129_s3 + $0x24] sm:$0xff]   ;;  %6069 = vmatpush.bf16.msra.mxu0 %v6062_v14  ;;  %v5762_v14 = vsel %vm16622_vm10, %v14135_v24, %v14384_v47  ;;  %v5716_v60 = vrot.slane %v11588_v26, 1  ;;  %vm16630_vm10 = vcmask 228352  }
 0x72c   : >> { %v5460_v32 = vrot.slane %v11135_v61, 1  ;;  %v5592_v18 = vshll.u32 %v10288_v27, 16  ;;  %v5590_v36 = vshrl.u32 %v10288_v27, 16  ;;  %v5778_v61 = vsel %vm2587_vm9, %v5762_v14, %v14379_v4 }
 0x72d   : >> { %v14403_v29 = vpop.permute.xlu0 %5172  ;;  %11275 = vmatpush.bf16.msra.mxu3 %v10749_v57  ;;  %v5794_v51 = vsel %vm16625_vm13, %v5778_v61, %v14338_v9  ;;  %v5717_v9 = vrot.slane %v5570_v44, 1 }
 0x72e   : >> { %5747 = vrot.lane.b32.xlu2 %v5730_v34, %s11754_s28  ;;  %11274 = vmatpush.bf16.msra.mxu2 %v10749_v57  ;;  %v5467_v34 = vrot.slane %v14414_v30, 1  ;;  %v5462_v54 = vsel %vm2017_vm15, %v5460_v32, %v5461_v38  ;;  %v5766_v30 = vsel %vm16623_vm7, %v14143_v48, %v14403_v29  ;;  %v5594_v10 = vrot.slane %v5592_v18, 1  ;;  %vm16632_vm7 = vmmov %vm16630_vm10 }
 0x72f   : >> { %11273 = vmatpush.bf16.msra.mxu1 %v10749_v57  ;;  %6070 = vmatpush.bf16.msra.mxu0 %v10749_v57  ;;  %v5623_v48 = vrot.slane %v5621_v62, 1  ;;  %v14524_v38 = vperm.slane %v14119_v7, 0 }
 0x730   : >> { %v14437_v56 = vpop.permute.xlu2 %5229  ;;  %v5595_v57 = vor.u32 %v5594_v10, %v5590_v36 }
 0x731   : >> { %5231 = vrot.lane.b32.xlu1 %v5212_v37, %s11747_s0  ;;  %v11138_v37 = vor.u32 %v11137_v35, %v11136_v21  ;;  %11278 = vmatpush.bf16.msra.mxu3 %v10748_v6  ;;  %v11590_v35 = vld [vmem:[%s14129_s3 + $0x3c] sm:$0xe]  ;;  %s10750_s3 = sshll.u32 %s11710_s24, 7  ;;  %s4890_s24 = sadd.s32 1, %s11710_s24  }
 0x732   : >> { %11277 = vmatpush.bf16.msra.mxu2 %v10748_v6  ;;  %p4887_p7 = scmp.ge.s32.totalorder %s4890_s24, 2  }
 0x733   : >> { %v14416_v22 = vpop.permute.xlu1 %5429  ;;  %5227 = vrot.lane.b32.xlu0 %v5206_v28, %s11747_s0  ;;  %v5344_v28 = vsel %vm16614_vm2, %v14205_v2, %v5343_v45  ;;  %v5466_v2 = vrot.slane %v11138_v37, 1  ;;  %11276 = vmatpush.bf16.msra.mxu1 %v10748_v6  ;;  %v5597_v45 = vshll.u32 %v5570_v44, 16  ;;  %vm16629_vm2 = vmmov %vm16627_vm0 }
 0x734   : >> { %6071 = vmatpush.bf16.msra.mxu0 %v10748_v6 }
 0x735   : >> { %v14424_v40 = vpop.permute.xlu0 %5425  ;;  %v5468_v17 = vsel %vm2017_vm15, %v5466_v2, %v5467_v34  ;;  %v5723_v2 = vrot.slane %v14468_v25, 1  ;;  %v5718_v34 = vsel %vm2017_vm15, %v5716_v60, %v5717_v9 }
 0x736   : >> { %5287 = vrot.lane.b32.xlu2 %v14135_v24, %s11749_s6  ;;  %v5782_v24 = vsel %vm2587_vm9, %v5766_v30, %v14397_v5  ;;  %v5810_v6 = vsel %vm2621_vm11, %v5794_v51, %v14424_v40 }
 0x737   : >> { %v5826_v32 = vsel %vm16629_vm2, %v5810_v6, %v14377_v42  ;;  %vm16638_vm2 = vcmask 31744  }
 0x738   : >> { %v14466_v46 = vpop.permute.xlu2 %5281 }
 0x739   : >> { %5283 = vrot.lane.b32.xlu1 %v14178_v33, %s11749_s6 }
 0x73b   : >> { %v14442_v49 = vpop.permute.xlu1 %5545  ;;  %5751 = vrot.lane.b32.xlu0 %v5736_v63, %s11754_s28  ;;  %v5614_v63 = vshrl.u32 %v14429_v3, 16 }
 0x73c   : >> { %v5842_v40 = vsel %vm2655_vm6, %v5826_v32, %v14442_v49 }
 0x73d   : >> { %v5494_v59 = vpop.permute.xlu0 %5493  ;;  %v5619_v47 = vor.u32 %v5618_v55, %v5614_v63  ;;  %v5858_v49 = vsel %vm16632_vm7, %v5842_v40, %v14412_v39  ;;  %vm16640_vm7 = vmmov %vm16638_vm2 }
 0x73e   : >> { %5483 = vrot.lane.b32.xlu2 %v5462_v54, %s11751_s22 }
 0x73f   : >> { %v5624_v37 = vsel %vm16626_vm14, %v5619_v47, %v5623_v48 }
 0x740   : >> { %v14490_v21 = vpop.permute.xlu2 %5421 }
 0x741   : >> { %5423 = vrot.lane.b32.xlu1 %v5368_v52, %s11750_s5  ;;  %v5599_v52 = vrot.slane %v5597_v45, 1 }
 0x743   : >> { %v14471_v16 = vpop.permute.xlu1 %5164  ;;  %5419 = vrot.lane.b32.xlu0 %v5344_v28, %s11750_s5  ;;  %v5600_v12 = vsel %vm16628_vm8, %v5595_v57, %v5599_v52  ;;  %vm16637_vm8 = vcmask 293888  }
 0x744   : >> { %v5758_v26 = vsel %vm16638_vm2, %v14178_v33, %v14471_v16 }
 0x745   : >> { %v14476_v41 = vpop.permute.xlu0 %5160  ;;  %v5774_v51 = vsel %vm2587_vm9, %v5758_v26, %v14437_v56 }
 0x746   : >> { %5543 = vrot.lane.b32.xlu2 %v14429_v3, %s11752_s23 }
 0x749   : >> { %5539 = vrot.lane.b32.xlu1 %v10288_v27, %s11752_s23  ;;  %v5798_v27 = vsel %vm16624_vm5, %v5782_v24, %v14359_v23  ;;  %v11591_v23 = vor.u32 %v11590_v35, %v14432_v20  ;;  %vm16633_vm5 = vcmask 289792  }
 0x74a   : >> { %v5814_v5 = vsel %vm2621_vm11, %v5798_v27, %v14416_v22  ;;  %v5538_v22 = vpop.permute.xlu2 %5537  ;;  %vm16634_vm13 = vmmov %vm16633_vm5 }
 0x74b   : >> { %v14497_v29 = vpop.permute.xlu1 %5225  ;;  %5487 = vrot.lane.b32.xlu0 %v5468_v17, %s11751_s22  ;;  %v5830_v28 = vsel %vm16627_vm0, %v5814_v5, %v5494_v59  ;;  %v5722_v42 = vrot.slane %v11591_v23, 1  ;;  %vm16635_vm14 = vmmov %vm16633_vm5  ;;  %s14646_s22 = scalar_lea.vmem %s11910_s26, %s10750_s3 }
 0x74c   : >> { %v5846_v59 = vsel %vm2655_vm6, %v5830_v28, %v14393_v43  ;;  %vm16636_vm0 = vmmov %vm16633_vm5 }
 0x74d   : >> { %v5686_v4 = vpop.permute.xlu0 %5685  ;;  %v5724_v25 = vsel %vm2017_vm15, %v5722_v42, %v5723_v2 }
 0x74e   : >> { %v5862_v3 = vsel %vm16630_vm10, %v5846_v59, %v5686_v4  ;;  %5739 = vrot.lane.b32.xlu2 %v5718_v34, %s11754_s28  ;;  %vm16639_vm10 = vmmov %vm16637_vm8  ;;  %v5754_v4 = vsel %vm16640_vm7, %v14183_v31, %v14476_v41 }
 0x751   : >> { %5679 = vrot.lane.b32.xlu1 %v5624_v37, %s11753_s4  ;;  %v5770_v37 = vsel %vm2587_vm9, %v5754_v4, %v14497_v29 }
 0x752   : >> { %v5678_v36 = vpop.permute.xlu2 %5677 }
 0x753   : >> { %v5750_v20 = vpop.permute.xlu1 %5749  ;;  %5675 = vrot.lane.b32.xlu0 %v5600_v12, %s11753_s4 }
 0x754   : >> { %v5884_v53 = vsel %vm16631_vm4, %v5862_v3, %v5750_v20 }
 0x755   : >> { %v5901_v44 = vunpack.c.l.bf16 %v5884_v53  ;;  %v5902_v43 = vunpack.c.h.bf16 %v5884_v53  ;;  %v5746_v18 = vpop.permute.xlu0 %5745 }
 0x756   : >> { %v5878_v54 = vsel %vm16631_vm4, %v5858_v49, %v5746_v18 }
 0x757   : >> { %v5918_v8 = vmul.f32 %v14524_v38, %v5901_v44  ;;  %v5919_v63 = vmul.f32 %v14524_v38, %v5902_v43  ;;  %v5897_v55 = vunpack.c.l.bf16 %v5878_v54  ;;  %v5898_v62 = vunpack.c.h.bf16 %v5878_v54 }
 0x759   : >> { %v5934_v14 = vpack.c.bf16 %v5918_v8, %v5918_v8  ;;  %v5935_v30 = vpack.c.bf16 %v5919_v63, %v5919_v63  ;;  %v5914_v17 = vmul.f32 %v14524_v38, %v5897_v55  ;;  %v5915_v39 = vmul.f32 %v14524_v38, %v5898_v62 }
 0x75a   : >> { %v5171_v24 = vpop.permute.xlu2 %5170 }
 0x75b   : >> { %5951 = vst.msk [vmem:[#allocation5 + $0x30] sm:$0xf] %vm16633_vm5, %v5934_v14  ;;  %v5930_v10 = vpack.c.bf16 %v5914_v17, %v5914_v17  ;;  %v5931_v45 = vpack.c.bf16 %v5915_v39, %v5915_v39  ;;  %v5418_v35 = vpop.permute.xlu1 %5417  ;;  %5743 = vrot.lane.b32.xlu0 %v5724_v25, %s11754_s28  ;;  %vm16641_vm5 = vcmask 97280   ;;  %s14658_s28 = scalar_lea.vmem %s11915_s27, %s10750_s3  ;;  %s14949_s3 = scalar_lea.vmem [#allocation3], %s10739_s1 }
 0x75c   : >> { %5952 = vst.msk [vmem:[#allocation5 + $0x34] sm:$0xf] %vm16634_vm13, %v5935_v30  ;;  %vm16642_vm13 = vmmov %vm16641_vm5  ;;  %s15227_s1 = smov (%p4887_p7), 0  }
 0x75d   : >> { %5947 = vst.msk [vmem:[#allocation5 + $0x20] sm:$0xf] %vm16635_vm14, %v5930_v10  ;;  %v5286_v61 = vpop.permute.xlu0 %5285  ;;  %v5786_v16 = vsel %vm16642_vm13, %v5770_v37, %v14466_v46  ;;  %vm16643_vm14 = vcmask 162816  }
 0x75e   : >> { %5948 = vst.msk [vmem:[#allocation5 + $0x24] sm:$0xf] %vm16636_vm0, %v5931_v45  ;;  %v5790_v5 = vsel %vm16641_vm5, %v5774_v51, %v5286_v61  ;;  %v5802_v56 = vsel %vm2621_vm11, %v5786_v16, %v5418_v35  ;;  %vm16644_vm0 = vmmov %vm16643_vm14 }
 0x75f   : >> { %v5806_v33 = vsel %vm2621_vm11, %v5790_v5, %v14490_v21 }
 0x762   : >> { %v14549_v27 = vpop.permute.xlu2 %5239 }
 0x763   : >> { %v5486_v47 = vpop.permute.xlu1 %5485  ;;  %v10746_v48 = vld [vmem:[#allocation5 + $0x30] sm:$0xff] }
 0x764   : >> { %10364 = vmatmul.msk.bf16.vlgmr.msra.gmra.mxu3 %vm16637_vm8, %v10746_v48  ;;  %v5822_v12 = vsel %vm16643_vm14, %v5806_v33, %v5486_v47  ;;  %vm16645_vm8 = vcmask 228352   ;;  %vm16651_vm14 = vcmask 293888  }
 0x765   : >> { %v5482_v57 = vpop.permute.xlu0 %5481  ;;  %v10744_v52 = vld [vmem:[#allocation5 + $0x20] sm:$0xff]  ;;  %vm16646_vm2 = vmmov %vm16645_vm8 }
 0x766   : >> { %10362 = vmatmul.msk.bf16.vlgmr.msra.gmra.mxu2 %vm16639_vm10, %v10744_v52  ;;  %v5818_v31 = vsel %vm16644_vm0, %v5802_v56, %v5482_v57  ;;  %vm16647_vm10 = vcmask 289792   ;;  %vm16652_vm0 = vmmov %vm16651_vm14 }
 0x767   : >> { %v5834_v29 = vsel %vm2655_vm6, %v5818_v31, %v5538_v22  ;;  %vm16648_vm7 = vmmov %vm16647_vm10 }
 0x768   : >> { %vm16649_vm5 = vmmov %vm16648_vm7 }
 0x769   : >> { %vm16650_vm13 = vmmov %vm16649_vm5 }
 0x76a   : >> { %v5428_v41 = vpop.permute.xlu2 %5427 }
 0x76b   : >> { %v5674_v6 = vpop.permute.xlu1 %5673 }
 0x76c   : >> { %v5850_v21 = vsel %vm16646_vm2, %v5834_v29, %v5674_v6  ;;  %vm16654_vm2 = vcmask 97280  }
 0x76d   : >> { %v5542_v28 = vpop.permute.xlu0 %5541 }
 0x76e   : >> { %v5838_v23 = vsel %vm2655_vm6, %v5822_v12, %v5542_v28 }
 0x76f   : >> { %v5854_v9 = vsel %vm16645_vm8, %v5838_v23, %v5678_v36  ;;  %vm16653_vm8 = vcmask 31744  }
 0x770   : >> { %v5764_v45 = vsel %vm16653_vm8, %v14270_v19, %v5171_v24 }
 0x772   : >> { %v5496_v8 = vpop.permute.xlu2 %5495 }
 0x773   : >> { %v5742_v60 = vpop.permute.xlu1 %5741 }
 0x774   : >> { %v5872_v32 = vsel %vm16631_vm4, %v5854_v9, %v5742_v60 }
 0x775   : >> { %v5893_v40 = vunpack.c.l.bf16 %v5872_v32  ;;  %v5894_v46 = vunpack.c.h.bf16 %v5872_v32  ;;  %v5738_v59 = vpop.permute.xlu0 %5737 }
 0x776   : >> { %v5866_v3 = vsel %vm16631_vm4, %v5850_v21, %v5738_v59 }
 0x777   : >> { %v5910_v20 = vmul.f32 %v14524_v38, %v5893_v40  ;;  %v5911_v53 = vmul.f32 %v14524_v38, %v5894_v46  ;;  %v5889_v42 = vunpack.c.l.bf16 %v5866_v3  ;;  %v5890_v2 = vunpack.c.h.bf16 %v5866_v3 }
 0x779   : >> { %v5926_v34 = vpack.c.bf16 %v5910_v20, %v5910_v20  ;;  %v5927_v49 = vpack.c.bf16 %v5911_v53, %v5911_v53  ;;  %v5906_v44 = vmul.f32 %v14524_v38, %v5889_v42  ;;  %v5907_v22 = vmul.f32 %v14524_v38, %v5890_v2 }
 0x77a   : >> { %v5163_v30 = vpop.permute.xlu2 %5162 }
 0x77b   : >> { %5943 = vst.msk [vmem:[#allocation5 + $0x10] sm:$0xf] %vm16647_vm10, %v5926_v34  ;;  %v5922_v43 = vpack.c.bf16 %v5906_v44, %v5906_v44  ;;  %v5923_v18 = vpack.c.bf16 %v5907_v22, %v5907_v22  ;;  %v5236_v54 = vpop.permute.xlu1 %5235  ;;  %vm16655_vm10 = vcmask 162816  }
 0x77c   : >> { %5944 = vst.msk [vmem:[#allocation5 + $0x14] sm:$0xf] %vm16648_vm7, %v5927_v49  ;;  %v5780_v35 = vsel %vm2587_vm9, %v5764_v45, %v5236_v54  ;;  %vm16656_vm7 = vcmask 228352  }
 0x77d   : >> { %5939 = vst.msk [vmem:[#allocation5] sm:$0xf] %vm16649_vm5, %v5922_v43  ;;  %v5175_v63 = vpop.permute.xlu0 %5174  ;;  %vm16657_vm5 = vmmov %vm16653_vm8 }
 0x77e   : >> { %5940 = vst.msk [vmem:[#allocation5 + $0x4] sm:$0xf] %vm16650_vm13, %v5923_v18  ;;  %v5768_v33 = vsel %vm16657_vm5, %v14275_v15, %v5175_v63  ;;  %vm16660_vm8 = vmmov %vm16655_vm10 }
 0x77f   : >> { %v5784_v23 = vsel %vm2587_vm9, %v5768_v33, %v14549_v27 }
 0x782   : >> { %v5688_v36 = vpop.permute.xlu2 %5687 }
 0x783   : >> { %v5296_v55 = vpop.permute.xlu1 %5295  ;;  %v10742_v62 = vld [vmem:[#allocation5 + $0x10] sm:$0xff] }
 0x784   : >> { %10360 = vmatmul.msk.bf16.vlgmr.msra.gmra.mxu1 %vm16651_vm14, %v10742_v62  ;;  %vm16658_vm14 = vmmov %vm16654_vm2 }
 0x785   : >> { %v5292_v25 = vpop.permute.xlu0 %5291  ;;  %v10740_v14 = vld [vmem:[#allocation5] sm:$0xff]  ;;  %v5800_v31 = vsel %vm16658_vm14, %v5784_v23, %v5296_v55 }
 0x786   : >> { %10358 = vmatmul.msk.bf16.vlgmr.msra.gmra.mxu0 %vm16652_vm0, %v10740_v14  ;;  %v5796_v47 = vsel %vm16654_vm2, %v5780_v35, %v5292_v25  ;;  %vm16659_vm0 = vmmov %vm16650_vm13 }
 0x787   : >> { %v5812_v48 = vsel %vm2621_vm11, %v5796_v47, %v5428_v41  ;;  %vm16661_vm2 = vmmov %vm16656_vm7 }
 0x788   : >> { %vm16664_vm5 = vmmov %vm16659_vm0 }
 0x78a   : >> { %v5748_v52 = vpop.permute.xlu2 %5747 }
 0x78b   : >> { %v5492_v17 = vpop.permute.xlu1 %5491 }
 0x78c   : >> { %v5828_v57 = vsel %vm16655_vm10, %v5812_v48, %v5492_v17  ;;  %vm16662_vm10 = vcmask 293888  }
 0x78d   : >> { %v5432_v39 = vpop.permute.xlu0 %5431  ;;  %vm16666_vm14 = vmmov %vm16662_vm10 }
 0x78e   : >> { %v5816_v60 = vsel %vm2621_vm11, %v5800_v31, %v5432_v39  ;;  %v14643_v31 = vld [vmem:[%s16446_s12] ss:$0 sm:$0xff] }
 0x78f   : >> { %v5832_v29 = vsel %vm16660_vm8, %v5816_v60, %v5496_v8 }
 0x792   : >> { %v5288_v9 = vpop.permute.xlu2 %5287 }
 0x793   : >> { %v5552_v10 = vpop.permute.xlu1 %5551 }
 0x794   : >> { %v5848_v15 = vsel %vm2655_vm6, %v5832_v29, %v5552_v10 }
 0x795   : >> { %v5548_v61 = vpop.permute.xlu0 %5547  ;;  %v5864_v40 = vsel %vm16661_vm2, %v5848_v15, %v5688_v36  ;;  %vm16669_vm2 = vcmask 162816  }
 0x796   : >> { %v5844_v26 = vsel %vm2655_vm6, %v5828_v57, %v5548_v61 }
 0x79a   : >> { %v5484_v20 = vpop.permute.xlu2 %5483 }
 0x79b   : >> { %v5684_v51 = vpop.permute.xlu1 %5683 }
 0x79c   : >> { %v5860_v4 = vsel %vm16656_vm7, %v5844_v26, %v5684_v51  ;;  %vm16663_vm7 = vmmov %vm16659_vm0 }
 0x79d   : >> { %v5881_v5 = vsel %vm16631_vm4, %v5860_v4, %v5748_v52  ;;  %v5167_v6 = vpop.permute.xlu0 %5166 }
 0x79e   : >> { %v5899_v37 = vunpack.c.l.bf16 %v5881_v5  ;;  %v5900_v19 = vunpack.c.h.bf16 %v5881_v5 }
 0x7a0   : >> { %v5916_v24 = vmul.f32 %v14524_v38, %v5899_v37  ;;  %v5917_v28 = vmul.f32 %v14524_v38, %v5900_v19 }
 0x7a2   : >> { %v5932_v16 = vpack.c.bf16 %v5916_v24, %v5916_v24  ;;  %v5933_v12 = vpack.c.bf16 %v5917_v28, %v5917_v28  ;;  %v5544_v22 = vpop.permute.xlu2 %5543 }
 0x7a3   : >> { %v5232_v56 = vpop.permute.xlu1 %5231 }
 0x7a4   : >> { %5949 = vst.msk [vmem:[#allocation5 + $0x28] sm:$0xf] %vm16650_vm13, %v5932_v16  ;;  %vm16665_vm13 = vcmask 31744  }
 0x7a5   : >> { %5950 = vst.msk [vmem:[#allocation5 + $0x2c] sm:$0xf] %vm16659_vm0, %v5933_v12  ;;  %v5228_v41 = vpop.permute.xlu0 %5227  ;;  %v5756_v54 = vsel %vm16665_vm13, %v14318_v58, %v5163_v30  ;;  %vm16667_vm0 = vcmask 97280   ;;  %vm16668_vm8 = vmmov %vm16665_vm13 }
 0x7a6   : >> { %v5772_v8 = vsel %vm2587_vm9, %v5756_v54, %v5228_v41  ;;  %v5760_v25 = vsel %vm16668_vm8, %v14331_v0, %v5167_v6 }
 0x7a7   : >> { %v5776_v14 = vsel %vm2587_vm9, %v5760_v25, %v5232_v56 }
 0x7aa   : >> { %v5740_v39 = vpop.permute.xlu2 %5739 }
 0x7ab   : >> { %v5284_v32 = vpop.permute.xlu1 %5283 }
 0x7ac   : >> { %v10745_v21 = vld [vmem:[#allocation5 + $0x28] sm:$0xff]  ;;  %v5788_v63 = vsel %vm16667_vm0, %v5772_v8, %v5284_v32 }
 0x7ad   : >> { %v5752_v46 = vpop.permute.xlu0 %5751  ;;  %10363 = vmatmul.msk.bf16.gmra.mxu2 %vm16662_vm10, %v10745_v21  ;;  %vm16670_vm10 = vcmask 228352   ;;  %v6123_v21 = vld [vmem:[%s14646_s22 + $0x40] sm:$0xff] }
 0x7ae   : >> { %v5887_v27 = vsel %vm16631_vm4, %v5864_v40, %v5752_v46  ;;  %vm16673_vm13 = vmmov %vm16670_vm10 }
 0x7af   : >> { %v5903_v59 = vunpack.c.l.bf16 %v5887_v27  ;;  %v5904_v3 = vunpack.c.h.bf16 %v5887_v27 }
 0x7b1   : >> { %v5920_v53 = vmul.f32 %v14524_v38, %v5903_v59  ;;  %v5921_v42 = vmul.f32 %v14524_v38, %v5904_v3 }
 0x7b3   : >> { %v5936_v2 = vpack.c.bf16 %v5920_v53, %v5920_v53  ;;  %v5937_v34 = vpack.c.bf16 %v5921_v42, %v5921_v42  ;;  %v5424_v44 = vpop.permute.xlu1 %5423  ;;  %v6128_v42 = vld [vmem:[%s14646_s22 + $0x68] sm:$0xff] }
 0x7b5   : >> { %5953 = vst.msk [vmem:[#allocation5 + $0x38] sm:$0xf] %vm16663_vm7, %v5936_v2  ;;  %v5420_v49 = vpop.permute.xlu0 %5419  ;;  %vm16671_vm7 = vmmov %vm16667_vm0 }
 0x7b6   : >> { %5954 = vst.msk [vmem:[#allocation5 + $0x3c] sm:$0xf] %vm16664_vm5, %v5937_v34  ;;  %v5804_v62 = vsel %vm2621_vm11, %v5788_v63, %v5420_v49  ;;  %v5792_v10 = vsel %vm16671_vm7, %v5776_v14, %v5288_v9  ;;  %vm16672_vm5 = vmmov %vm16669_vm2  ;;  %v6127_v9 = vld [vmem:[%s14646_s22 + $0x60] sm:$0xff] }
 0x7b7   : >> { %v5820_v17 = vsel %vm16669_vm2, %v5804_v62, %v5484_v20  ;;  %v5808_v35 = vsel %vm2621_vm11, %v5792_v10, %v5424_v44  ;;  %v6124_v44 = vld [vmem:[%s14646_s22 + $0x48] sm:$0xff] }
 0x7bb   : >> { %v5540_v55 = vpop.permute.xlu1 %5539 }
 0x7bc   : >> { %v5836_v36 = vsel %vm2655_vm6, %v5820_v17, %v5540_v55  ;;  %v6119_v55 = vld [vmem:[%s14646_s22 + $0x20] sm:$0xff] }
 0x7bd   : >> { %v5488_v43 = vpop.permute.xlu0 %5487  ;;  %v10747_v18 = vld [vmem:[#allocation5 + $0x38] sm:$0xff] }
 0x7be   : >> { %10365 = vmatmul.msk.bf16.gmra.mxu3 %vm16666_vm14, %v10747_v18  ;;  %v5824_v0 = vsel %vm16672_vm5, %v5808_v35, %v5488_v43  ;;  %vm16674_vm14 = vcmask 289792   ;;  %vm16680_vm5 = vcmask 31744   ;;  %v6115_v17 = vld [vmem:[%s14646_s22] sm:$0xff]  ;;  %v6120_v35 = vld [vmem:[%s14646_s22 + $0x28] sm:$0xff] }
 0x7bf   : >> { %v5840_v26 = vsel %vm2655_vm6, %v5824_v0, %v5544_v22  ;;  %vm16675_vm0 = vmmov %vm16674_vm14 }
 0x7c0   : >> { %vm16676_vm8 = vmmov %vm16675_vm0 }
 0x7c1   : >> { %vm16677_vm2 = vmmov %vm16675_vm0 }
 0x7c3   : >> { %v5680_v48 = vpop.permute.xlu1 %5679 }
 0x7c4   : >> { %v5856_v5 = vsel %vm16673_vm13, %v5840_v26, %v5680_v48  ;;  %vm16681_vm13 = vmmov %vm16680_vm5  ;;  %v6116_v48 = vld [vmem:[%s14646_s22 + $0x8] sm:$0xff] }
 0x7c5   : >> { %v5676_v58 = vpop.permute.xlu0 %5675 }
 0x7c6   : >> { %v5852_v30 = vsel %vm16670_vm10, %v5836_v36, %v5676_v58  ;;  %vm16678_vm10 = vcmask 293888  }
 0x7c7   : >> { %v5869_v45 = vsel %vm16631_vm4, %v5852_v30, %v5740_v39  ;;  %vm16679_vm7 = vmmov %vm16678_vm10 }
 0x7c8   : >> { %v5891_v61 = vunpack.c.l.bf16 %v5869_v45  ;;  %v5892_v47 = vunpack.c.h.bf16 %v5869_v45 }
 0x7ca   : >> { %v5908_v57 = vmul.f32 %v14524_v38, %v5891_v61  ;;  %v5909_v52 = vmul.f32 %v14524_v38, %v5892_v47 }
 0x7cc   : >> { %v5924_v51 = vpack.c.bf16 %v5908_v57, %v5908_v57  ;;  %v5925_v4 = vpack.c.bf16 %v5909_v52, %v5909_v52 }
 0x7cd   : >> { %v5744_v6 = vpop.permute.xlu0 %5743 }
 0x7ce   : >> { %5941 = vst.msk [vmem:[#allocation5 + $0x8] sm:$0xf] %vm16674_vm14, %v5924_v51  ;;  %v5875_v37 = vsel %vm16631_vm4, %v5856_v5, %v5744_v6  ;;  %vm16682_vm14 = vmmov %vm16680_vm5 }
 0x7cf   : >> { %5942 = vst.msk [vmem:[#allocation5 + $0xc] sm:$0xf] %vm16675_vm0, %v5925_v4  ;;  %v5895_v19 = vunpack.c.l.bf16 %v5875_v37  ;;  %v5896_v24 = vunpack.c.h.bf16 %v5875_v37  ;;  %vm16683_vm0 = vmmov %vm16680_vm5 }
 0x7d1   : >> { %v5912_v28 = vmul.f32 %v14524_v38, %v5895_v19  ;;  %v5913_v33 = vmul.f32 %v14524_v38, %v5896_v24  ;;  %v14651_v38 = vld [vmem:[%s16447_s13] ss:$0 sm:$0xff]  ;;  %v6125_v24 = vld [vmem:[%s14646_s22 + $0x50] sm:$0xff] }
 0x7d3   : >> { %v5928_v16 = vpack.c.bf16 %v5912_v28, %v5912_v28  ;;  %v5929_v12 = vpack.c.bf16 %v5913_v33, %v5913_v33 }
 0x7d5   : >> { %5945 = vst.msk [vmem:[#allocation5 + $0x18] sm:$0xf] %vm16676_vm8, %v5928_v16  ;;  %vm16684_vm8 = vmmov %vm16683_vm0 }
 0x7d6   : >> { %5946 = vst.msk [vmem:[#allocation5 + $0x1c] sm:$0xf] %vm16677_vm2, %v5929_v12  ;;  %v10741_v56 = vld [vmem:[#allocation5 + $0x8] sm:$0xff]  ;;  %vm16685_vm2 = vmmov %vm16683_vm0 }
 0x7d7   : >> { %10359 = vmatmul.msk.bf16.gmra.mxu0 %vm16678_vm10, %v10741_v56  ;;  %vm16686_vm10 = vmmov %vm16683_vm0 }
 0x7dd   : >> { %v10743_v23 = vld [vmem:[#allocation5 + $0x18] sm:$0xff] }
 0x7de   : >> { %10361 = vmatmul.msk.bf16.gmra.mxu1 %vm16679_vm7, %v10743_v23  ;;  %vm16687_vm7 = vmmov %vm16683_vm0  ;;  %v6126_v23 = vld [vmem:[%s14646_s22 + $0x58] sm:$0xff] }
 0x7e7   : >> { %v6103_v41 = vpop.f32.mrf.mxu3 }
 0x7e8   : >> { %v6104_v60 = vadd.f32 %v14643_v31, %v6103_v41 }
 0x7e9   : >> { %v6093_v29 = vpop.f32.mrf.mxu2 }
 0x7ea   : >> { %v6147_v15 = vmul.f32 %v14651_v38, %v6104_v60  ;;  %v6094_v32 = vadd.f32 %v14643_v31, %v6093_v29 }
 0x7ec   : >> { %v14661_v40 = vadd.f32 %v6147_v15, %v6127_v9  ;;  %v6143_v46 = vmul.f32 %v14651_v38, %v6094_v32  ;;  %v6129_v15 = vld [vmem:[%s14646_s22 + $0x70] sm:$0xff] }
 0x7ee   : >> { %6180 = vst.msk [vmem:[%s14658_s28 + $0x60] sm:$0xff] %vm16680_vm5, %v14661_v40  ;;  %v14667_v27 = vadd.f32 %v6143_v46, %v6123_v21  ;;  %v6220_v59 = vsel %vm16681_vm13, %v14661_v40, 0.0  ;;  %vm16688_vm5 = vmmov %vm16683_vm0 }
 0x7ef   : >> { %v6105_v3 = vpop.f32.mrf.mxu3  ;;  %6221 = vadd.xlane.f32.xlu0 %v6220_v59  ;;  %vm16689_vm13 = vmmov %vm16683_vm0 }
 0x7f0   : >> { %6176 = vst.msk [vmem:[%s14658_s28 + $0x40] sm:$0xff] %vm16682_vm14, %v14667_v27  ;;  %v6106_v20 = vadd.f32 %v14643_v31, %v6105_v3  ;;  %v6208_v53 = vsel %vm16683_vm0, %v14667_v27, 0.0  ;;  %vm16690_vm14 = vmmov %vm16683_vm0  ;;  %v6130_v3 = vld [vmem:[%s14646_s22 + $0x78] sm:$0xff] }
 0x7f1   : >> { %v6095_v2 = vpop.f32.mrf.mxu2  ;;  %6209 = vadd.xlane.f32.xlu2 %v6208_v53 }
 0x7f2   : >> { %v6148_v34 = vmul.f32 %v14651_v38, %v6106_v20  ;;  %v6096_v49 = vadd.f32 %v14643_v31, %v6095_v2 }
 0x7f4   : >> { %v14681_v22 = vadd.f32 %v6148_v34, %v6128_v42  ;;  %v6144_v43 = vmul.f32 %v14651_v38, %v6096_v49  ;;  %v6117_v34 = vld [vmem:[%s14646_s22 + $0x10] sm:$0xff] }
 0x7f6   : >> { %6181 = vst.msk [vmem:[%s14658_s28 + $0x68] sm:$0xff] %vm16684_vm8, %v14681_v22  ;;  %v14687_v18 = vadd.f32 %v6144_v43, %v6124_v44  ;;  %vm16691_vm8 = vmmov %vm16683_vm0 }
 0x7f8   : >> { %6177 = vst.msk [vmem:[%s14658_s28 + $0x48] sm:$0xff] %vm16685_vm2, %v14687_v18  ;;  %v6211_v54 = vsel %vm16686_vm10, %v14687_v18, 0.0  ;;  %vm16692_vm2 = vmmov %vm16683_vm0 }
 0x7f9   : >> { %6212 = vadd.xlane.f32.xlu0 %v6211_v54  ;;  %vm16693_vm10 = vmmov %vm16683_vm0 }
 0x801   : >> { %v6083_v8 = vpop.f32.mrf.mxu1 }
 0x802   : >> { %v6084_v63 = vadd.f32 %v14643_v31, %v6083_v8 }
 0x803   : >> { %v6073_v62 = vpop.f32.mrf.mxu0 }
 0x804   : >> { %v6139_v25 = vmul.f32 %v14651_v38, %v6084_v63  ;;  %v6074_v14 = vadd.f32 %v14643_v31, %v6073_v62 }
 0x806   : >> { %v14699_v39 = vadd.f32 %v6139_v25, %v6119_v55  ;;  %v6135_v36 = vmul.f32 %v14651_v38, %v6074_v14  ;;  %v6121_v55 = vld [vmem:[%s14646_s22 + $0x30] sm:$0xff]  ;;  %v6118_v14 = vld [vmem:[%s14646_s22 + $0x18] sm:$0xff] }
 0x808   : >> { %6172 = vst.msk [vmem:[%s14658_s28 + $0x20] sm:$0xff] %vm16687_vm7, %v14699_v39  ;;  %v14705_v58 = vadd.f32 %v6135_v36, %v6115_v17  ;;  %v6196_v4 = vsel %vm16692_vm2, %v14699_v39, 0.0  ;;  %vm16694_vm7 = vmmov %vm16683_vm0 }
 0x809   : >> { %v6085_v30 = vpop.f32.mrf.mxu1  ;;  %v6223_v6 = vsel %vm16694_vm7, %v14681_v22, 0.0  ;;  %vm16699_vm2 = vmmov %vm16683_vm0 }
 0x80a   : >> { %6168 = vst.msk [vmem:[%s14658_s28] sm:$0xff] %vm16688_vm5, %v14705_v58  ;;  %v6086_v10 = vadd.f32 %v14643_v31, %v6085_v30  ;;  %v6184_v45 = vsel %vm16689_vm13, %v14705_v58, 0.0  ;;  %vm16695_vm5 = vmmov %vm16683_vm0 }
 0x80b   : >> { %v6075_v61 = vpop.f32.mrf.mxu0  ;;  %6185 = vadd.xlane.f32.xlu1 %v6184_v45  ;;  %vm16696_vm13 = vmmov %vm16683_vm0 }
 0x80c   : >> { %v6140_v47 = vmul.f32 %v14651_v38, %v6086_v10  ;;  %v6076_v0 = vadd.f32 %v14643_v31, %v6075_v61  ;;  %vm16701_vm7 = vmmov %vm16683_vm0 }
 0x80e   : >> { %v14717_v57 = vadd.f32 %v6140_v47, %v6120_v35  ;;  %v6136_v52 = vmul.f32 %v14651_v38, %v6076_v0  ;;  %v6122_v0 = vld [vmem:[%s14646_s22 + $0x38] sm:$0xff] }
 0x810   : >> { %6173 = vst.msk [vmem:[%s14658_s28 + $0x28] sm:$0xff] %vm16690_vm14, %v14717_v57  ;;  %v14723_v26 = vadd.f32 %v6136_v52, %v6116_v48  ;;  %v6199_v5 = vsel %vm16693_vm10, %v14717_v57, 0.0  ;;  %vm16697_vm14 = vmmov %vm16683_vm0 }
 0x811   : >> { %vm16700_vm10 = vmmov %vm16683_vm0 }
 0x812   : >> { %6169 = vst.msk [vmem:[%s14658_s28 + $0x8] sm:$0xff] %vm16683_vm0, %v14723_v26  ;;  %v6187_v51 = vsel %vm16691_vm8, %v14723_v26, 0.0  ;;  %vm16698_vm8 = vmmov %vm16683_vm0 }
 0x813   : >> { %6188 = vadd.xlane.f32.xlu2 %v6187_v51  ;;  %6197 = vadd.xlane.f32.xlu1 %v6196_v4 }
 0x81b   : >> { %6200 = vadd.xlane.f32.xlu2 %v6199_v5  ;;  %6224 = vadd.xlane.f32.xlu1 %v6223_v6 }
 0x830   : >> { %v6098_v37 = vpop.f32.mrf.mxu2 }
 0x831   : >> { %v6099_v19 = vadd.f32 %v14643_v31, %v6098_v37 }
 0x833   : >> { %v6145_v28 = vmul.f32 %v14651_v38, %v6099_v19 }
 0x835   : >> { %v14739_v33 = vadd.f32 %v6145_v28, %v6125_v24 }
 0x837   : >> { %6178 = vst.msk [vmem:[%s14658_s28 + $0x50] sm:$0xff] %vm16695_vm5, %v14739_v33  ;;  %v6214_v16 = vsel %vm16696_vm13, %v14739_v33, 0.0  ;;  %vm16702_vm5 = vmmov %vm16683_vm0 }
 0x838   : >> { %v6100_v12 = vpop.f32.mrf.mxu2  ;;  %6215 = vadd.xlane.f32.xlu1 %v6214_v16  ;;  %vm16703_vm13 = vmmov %vm16683_vm0 }
 0x839   : >> { %v6101_v56 = vadd.f32 %v14643_v31, %v6100_v12 }
 0x83b   : >> { %v6146_v41 = vmul.f32 %v14651_v38, %v6101_v56 }
 0x83d   : >> { %v14749_v60 = vadd.f32 %v6146_v41, %v6126_v23 }
 0x83f   : >> { %6179 = vst.msk [vmem:[%s14658_s28 + $0x58] sm:$0xff] %vm16697_vm14, %v14749_v60  ;;  %vm16704_vm14 = vmmov %vm16683_vm0 }
 0x841   : >> { %v6108_v9 = vpop.f32.mrf.mxu3 }
 0x842   : >> { %v6109_v29 = vadd.f32 %v14643_v31, %v6108_v9 }
 0x844   : >> { %v6149_v32 = vmul.f32 %v14651_v38, %v6109_v29 }
 0x846   : >> { %v14757_v21 = vadd.f32 %v6149_v32, %v6129_v15 }
 0x848   : >> { %6182 = vst.msk [vmem:[%s14658_s28 + $0x70] sm:$0xff] %vm16683_vm0, %v14757_v21 }
 0x849   : >> { %v6110_v46 = vpop.f32.mrf.mxu3 }
 0x84a   : >> { %v6111_v59 = vadd.f32 %v14643_v31, %v6110_v46 }
 0x84c   : >> { %v6150_v20 = vmul.f32 %v14651_v38, %v6111_v59 }
 0x84e   : >> { %v14765_v53 = vadd.f32 %v6150_v20, %v6130_v3 }
 0x850   : >> { %6183 = vst.msk [vmem:[%s14658_s28 + $0x78] sm:$0xff] %vm16698_vm8, %v14765_v53  ;;  %vm16705_vm8 = vmmov %vm16683_vm0 }
 0x854   : >> { %v6078_v42 = vpop.f32.mrf.mxu0 }
 0x855   : >> { %v6079_v2 = vadd.f32 %v14643_v31, %v6078_v42 }
 0x857   : >> { %v6137_v49 = vmul.f32 %v14651_v38, %v6079_v2 }
 0x859   : >> { %v14773_v44 = vadd.f32 %v6137_v49, %v6117_v34 }
 0x85b   : >> { %6170 = vst.msk [vmem:[%s14658_s28 + $0x10] sm:$0xff] %vm16699_vm2, %v14773_v44  ;;  %v6088_v43 = vpop.f32.mrf.mxu1  ;;  %v6190_v54 = vsel %vm16700_vm10, %v14773_v44, 0.0  ;;  %vm16706_vm2 = vmmov %vm16683_vm0 }
 0x85c   : >> { %v6089_v8 = vadd.f32 %v14643_v31, %v6088_v43  ;;  %v6080_v63 = vpop.f32.mrf.mxu0  ;;  %6191 = vadd.xlane.f32.xlu0 %v6190_v54  ;;  %vm16707_vm10 = vmmov %vm16683_vm0 }
 0x85d   : >> { %v6081_v62 = vadd.f32 %v14643_v31, %v6080_v63 }
 0x85e   : >> { %v6141_v25 = vmul.f32 %v14651_v38, %v6089_v8 }
 0x85f   : >> { %v6138_v17 = vmul.f32 %v14651_v38, %v6081_v62 }
 0x860   : >> { %v14786_v36 = vadd.f32 %v6141_v25, %v6121_v55 }
 0x861   : >> { %v14788_v30 = vadd.f32 %v6138_v17, %v6118_v14 }
 0x862   : >> { %6174 = vst.msk [vmem:[%s14658_s28 + $0x30] sm:$0xff] %vm16701_vm7, %v14786_v36  ;;  %v6202_v10 = vsel %vm16702_vm5, %v14786_v36, 0.0  ;;  %vm16708_vm7 = vmmov %vm16683_vm0 }
 0x863   : >> { %6171 = vst.msk [vmem:[%s14658_s28 + $0x18] sm:$0xff] %vm16703_vm13, %v14788_v30  ;;  %v6090_v45 = vpop.f32.mrf.mxu1  ;;  %v6193_v35 = vsel %vm16704_vm14, %v14788_v30, 0.0  ;;  %v6226_v37 = vsel %vm16708_vm7, %v14757_v21, 0.0  ;;  %vm16709_vm5 = vmmov %vm16683_vm0 }
 0x864   : >> { %v6091_v61 = vadd.f32 %v14643_v31, %v6090_v45  ;;  %v6210_v47 = vpop.xlane.xlu2 %6209  ;;  %6194 = vadd.xlane.f32.xlu2 %v6193_v35  ;;  %6203 = vadd.xlane.f32.xlu0 %v6202_v10  ;;  %v6217_v31 = vsel %vm16706_vm2, %v14749_v60, 0.0  ;;  %vm16710_vm13 = vmmov %vm16683_vm0 }
 0x865   : >> { %v6247_v52 = vmul.f32 %v6210_v47, %v12245_v50  ;;  %vm16711_vm14 = vmmov %vm16683_vm0 }
 0x866   : >> { %v6142_v48 = vmul.f32 %v14651_v38, %v6091_v61  ;;  %v6229_v38 = vsel %vm16707_vm10, %v14765_v53, 0.0  ;;  %vm16713_vm2 = vmmov %vm16683_vm0 }
 0x867   : >> { %v14812_v5 = vsub.f32 %v14667_v27, %v6247_v52  ;;  %v6222_v27 = vpop.xlane.xlu0 %6221  ;;  %vm16714_vm10 = vmmov %vm16683_vm0 }
 0x868   : >> { %v14804_v51 = vadd.f32 %v6142_v48, %v6122_v0  ;;  %v6251_v16 = vmul.f32 %v6222_v27, %v12245_v50  ;;  %vm16715_vm7 = vmmov %vm16683_vm0 }
 0x869   : >> { %v6279_v6 = vmul.f32 %v14812_v5, %v14812_v5 }
 0x86a   : >> { %6175 = vst.msk [vmem:[%s14658_s28 + $0x38] sm:$0xff] %vm16683_vm0, %v14804_v51  ;;  %v6205_v4 = vsel %vm16705_vm8, %v14804_v51, 0.0  ;;  %v14831_v23 = vsub.f32 %v14661_v40, %v6251_v16  ;;  %vm16712_vm8 = vmmov %vm16683_vm0 }
 0x86b   : >> { %6206 = vadd.xlane.f32.xlu1 %v6205_v4  ;;  %v6311_v19 = vsel %vm16709_vm5, %v6279_v6, 0.0  ;;  %vm16716_vm5 = vmmov %vm16683_vm0 }
 0x86c   : >> { %6218 = vadd.xlane.f32.xlu2 %v6217_v31  ;;  %6230 = vadd.xlane.f32.xlu0 %v6229_v38 }
 0x86f   : >> { %v6213_v15 = vpop.xlane.xlu0 %6212 }
 0x870   : >> { %v6248_v3 = vmul.f32 %v6213_v15, %v12245_v50 }
 0x872   : >> { %v14850_v34 = vsub.f32 %v14687_v18, %v6248_v3 }
 0x874   : >> { %6227 = vadd.xlane.f32.xlu2 %v6226_v37  ;;  %6312 = vadd.xlane.f32.xlu0 %v6311_v19 }
 0x87e   : >> { %v6186_v24 = vpop.xlane.xlu1 %6185 }
 0x87f   : >> { %v6239_v28 = vmul.f32 %v6186_v24, %v12245_v50 }
 0x881   : >> { %v14826_v12 = vsub.f32 %v14705_v58, %v6239_v28  ;;  %v6283_v58 = vmul.f32 %v14831_v23, %v14831_v23 }
 0x883   : >> { %v6271_v56 = vmul.f32 %v14826_v12, %v14826_v12  ;;  %v6323_v2 = vsel %vm16683_vm0, %v6283_v58, 0.0 }
 0x885   : >> { %v6287_v41 = vsel %vm16710_vm13, %v6271_v56, 0.0  ;;  %vm16717_vm13 = vmmov %vm16683_vm0 }
 0x886   : >> { %v6189_v9 = vpop.xlane.xlu2 %6188  ;;  %v6198_v29 = vpop.xlane.xlu1 %6197  ;;  %6288 = vadd.xlane.f32.xlu1 %v6287_v41 }
 0x887   : >> { %v6243_v32 = vmul.f32 %v6198_v29, %v12245_v50  ;;  %v6240_v46 = vmul.f32 %v6189_v9, %v12245_v50 }
 0x889   : >> { %v14837_v59 = vsub.f32 %v14699_v39, %v6243_v32  ;;  %v14845_v20 = vsub.f32 %v14723_v26, %v6240_v46  ;;  %v6280_v26 = vmul.f32 %v14850_v34, %v14850_v34 }
 0x88b   : >> { %v6275_v40 = vmul.f32 %v14837_v59, %v14837_v59  ;;  %v6272_v54 = vmul.f32 %v14845_v20, %v14845_v20  ;;  %v6314_v55 = vsel %vm16714_vm10, %v6280_v26, 0.0  ;;  %vm16721_vm10 = vmmov %vm16683_vm0 }
 0x88d   : >> { %v6299_v42 = vsel %vm16711_vm14, %v6275_v40, 0.0  ;;  %v6290_v18 = vsel %vm16712_vm8, %v6272_v54, 0.0  ;;  %vm16718_vm14 = vmmov %vm16683_vm0 }
 0x88e   : >> { %v6201_v39 = vpop.xlane.xlu2 %6200  ;;  %6300 = vadd.xlane.f32.xlu2 %v6299_v42  ;;  %6324 = vadd.xlane.f32.xlu1 %v6323_v2  ;;  %vm16719_vm8 = vmmov %vm16683_vm0 }
 0x88f   : >> { %v6244_v49 = vmul.f32 %v6201_v39, %v12245_v50 }
 0x891   : >> { %v14854_v43 = vsub.f32 %v14717_v57, %v6244_v49  ;;  %v6225_v57 = vpop.xlane.xlu1 %6224 }
 0x892   : >> { %v6252_v16 = vmul.f32 %v6225_v57, %v12245_v50 }
 0x893   : >> { %v6276_v8 = vmul.f32 %v14854_v43, %v14854_v43 }
 0x894   : >> { %v14907_v15 = vsub.f32 %v14681_v22, %v6252_v16 }
 0x895   : >> { %v6302_v63 = vsel %vm16713_vm2, %v6276_v8, 0.0  ;;  %vm16720_vm2 = vmmov %vm16683_vm0 }
 0x896   : >> { %6291 = vadd.xlane.f32.xlu2 %v6290_v18  ;;  %6303 = vadd.xlane.f32.xlu0 %v6302_v63  ;;  %v6284_v22 = vmul.f32 %v14907_v15, %v14907_v15 }
 0x897   : >> { %6315 = vadd.xlane.f32.xlu1 %v6314_v55 }
 0x898   : >> { %v6326_v54 = vsel %vm16720_vm2, %v6284_v22, 0.0 }
 0x8ab   : >> { %v6216_v62 = vpop.xlane.xlu1 %6215 }
 0x8ac   : >> { %v6249_v25 = vmul.f32 %v6216_v62, %v12245_v50 }
 0x8ae   : >> { %v14867_v14 = vsub.f32 %v14739_v33, %v6249_v25 }
 0x8b0   : >> { %v6281_v17 = vmul.f32 %v14867_v14, %v14867_v14 }
 0x8b2   : >> { %v6317_v10 = vsel %vm16715_vm7, %v6281_v17, 0.0  ;;  %vm16722_vm7 = vmmov %vm16683_vm0 }
 0x8b3   : >> { %6318 = vadd.xlane.f32.xlu2 %v6317_v10  ;;  %v14933_v10 = vld [vmem:[%s16448_s14] ss:$0 sm:$0xff] }
 0x8cf   : >> { %v6192_v45 = vpop.xlane.xlu0 %6191 }
 0x8d0   : >> { %v6241_v35 = vmul.f32 %v6192_v45, %v12245_v50 }
 0x8d2   : >> { %v14874_v61 = vsub.f32 %v14773_v44, %v6241_v35 }
 0x8d4   : >> { %v6273_v47 = vmul.f32 %v14874_v61, %v14874_v61 }
 0x8d6   : >> { %v6293_v0 = vsel %vm16716_vm5, %v6273_v47, 0.0  ;;  %v14938_v47 = vld [vmem:[%s16449_s15] ss:$0 sm:$0xff] }
 0x8d7   : >> { %v6195_v48 = vpop.xlane.xlu2 %6194  ;;  %6294 = vadd.xlane.f32.xlu0 %v6293_v0  ;;  %v6204_v33 = vpop.xlane.xlu0 %6203 }
 0x8d8   : >> { %v6245_v52 = vmul.f32 %v6204_v33, %v12245_v50  ;;  %v6242_v4 = vmul.f32 %v6195_v48, %v12245_v50 }
 0x8da   : >> { %v14882_v31 = vsub.f32 %v14786_v36, %v6245_v52  ;;  %v14887_v44 = vsub.f32 %v14788_v30, %v6242_v4 }
 0x8dc   : >> { %v6277_v38 = vmul.f32 %v14882_v31, %v14882_v31  ;;  %v6274_v41 = vmul.f32 %v14887_v44, %v14887_v44 }
 0x8de   : >> { %v6207_v6 = vpop.xlane.xlu1 %6206  ;;  %v6305_v37 = vsel %vm16717_vm13, %v6277_v38, 0.0  ;;  %v6296_v46 = vsel %vm16719_vm8, %v6274_v41, 0.0 }
 0x8df   : >> { %v6246_v19 = vmul.f32 %v6207_v6, %v12245_v50  ;;  %v6219_v27 = vpop.xlane.xlu2 %6218  ;;  %6306 = vadd.xlane.f32.xlu1 %v6305_v37  ;;  %v6231_v24 = vpop.xlane.xlu0 %6230 }
 0x8e0   : >> { %v6250_v28 = vmul.f32 %v6219_v27, %v12245_v50  ;;  %v6254_v30 = vmul.f32 %v6231_v24, %v12245_v50 }
 0x8e1   : >> { %v14894_v36 = vsub.f32 %v14804_v51, %v6246_v19 }
 0x8e2   : >> { %v14897_v56 = vsub.f32 %v14749_v60, %v6250_v28  ;;  %v14911_v32 = vsub.f32 %v14765_v53, %v6254_v30 }
 0x8e3   : >> { %v6278_v9 = vmul.f32 %v14894_v36, %v14894_v36 }
 0x8e4   : >> { %v6282_v29 = vmul.f32 %v14897_v56, %v14897_v56  ;;  %v6286_v39 = vmul.f32 %v14911_v32, %v14911_v32 }
 0x8e5   : >> { %v6308_v51 = vsel %vm16718_vm14, %v6278_v9, 0.0  ;;  %v10389_v9 = vld [vmem:[%s14949_s3 + $0x3c] sm:$0xf] }
 0x8e6   : >> { %6309 = vadd.xlane.f32.xlu2 %v6308_v51  ;;  %v6320_v60 = vsel %vm16683_vm0, %v6282_v29, 0.0  ;;  %v6332_v8 = vsel %vm16722_vm7, %v6286_v39, 0.0 }
 0x8e7   : >> { %v6228_v58 = vpop.xlane.xlu2 %6227  ;;  %6321 = vadd.xlane.f32.xlu0 %v6320_v60  ;;  %6297 = vadd.xlane.f32.xlu1 %v6296_v46  ;;  %v6313_v3 = vpop.xlane.xlu0 %6312 }
 0x8e8   : >> { %v6253_v40 = vmul.f32 %v6228_v58, %v12245_v50  ;;  %v6343_v42 = vmul.f32 %v6313_v3, %v12245_v50 }
 0x8ea   : >> { %v14920_v2 = vsub.f32 %v14757_v21, %v6253_v40  ;;  %v6359_v53 = vadd.f32 1e-06, %v6343_v42 }
 0x8ec   : >> { %11446 = vrsqrt.f32 %v6359_v53  ;;  %v6285_v49 = vmul.f32 %v14920_v2, %v14920_v2  ;;  %vm6453_vm13 = vweird.f32 %v6359_v53 }
 0x8ee   : >> { %6327 = vadd.xlane.f32.xlu2 %v6326_v54  ;;  %v6329_v26 = vsel %vm16721_vm10, %v6285_v49, 0.0 }
 0x8ef   : >> { %6330 = vadd.xlane.f32.xlu0 %v6329_v26  ;;  %6333 = vadd.xlane.f32.xlu1 %v6332_v8 }
 0x8f2   : >> { %v11447_v18 = vpop.eup %11446 }
 0x8f3   : >> { %v6448_v21 = vmul.f32 %v11447_v18, %v6359_v53  ;;  %vm6454_vm5 = vweird.f32 %v11447_v18 }
 0x8f4   : >> { %vm6455_vm14 = vmor %vm6453_vm13, %vm6454_vm5 }
 0x8f5   : >> { %v6449_v63 = vmul.f32 %v11447_v18, %v6448_v21 }
 0x8f7   : >> { %v6450_v55 = vmul.f32 0.5, %v6449_v63 }
 0x8f9   : >> { %v6451_v57 = vsub.f32 1.5, %v6450_v55  ;;  %v6289_v62 = vpop.xlane.xlu1 %6288 }
 0x8fa   : >> { %v6335_v25 = vmul.f32 %v6289_v62, %v12245_v50 }
 0x8fb   : >> { %v6452_v17 = vmul.f32 %v11447_v18, %v6451_v57 }
 0x8fc   : >> { %v6351_v45 = vadd.f32 1e-06, %v6335_v25 }
 0x8fd   : >> { %v6456_v35 = vsel %vm6455_vm14, %v11447_v18, %v6452_v17 }
 0x8fe   : >> { %v6535_v0 = vmul.f32 %v6456_v35, %v14812_v5  ;;  %11448 = vrsqrt.f32 %v6351_v45  ;;  %vm6373_vm8 = vweird.f32 %v6351_v45 }
 0x900   : >> { %v6555_v48 = vmul.f32 %v14933_v10, %v6535_v0 }
 0x901   : >> { %v6301_v33 = vpop.xlane.xlu2 %6300  ;;  %v6325_v52 = vpop.xlane.xlu1 %6324 }
 0x902   : >> { %v6575_v4 = vadd.f32 %v14938_v47, %v6555_v48  ;;  %v6339_v38 = vmul.f32 %v6301_v33, %v12245_v50  ;;  %v6347_v6 = vmul.f32 %v6325_v52, %v12245_v50 }
 0x904   : >> { %v11449_v37 = vpop.eup %11448  ;;  %v6591_v19 = vpack.c.bf16 %v6575_v4, %v6575_v4  ;;  %v6355_v27 = vadd.f32 1e-06, %v6339_v38  ;;  %v6363_v24 = vadd.f32 1e-06, %v6347_v6 }
 0x905   : >> { %v6368_v28 = vmul.f32 %v11449_v37, %v6351_v45  ;;  %vm6374_vm0 = vweird.f32 %v11449_v37 }
 0x906   : >> { %v6670_v16 = vshrl.u32 %v6591_v19, 16  ;;  %11450 = vrsqrt.f32 %v6355_v27  ;;  %v6673_v41 = vshll.u32 %v6591_v19, 16  ;;  %vm6375_vm2 = vmor %vm6373_vm8, %vm6374_vm0  ;;  %vm6413_vm5 = vweird.f32 %v6355_v27 }
 0x907   : >> { %v6369_v5 = vmul.f32 %v11449_v37, %v6368_v28  ;;  %11452 = vrsqrt.f32 %v6363_v24  ;;  %vm6493_vm14 = vweird.f32 %v6363_v24 }
 0x908   : >> { %v14945_v30 = vrot.slane %v6670_v16, 7 }
 0x909   : >> { %v6370_v29 = vmul.f32 0.5, %v6369_v5  ;;  %v6292_v51 = vpop.xlane.xlu2 %6291  ;;  %v6304_v60 = vpop.xlane.xlu0 %6303 }
 0x90a   : >> { %v6675_v46 = vor.u32 %v6673_v41, %v14945_v30  ;;  %v6336_v58 = vmul.f32 %v6292_v51, %v12245_v50  ;;  %v6316_v3 = vpop.xlane.xlu1 %6315  ;;  %v6340_v40 = vmul.f32 %v6304_v60, %v12245_v50 }
 0x90b   : >> { %v6371_v42 = vsub.f32 1.5, %v6370_v29  ;;  %v6344_v22 = vmul.f32 %v6316_v3, %v12245_v50 }
 0x90c   : >> { %v11451_v53 = vpop.eup %11450  ;;  %v6794_v39 = vsel %vm12459_vm12, %v6675_v46, %v10389_v9  ;;  %v14958_v49 = vadd.f32 1e-06, %v6336_v58  ;;  %v14960_v54 = vadd.f32 1e-06, %v6340_v40 }
 0x90d   : >> { %v11453_v26 = vpop.eup %11452  ;;  %10390 = vst [vmem:[%s14949_s3 + $0x3c] sm:$0xf] %v6794_v39  ;;  %v6372_v8 = vmul.f32 %v11449_v37, %v6371_v42  ;;  %v6408_v18 = vmul.f32 %v11451_v53, %v6355_v27  ;;  %v14963_v21 = vadd.f32 1e-06, %v6344_v22  ;;  %vm6414_vm10 = vweird.f32 %v11451_v53  ;;  %v10369_v42 = vld [vmem:[%s14949_s3 + $0xc] sm:$0xf] }
 0x90e   : >> { %v6488_v63 = vmul.f32 %v11453_v26, %v6363_v24  ;;  %11454 = vrsqrt.f32 %v14958_v49  ;;  %vm6494_vm7 = vweird.f32 %v11453_v26  ;;  %vm6415_vm13 = vmor %vm6413_vm5, %vm6414_vm10  ;;  %vm6383_vm8 = vweird.f32 %v14958_v49 }
 0x90f   : >> { %v6376_v55 = vsel %vm6375_vm2, %v11449_v37, %v6372_v8  ;;  %v6409_v57 = vmul.f32 %v11451_v53, %v6408_v18  ;;  %11456 = vrsqrt.f32 %v14963_v21  ;;  %vm6495_vm0 = vmor %vm6493_vm14, %vm6494_vm7  ;;  %vm6423_vm14 = vweird.f32 %v14960_v54 }
 0x910   : >> { %v6527_v62 = vmul.f32 %v6376_v55, %v14826_v12  ;;  %v6489_v25 = vmul.f32 %v11453_v26, %v6488_v63  ;;  %11458 = vrsqrt.f32 %v14960_v54 }
 0x911   : >> { %v6410_v17 = vmul.f32 0.5, %v6409_v57 }
 0x912   : >> { %v6547_v35 = vmul.f32 %v14933_v10, %v6527_v62  ;;  %v6490_v45 = vmul.f32 0.5, %v6489_v25 }
 0x913   : >> { %v6411_v0 = vsub.f32 1.5, %v6410_v17 }
 0x914   : >> { %v11455_v48 = vpop.eup %11454  ;;  %v6567_v33 = vadd.f32 %v14938_v47, %v6547_v35  ;;  %v6491_v52 = vsub.f32 1.5, %v6490_v45 }
 0x915   : >> { %v11457_v4 = vpop.eup %11456  ;;  %v6412_v38 = vmul.f32 %v11451_v53, %v6411_v0  ;;  %v6378_v6 = vmul.f32 %v11455_v48, %v14958_v49  ;;  %vm6384_vm2 = vweird.f32 %v11455_v48 }
 0x916   : >> { %v11459_v12 = vpop.eup %11458  ;;  %v6583_v37 = vpack.c.bf16 %v6567_v33, %v6567_v33  ;;  %v6492_v19 = vmul.f32 %v11453_v26, %v6491_v52  ;;  %v6458_v28 = vmul.f32 %v11457_v4, %v14963_v21  ;;  %vm6464_vm10 = vweird.f32 %v11457_v4  ;;  %vm6385_vm5 = vmor %vm6383_vm8, %vm6384_vm2 }
 0x917   : >> { %v6416_v16 = vsel %vm6415_vm13, %v11451_v53, %v6412_v38  ;;  %v6379_v5 = vmul.f32 %v11455_v48, %v6378_v6  ;;  %v6418_v41 = vmul.f32 %v11459_v12, %v14960_v54  ;;  %vm6424_vm7 = vweird.f32 %v11459_v12 }
 0x918   : >> { %v6602_v9 = vshrl.u32 %v6583_v37, 16  ;;  %v6531_v29 = vmul.f32 %v6416_v16, %v14837_v59  ;;  %v6496_v51 = vsel %vm6495_vm0, %v11453_v26, %v6492_v19  ;;  %v6459_v46 = vmul.f32 %v11457_v4, %v6458_v28  ;;  %vm6425_vm4 = vmor %vm6423_vm14, %vm6424_vm7  ;;  %v10379_v19 = vld [vmem:[%s14949_s3 + $0x24] sm:$0xf] }
 0x919   : >> { %v6539_v27 = vmul.f32 %v6496_v51, %v14831_v23  ;;  %v6380_v60 = vmul.f32 0.5, %v6379_v5  ;;  %v6419_v58 = vmul.f32 %v11459_v12, %v6418_v41  ;;  %v6605_v3 = vshll.u32 %v6583_v37, 16  ;;  %v10399_v5 = vld [vmem:[%s14949_s3 + $0x54] sm:$0xf] }
 0x91a   : >> { %v14977_v24 = vrot.slane %v6602_v9, 7  ;;  %v6551_v40 = vmul.f32 %v14933_v10, %v6531_v29  ;;  %v6460_v59 = vmul.f32 0.5, %v6459_v46  ;;  %vm6463_vm13 = vweird.f32 %v14963_v21 }
 0x91b   : >> { %v6559_v22 = vmul.f32 %v14933_v10, %v6539_v27  ;;  %v6381_v53 = vsub.f32 1.5, %v6380_v60  ;;  %v6420_v39 = vmul.f32 0.5, %v6419_v58  ;;  %vm6465_vm0 = vmor %vm6463_vm13, %vm6464_vm10 }
 0x91c   : >> { %v6607_v26 = vor.u32 %v6605_v3, %v14977_v24  ;;  %v6571_v23 = vadd.f32 %v14938_v47, %v6551_v40  ;;  %v6461_v63 = vsub.f32 1.5, %v6460_v59 }
 0x91d   : >> { %v6579_v8 = vadd.f32 %v14938_v47, %v6559_v22  ;;  %v6382_v18 = vmul.f32 %v11455_v48, %v6381_v53  ;;  %v6421_v55 = vsub.f32 1.5, %v6420_v39  ;;  %v6608_v39 = vrot.slane %v14977_v24, 4 }
 0x91e   : >> { %v6766_v57 = vsel %vm12459_vm12, %v6607_v26, %v10369_v42  ;;  %v6587_v62 = vpack.c.bf16 %v6571_v23, %v6571_v23  ;;  %v6462_v35 = vmul.f32 %v11457_v4, %v6461_v63  ;;  %v10372_v26 = vld [vmem:[%s14949_s3 + $0x14] sm:$0x1] }
 0x91f   : >> { %10370 = vst [vmem:[%s14949_s3 + $0xc] sm:$0xf] %v6766_v57  ;;  %v6595_v25 = vpack.c.bf16 %v6579_v8, %v6579_v8  ;;  %v6386_v17 = vsel %vm6385_vm5, %v11455_v48, %v6382_v18  ;;  %v6422_v45 = vmul.f32 %v11459_v12, %v6421_v55  ;;  %v6676_v57 = vrot.slane %v14945_v30, 4 }
 0x920   : >> { %v6636_v0 = vshrl.u32 %v6587_v62, 16  ;;  %v6528_v33 = vmul.f32 %v6386_v17, %v14845_v20  ;;  %v6639_v49 = vshll.u32 %v6587_v62, 16  ;;  %v6466_v38 = vsel %vm6465_vm0, %v11457_v4, %v6462_v35  ;;  %v10392_v62 = vld [vmem:[%s14949_s3 + $0x44] sm:$0x1] }
 0x921   : >> { %v6704_v52 = vshrl.u32 %v6595_v25, 16  ;;  %v6426_v21 = vsel %vm6425_vm4, %v11459_v12, %v6422_v45  ;;  %v6536_v48 = vmul.f32 %v6466_v38, %v14850_v34  ;;  %v6707_v16 = vshll.u32 %v6595_v25, 16 }
 0x922   : >> { %v6638_v6 = vrot.slane %v6636_v0, 7  ;;  %v6548_v54 = vmul.f32 %v14933_v10, %v6528_v33  ;;  %v6532_v37 = vmul.f32 %v6426_v21, %v14854_v43  ;;  %v10382_v33 = vld [vmem:[%s14949_s3 + $0x2c] sm:$0x1]  ;;  %vm16723_vm4 = vcmask 27648  }
 0x923   : >> { %v15000_v28 = vrot.slane %v6704_v52, 7  ;;  %v6556_v4 = vmul.f32 %v14933_v10, %v6536_v48  ;;  %vm16724_vm8 = vmmov %vm16723_vm4 }
 0x924   : >> { %v6641_v20 = vor.u32 %v6639_v49, %v6638_v6  ;;  %v6568_v41 = vadd.f32 %v14938_v47, %v6548_v54  ;;  %v6552_v9 = vmul.f32 %v14933_v10, %v6532_v37  ;;  %v6642_v49 = vrot.slane %v6638_v6, 4  ;;  %vm16725_vm2 = vmmov %vm16723_vm4 }
 0x925   : >> { %v6709_v12 = vor.u32 %v6707_v16, %v15000_v28  ;;  %v6576_v43 = vadd.f32 %v14938_v47, %v6556_v4 }
 0x926   : >> { %v6780_v34 = vsel %vm12459_vm12, %v6641_v20, %v10379_v19  ;;  %v6584_v29 = vpack.c.bf16 %v6568_v41, %v6568_v41  ;;  %v6319_v51 = vpop.xlane.xlu2 %6318  ;;  %v6572_v60 = vadd.f32 %v14938_v47, %v6552_v9 }
 0x927   : >> { %10380 = vst [vmem:[%s14949_s3 + $0x24] sm:$0xf] %v6780_v34  ;;  %v6808_v27 = vsel %vm12459_vm12, %v6709_v12, %v10399_v5  ;;  %v6345_v46 = vmul.f32 %v6319_v51, %v12245_v50  ;;  %v6592_v3 = vpack.c.bf16 %v6576_v43, %v6576_v43 }
 0x928   : >> { %10400 = vst [vmem:[%s14949_s3 + $0x54] sm:$0xf] %v6808_v27  ;;  %v6610_v58 = vshrl.u32 %v6584_v29, 16  ;;  %v6588_v40 = vpack.c.bf16 %v6572_v60, %v6572_v60  ;;  %v6613_v53 = vshll.u32 %v6584_v29, 16  ;;  %v10394_v27 = vld [vmem:[%s14949_s3 + $0x48] sm:$0xf] }
 0x929   : >> { %v6361_v42 = vadd.f32 1e-06, %v6345_v46  ;;  %v6678_v59 = vshrl.u32 %v6592_v3, 16  ;;  %v6681_v55 = vshll.u32 %v6592_v3, 16 }
 0x92a   : >> { %v6612_v22 = vrot.slane %v6610_v58, 7  ;;  %v6644_v23 = vshrl.u32 %v6588_v40, 16  ;;  %v6647_v17 = vshll.u32 %v6588_v40, 16 }
 0x92b   : >> { %11460 = vrsqrt.f32 %v6361_v42  ;;  %v6680_v63 = vrot.slane %v6678_v59, 7  ;;  %vm6473_vm7 = vweird.f32 %v6361_v42 }
 0x92c   : >> { %v6615_v8 = vor.u32 %v6613_v53, %v6612_v22  ;;  %v6617_v18 = vrot.slane %v6612_v22, 4  ;;  %v6646_v25 = vrot.slane %v6644_v23, 7 }
 0x92d   : >> { %v6683_v45 = vor.u32 %v6681_v55, %v6680_v63  ;;  %v6685_v0 = vrot.slane %v6680_v63, 4 }
 0x92e   : >> { %v6616_v35 = vsel %vm12515_vm1, %v6608_v39, %v6615_v8  ;;  %v6770_v24 = vsel %vm11925_vm3, %v6617_v18, %v10372_v26  ;;  %v6649_v30 = vor.u32 %v6647_v17, %v6646_v25  ;;  %v6651_v52 = vrot.slane %v6646_v25, 4 }
 0x92f   : >> { %10371 = vst.msk [vmem:[%s14949_s3 + $0x10] sm:$0xf] %vm16723_vm4, %v6616_v35  ;;  %v6684_v38 = vsel %vm12515_vm1, %v6676_v57, %v6683_v45  ;;  %v6798_v21 = vsel %vm11925_vm3, %v6685_v0, %v10392_v62 }
 0x930   : >> { %10373 = vst [vmem:[%s14949_s3 + $0x14] sm:$0x1] %v6770_v24  ;;  %v6650_v48 = vsel %vm12515_vm1, %v6642_v49, %v6649_v30  ;;  %v6784_v6 = vsel %vm11925_vm3, %v6651_v52, %v10382_v33 }
 0x931   : >> { %v11461_v54 = vpop.eup %11460  ;;  %10391 = vst.msk [vmem:[%s14949_s3 + $0x40] sm:$0xf] %vm16724_vm8, %v6684_v38 }
 0x932   : >> { %10393 = vst [vmem:[%s14949_s3 + $0x44] sm:$0x1] %v6798_v21  ;;  %v6468_v37 = vmul.f32 %v11461_v54, %v6361_v42  ;;  %vm6474_vm10 = vweird.f32 %v11461_v54 }
 0x933   : >> { %10381 = vst.msk [vmem:[%s14949_s3 + $0x28] sm:$0xf] %vm16725_vm2, %v6650_v48  ;;  %vm6475_vm5 = vmor %vm6473_vm7, %vm6474_vm10 }
 0x934   : >> { %10383 = vst [vmem:[%s14949_s3 + $0x2c] sm:$0x1] %v6784_v6  ;;  %v6469_v19 = vmul.f32 %v11461_v54, %v6468_v37 }
 0x936   : >> { %v6470_v16 = vmul.f32 0.5, %v6469_v19 }
 0x938   : >> { %v6471_v20 = vsub.f32 1.5, %v6470_v16 }
 0x93a   : >> { %v6472_v5 = vmul.f32 %v11461_v54, %v6471_v20 }
 0x93c   : >> { %v6476_v41 = vsel %vm6475_vm5, %v11461_v54, %v6472_v5 }
 0x93d   : >> { %v6537_v4 = vmul.f32 %v6476_v41, %v14867_v14 }
 0x93f   : >> { %v6557_v12 = vmul.f32 %v14933_v10, %v6537_v4 }
 0x941   : >> { %v6577_v9 = vadd.f32 %v14938_v47, %v6557_v12 }
 0x943   : >> { %v6593_v34 = vpack.c.bf16 %v6577_v9, %v6577_v9 }
 0x945   : >> { %v6687_v29 = vshrl.u32 %v6593_v34, 16  ;;  %v6690_v51 = vshll.u32 %v6593_v34, 16 }
 0x947   : >> { %v15045_v43 = vrot.slane %v6687_v29, 7 }
 0x949   : >> { %v6692_v60 = vor.u32 %v6690_v51, %v15045_v43  ;;  %v6693_v16 = vrot.slane %v15045_v43, 4 }
 0x94a   : >> { %v6295_v46 = vpop.xlane.xlu0 %6294 }
 0x94b   : >> { %v6801_v58 = vsel %vm12459_vm12, %v6692_v60, %v10394_v27  ;;  %v6337_v3 = vmul.f32 %v6295_v46, %v12245_v50 }
 0x94c   : >> { %10395 = vst [vmem:[%s14949_s3 + $0x48] sm:$0xf] %v6801_v58 }
 0x94d   : >> { %v6353_v14 = vadd.f32 1e-06, %v6337_v3 }
 0x94f   : >> { %11462 = vrsqrt.f32 %v6353_v14  ;;  %vm6393_vm14 = vweird.f32 %v6353_v14 }
 0x952   : >> { %v6307_v40 = vpop.xlane.xlu1 %6306 }
 0x953   : >> { %v6341_v42 = vmul.f32 %v6307_v40, %v12245_v50 }
 0x955   : >> { %v11463_v22 = vpop.eup %11462  ;;  %v6357_v53 = vadd.f32 1e-06, %v6341_v42 }
 0x956   : >> { %v6388_v59 = vmul.f32 %v11463_v22, %v6353_v14  ;;  %vm6394_vm13 = vweird.f32 %v11463_v22 }
 0x957   : >> { %11464 = vrsqrt.f32 %v6357_v53  ;;  %vm6395_vm0 = vmor %vm6393_vm14, %vm6394_vm13  ;;  %vm6433_vm8 = vweird.f32 %v6357_v53 }
 0x958   : >> { %v6389_v39 = vmul.f32 %v11463_v22, %v6388_v59 }
 0x959   : >> { %v6310_v26 = vpop.xlane.xlu2 %6309 }
 0x95a   : >> { %v6390_v23 = vmul.f32 0.5, %v6389_v39  ;;  %v6342_v8 = vmul.f32 %v6310_v26, %v12245_v50  ;;  %v6298_v18 = vpop.xlane.xlu1 %6297  ;;  %v6322_v63 = vpop.xlane.xlu0 %6321 }
 0x95b   : >> { %v6338_v55 = vmul.f32 %v6298_v18, %v12245_v50  ;;  %v6346_v57 = vmul.f32 %v6322_v63, %v12245_v50  ;;  %v10374_v63 = vld [vmem:[%s14949_s3 + $0x18] sm:$0xf] }
 0x95c   : >> { %v6391_v62 = vsub.f32 1.5, %v6390_v23  ;;  %v15057_v25 = vadd.f32 1e-06, %v6342_v8 }
 0x95d   : >> { %v11465_v17 = vpop.eup %11464  ;;  %v15059_v35 = vadd.f32 1e-06, %v6338_v55  ;;  %v15061_v24 = vadd.f32 1e-06, %v6346_v57 }
 0x95e   : >> { %v6392_v45 = vmul.f32 %v11463_v22, %v6391_v62  ;;  %v6428_v0 = vmul.f32 %v11465_v17, %v6357_v53  ;;  %11466 = vrsqrt.f32 %v15057_v25  ;;  %vm6434_vm4 = vweird.f32 %v11465_v17 }
 0x95f   : >> { %11468 = vrsqrt.f32 %v15059_v35  ;;  %vm6435_vm2 = vmor %vm6433_vm8, %vm6434_vm4  ;;  %vm6443_vm10 = vweird.f32 %v15057_v25  ;;  %vm6403_vm7 = vweird.f32 %v15059_v35  ;;  %vm6483_vm5 = vweird.f32 %v15061_v24 }
 0x960   : >> { %v6396_v33 = vsel %vm6395_vm0, %v11463_v22, %v6392_v45  ;;  %v6429_v49 = vmul.f32 %v11465_v17, %v6428_v0  ;;  %11470 = vrsqrt.f32 %v15061_v24 }
 0x961   : >> { %v6529_v30 = vmul.f32 %v6396_v33, %v14874_v61  ;;  %v6328_v52 = vpop.xlane.xlu2 %6327 }
 0x962   : >> { %v6430_v38 = vmul.f32 0.5, %v6429_v49  ;;  %v6348_v21 = vmul.f32 %v6328_v52, %v12245_v50  ;;  %v6334_v54 = vpop.xlane.xlu1 %6333  ;;  %v6331_v37 = vpop.xlane.xlu0 %6330 }
 0x963   : >> { %v6549_v48 = vmul.f32 %v14933_v10, %v6529_v30  ;;  %v6350_v6 = vmul.f32 %v6334_v54, %v12245_v50  ;;  %v6349_v51 = vmul.f32 %v6331_v37, %v12245_v50 }
 0x964   : >> { %v11467_v19 = vpop.eup %11466  ;;  %v6431_v20 = vsub.f32 1.5, %v6430_v38  ;;  %v15071_v5 = vadd.f32 1e-06, %v6348_v21 }
 0x965   : >> { %v11469_v41 = vpop.eup %11468  ;;  %v6569_v61 = vadd.f32 %v14938_v47, %v6549_v48  ;;  %v6438_v4 = vmul.f32 %v11467_v19, %v15057_v25  ;;  %v15075_v12 = vadd.f32 1e-06, %v6350_v6  ;;  %vm6444_vm13 = vweird.f32 %v11467_v19 }
 0x966   : >> { %v15077_v9 = vpop.eup %11470  ;;  %v6432_v34 = vmul.f32 %v11465_v17, %v6431_v20  ;;  %v6398_v29 = vmul.f32 %v11469_v41, %v15059_v35  ;;  %11472 = vrsqrt.f32 %v15071_v5  ;;  %v15090_v59 = vadd.f32 1e-06, %v6349_v51  ;;  %vm6445_vm4 = vmor %vm6443_vm10, %vm6444_vm13 }
 0x967   : >> { %v6585_v27 = vpack.c.bf16 %v6569_v61, %v6569_v61  ;;  %v6439_v60 = vmul.f32 %v11467_v19, %v6438_v4  ;;  %v6478_v46 = vmul.f32 %v15077_v9, %v15061_v24  ;;  %11474 = vrsqrt.f32 %v15075_v12 }
 0x968   : >> { %v6436_v58 = vsel %vm6435_vm2, %v11465_v17, %v6432_v34  ;;  %v6399_v3 = vmul.f32 %v11469_v41, %v6398_v29  ;;  %vm6404_vm14 = vweird.f32 %v11469_v41  ;;  %11476 = vrsqrt.f32 %v15090_v59 }
 0x969   : >> { %v6619_v14 = vshrl.u32 %v6585_v27, 16  ;;  %v6533_v40 = vmul.f32 %v6436_v58, %v14882_v31  ;;  %v6440_v42 = vmul.f32 0.5, %v6439_v60  ;;  %v6479_v53 = vmul.f32 %v15077_v9, %v6478_v46  ;;  %vm6405_vm2 = vmor %vm6403_vm7, %vm6404_vm14  ;;  %v10384_v60 = vld [vmem:[%s14949_s3 + $0x30] sm:$0xf] }
 0x96a   : >> { %v6400_v22 = vmul.f32 0.5, %v6399_v3  ;;  %v6622_v26 = vshll.u32 %v6585_v27, 16  ;;  %vm6484_vm0 = vweird.f32 %v15077_v9  ;;  %vm6503_vm8 = vweird.f32 %v15071_v5 }
 0x96b   : >> { %v15092_v39 = vrot.slane %v6619_v14, 7  ;;  %v6553_v23 = vmul.f32 %v14933_v10, %v6533_v40  ;;  %v6441_v8 = vsub.f32 1.5, %v6440_v42  ;;  %v6480_v31 = vmul.f32 0.5, %v6479_v53  ;;  %vm6485_vm7 = vmor %vm6483_vm5, %vm6484_vm0 }
 0x96c   : >> { %v15095_v18 = vpop.eup %11472  ;;  %v6401_v55 = vsub.f32 1.5, %v6400_v22  ;;  %vm6523_vm10 = vweird.f32 %v15075_v12  ;;  %vm6513_vm14 = vweird.f32 %v15090_v59 }
 0x96d   : >> { %v6624_v57 = vor.u32 %v6622_v26, %v15092_v39  ;;  %v6573_v62 = vadd.f32 %v14938_v47, %v6553_v23  ;;  %v6442_v17 = vmul.f32 %v11467_v19, %v6441_v8  ;;  %v15102_v45 = vpop.eup %11474  ;;  %v6481_v33 = vsub.f32 1.5, %v6480_v31 }
 0x96e   : >> { %v6402_v0 = vmul.f32 %v11469_v41, %v6401_v55  ;;  %v6498_v49 = vmul.f32 %v15095_v18, %v15071_v5  ;;  %v6518_v25 = vmul.f32 %v15102_v45, %v15075_v12  ;;  %v6625_v37 = vrot.slane %v15092_v39, 4  ;;  %v15129_v20 = vpop.eup %11476 }
 0x96f   : >> { %v6773_v30 = vsel %vm12459_vm12, %v6624_v57, %v10374_v63  ;;  %v6589_v52 = vpack.c.bf16 %v6573_v62, %v6573_v62  ;;  %v6446_v38 = vsel %vm6445_vm4, %v11467_v19, %v6442_v17  ;;  %v6482_v48 = vmul.f32 %v15077_v9, %v6481_v33 }
 0x970   : >> { %10375 = vst [vmem:[%s14949_s3 + $0x18] sm:$0xf] %v6773_v30  ;;  %v6534_v21 = vmul.f32 %v6446_v38, %v14894_v36  ;;  %v6406_v54 = vsel %vm6405_vm2, %v11469_v41, %v6402_v0  ;;  %v6499_v6 = vmul.f32 %v15095_v18, %v6498_v49  ;;  %v6519_v36 = vmul.f32 %v15102_v45, %v6518_v25 }
 0x971   : >> { %v6653_v19 = vshrl.u32 %v6589_v52, 16  ;;  %v6530_v35 = vmul.f32 %v6406_v54, %v14887_v44  ;;  %v6656_v41 = vshll.u32 %v6589_v52, 16  ;;  %v6486_v4 = vsel %vm6485_vm7, %v15077_v9, %v6482_v48  ;;  %v10387_v52 = vld [vmem:[%s14949_s3 + $0x38] sm:$0x1]  ;;  %v10377_v48 = vld [vmem:[%s14949_s3 + $0x20] sm:$0x1] }
 0x972   : >> { %v6554_v61 = vmul.f32 %v14933_v10, %v6534_v21  ;;  %v6500_v34 = vmul.f32 0.5, %v6499_v6  ;;  %v6538_v44 = vmul.f32 %v6486_v4, %v14897_v56  ;;  %v6520_v27 = vmul.f32 0.5, %v6519_v36  ;;  %v10397_v4 = vld [vmem:[%s14949_s3 + $0x50] sm:$0x1] }
 0x973   : >> { %v6655_v29 = vrot.slane %v6653_v19, 7  ;;  %v6550_v51 = vmul.f32 %v14933_v10, %v6530_v35  ;;  %vm6504_vm5 = vweird.f32 %v15095_v18  ;;  %v6508_v58 = vmul.f32 %v15129_v20, %v15090_v59 }
 0x974   : >> { %v6574_v24 = vadd.f32 %v14938_v47, %v6554_v61  ;;  %v6501_v46 = vsub.f32 1.5, %v6500_v34  ;;  %v6558_v14 = vmul.f32 %v14933_v10, %v6538_v44  ;;  %vm6524_vm13 = vweird.f32 %v15102_v45  ;;  %vm6505_vm0 = vmor %vm6503_vm8, %vm6504_vm5 }
 0x975   : >> { %v6658_v3 = vor.u32 %v6656_v41, %v6655_v29  ;;  %v6570_v9 = vadd.f32 %v14938_v47, %v6550_v51  ;;  %v6521_v42 = vsub.f32 1.5, %v6520_v27  ;;  %v6509_v22 = vmul.f32 %v15129_v20, %v6508_v58  ;;  %vm6525_vm8 = vmor %vm6523_vm10, %vm6524_vm13 }
 0x976   : >> { %v6590_v40 = vpack.c.bf16 %v6574_v24, %v6574_v24  ;;  %v6502_v56 = vmul.f32 %v15095_v18, %v6501_v46  ;;  %v6578_v23 = vadd.f32 %v14938_v47, %v6558_v14  ;;  %vm6514_vm4 = vweird.f32 %v15129_v20 }
 0x977   : >> { %v6787_v53 = vsel %vm12459_vm12, %v6658_v3, %v10384_v60  ;;  %v6586_v26 = vpack.c.bf16 %v6570_v9, %v6570_v9  ;;  %v6659_v8 = vrot.slane %v6655_v29, 4  ;;  %v6522_v31 = vmul.f32 %v15102_v45, %v6521_v42  ;;  %vm6515_vm10 = vmor %vm6513_vm14, %vm6514_vm4 }
 0x978   : >> { %10385 = vst [vmem:[%s14949_s3 + $0x30] sm:$0xf] %v6787_v53  ;;  %v6661_v63 = vshrl.u32 %v6590_v40, 16  ;;  %v6506_v55 = vsel %vm6505_vm0, %v15095_v18, %v6502_v56  ;;  %v6664_v57 = vshll.u32 %v6590_v40, 16  ;;  %v6594_v17 = vpack.c.bf16 %v6578_v23, %v6578_v23  ;;  %v10407_v53 = vld [vmem:[%s14949_s3 + $0x68] sm:$0x1] }
 0x979   : >> { %v6627_v62 = vshrl.u32 %v6586_v26, 16  ;;  %v6540_v0 = vmul.f32 %v6506_v55, %v14907_v15  ;;  %v6630_v33 = vshll.u32 %v6586_v26, 16  ;;  %v6526_v49 = vsel %vm6525_vm8, %v15102_v45, %v6522_v31 }
 0x97a   : >> { %v6663_v5 = vrot.slane %v6661_v63, 7  ;;  %v6510_v30 = vmul.f32 0.5, %v6509_v22  ;;  %v6695_v38 = vshrl.u32 %v6594_v17, 16  ;;  %v6698_v25 = vshll.u32 %v6594_v17, 16 }
 0x97b   : >> { %v6629_v18 = vrot.slane %v6627_v62, 7  ;;  %v6560_v21 = vmul.f32 %v14933_v10, %v6540_v0  ;;  %v6542_v6 = vmul.f32 %v6526_v49, %v14911_v32  ;;  %vm16726_vm2 = vcmask 27648   ;;  %v10404_v62 = vld [vmem:[%s14949_s3 + $0x60] sm:$0xf] }
 0x97c   : >> { %v6666_v54 = vor.u32 %v6664_v57, %v6663_v5  ;;  %v6668_v15 = vrot.slane %v6663_v5, 4  ;;  %v6511_v12 = vsub.f32 1.5, %v6510_v30  ;;  %v6697_v36 = vrot.slane %v6695_v38, 7  ;;  %vm16727_vm7 = vmmov %vm16726_vm2 }
 0x97d   : >> { %v6632_v19 = vor.u32 %v6630_v33, %v6629_v18  ;;  %v6634_v35 = vrot.slane %v6629_v18, 4  ;;  %v6580_v45 = vadd.f32 %v14938_v47, %v6560_v21  ;;  %v6562_v34 = vmul.f32 %v14933_v10, %v6542_v6  ;;  %vm16728_vm5 = vmmov %vm16726_vm2 }
 0x97e   : >> { %v6667_v41 = vsel %vm12515_vm1, %v6659_v8, %v6666_v54  ;;  %v6791_v61 = vsel %vm11925_vm3, %v6668_v15, %v10387_v52  ;;  %v6512_v32 = vmul.f32 %v15129_v20, %v6511_v12  ;;  %v6700_v44 = vor.u32 %v6698_v25, %v6697_v36  ;;  %vm16729_vm13 = vmmov %vm16726_vm2 }
 0x97f   : >> { %10386 = vst.msk [vmem:[%s14949_s3 + $0x34] sm:$0xf] %vm16726_vm2, %v6667_v41  ;;  %v6633_v29 = vsel %vm12515_vm1, %v6625_v37, %v6632_v19  ;;  %v6777_v51 = vsel %vm11925_vm3, %v6634_v35, %v10377_v48  ;;  %v6702_v27 = vrot.slane %v6697_v36, 4  ;;  %v6596_v60 = vpack.c.bf16 %v6580_v45, %v6580_v45  ;;  %vm16730_vm14 = vmmov %vm16726_vm2 }
 0x980   : >> { %10388 = vst [vmem:[%s14949_s3 + $0x38] sm:$0x1] %v6791_v61  ;;  %v6582_v39 = vadd.f32 %v14938_v47, %v6562_v34  ;;  %v6516_v24 = vsel %vm6515_vm10, %v15129_v20, %v6512_v32  ;;  %v6701_v37 = vsel %vm12515_vm1, %v6693_v16, %v6700_v44  ;;  %v10402_v16 = vld [vmem:[%s14949_s3 + $0x5c] sm:$0x1] }
 0x981   : >> { %10376 = vst.msk [vmem:[%s14949_s3 + $0x1c] sm:$0xf] %vm16727_vm7, %v6633_v29  ;;  %v6805_v46 = vsel %vm11925_vm3, %v6702_v27, %v10397_v4  ;;  %v6541_v59 = vmul.f32 %v6516_v24, %v14920_v2  ;;  %v6712_v58 = vshrl.u32 %v6596_v60, 16  ;;  %v6715_v43 = vshll.u32 %v6596_v60, 16 }
 0x982   : >> { %10378 = vst [vmem:[%s14949_s3 + $0x20] sm:$0x1] %v6777_v51  ;;  %v6598_v3 = vpack.c.bf16 %v6582_v39, %v6582_v39  ;;  %v6710_v2 = vrot.slane %v15000_v28, 4 }
 0x983   : >> { %10396 = vst.msk [vmem:[%s14949_s3 + $0x4c] sm:$0xf] %vm16728_vm5, %v6701_v37  ;;  %v6561_v20 = vmul.f32 %v14933_v10, %v6541_v59  ;;  %v6714_v9 = vrot.slane %v6712_v58, 7 }
 0x984   : >> { %10398 = vst [vmem:[%s14949_s3 + $0x50] sm:$0x1] %v6805_v46  ;;  %v6729_v14 = vshrl.u32 %v6598_v3, 16 }
 0x985   : >> { %v6581_v40 = vadd.f32 %v14938_v47, %v6561_v20  ;;  %v6717_v56 = vor.u32 %v6715_v43, %v6714_v9  ;;  %v6719_v42 = vrot.slane %v6714_v9, 4  ;;  %v6732_v47 = vshll.u32 %v6598_v3, 16 }
 0x986   : >> { %v6731_v22 = vrot.slane %v6729_v14, 7 }
 0x987   : >> { %v6597_v26 = vpack.c.bf16 %v6581_v40, %v6581_v40  ;;  %v6718_v10 = vsel %vm12515_vm1, %v6710_v2, %v6717_v56  ;;  %v6812_v23 = vsel %vm11925_vm3, %v6719_v42, %v10402_v16 }
 0x988   : >> { %v6736_v8 = vrot.slane %v6731_v22, 4  ;;  %10401 = vst.msk [vmem:[%s14949_s3 + $0x58] sm:$0xf] %vm16729_vm13, %v6718_v10  ;;  %v6734_v55 = vor.u32 %v6732_v47, %v6731_v22 }
 0x989   : >> { %v6721_v63 = vshrl.u32 %v6597_v26, 16  ;;  %10403 = vst [vmem:[%s14949_s3 + $0x5c] sm:$0x1] %v6812_v23  ;;  %v6724_v57 = vshll.u32 %v6597_v26, 16 }
 0x98a   : >> { %v6819_v28 = vsel %vm11925_vm3, %v6736_v8, %v10407_v53 }
 0x98b   : >> { %10408 = vst [vmem:[%s14949_s3 + $0x68] sm:$0x1] %v6819_v28  ;;  %v6723_v31 = vrot.slane %v6721_v63, 7 }
 0x98d   : >> { %v6726_v17 = vor.u32 %v6724_v57, %v6723_v31  ;;  %v6727_v0 = vrot.slane %v6723_v31, 4  ;;  %4889 = sbr.rel (!%p4887_p7) target bundleno = 1702 (0x6a6), region = 247 }
 0x98f   : >> { %v6735_v5 = vsel %vm12515_vm1, %v6727_v0, %v6734_v55  ;;  %v6815_v33 = vsel %vm12459_vm12, %v6726_v17, %v10404_v62 }
 0x990   : >> { %10405 = vst [vmem:[%s14949_s3 + $0x60] sm:$0xf] %v6815_v33 }
 0x991   : >> { %10406 = vst.msk [vmem:[%s14949_s3 + $0x64] sm:$0xf] %vm16730_vm14, %v6735_v5 }
 0x992 LB: >> { %s16495_s6 = smul.u32 96, %s11714_s1  ;;  %s11755_s26 = smov 24   ;;  %vm16731_vm0 = vsmask.f32 7424  ;;  %s11714_s1 = sphi %s15227_s1, %s6826_s1  }
 0x993   : >> { %s11756_s24 = smov 12   ;;  %s11757_s22 = smov 8   ;;  %vm16732_vm4 = vmmov %vm16731_vm0 }
 0x994   : >> { %s15235_s5 = scalar_lea.vmem [#allocation3], %s16495_s6  ;;  %s11758_s23 = smov 28   ;;  %vm16733_vm8 = vmmov %vm16731_vm0 }
 0x995   : >> { %s11759_s4 = smov 4   ;;  %s11760_s28 = smov 20   ;;  %vm16734_vm2 = vmmov %vm16731_vm0 }
 0x996   : >> { %s11761_s0 = smov 16   ;;  %s11762_s25 = smov 32   ;;  %vm16735_vm10 = vmmov %vm16731_vm0 }
 0x997   : >> { %vm16736_vm7 = vmmov %vm16731_vm0 }
 0x998   : >> { %v10422_v50 = vld [vmem:[%s15235_s5 + $0x3c] sm:$0xff]   ;;  %v11174_v49 = vld [vmem:[%s15235_s5 + $0x30] sm:$0xf0]  ;;  %v6851_v30 = vld [vmem:[%s15235_s5 + $0x38] sm:$0x1] }
 0x999   : >> { %v15239_v7 = vld [vmem:[%s15235_s5 + $0x3c] sm:$0xf0]  ;;  %v11175_v52 = vld [vmem:[%s15235_s5 + $0x30] sm:$0xe]  ;;  %v6987_v18 = vunpack.c.l.b16 %v6851_v30  ;;  %v15245_v38 = vld [vmem:[%s15235_s5 + $0x48] sm:$0xff]   ;;  %7225 = vrot.lane.b32.xlu1 %v10422_v50, %s11756_s24  ;;  %v7308_v39 = vshll.u32 %v10422_v50, 16 }
 0x99a   : >> { %v10468_v25 = vld [vmem:[%s15235_s5 + $0x50] sm:$0x1]  ;;  %v11176_v21 = vor.u32 %v11175_v52, %v11174_v49  ;;  %v7562_v15 = vshrl.u32 %v15245_v38, 16  ;;  %v7564_v48 = vshll.u32 %v15245_v38, 16  ;;  %v10434_v12 = vld [vmem:[%s15235_s5 + $0x44] sm:$0x1]  ;;  %7481 = vrot.lane.b32.xlu2 %v15245_v38, %s11755_s26  ;;  %vm16737_vm5 = vmmov %vm16731_vm0 }
 0x99b   : >> { %v7501_v54 = vunpack.c.l.b16 %v10468_v25  ;;  %v15251_v6 = vld [vmem:[%s15235_s5 + $0x30] sm:$0xff]   ;;  %v6995_v19 = vpack.c.b16 %v6987_v18, %v6987_v18  ;;  %v7245_v61 = vunpack.c.l.b16 %v10434_v12  ;;  %v6847_v4 = vld [vmem:[%s15235_s5 + $0x8] sm:$0x1]  ;;  %v15266_v24 = vld [vmem:[%s15235_s5] sm:$0xff]   ;;  %v7306_v14 = vshrl.u32 %v10422_v50, 16 }
 0x99c   : >> { %v7051_v35 = vshll.u32 %v15251_v6, 16  ;;  %v7149_v36 = vrot.slane %v11176_v21, 1  ;;  %v7566_v41 = vrot.slane %v7564_v48, 1  ;;  %v7049_v32 = vshrl.u32 %v15251_v6, 16  ;;  %v11593_v2 = vld [vmem:[%s15235_s5 + $0x3c] sm:$0xe]  ;;  %vm16738_vm13 = vmmov %vm16731_vm0 }
 0x99d   : >> { %v15257_v45 = vpack.c.b16 %v7501_v54, %v7501_v54  ;;  %v7150_v34 = vrot.slane %v6995_v19, 1  ;;  %v7056_v51 = vshll.u32 %v6995_v19, 16  ;;  %v7253_v60 = vpack.c.b16 %v7245_v61, %v7245_v61  ;;  %v10414_v26 = vld [vmem:[%s15235_s5 + $0xc] sm:$0xff]   ;;  %v11168_v47 = vld [vmem:[%s15235_s5] sm:$0xf0]  ;;  %v15292_v52 = vld [vmem:[%s15235_s5 + $0x3c] sm:$0xff]  }
 0x99e   : >> { %v7053_v29 = vrot.slane %v7051_v35, 1  ;;  %v15262_v44 = vor.u32 %v7566_v41, %v7562_v15  ;;  %v6983_v46 = vunpack.c.l.b16 %v6847_v4  ;;  %v7003_v9 = vshll.u32 %v15266_v24, 16  ;;  %v11595_v10 = vld [vmem:[%s15235_s5 + $0xc] sm:$0xf0]  ;;  %v11169_v63 = vld [vmem:[%s15235_s5] sm:$0xe]  ;;  %vm16739_vm14 = vmmov %vm16731_vm0 }
 0x99f   : >> { %v7569_v27 = vshll.u32 %v15257_v45, 16  ;;  %v7151_v37 = vsel %vm2017_vm15, %v7149_v36, %v7150_v34  ;;  %v7058_v3 = vrot.slane %v7056_v51, 1  ;;  %v7310_v16 = vrot.slane %v7308_v39, 1  ;;  %v10430_v31 = vld [vmem:[%s15235_s5 + $0x14] sm:$0x1]  ;;  %v15307_v51 = vld [vmem:[%s15235_s5 + $0x18] sm:$0xff]  }
 0x9a0   : >> { %7169 = vrot.lane.b32.xlu0 %v7151_v37, %s11757_s22  ;;  %v15270_v58 = vor.u32 %v7053_v29, %v7049_v32  ;;  %v6991_v20 = vpack.c.b16 %v6983_v46, %v6983_v46  ;;  %v7313_v40 = vshll.u32 %v7253_v60, 16  ;;  %v7001_v56 = vshrl.u32 %v15266_v24, 16  ;;  %v11198_v17 = vld [vmem:[%s15235_s5 + $0x48] sm:$0xf0]  ;;  %v11199_v0 = vld [vmem:[%s15235_s5 + $0x48] sm:$0xe] }
 0x9a1   : >> { %v7571_v59 = vrot.slane %v7569_v27, 1  ;;  %v7005_v22 = vrot.slane %v7003_v9, 1  ;;  %v7311_v23 = vor.u32 %v7310_v16, %v7306_v14  ;;  %v11594_v28 = vor.u32 %v11593_v2, %v15239_v7  ;;  %v15295_v7 = vld [vmem:[%s15235_s5 + $0x3c] sm:$0xf0]  ;;  %v11596_v21 = vld [vmem:[%s15235_s5 + $0xc] sm:$0xe] }
 0x9a2   : >> { %v7059_v42 = vsel %vm16732_vm4, %v15270_v58, %v7058_v3  ;;  %v7008_v53 = vshll.u32 %v6991_v20, 16  ;;  %v7315_v8 = vrot.slane %v7313_v40, 1  ;;  %v7406_v55 = vrot.slane %v7253_v60, 1  ;;  %v6852_v54 = vld [vmem:[%s15235_s5 + $0x44] sm:$0x1]  ;;  %vm16740_vm4 = vmmov %vm16731_vm0 }
 0x9a3   : >> { %v7572_v43 = vsel %vm16731_vm0, %v15262_v44, %v7571_v59  ;;  %v7006_v57 = vor.u32 %v7005_v22, %v7001_v56  ;;  %v7405_v5 = vrot.slane %v11594_v28, 1  ;;  %v11170_v33 = vor.u32 %v11169_v63, %v11168_v47  ;;  %v10464_v61 = vld [vmem:[%s15235_s5 + $0x20] sm:$0x1]  ;;  %v10435_v9 = vld [vmem:[%s15235_s5 + $0x50] sm:$0x1] }
 0x9a4   : >> { %7617 = vrot.lane.b32.xlu1 %v7572_v43, %s11758_s23  ;;  %v7010_v62 = vrot.slane %v7008_v53, 1  ;;  %v7316_v50 = vsel %vm16733_vm8, %v7311_v23, %v7315_v8  ;;  %v7241_v30 = vunpack.c.l.b16 %v10430_v31  ;;  %v11200_v18 = vor.u32 %v11199_v0, %v11198_v17  ;;  %v11192_v40 = vld [vmem:[%s15235_s5 + $0x18] sm:$0xf0]  ;;  %v15323_v47 = vld [vmem:[%s15235_s5 + $0xc] sm:$0xff]   ;;  %vm16741_vm8 = vmmov %vm16731_vm0 }
 0x9a5   : >> { %v7407_v49 = vsel %vm2017_vm15, %v7405_v5, %v7406_v55  ;;  %v7137_v15 = vrot.slane %v11170_v33, 1  ;;  %v7138_v48 = vrot.slane %v6991_v20, 1  ;;  %v7260_v12 = vshll.u32 %v10414_v26, 16  ;;  %v11599_v8 = vld [vmem:[%s15235_s5 + $0x3c] sm:$0xe] }
 0x9a6   : >> { %7425 = vrot.lane.b32.xlu2 %v7407_v49, %s11760_s28  ;;  %v7011_v25 = vsel %vm16734_vm2, %v7006_v57, %v7010_v62  ;;  %v7249_v19 = vpack.c.b16 %v7241_v30, %v7241_v30  ;;  %v7661_v35 = vrot.slane %v11200_v18, 1  ;;  %v7662_v36 = vrot.slane %v15257_v45, 1  ;;  %v15326_v63 = vld [vmem:[%s15235_s5 + $0xc] sm:$0xf0]  ;;  %v6848_v5 = vld [vmem:[%s15235_s5 + $0x14] sm:$0x1]  ;;  %vm16742_vm2 = vmmov %vm16731_vm0 }
 0x9a7   : >> { %v6988_v41 = vunpack.c.l.b16 %v6852_v54  ;;  %v7139_v4 = vsel %vm2017_vm15, %v7137_v15, %v7138_v48  ;;  %v7258_v34 = vshrl.u32 %v10414_v26, 16  ;;  %v7262_v32 = vrot.slane %v7260_v12, 1  ;;  %v10458_v54 = vld [vmem:[%s15235_s5 + $0x54] sm:$0xff]  }
 0x9a8   : >> { %7104 = vrot.lane.b32.xlu0 %v7059_v42, %s11759_s4  ;;  %v7265_v29 = vshll.u32 %v7249_v19, 16  ;;  %v7497_v27 = vunpack.c.l.b16 %v10464_v61  ;;  %v7516_v60 = vshll.u32 %v15307_v51, 16  ;;  %v11597_v39 = vor.u32 %v11596_v21, %v11595_v10  ;;  %v11193_v42 = vld [vmem:[%s15235_s5 + $0x18] sm:$0xe]  ;;  %v11187_v61 = vld [vmem:[%s15235_s5 + $0x48] sm:$0xe] }
 0x9a9   : >> { %v7663_v45 = vsel %vm2017_vm15, %v7661_v35, %v7662_v36  ;;  %v6996_v37 = vpack.c.b16 %v6988_v41, %v6988_v41  ;;  %v7263_v46 = vor.u32 %v7262_v32, %v7258_v34  ;;  %v7063_v3 = vshll.u32 %v15292_v52, 16  ;;  %v11601_v15 = vld [vmem:[%s15235_s5 + $0x54] sm:$0xf0]  ;;  %v11186_v41 = vld [vmem:[%s15235_s5 + $0x48] sm:$0xf0] }
 0x9aa   : >> { %v7267_v59 = vrot.slane %v7265_v29, 1  ;;  %v7505_v20 = vpack.c.b16 %v7497_v27, %v7497_v27  ;;  %v7514_v43 = vshrl.u32 %v15307_v51, 16  ;;  %v7393_v14 = vrot.slane %v11597_v39, 1 }
 0x9ab   : >> { %v7394_v16 = vrot.slane %v7249_v19, 1  ;;  %v7518_v2 = vrot.slane %v7516_v60, 1  ;;  %v7068_v56 = vshll.u32 %v6996_v37, 16  ;;  %v7065_v10 = vrot.slane %v7063_v3, 1 }
 0x9ac   : >> { %7361 = vrot.lane.b32.xlu1 %v7316_v50, %s11761_s0  ;;  %v7268_v22 = vsel %vm16735_vm10, %v7263_v46, %v7267_v59  ;;  %v7521_v53 = vshll.u32 %v7505_v20, 16  ;;  %v7246_v23 = vunpack.c.l.b16 %v10435_v9  ;;  %v11194_v55 = vor.u32 %v11193_v42, %v11192_v40  ;;  %v11605_v46 = vld [vmem:[%s15235_s5 + $0xc] sm:$0xe]  ;;  %vm16743_vm10 = vmmov %vm16731_vm0 }
 0x9ad   : >> { %v7395_v28 = vsel %vm2017_vm15, %v7393_v14, %v7394_v16  ;;  %v7070_v31 = vrot.slane %v7068_v56, 1  ;;  %v15332_v57 = vor.u32 %v7518_v2, %v7514_v43  ;;  %v7650_v50 = vrot.slane %v7505_v20, 1 }
 0x9ae   : >> { %7161 = vrot.lane.b32.xlu2 %v7139_v4, %s11757_s22  ;;  %v7523_v62 = vrot.slane %v7521_v53, 1  ;;  %v7254_v0 = vpack.c.b16 %v7246_v23, %v7246_v23  ;;  %v7649_v33 = vrot.slane %v11194_v55, 1  ;;  %v11600_v30 = vor.u32 %v11599_v8, %v15295_v7  ;;  %v10469_v4 = vld [vmem:[%s15235_s5 + $0x5c] sm:$0x1]  ;;  %v10431_v53 = vld [vmem:[%s15235_s5 + $0x20] sm:$0x1] }
 0x9af   : >> { %v6984_v21 = vunpack.c.l.b16 %v6848_v5  ;;  %v7153_v19 = vrot.slane %v6996_v37, 1  ;;  %v7015_v7 = vshll.u32 %v15323_v47, 16  ;;  %v11188_v32 = vor.u32 %v11187_v61, %v11186_v41  ;;  %v10450_v55 = vld [vmem:[%s15235_s5 + $0x24] sm:$0xff]  }
 0x9b0   : >> { %7096 = vrot.lane.b32.xlu0 %v7011_v25, %s11759_s4  ;;  %v7524_v49 = vsel %vm16736_vm7, %v15332_v57, %v7523_v62  ;;  %v7325_v25 = vshll.u32 %v7254_v0, 16  ;;  %v7651_v48 = vsel %vm2017_vm15, %v7649_v33, %v7650_v50  ;;  %v7152_v12 = vrot.slane %v11600_v30, 1  ;;  %v11180_v62 = vld [vmem:[%s15235_s5 + $0x18] sm:$0xf0]  ;;  %v10465_v30 = vld [vmem:[%s15235_s5 + $0x2c] sm:$0x1]  ;;  %vm16744_vm7 = vmmov %vm16731_vm0 }
 0x9b1   : >> { %v6992_v36 = vpack.c.b16 %v6984_v21, %v6984_v21  ;;  %v7013_v27 = vshrl.u32 %v15323_v47, 16  ;;  %v7017_v60 = vrot.slane %v7015_v7, 1  ;;  %v7502_v37 = vunpack.c.l.b16 %v10469_v4  ;;  %v10426_v4 = vld [vmem:[%s15235_s5 + $0x54] sm:$0xff]  }
 0x9b2   : >> { %v7327_v35 = vrot.slane %v7325_v25, 1  ;;  %v7154_v34 = vsel %vm2017_vm15, %v7152_v12, %v7153_v19  ;;  %v7408_v59 = vrot.slane %v11188_v32, 1  ;;  %v7409_v3 = vrot.slane %v7254_v0, 1  ;;  %v6853_v12 = vld [vmem:[%s15235_s5 + $0x50] sm:$0x1] }
 0x9b3   : >> { %v7020_v39 = vshll.u32 %v6992_v36, 16  ;;  %v7576_v20 = vshll.u32 %v10458_v54, 16  ;;  %v7018_v9 = vor.u32 %v7017_v60, %v7013_v27  ;;  %v7510_v14 = vpack.c.b16 %v7502_v37, %v7502_v37 }
 0x9b4   : >> { %7217 = vrot.lane.b32.xlu1 %v10414_v26, %s11756_s24  ;;  %v7061_v26 = vshrl.u32 %v15292_v52, 16  ;;  %v7328_v29 = vsel %vm16738_vm13, %v15262_v44, %v7327_v35  ;;  %v7410_v16 = vsel %vm2017_vm15, %v7408_v59, %v7409_v3  ;;  %v7574_v40 = vshrl.u32 %v10458_v54, 16  ;;  %vm16746_vm13 = vmmov %vm16731_vm0 }
 0x9b5   : >> { %v7022_v43 = vrot.slane %v7020_v39, 1  ;;  %v7578_v2 = vrot.slane %v7576_v20, 1  ;;  %v7581_v56 = vshll.u32 %v7510_v14, 16  ;;  %v6989_v61 = vunpack.c.l.b16 %v6853_v12  ;;  %v11177_v20 = vld [vmem:[%s15235_s5 + $0x48] sm:$0xf0] }
 0x9b6   : >> { %7353 = vrot.lane.b32.xlu2 %v7268_v22, %s11761_s0  ;;  %v7066_v17 = vor.u32 %v7065_v10, %v7061_v26  ;;  %v11606_v26 = vor.u32 %v11605_v46, %v15326_v63  ;;  %v7141_v63 = vrot.slane %v6992_v36, 1  ;;  %v7528_v36 = vshll.u32 %v10450_v55, 16  ;;  %v10436_v46 = vld [vmem:[%s15235_s5 + $0x5c] sm:$0x1] }
 0x9b7   : >> { %v7023_v42 = vsel %vm16739_vm14, %v7018_v9, %v7022_v43  ;;  %v7579_v10 = vor.u32 %v7578_v2, %v7574_v40  ;;  %v7583_v23 = vrot.slane %v7581_v56, 1  ;;  %v6997_v37 = vpack.c.b16 %v6989_v61, %v6989_v61  ;;  %v11611_v2 = vld [vmem:[%s15235_s5 + $0x54] sm:$0xe] }
 0x9b8   : >> { %7681 = vrot.lane.b32.xlu0 %v7663_v45, %s11762_s25  ;;  %v7071_v18 = vsel %vm16737_vm5, %v7066_v17, %v7070_v31  ;;  %v11602_v45 = vld [vmem:[%s15235_s5 + $0x54] sm:$0xe]  ;;  %v11607_v31 = vld [vmem:[%s15235_s5 + $0x24] sm:$0xf0]  ;;  %v11181_v17 = vld [vmem:[%s15235_s5 + $0x18] sm:$0xe] }
 0x9b9   : >> { %v11603_v22 = vor.u32 %v11602_v45, %v11601_v15  ;;  %v7140_v0 = vrot.slane %v11606_v26, 1  ;;  %v7584_v33 = vsel %vm16731_vm0, %v7579_v10, %v7583_v23  ;;  %v7530_v27 = vrot.slane %v7528_v36, 1  ;;  %vm16745_vm5 = vmmov %vm16731_vm0 }
 0x9ba   : >> { %v7080_v9 = vshll.u32 %v6997_v37, 16  ;;  %v7156_v26 = vrot.slane %v6997_v37, 1  ;;  %v7330_v23 = vshrl.u32 %v10426_v4, 16  ;;  %v11202_v37 = vld [vmem:[%s15235_s5 + $0x60] sm:$0xe]  ;;  %vm16747_vm14 = vcmask 1041408  }
 0x9bb   : >> { %v7664_v8 = vrot.slane %v11603_v22, 1  ;;  %v7142_v25 = vsel %vm2017_vm15, %v7140_v0, %v7141_v63  ;;  %vm16748_vm0 = vmmov %vm16747_vm14 }
 0x9bc   : >> { %7473 = vrot.lane.b32.xlu1 %v15307_v51, %s11755_s26  ;;  %v7082_v56 = vrot.slane %v7080_v9, 1 }
 0x9be   : >> { %7609 = vrot.lane.b32.xlu2 %v7524_v49, %s11758_s23  ;;  %v11182_v49 = vor.u32 %v11181_v17, %v11180_v62  ;;  %v7083_v10 = vsel %vm16742_vm2, %v15262_v44, %v7082_v56  ;;  %v15403_v62 = vld [vmem:[%s15235_s5 + $0x24] sm:$0xff]   ;;  %v11172_v44 = vld [vmem:[%s15235_s5 + $0x18] sm:$0xe] }
 0x9bf   : >> { %v15406_v17 = vld [vmem:[%s15235_s5 + $0x24] sm:$0xf0] }
 0x9c0   : >> { %7417 = vrot.lane.b32.xlu0 %v7395_v28, %s11760_s28  ;;  %v7665_v28 = vrot.slane %v7510_v14, 1  ;;  %v7396_v15 = vrot.slane %v11182_v49, 1  ;;  %v7247_v14 = vunpack.c.l.b16 %v10436_v46  ;;  %v10466_v46 = vld [vmem:[%s15235_s5 + $0x38] sm:$0x1] }
 0x9c2   : >> { %v7666_v50 = vsel %vm2017_vm15, %v7664_v8, %v7665_v28  ;;  %v7255_v22 = vpack.c.b16 %v7247_v14, %v7247_v14 }
 0x9c4   : >> { %7106 = vrot.lane.b32.xlu1 %v7071_v18, %s11759_s4  ;;  %v11608_v18 = vld [vmem:[%s15235_s5 + $0x24] sm:$0xe]  ;;  %v7337_v28 = vshll.u32 %v7255_v22, 16 }
 0x9c5   : >> { %v11609_v41 = vor.u32 %v11608_v18, %v11607_v31 }
 0x9c6   : >> { %7171 = vrot.lane.b32.xlu2 %v7154_v34, %s11757_s22  ;;  %v11610_v34 = vld [vmem:[%s15235_s5 + $0x54] sm:$0xf0]  ;;  %v7339_v49 = vrot.slane %v7337_v28, 1 }
 0x9c7   : >> { %v7652_v39 = vrot.slane %v11609_v41, 1  ;;  %v11612_v0 = vor.u32 %v11611_v2, %v11610_v34  ;;  %v11614_v2 = vld [vmem:[%s15235_s5 + $0x24] sm:$0xe] }
 0x9c8   : >> { %7673 = vrot.lane.b32.xlu0 %v7651_v48, %s11762_s25 }
 0x9cc   : >> { %7363 = vrot.lane.b32.xlu1 %v7328_v29, %s11761_s0  ;;  %v7526_v29 = vshrl.u32 %v10450_v55, 16 }
 0x9ce   : >> { %7427 = vrot.lane.b32.xlu2 %v7410_v16, %s11760_s28  ;;  %v7531_v59 = vor.u32 %v7530_v27, %v7526_v29 }
 0x9d0   : >> { %7227 = vrot.lane.b32.xlu0 %v15245_v38, %s11756_s24  ;;  %v7242_v38 = vunpack.c.l.b16 %v10431_v53 }
 0x9d2   : >> { %v7250_v5 = vpack.c.b16 %v7242_v38, %v7242_v38  ;;  %v6849_v38 = vld [vmem:[%s15235_s5 + $0x20] sm:$0x1] }
 0x9d3   : >> { %v6985_v31 = vunpack.c.l.b16 %v6849_v38 }
 0x9d4   : >> { %7098 = vrot.lane.b32.xlu1 %v7023_v42, %s11759_s4  ;;  %v7277_v21 = vshll.u32 %v7250_v5, 16  ;;  %v7397_v48 = vrot.slane %v7250_v5, 1  ;;  %v7332_v42 = vshll.u32 %v10426_v4, 16  ;;  %v11171_v5 = vld [vmem:[%s15235_s5 + $0x18] sm:$0xf0] }
 0x9d5   : >> { %v6993_v18 = vpack.c.b16 %v6985_v31, %v6985_v31 }
 0x9d6   : >> { %7619 = vrot.lane.b32.xlu2 %v7584_v33, %s11758_s23  ;;  %v7279_v19 = vrot.slane %v7277_v21, 1  ;;  %v7398_v7 = vsel %vm2017_vm15, %v7396_v15, %v7397_v48  ;;  %v7334_v8 = vrot.slane %v7332_v42, 1  ;;  %v11173_v15 = vor.u32 %v11172_v44, %v11171_v5  ;;  %v15444_v42 = vld [vmem:[%s15235_s5 + $0x54] sm:$0xff]   ;;  %v8052_v5 = vld [vmem:[%s16452_s18 + $0x10] sm:$0x3] }
 0x9d7   : >> { %v7412_v48 = vrot.slane %v7255_v22, 1  ;;  %v7144_v61 = vrot.slane %v6993_v18, 1  ;;  %v11616_v22 = vld [vmem:[%s15235_s5 + $0x54] sm:$0xf0]  ;;  %v11617_v44 = vld [vmem:[%s15235_s5 + $0x54] sm:$0xe] }
 0x9d8   : >> { %7483 = vrot.lane.b32.xlu0 %v10458_v54, %s11755_s26  ;;  %v7498_v54 = vunpack.c.l.b16 %v10465_v30  ;;  %v7280_v32 = vsel %vm16740_vm4, %v15332_v57, %v7279_v19  ;;  %v15414_v30 = vld [vmem:[%s15235_s5 + $0x60] sm:$0xff]   ;;  %v7143_v41 = vrot.slane %v11173_v15, 1  ;;  %vm16749_vm4 = vmmov %vm16742_vm2 }
 0x9d9   : >> { %v7588_v21 = vshll.u32 %v15414_v30, 16 }
 0x9da   : >> { %v7506_v35 = vpack.c.b16 %v7498_v54, %v7498_v54  ;;  %v7411_v54 = vrot.slane %v11612_v0, 1 }
 0x9db   : >> { %v7590_v34 = vrot.slane %v7588_v21, 1 }
 0x9dc   : >> { %7683 = vrot.lane.b32.xlu1 %v7666_v50, %s11762_s25  ;;  %v7533_v60 = vshll.u32 %v7506_v35, 16  ;;  %v7653_v45 = vrot.slane %v7506_v35, 1  ;;  %v7335_v50 = vor.u32 %v7334_v8, %v7330_v23  ;;  %v7032_v35 = vshll.u32 %v6993_v18, 16  ;;  %v6854_v8 = vld [vmem:[%s15235_s5 + $0x5c] sm:$0x1] }
 0x9de   : >> { %7219 = vrot.lane.b32.xlu2 %v15307_v51, %s11756_s24  ;;  %v7535_v3 = vrot.slane %v7533_v60, 1  ;;  %v11178_v51 = vld [vmem:[%s15235_s5 + $0x48] sm:$0xe]  ;;  %v7654_v43 = vsel %vm2017_vm15, %v7652_v39, %v7653_v45  ;;  %v7340_v19 = vsel %vm16743_vm10, %v7335_v50, %v7339_v49  ;;  %v7034_v27 = vrot.slane %v7032_v35, 1  ;;  %v11201_v45 = vld [vmem:[%s15235_s5 + $0x60] sm:$0xf0] }
 0x9df   : >> { %v11179_v16 = vor.u32 %v11178_v51, %v11177_v20  ;;  %v7284_v39 = vshll.u32 %v15403_v62, 16  ;;  %v11203_v9 = vor.u32 %v11202_v37, %v11201_v45  ;;  %v8066_v50 = vunpack.c.l.b16 %v8052_v5  ;;  %v15488_v45 = vld [vmem:[%s15235_s5 + $0x6c] sm:$0xff]  }
 0x9e0   : >> { %7163 = vrot.lane.b32.xlu0 %v7142_v25, %s11757_s22  ;;  %v7536_v40 = vsel %vm16741_vm8, %v7531_v59, %v7535_v3  ;;  %v10432_v25 = vld [vmem:[%s15235_s5 + $0x2c] sm:$0x1]  ;;  %v7145_v59 = vsel %vm2017_vm15, %v7143_v41, %v7144_v61  ;;  %v7035_v51 = vsel %vm16744_vm7, %v15332_v57, %v7034_v27  ;;  %v6990_v49 = vunpack.c.l.b16 %v6854_v8  ;;  %v10437_v61 = vld [vmem:[%s15235_s5 + $0x68] sm:$0x1]  ;;  %v15491_v37 = vld [vmem:[%s15235_s5 + $0x6c] sm:$0xf0] }
 0x9e1   : >> { %v7155_v53 = vrot.slane %v11179_v16, 1  ;;  %v7243_v36 = vunpack.c.l.b16 %v10432_v25  ;;  %v7286_v14 = vrot.slane %v7284_v39, 1  ;;  %v7667_v57 = vrot.slane %v11203_v9, 1  ;;  %v10763_v27 = vld [vmem:[%s16452_s18 + $0x8] sm:$0xff] }
 0x9e2   : >> { %v8069_v21 = vpack.c.b16 %v8066_v50, %v8066_v50  ;;  %v6998_v41 = vpack.c.b16 %v6990_v49, %v6990_v49  ;;  %v11618_v39 = vor.u32 %v11617_v44, %v11616_v22  ;;  %v15506_v22 = vld [vmem:[%s15235_s5 + $0x24] sm:$0xff]   ;;  %vm16750_vm8 = vcmask 31744  }
 0x9e3   : >> { %v7157_v63 = vsel %vm2017_vm15, %v7155_v53, %v7156_v26  ;;  %v7251_v60 = vpack.c.b16 %v7243_v36, %v7243_v36  ;;  %vm16751_vm10 = vcmask 97280   ;;  %vm16752_vm7 = vcmask 162816  }
 0x9e4   : >> { %7419 = vrot.lane.b32.xlu1 %v7398_v7, %s11760_s28  ;;  %v7586_v7 = vshrl.u32 %v15414_v30, 16  ;;  %v8073_v36 = vsel %vm16748_vm0, %v8069_v21, 0  ;;  %vm16756_vm0 = vcmask 261120  }
 0x9e5   : >> { %v7289_v16 = vshll.u32 %v7251_v60, 16  ;;  %v7400_v18 = vrot.slane %v7251_v60, 1  ;;  %11282 = vmatpush.bf16.msra.mxu3 %v8073_v36  ;;  %8080 = vmatpush.bf16.msra.mxu1 %v8073_v36 }
 0x9e6   : >> { %7475 = vrot.lane.b32.xlu2 %v10450_v55, %s11755_s26  ;;  %v10470_v55 = vld [vmem:[%s15235_s5 + $0x68] sm:$0x1]  ;;  %v15433_v3 = vor.u32 %v7590_v34, %v7586_v7  ;;  %v7087_v7 = vshll.u32 %v15444_v42, 16 }
 0x9e7   : >> { %v7503_v33 = vunpack.c.l.b16 %v10470_v55  ;;  %v7291_v38 = vrot.slane %v7289_v16, 1  ;;  %v11615_v55 = vor.u32 %v11614_v2, %v15406_v17  ;;  %v10762_v16 = vld [vmem:[%s16452_s18] sm:$0xff]  ;;  %v7159_v2 = vrot.slane %v6998_v41, 1 }
 0x9e8   : >> { %7355 = vrot.lane.b32.xlu0 %v7280_v32, %s11761_s0  ;;  %v7413_v32 = vsel %vm2017_vm15, %v7411_v54, %v7412_v48  ;;  %v11195_v48 = vld [vmem:[%s15235_s5 + $0x30] sm:$0xf0] }
 0x9e9   : >> { %v7511_v12 = vpack.c.b16 %v7503_v33, %v7503_v33  ;;  %v7399_v17 = vrot.slane %v11615_v55, 1  ;;  %11283 = vmatpush.bf16.msra.mxu3 %v10763_v27  ;;  %8081 = vmatpush.bf16.msra.mxu1 %v10763_v27 }
 0x9eb   : >> { %v7593_v29 = vshll.u32 %v7511_v12, 16  ;;  %v7668_v53 = vrot.slane %v7511_v12, 1  ;;  %v11196_v12 = vld [vmem:[%s15235_s5 + $0x30] sm:$0xe]  ;;  %v7401_v34 = vsel %vm2017_vm15, %v7399_v17, %v7400_v18 }
 0x9ec   : >> { %7675 = vrot.lane.b32.xlu1 %v7654_v43, %s11762_s25  ;;  %v7282_v43 = vshrl.u32 %v15403_v62, 16 }
 0x9ed   : >> { %v7595_v20 = vrot.slane %v7593_v29, 1  ;;  %v7669_v28 = vsel %vm2017_vm15, %v7667_v57, %v7668_v53  ;;  %v10761_v29 = vld [vmem:[%s16450_s16 + $0x8] sm:$0xff]  ;;  %11284 = vmatpush.bf16.msra.mxu3 %v10762_v16  ;;  %8082 = vmatpush.bf16.msra.mxu1 %v10762_v16 }
 0x9ee   : >> { %7108 = vrot.lane.b32.xlu2 %v7083_v10, %s11759_s4  ;;  %v7287_v26 = vor.u32 %v7286_v14, %v7282_v43  ;;  %v10760_v14 = vld [vmem:[%s16450_s16] sm:$0xff]  ;;  %v15509_v57 = vld [vmem:[%s15235_s5 + $0x24] sm:$0xf0] }
 0x9ef   : >> { %v7596_v56 = vsel %vm16745_vm5, %v15433_v3, %v7595_v20  ;;  %v7248_v20 = vunpack.c.l.b16 %v10437_v61  ;;  %vm16753_vm5 = vmmov %vm16742_vm2 }
 0x9f0   : >> { %7611 = vrot.lane.b32.xlu0 %v7536_v40, %s11758_s23  ;;  %v7499_v40 = vunpack.c.l.b16 %v10466_v46  ;;  %v7292_v31 = vsel %vm16746_vm13, %v7287_v26, %v7291_v38  ;;  %v7085_v46 = vshrl.u32 %v15444_v42, 16  ;;  %v11189_v26 = vld [vmem:[%s15235_s5 + $0x60] sm:$0xf0]  ;;  %v11190_v38 = vld [vmem:[%s15235_s5 + $0x60] sm:$0xe]  ;;  %vm16754_vm13 = vcmask 228352  }
 0x9f1   : >> { %v11191_v5 = vor.u32 %v11190_v38, %v11189_v26 }
 0x9f2   : >> { %v15447_v10 = vpack.c.b16 %v7499_v40, %v7499_v40  ;;  %v7158_v40 = vrot.slane %v11618_v39, 1 }
 0x9f3   : >> { %v7414_v21 = vrot.slane %v11191_v5, 1 }
 0x9f4   : >> { %7229 = vrot.lane.b32.xlu1 %v10426_v4, %s11756_s24  ;;  %v15422_v4 = vpop.permute.xlu2 %7481  ;;  %v7545_v0 = vshll.u32 %v15447_v10, 16  ;;  %v7656_v43 = vrot.slane %v15447_v10, 1  ;;  %v10471_v10 = vld [vmem:[%s15235_s5 + $0x74] sm:$0x1] }
 0x9f5   : >> { %v7504_v44 = vunpack.c.l.b16 %v10471_v10 }
 0x9f6   : >> { %7365 = vrot.lane.b32.xlu2 %v7340_v19, %s11761_s0  ;;  %v7547_v54 = vrot.slane %v7545_v0, 1 }
 0x9f8   : >> { %7173 = vrot.lane.b32.xlu0 %v7157_v63, %s11757_s22  ;;  %v7910_v63 = vld [vmem:[%s16450_s16 + $0x10] sm:$0x3]  ;;  %v7548_v60 = vsel %vm16749_vm4, %v15270_v58, %v7547_v54  ;;  %vm16757_vm4 = vmmov %vm16750_vm8 }
 0x9f9   : >> { %v7964_v33 = vunpack.c.l.b16 %v7910_v63  ;;  %v7160_v63 = vsel %vm2017_vm15, %v7158_v40, %v7159_v2 }
 0x9fb   : >> { %v7967_v25 = vpack.c.b16 %v7964_v33, %v7964_v33  ;;  %v6850_v33 = vld [vmem:[%s15235_s5 + $0x2c] sm:$0x1] }
 0x9fc   : >> { %7485 = vrot.lane.b32.xlu1 %v15414_v30, %s11755_s26 }
 0x9fd   : >> { %v7997_v35 = vsel %vm16747_vm14, %v7967_v25, 0  ;;  %v6986_v25 = vunpack.c.l.b16 %v6850_v33  ;;  %vm16755_vm14 = vmmov %vm16742_vm2 }
 0x9fe   : >> { %7100 = vrot.lane.b32.xlu2 %v7035_v51, %s11759_s4  ;;  %11279 = vmatpush.bf16.msra.mxu2 %v7997_v35  ;;  %v7092_v51 = vshll.u32 %v6998_v41, 16 }
 0x9ff   : >> { %8004 = vmatpush.bf16.msra.mxu0 %v7997_v35 }
 0xa00   : >> { %7429 = vrot.lane.b32.xlu0 %v7413_v32, %s11760_s28  ;;  %v15449_v23 = vpop.permute.xlu2 %7425  ;;  %v11197_v32 = vor.u32 %v11196_v12, %v11195_v48  ;;  %v7094_v55 = vrot.slane %v7092_v51, 1  ;;  %v15525_v48 = vpack.c.b16 %v7504_v44, %v7504_v44  ;;  %v7600_v12 = vshll.u32 %v15488_v45, 16  ;;  %v10454_v44 = vld [vmem:[%s15235_s5 + $0x3c] sm:$0xff]  }
 0xa01   : >> { %v7037_v51 = vshrl.u32 %v15506_v22, 16 }
 0xa02   : >> { %11280 = vmatpush.bf16.msra.mxu2 %v10761_v29  ;;  %v7655_v9 = vrot.slane %v11197_v32, 1  ;;  %v7039_v32 = vshll.u32 %v15506_v22, 16  ;;  %v7605_v39 = vshll.u32 %v15525_v48, 16 }
 0xa03   : >> { %8005 = vmatpush.bf16.msra.mxu0 %v10761_v29 }
 0xa04   : >> { %7165 = vrot.lane.b32.xlu1 %v7145_v59, %s11757_s22  ;;  %v7089_v59 = vrot.slane %v7087_v7, 1  ;;  %v7607_v16 = vrot.slane %v7605_v39, 1  ;;  %v7552_v39 = vshll.u32 %v10454_v44, 16 }
 0xa06   : >> { %7685 = vrot.lane.b32.xlu2 %v7669_v28, %s11762_s25  ;;  %v7090_v8 = vor.u32 %v7089_v59, %v7085_v46  ;;  %v7256_v28 = vpack.c.b16 %v7248_v20, %v7248_v20  ;;  %11281 = vmatpush.bf16.msra.mxu2 %v10760_v14  ;;  %v11620_v46 = vld [vmem:[%s15235_s5 + $0x24] sm:$0xe]  ;;  %v11623_v59 = vld [vmem:[%s15235_s5 + $0x6c] sm:$0xe] }
 0xa07   : >> { %8006 = vmatpush.bf16.msra.mxu0 %v10760_v14  ;;  %v11621_v38 = vor.u32 %v11620_v46, %v15509_v57  ;;  %v15565_v57 = vld [vmem:[%s15235_s5 + $0x3c] sm:$0xf0] }
 0xa08   : >> { %7621 = vrot.lane.b32.xlu0 %v7596_v56, %s11758_s23  ;;  %v15466_v15 = vpop.permute.xlu2 %7161  ;;  %v7349_v49 = vshll.u32 %v7256_v28, 16  ;;  %v7095_v18 = vsel %vm16742_vm2, %v7090_v8, %v7094_v55  ;;  %v7415_v54 = vrot.slane %v7256_v28, 1  ;;  %v11624_v55 = vor.u32 %v11623_v59, %v15491_v37 }
 0xa0a   : >> { %v7351_v41 = vrot.slane %v7349_v49, 1  ;;  %v7416_v27 = vsel %vm2017_vm15, %v7414_v21, %v7415_v54  ;;  %v11183_v54 = vld [vmem:[%s15235_s5 + $0x30] sm:$0xf0] }
 0xa0b   : >> { %v15470_v19 = vpop.permute.xlu1 %7225 }
 0xa0c   : >> { %7357 = vrot.lane.b32.xlu1 %v7292_v31, %s11761_s0  ;;  %v7657_v31 = vsel %vm2017_vm15, %v7655_v9, %v7656_v43  ;;  %v7352_v20 = vsel %vm16753_vm5, %v15433_v3, %v7351_v41  ;;  %v7041_v9 = vrot.slane %v7039_v32, 1  ;;  %v10433_v3 = vld [vmem:[%s15235_s5 + $0x38] sm:$0x1]  ;;  %vm16762_vm5 = vcmask 162816  }
 0xa0e   : >> { %7421 = vrot.lane.b32.xlu2 %v7401_v34, %s11760_s28  ;;  %v6994_v34 = vpack.c.b16 %v6986_v25, %v6986_v25 }
 0xa10   : >> { %7221 = vrot.lane.b32.xlu0 %v15403_v62, %s11756_s24  ;;  %v15503_v56 = vpop.permute.xlu2 %7353  ;;  %v7044_v43 = vshll.u32 %v6994_v34, 16  ;;  %v7147_v33 = vrot.slane %v6994_v34, 1 }
 0xa12   : >> { %v7170_v62 = vpop.permute.xlu0 %7169  ;;  %v7046_v26 = vrot.slane %v7044_v43, 1 }
 0xa14   : >> { %7613 = vrot.lane.b32.xlu1 %v7548_v60, %s11758_s23  ;;  %v7602_v60 = vrot.slane %v7600_v12, 1  ;;  %v10467_v12 = vld [vmem:[%s15235_s5 + $0x44] sm:$0x1] }
 0xa15   : >> { %v7500_v32 = vunpack.c.l.b16 %v10467_v12 }
 0xa16   : >> { %v7618_v53 = vpop.permute.xlu1 %7617  ;;  %7677 = vrot.lane.b32.xlu2 %v7657_v31, %s11762_s25 }
 0xa18   : >> { %7477 = vrot.lane.b32.xlu0 %v15251_v6, %s11755_s26  ;;  %v15528_v35 = vpop.permute.xlu2 %7609 }
 0xa1a   : >> { %v7105_v0 = vpop.permute.xlu0 %7104 }
 0xa1b   : >> { %v7698_v50 = vsel %vm16750_vm8, %v15251_v6, %v7105_v0  ;;  %v7244_v0 = vunpack.c.l.b16 %v10433_v3  ;;  %vm16758_vm8 = vmmov %vm16742_vm2 }
 0xa1c   : >> { %v7714_v17 = vsel %vm2587_vm9, %v7698_v50, %v7170_v62  ;;  %7175 = vrot.lane.b32.xlu1 %v7160_v63, %s11757_s22  ;;  %v7598_v62 = vshrl.u32 %v15488_v45, 16  ;;  %vm16759_vm2 = vmmov %vm16751_vm10 }
 0xa1d   : >> { %v7730_v7 = vsel %vm16751_vm10, %v7714_v17, %v15470_v19  ;;  %v7252_v25 = vpack.c.b16 %v7244_v0, %v7244_v0  ;;  %vm16760_vm10 = vcmask 289792  }
 0xa1e   : >> { %v7362_v36 = vpop.permute.xlu1 %7361  ;;  %7231 = vrot.lane.b32.xlu2 %v15414_v30, %s11756_s24  ;;  %v7603_v14 = vor.u32 %v7602_v60, %v7598_v62  ;;  %v7042_v30 = vor.u32 %v7041_v9, %v7037_v51 }
 0xa1f   : >> { %v7746_v61 = vsel %vm2621_vm11, %v7730_v7, %v7362_v36  ;;  %v7671_v36 = vrot.slane %v15525_v48, 1  ;;  %v11184_v7 = vld [vmem:[%s15235_s5 + $0x30] sm:$0xe]  ;;  %v11626_v48 = vld [vmem:[%s15235_s5 + $0x3c] sm:$0xe]  ;;  %v7403_v9 = vrot.slane %v7252_v25, 1 }
 0xa20   : >> { %7110 = vrot.lane.b32.xlu0 %v7095_v18, %s11759_s4  ;;  %v7762_v19 = vsel %vm16752_vm7, %v7746_v61, %v15449_v23  ;;  %v15548_v40 = vpop.permute.xlu2 %7171  ;;  %v7608_v28 = vsel %vm16755_vm14, %v7603_v14, %v7607_v16  ;;  %v7047_v37 = vsel %vm16758_vm8, %v7042_v30, %v7046_v26  ;;  %vm16761_vm7 = vmmov %vm16760_vm10  ;;  %v7301_v61 = vshll.u32 %v7252_v25, 16 }
 0xa21   : >> { %v7778_v23 = vsel %vm2655_vm6, %v7762_v19, %v15422_v4  ;;  %v7550_v14 = vshrl.u32 %v10454_v44, 16  ;;  %vm16764_vm14 = vcmask 293888  }
 0xa22   : >> { %v7097_v29 = vpop.permute.xlu0 %7096  ;;  %v7794_v10 = vsel %vm16754_vm13, %v7778_v23, %v7618_v53  ;;  %v7146_v53 = vrot.slane %v11621_v38, 1  ;;  %v7303_v60 = vrot.slane %v7301_v61, 1  ;;  %vm16763_vm13 = vmmov %vm16758_vm8  ;;  %vm16767_vm8 = vcmask 261120  }
 0xa23   : >> { %v7690_v4 = vsel %vm16757_vm4, %v15266_v24, %v7097_v29  ;;  %v7670_v24 = vrot.slane %v11624_v55, 1  ;;  %vm16766_vm4 = vcmask 228352  }
 0xa24   : >> { %7431 = vrot.lane.b32.xlu1 %v7416_v27, %s11760_s28  ;;  %v7148_v41 = vsel %vm2017_vm15, %v7146_v53, %v7147_v33  ;;  %v11185_v27 = vor.u32 %v11184_v7, %v11183_v54  ;;  %v7304_v43 = vsel %vm16763_vm13, %v15270_v58, %v7303_v60  ;;  %v11627_v58 = vor.u32 %v11626_v48, %v15565_v57 }
 0xa25   : >> { %v7672_v62 = vsel %vm2017_vm15, %v7670_v24, %v7671_v36 }
 0xa26   : >> { %v7218_v2 = vpop.permute.xlu1 %7217  ;;  %7487 = vrot.lane.b32.xlu2 %v15488_v45, %s11755_s26  ;;  %v7706_v45 = vsel %vm2587_vm9, %v7690_v4, %v15466_v15  ;;  %v7402_v51 = vrot.slane %v11185_v27, 1  ;;  %v7658_v0 = vrot.slane %v11627_v58, 1 }
 0xa27   : >> { %v7722_v21 = vsel %vm16759_vm2, %v7706_v45, %v7218_v2  ;;  %vm16768_vm2 = vcmask 31744  }
 0xa28   : >> { %7367 = vrot.lane.b32.xlu0 %v7352_v20, %s11761_s0  ;;  %v15569_v17 = vpop.permute.xlu2 %7427  ;;  %v7738_v34 = vsel %vm2621_vm11, %v7722_v21, %v15503_v56  ;;  %v7508_v20 = vpack.c.b16 %v7500_v32, %v7500_v32  ;;  %v7404_v38 = vsel %vm2017_vm15, %v7402_v51, %v7403_v9 }
 0xa2a   : >> { %v7682_v8 = vpop.permute.xlu0 %7681  ;;  %v7557_v16 = vshll.u32 %v7508_v20, 16  ;;  %v7659_v4 = vrot.slane %v7508_v20, 1 }
 0xa2b   : >> { %v7810_v31 = vsel %vm16756_vm0, %v7794_v10, %v7682_v8  ;;  %vm16765_vm0 = vmmov %vm16764_vm14 }
 0xa2c   : >> { %v7833_v63 = vunpack.c.l.b16 %v7810_v31  ;;  %v7834_v5 = vunpack.c.h.b16 %v7810_v31  ;;  %7623 = vrot.lane.b32.xlu1 %v7608_v28, %s11758_s23  ;;  %v7559_v8 = vrot.slane %v7557_v16, 1  ;;  %v11480_v16 = vld [vmem:[%s15235_s5 + $0x48] sm:$0xff]  }
 0xa2e   : >> { %v7849_v50 = vpack.c.b16 %v7833_v63, %v7833_v63  ;;  %v7850_v49 = vpack.c.b16 %v7834_v5, %v7834_v5  ;;  %v7474_v18 = vpop.permute.xlu1 %7473  ;;  %7167 = vrot.lane.b32.xlu2 %v7148_v41, %s11757_s22 }
 0xa30   : >> { %7882 = vst.msk [vmem:[#allocation5 + $0x20] sm:$0xf] %vm16760_vm10, %v7849_v50  ;;  %7102 = vrot.lane.b32.xlu0 %v7047_v37, %s11759_s4  ;;  %v7620_v19 = vpop.permute.xlu2 %7619  ;;  %vm16769_vm10 = vmmov %vm16761_vm7  ;;  %v7660_v37 = vsel %vm2017_vm15, %v7658_v0, %v7659_v4 }
 0xa31   : >> { %7883 = vst.msk [vmem:[#allocation5 + $0x24] sm:$0xf] %vm16761_vm7, %v7850_v49 }
 0xa32   : >> { %v7418_v15 = vpop.permute.xlu0 %7417 }
 0xa33   : >> { %v7754_v29 = vsel %vm16762_vm5, %v7738_v34, %v7418_v15  ;;  %vm16770_vm5 = vmmov %vm16763_vm13  ;;  %vm16771_vm13 = vcmask 97280  }
 0xa34   : >> { %7223 = vrot.lane.b32.xlu1 %v15251_v6, %s11756_s24  ;;  %v7770_v46 = vsel %vm2655_vm6, %v7754_v29, %v7474_v18  ;;  %v7554_v6 = vrot.slane %v7552_v39, 1 }
 0xa35   : >> { %v7786_v2 = vsel %vm16766_vm4, %v7770_v46, %v15528_v35  ;;  %vm16773_vm4 = vcmask 162816  }
 0xa36   : >> { %v7107_v59 = vpop.permute.xlu1 %7106  ;;  %7359 = vrot.lane.b32.xlu2 %v7304_v43, %s11761_s0  ;;  %v7555_v10 = vor.u32 %v7554_v6, %v7550_v14 }
 0xa37   : >> { %v7700_v35 = vsel %vm16768_vm2, %v15292_v52, %v7107_v59  ;;  %vm16775_vm2 = vcmask 261120  }
 0xa38   : >> { %7687 = vrot.lane.b32.xlu0 %v7672_v62, %s11762_s25  ;;  %v10756_v56 = vld [vmem:[#allocation5 + $0x20] sm:$0xff]  ;;  %v7220_v63 = vpop.permute.xlu2 %7219  ;;  %v7560_v5 = vsel %vm16770_vm5, %v7555_v10, %v7559_v8  ;;  %vm16777_vm5 = vmmov %vm16761_vm7 }
 0xa39   : >> { %10524 = vmatmul.msk.bf16.vlgmr.msra.gmra.mxu2 %vm16764_vm14, %v10756_v56  ;;  %10540 = vmatmul.msk.bf16.vlgmr.msra.gmra.mxu3 %vm16765_vm0, %v10756_v56  ;;  %vm16772_vm14 = vmmov %vm16765_vm0 }
 0xa3a   : >> { %v7674_v23 = vpop.permute.xlu0 %7673 }
 0xa3b   : >> { %v7802_v3 = vsel %vm16767_vm8, %v7786_v2, %v7674_v23  ;;  %vm16774_vm8 = vcmask 228352  }
 0xa3c   : >> { %v7825_v30 = vunpack.c.l.b16 %v7802_v3  ;;  %v7826_v26 = vunpack.c.h.b16 %v7802_v3  ;;  %7479 = vrot.lane.b32.xlu1 %v10454_v44, %s11755_s26  ;;  %v7716_v44 = vsel %vm2587_vm9, %v7700_v35, %v15548_v40 }
 0xa3e   : >> { %v7841_v28 = vpack.c.b16 %v7825_v30, %v7825_v30  ;;  %v7842_v55 = vpack.c.b16 %v7826_v26, %v7826_v26  ;;  %v7364_v31 = vpop.permute.xlu1 %7363  ;;  %7615 = vrot.lane.b32.xlu2 %v7560_v5, %s11758_s23  ;;  %s16806_s23 = smul.u32 96, %s11714_s1  ;;  %s6826_s1 = sadd.s32 1, %s11714_s1  }
 0xa3f   : >> { %p6823_p8 = scmp.ge.s32.totalorder %s6826_s1, 2  }
 0xa40   : >> { %7874 = vst.msk [vmem:[#allocation5] sm:$0xf] %vm16769_vm10, %v7841_v28  ;;  %7423 = vrot.lane.b32.xlu0 %v7404_v38, %s11760_s28  ;;  %v7476_v24 = vpop.permute.xlu2 %7475  ;;  %vm16776_vm10 = vcmask 31744   ;;  %s15706_s4 = scalar_lea.vmem [#allocation2], %s16806_s23  ;;  %s15837_s28 = smov (%p6823_p8), 0  }
 0xa41   : >> { %7875 = vst.msk [vmem:[#allocation5 + $0x4] sm:$0xf] %vm16761_vm7, %v7842_v55 }
 0xa42   : >> { %v7228_v57 = vpop.permute.xlu0 %7227 }
 0xa43   : >> { %v7732_v52 = vsel %vm16771_vm13, %v7716_v44, %v7228_v57 }
 0xa44   : >> { %v7748_v33 = vsel %vm2621_vm11, %v7732_v52, %v7364_v31 }
 0xa45   : >> { %v7764_v40 = vsel %vm16773_vm4, %v7748_v33, %v15569_v17 }
 0xa46   : >> { %v7099_v53 = vpop.permute.xlu1 %7098 }
 0xa47   : >> { %v7692_v61 = vsel %vm16776_vm10, %v15323_v47, %v7099_v53  ;;  %vm16780_vm10 = vmmov %vm16777_vm5 }
 0xa48   : >> { %7679 = vrot.lane.b32.xlu0 %v7660_v37, %s11762_s25  ;;  %v10752_v50 = vld [vmem:[#allocation5] sm:$0xff]  ;;  %v7109_v15 = vpop.permute.xlu2 %7108  ;;  %v11481_v37 = vld [vmem:[%s15235_s5 + $0x18] sm:$0xff]  }
 0xa49   : >> { %10520 = vmatmul.msk.bf16.vlgmr.msra.gmra.mxu0 %vm16772_vm14, %v10752_v50  ;;  %10536 = vmatmul.msk.bf16.vlgmr.msra.gmra.mxu1 %vm16765_vm0, %v10752_v50  ;;  %vm16778_vm14 = vmmov %vm16773_vm4 }
 0xa4a   : >> { %v7484_v49 = vpop.permute.xlu0 %7483  ;;  %vm16779_vm4 = vmmov %vm16765_vm0 }
 0xa4b   : >> { %v7780_v45 = vsel %vm2655_vm6, %v7764_v40, %v7484_v49 }
 0xa4c   : >> { %v7796_v25 = vsel %vm16774_vm8, %v7780_v45, %v7620_v19 }
 0xa4e   : >> { %v7684_v18 = vpop.permute.xlu1 %7683 }
 0xa4f   : >> { %v7812_v21 = vsel %vm16775_vm2, %v7796_v25, %v7684_v18 }
 0xa50   : >> { %v7835_v54 = vunpack.c.l.b16 %v7812_v21  ;;  %v7836_v12 = vunpack.c.h.b16 %v7812_v21  ;;  %v7366_v47 = vpop.permute.xlu2 %7365 }
 0xa52   : >> { %v7164_v36 = vpop.permute.xlu0 %7163  ;;  %v7851_v7 = vpack.c.b16 %v7835_v54, %v7835_v54  ;;  %v7852_v41 = vpack.c.b16 %v7836_v12, %v7836_v12 }
 0xa53   : >> { %v7708_v34 = vsel %vm2587_vm9, %v7692_v61, %v7164_v36 }
 0xa54   : >> { %7884 = vst.msk [vmem:[#allocation5 + $0x28] sm:$0xf] %vm16761_vm7, %v7851_v7  ;;  %v7724_v29 = vsel %vm16771_vm13, %v7708_v34, %v7220_v63  ;;  %vm16781_vm7 = vmmov %vm16777_vm5 }
 0xa55   : >> { %7885 = vst.msk [vmem:[#allocation5 + $0x2c] sm:$0xf] %vm16777_vm5, %v7852_v41  ;;  %vm16782_vm5 = vcmask 31744  }
 0xa56   : >> { %v7420_v17 = vpop.permute.xlu1 %7419  ;;  %v7702_v2 = vsel %vm16782_vm5, %v11480_v16, %v7109_v15 }
 0xa58   : >> { %v7101_v14 = vpop.permute.xlu2 %7100 }
 0xa5a   : >> { %v7356_v32 = vpop.permute.xlu0 %7355 }
 0xa5b   : >> { %v7740_v27 = vsel %vm2621_vm11, %v7724_v29, %v7356_v32 }
 0xa5c   : >> { %v10757_v62 = vld [vmem:[#allocation5 + $0x28] sm:$0xff]  ;;  %v7756_v48 = vsel %vm16778_vm14, %v7740_v27, %v7420_v17  ;;  %vm16783_vm14 = vmmov %vm16765_vm0 }
 0xa5d   : >> { %10525 = vmatmul.msk.bf16.gmra.mxu2 %vm16765_vm0, %v10757_v62  ;;  %10541 = vmatmul.msk.bf16.gmra.mxu3 %vm16779_vm4, %v10757_v62  ;;  %v7772_v39 = vsel %vm2655_vm6, %v7756_v48, %v7476_v24  ;;  %vm16784_vm4 = vcmask 162816  }
 0xa5e   : >> { %v7676_v60 = vpop.permute.xlu1 %7675 }
 0xa60   : >> { %v7686_v58 = vpop.permute.xlu2 %7685 }
 0xa62   : >> { %v7612_v46 = vpop.permute.xlu0 %7611 }
 0xa63   : >> { %v7788_v59 = vsel %vm16774_vm8, %v7772_v39, %v7612_v46 }
 0xa64   : >> { %v7804_v19 = vsel %vm16775_vm2, %v7788_v59, %v7676_v60 }
 0xa65   : >> { %v7827_v20 = vunpack.c.l.b16 %v7804_v19  ;;  %v7828_v56 = vunpack.c.h.b16 %v7804_v19 }
 0xa66   : >> { %v7230_v43 = vpop.permute.xlu1 %7229 }
 0xa67   : >> { %v7843_v51 = vpack.c.b16 %v7827_v20, %v7827_v20  ;;  %v7844_v9 = vpack.c.b16 %v7828_v56, %v7828_v56 }
 0xa68   : >> { %v7422_v5 = vpop.permute.xlu2 %7421 }
 0xa69   : >> { %7876 = vst.msk [vmem:[#allocation5 + $0x8] sm:$0xf] %vm16780_vm10, %v7843_v51  ;;  %vm16785_vm10 = vmmov %vm16782_vm5 }
 0xa6a   : >> { %7877 = vst.msk [vmem:[#allocation5 + $0xc] sm:$0xf] %vm16781_vm7, %v7844_v9  ;;  %v7174_v6 = vpop.permute.xlu0 %7173  ;;  %v7694_v53 = vsel %vm16785_vm10, %v11481_v37, %v7101_v14  ;;  %vm16786_vm5 = vmmov %vm16781_vm7 }
 0xa6b   : >> { %v7718_v3 = vsel %vm2587_vm9, %v7702_v2, %v7174_v6  ;;  %vm16789_vm10 = vmmov %vm16786_vm5 }
 0xa6c   : >> { %v7734_v38 = vsel %vm16771_vm13, %v7718_v3, %v7230_v43 }
 0xa6d   : >> { %v7750_v10 = vsel %vm2621_vm11, %v7734_v38, %v7366_v47 }
 0xa6e   : >> { %v7486_v23 = vpop.permute.xlu1 %7485 }
 0xa70   : >> { %v7678_v45 = vpop.permute.xlu2 %7677 }
 0xa71   : >> { %v10753_v30 = vld [vmem:[#allocation5 + $0x8] sm:$0xff] }
 0xa72   : >> { %v7430_v26 = vpop.permute.xlu0 %7429  ;;  %10521 = vmatmul.msk.bf16.gmra.mxu0 %vm16783_vm14, %v10753_v30  ;;  %10537 = vmatmul.msk.bf16.gmra.mxu1 %vm16765_vm0, %v10753_v30  ;;  %vm16787_vm14 = vmmov %vm16784_vm4 }
 0xa73   : >> { %v7766_v8 = vsel %vm16784_vm4, %v7750_v10, %v7430_v26  ;;  %vm16788_vm4 = vmmov %vm16765_vm0 }
 0xa74   : >> { %v7782_v55 = vsel %vm2655_vm6, %v7766_v8, %v7486_v23 }
 0xa76   : >> { %v7166_v28 = vpop.permute.xlu1 %7165 }
 0xa77   : >> { %v7710_v50 = vsel %vm2587_vm9, %v7694_v53, %v7166_v28 }
 0xa78   : >> { %v7232_v34 = vpop.permute.xlu2 %7231 }
 0xa7a   : >> { %v7622_v35 = vpop.permute.xlu0 %7621 }
 0xa7b   : >> { %v7798_v31 = vsel %vm16774_vm8, %v7782_v55, %v7622_v35 }
 0xa7c   : >> { %v7814_v0 = vsel %vm16775_vm2, %v7798_v31, %v7686_v58 }
 0xa7d   : >> { %v7837_v4 = vunpack.c.l.b16 %v7814_v0  ;;  %v7838_v63 = vunpack.c.h.b16 %v7814_v0 }
 0xa7e   : >> { %v7358_v52 = vpop.permute.xlu1 %7357 }
 0xa7f   : >> { %v7853_v44 = vpack.c.b16 %v7837_v4, %v7837_v4  ;;  %v7854_v57 = vpack.c.b16 %v7838_v63, %v7838_v63  ;;  %v15690_v4 = vld [vmem:[%s16451_s17] ss:$0 sm:$0xff] }
 0xa80   : >> { %v7488_v48 = vpop.permute.xlu2 %7487  ;;  %v15695_v63 = vld [vmem:[%s16453_s19] ss:$0 sm:$0xff] }
 0xa81   : >> { %7886 = vst.msk [vmem:[#allocation5 + $0x30] sm:$0xf] %vm16781_vm7, %v7853_v44  ;;  %vm16790_vm7 = vmmov %vm16786_vm5 }
 0xa82   : >> { %7887 = vst.msk [vmem:[#allocation5 + $0x34] sm:$0xf] %vm16786_vm5, %v7854_v57  ;;  %v7222_v33 = vpop.permute.xlu0 %7221  ;;  %vm16791_vm5 = vcmask 31744  }
 0xa83   : >> { %v7726_v49 = vsel %vm16771_vm13, %v7710_v50, %v7222_v33  ;;  %vm16792_vm13 = vmmov %vm16765_vm0 }
 0xa84   : >> { %v7742_v40 = vsel %vm2621_vm11, %v7726_v49, %v7358_v52 }
 0xa85   : >> { %v7758_v25 = vsel %vm16787_vm14, %v7742_v40, %v7422_v5  ;;  %vm16793_vm14 = vmmov %vm16765_vm0 }
 0xa86   : >> { %v7614_v24 = vpop.permute.xlu1 %7613 }
 0xa88   : >> { %v7168_v20 = vpop.permute.xlu2 %7167 }
 0xa89   : >> { %v10758_v18 = vld [vmem:[#allocation5 + $0x30] sm:$0xff] }
 0xa8a   : >> { %v7478_v21 = vpop.permute.xlu0 %7477  ;;  %10526 = vmatmul.msk.bf16.gmra.mxu2 %vm16765_vm0, %v10758_v18  ;;  %10542 = vmatmul.msk.bf16.gmra.mxu3 %vm16788_vm4, %v10758_v18  ;;  %vm16794_vm0 = vcmask 97280   ;;  %vm16795_vm4 = vcmask 162816  }
 0xa8b   : >> { %v7774_v54 = vsel %vm2655_vm6, %v7758_v25, %v7478_v21 }
 0xa8c   : >> { %v7790_v12 = vsel %vm16774_vm8, %v7774_v54, %v7614_v24 }
 0xa8d   : >> { %v7806_v36 = vsel %vm16775_vm2, %v7790_v12, %v7678_v45 }
 0xa8e   : >> { %v7829_v7 = vunpack.c.l.b16 %v7806_v36  ;;  %v7830_v41 = vunpack.c.h.b16 %v7806_v36  ;;  %v7176_v61 = vpop.permute.xlu1 %7175 }
 0xa90   : >> { %v7845_v15 = vpack.c.b16 %v7829_v7, %v7829_v7  ;;  %v7846_v17 = vpack.c.b16 %v7830_v41, %v7830_v41  ;;  %v7360_v26 = vpop.permute.xlu2 %7359  ;;  %v10566_v7 = vld [vmem:[%s15706_s4 + $0x3c] sm:$0xf] }
 0xa92   : >> { %7878 = vst.msk [vmem:[#allocation5 + $0x10] sm:$0xf] %vm16789_vm10, %v7845_v15  ;;  %v7111_v32 = vpop.permute.xlu0 %7110  ;;  %vm16796_vm10 = vmmov %vm16791_vm5 }
 0xa93   : >> { %7879 = vst.msk [vmem:[#allocation5 + $0x14] sm:$0xf] %vm16790_vm7, %v7846_v17  ;;  %v7704_v60 = vsel %vm16791_vm5, %v15444_v42, %v7111_v32  ;;  %vm16797_vm7 = vmmov %vm16794_vm0  ;;  %vm16798_vm5 = vcmask 289792  }
 0xa94   : >> { %v7720_v47 = vsel %vm2587_vm9, %v7704_v60, %v7176_v61 }
 0xa95   : >> { %v7736_v39 = vsel %vm16794_vm0, %v7720_v47, %v7232_v34  ;;  %vm16801_vm0 = vmmov %vm16774_vm8 }
 0xa96   : >> { %v7432_v29 = vpop.permute.xlu1 %7431 }
 0xa98   : >> { %v7616_v55 = vpop.permute.xlu2 %7615 }
 0xa9a   : >> { %v7368_v27 = vpop.permute.xlu0 %7367  ;;  %v10754_v62 = vld [vmem:[#allocation5 + $0x10] sm:$0xff] }
 0xa9b   : >> { %10522 = vmatmul.msk.bf16.gmra.mxu0 %vm16792_vm13, %v10754_v62  ;;  %10538 = vmatmul.msk.bf16.gmra.mxu1 %vm16793_vm14, %v10754_v62  ;;  %v7752_v19 = vsel %vm2621_vm11, %v7736_v39, %v7368_v27  ;;  %vm16799_vm13 = vmmov %vm16798_vm5 }
 0xa9c   : >> { %v7768_v56 = vsel %vm16795_vm4, %v7752_v19, %v7432_v29  ;;  %vm16800_vm14 = vmmov %vm16795_vm4  ;;  %vm16802_vm4 = vcmask 293888   ;;  %v10569_v19 = vld [vmem:[%s15706_s4 + $0x44] sm:$0x1] }
 0xa9d   : >> { %v7784_v51 = vsel %vm2655_vm6, %v7768_v56, %v7488_v48 }
 0xa9e   : >> { %v7624_v46 = vpop.permute.xlu1 %7623 }
 0xa9f   : >> { %v7800_v9 = vsel %vm16774_vm8, %v7784_v51, %v7624_v46  ;;  %vm16803_vm8 = vmmov %vm16802_vm4 }
 0xaa2   : >> { %v7103_v59 = vpop.permute.xlu0 %7102 }
 0xaa3   : >> { %v7696_v14 = vsel %vm16796_vm10, %v15506_v22, %v7103_v59  ;;  %vm16804_vm10 = vmmov %vm16798_vm5 }
 0xaa4   : >> { %v7712_v30 = vsel %vm2587_vm9, %v7696_v14, %v7168_v20 }
 0xaa6   : >> { %v7224_v6 = vpop.permute.xlu1 %7223 }
 0xaa7   : >> { %v7728_v38 = vsel %vm16797_vm7, %v7712_v30, %v7224_v6  ;;  %vm16805_vm7 = vmmov %vm16798_vm5 }
 0xaa8   : >> { %v7744_v10 = vsel %vm2621_vm11, %v7728_v38, %v7360_v26 }
 0xaaa   : >> { %v7688_v42 = vpop.permute.xlu0 %7687 }
 0xaab   : >> { %v7816_v43 = vsel %vm16775_vm2, %v7800_v9, %v7688_v42 }
 0xaac   : >> { %v7839_v16 = vunpack.c.l.b16 %v7816_v43  ;;  %v7840_v2 = vunpack.c.h.b16 %v7816_v43 }
 0xaae   : >> { %v7855_v23 = vpack.c.b16 %v7839_v16, %v7839_v16  ;;  %v7856_v3 = vpack.c.b16 %v7840_v2, %v7840_v2  ;;  %v7480_v22 = vpop.permute.xlu1 %7479 }
 0xab0   : >> { %7888 = vst.msk [vmem:[#allocation5 + $0x38] sm:$0xf] %vm16798_vm5, %v7855_v23  ;;  %vm16807_vm5 = vmmov %vm16802_vm4 }
 0xab1   : >> { %7889 = vst.msk [vmem:[#allocation5 + $0x3c] sm:$0xf] %vm16799_vm13, %v7856_v3  ;;  %vm16808_vm13 = vmmov %vm16802_vm4  ;;  %v10546_v3 = vld [vmem:[%s15706_s4 + $0xc] sm:$0xf] }
 0xab2   : >> { %v7424_v58 = vpop.permute.xlu0 %7423 }
 0xab3   : >> { %v7760_v8 = vsel %vm16800_vm14, %v7744_v10, %v7424_v58  ;;  %vm16809_vm14 = vcmask 27648  }
 0xab4   : >> { %v7776_v28 = vsel %vm2655_vm6, %v7760_v8, %v7480_v22 }
 0xab5   : >> { %v7792_v31 = vsel %vm16801_vm0, %v7776_v28, %v7616_v55  ;;  %v10549_v28 = vld [vmem:[%s15706_s4 + $0x14] sm:$0x1]  ;;  %vm16810_vm0 = vmmov %vm16809_vm14 }
 0xab8   : >> { %v10759_v35 = vld [vmem:[#allocation5 + $0x38] sm:$0xff] }
 0xab9   : >> { %10527 = vmatmul.msk.bf16.gmra.mxu2 %vm16802_vm4, %v10759_v35  ;;  %10543 = vmatmul.msk.bf16.gmra.mxu3 %vm16803_vm8, %v10759_v35  ;;  %vm16811_vm4 = vmmov %vm16810_vm0 }
 0xaba   : >> { %v7680_v0 = vpop.permute.xlu0 %7679  ;;  %vm16812_vm8 = vmmov %vm16810_vm0 }
 0xabb   : >> { %v7808_v5 = vsel %vm16775_vm2, %v7792_v31, %v7680_v0  ;;  %vm16813_vm2 = vmmov %vm16810_vm0 }
 0xabc   : >> { %v7831_v44 = vunpack.c.l.b16 %v7808_v5  ;;  %v7832_v57 = vunpack.c.h.b16 %v7808_v5  ;;  %v8028_v52 = vpop.f32.mrf.mxu2  ;;  %v8104_v37 = vpop.f32.mrf.mxu3 }
 0xabd   : >> { %v8029_v50 = vadd.f32 %v15690_v4, %v8028_v52  ;;  %v8105_v49 = vadd.f32 %v15695_v63, %v8104_v37 }
 0xabe   : >> { %v7847_v53 = vpack.c.b16 %v7831_v44, %v7831_v44  ;;  %v7848_v33 = vpack.c.b16 %v7832_v57, %v7832_v57 }
 0xabf   : >> { %v8132_v40 = vmul.f32 %v8105_v49, %v8029_v50 }
 0xac0   : >> { %7880 = vst.msk [vmem:[#allocation5 + $0x18] sm:$0xf] %vm16804_vm10, %v7847_v53  ;;  %vm16814_vm10 = vmmov %vm16810_vm0 }
 0xac1   : >> { %7881 = vst.msk [vmem:[#allocation5 + $0x1c] sm:$0xf] %vm16805_vm7, %v7848_v33  ;;  %v8148_v24 = vpack.c.bf16 %v8132_v40, %v8132_v40  ;;  %vm16815_vm7 = vmmov %vm16810_vm0 }
 0xac3   : >> { %v8227_v45 = vshrl.u32 %v8148_v24, 16  ;;  %v8230_v54 = vshll.u32 %v8148_v24, 16 }
 0xac4   : >> { %v8030_v18 = vpop.f32.mrf.mxu2  ;;  %v8106_v25 = vpop.f32.mrf.mxu3 }
 0xac5   : >> { %v8229_v21 = vrot.slane %v8227_v45, 7  ;;  %v8031_v12 = vadd.f32 %v15690_v4, %v8030_v18  ;;  %v8107_v36 = vadd.f32 %v15695_v63, %v8106_v25 }
 0xac6   : >> { %v8008_v41 = vpop.f32.mrf.mxu0  ;;  %v8084_v61 = vpop.f32.mrf.mxu1 }
 0xac7   : >> { %v8232_v15 = vor.u32 %v8230_v54, %v8229_v21  ;;  %v8133_v17 = vmul.f32 %v8107_v36, %v8031_v12  ;;  %v8009_v34 = vadd.f32 %v15690_v4, %v8008_v41  ;;  %v8085_v29 = vadd.f32 %v15695_v63, %v8084_v61 }
 0xac8   : >> { %v10755_v32 = vld [vmem:[#allocation5 + $0x18] sm:$0xff]  ;;  %v8233_v59 = vrot.slane %v8229_v21, 4  ;;  %v10571_v21 = vld [vmem:[%s15706_s4 + $0x48] sm:$0xf] }
 0xac9   : >> { %v8351_v27 = vsel %vm12459_vm12, %v8232_v15, %v10566_v7  ;;  %v8149_v62 = vpack.c.bf16 %v8133_v17, %v8133_v17  ;;  %10523 = vmatmul.msk.bf16.gmra.mxu0 %vm16807_vm5, %v10755_v32  ;;  %10539 = vmatmul.msk.bf16.gmra.mxu1 %vm16808_vm13, %v10755_v32  ;;  %v8124_v48 = vmul.f32 %v8085_v29, %v8009_v34  ;;  %vm16816_vm5 = vmmov %vm16810_vm0 }
 0xaca   : >> { %10567 = vst [vmem:[%s15706_s4 + $0x3c] sm:$0xf] %v8351_v27 }
 0xacb   : >> { %v8235_v60 = vshrl.u32 %v8149_v62, 16  ;;  %v8140_v47 = vpack.c.bf16 %v8124_v48, %v8124_v48  ;;  %v8238_v46 = vshll.u32 %v8149_v62, 16  ;;  %v10574_v62 = vld [vmem:[%s15706_s4 + $0x50] sm:$0x1] }
 0xacd   : >> { %v8237_v39 = vrot.slane %v8235_v60, 7  ;;  %v8159_v20 = vshrl.u32 %v8140_v47, 16  ;;  %v8162_v16 = vshll.u32 %v8140_v47, 16 }
 0xace   : >> { %v8010_v56 = vpop.f32.mrf.mxu0  ;;  %v8086_v51 = vpop.f32.mrf.mxu1 }
 0xacf   : >> { %v8240_v9 = vor.u32 %v8238_v46, %v8237_v39  ;;  %v8242_v42 = vrot.slane %v8237_v39, 4  ;;  %v8011_v43 = vadd.f32 %v15690_v4, %v8010_v56  ;;  %v8087_v14 = vadd.f32 %v15695_v63, %v8086_v51 }
 0xad0   : >> { %v8161_v6 = vrot.slane %v8159_v20, 7 }
 0xad1   : >> { %v8241_v2 = vsel %vm12515_vm1, %v8233_v59, %v8240_v9  ;;  %v8355_v23 = vsel %vm11925_vm3, %v8242_v42, %v10569_v19  ;;  %v8125_v30 = vmul.f32 %v8087_v14, %v8011_v43  ;;  %v10551_v14 = vld [vmem:[%s15706_s4 + $0x18] sm:$0xf] }
 0xad2   : >> { %10568 = vst.msk [vmem:[%s15706_s4 + $0x40] sm:$0xf] %vm16809_vm14, %v8241_v2  ;;  %v8164_v26 = vor.u32 %v8162_v16, %v8161_v6  ;;  %v8165_v55 = vrot.slane %v8161_v6, 4 }
 0xad3   : >> { %10570 = vst [vmem:[%s15706_s4 + $0x44] sm:$0x1] %v8355_v23  ;;  %v8141_v38 = vpack.c.bf16 %v8125_v30, %v8125_v30 }
 0xad4   : >> { %v8323_v58 = vsel %vm12459_vm12, %v8164_v26, %v10546_v3 }
 0xad5   : >> { %10547 = vst [vmem:[%s15706_s4 + $0xc] sm:$0xf] %v8323_v58  ;;  %v8167_v10 = vshrl.u32 %v8141_v38, 16  ;;  %v8170_v22 = vshll.u32 %v8141_v38, 16  ;;  %v10554_v38 = vld [vmem:[%s15706_s4 + $0x20] sm:$0x1] }
 0xad7   : >> { %v8169_v8 = vrot.slane %v8167_v10, 7 }
 0xad9   : >> { %v8172_v35 = vor.u32 %v8170_v22, %v8169_v8  ;;  %v8174_v31 = vrot.slane %v8169_v8, 4 }
 0xadb   : >> { %v8173_v0 = vsel %vm12515_vm1, %v8165_v55, %v8172_v35  ;;  %v8327_v5 = vsel %vm11925_vm3, %v8174_v31, %v10549_v28 }
 0xadc   : >> { %10548 = vst.msk [vmem:[%s15706_s4 + $0x10] sm:$0xf] %vm16810_vm0, %v8173_v0 }
 0xadd   : >> { %10550 = vst [vmem:[%s15706_s4 + $0x14] sm:$0x1] %v8327_v5 }
 0xae0   : >> { %v8033_v44 = vpop.f32.mrf.mxu2  ;;  %v8109_v57 = vpop.f32.mrf.mxu3 }
 0xae1   : >> { %v8034_v52 = vadd.f32 %v15690_v4, %v8033_v44  ;;  %v8110_v37 = vadd.f32 %v15695_v63, %v8109_v57 }
 0xae3   : >> { %v8134_v53 = vmul.f32 %v8110_v37, %v8034_v52 }
 0xae5   : >> { %v8150_v33 = vpack.c.bf16 %v8134_v53, %v8134_v53 }
 0xae7   : >> { %v8244_v50 = vshrl.u32 %v8150_v33, 16  ;;  %v8247_v45 = vshll.u32 %v8150_v33, 16 }
 0xae8   : >> { %v8035_v49 = vpop.f32.mrf.mxu2  ;;  %v8111_v40 = vpop.f32.mrf.mxu3 }
 0xae9   : >> { %v8246_v24 = vrot.slane %v8244_v50, 7  ;;  %v8036_v18 = vadd.f32 %v15690_v4, %v8035_v49  ;;  %v8112_v25 = vadd.f32 %v15695_v63, %v8111_v40  ;;  %v10576_v40 = vld [vmem:[%s15706_s4 + $0x54] sm:$0xf] }
 0xaeb   : >> { %v8249_v54 = vor.u32 %v8247_v45, %v8246_v24  ;;  %v8135_v12 = vmul.f32 %v8112_v25, %v8036_v18  ;;  %v8250_v48 = vrot.slane %v8246_v24, 4 }
 0xaed   : >> { %v8358_v36 = vsel %vm12459_vm12, %v8249_v54, %v10571_v21  ;;  %v8151_v7 = vpack.c.bf16 %v8135_v12, %v8135_v12 }
 0xaee   : >> { %10572 = vst [vmem:[%s15706_s4 + $0x48] sm:$0xf] %v8358_v36 }
 0xaef   : >> { %v8013_v41 = vpop.f32.mrf.mxu0  ;;  %v8089_v61 = vpop.f32.mrf.mxu1  ;;  %v8252_v15 = vshrl.u32 %v8151_v7, 16  ;;  %v8255_v29 = vshll.u32 %v8151_v7, 16 }
 0xaf0   : >> { %v8014_v17 = vadd.f32 %v15690_v4, %v8013_v41  ;;  %v8090_v34 = vadd.f32 %v15695_v63, %v8089_v61 }
 0xaf1   : >> { %v8254_v32 = vrot.slane %v8252_v15, 7 }
 0xaf2   : >> { %v8126_v27 = vmul.f32 %v8090_v34, %v8014_v17  ;;  %v10579_v34 = vld [vmem:[%s15706_s4 + $0x5c] sm:$0x1] }
 0xaf3   : >> { %v8257_v60 = vor.u32 %v8255_v29, %v8254_v32  ;;  %v8259_v47 = vrot.slane %v8254_v32, 4 }
 0xaf4   : >> { %v8142_v39 = vpack.c.bf16 %v8126_v27, %v8126_v27 }
 0xaf5   : >> { %v8258_v46 = vsel %vm12515_vm1, %v8250_v48, %v8257_v60  ;;  %v8362_v59 = vsel %vm11925_vm3, %v8259_v47, %v10574_v62 }
 0xaf6   : >> { %v8176_v19 = vshrl.u32 %v8142_v39, 16  ;;  %10573 = vst.msk [vmem:[%s15706_s4 + $0x4c] sm:$0xf] %vm16811_vm4, %v8258_v46  ;;  %v8179_v9 = vshll.u32 %v8142_v39, 16 }
 0xaf7   : >> { %v8015_v20 = vpop.f32.mrf.mxu0  ;;  %v8091_v56 = vpop.f32.mrf.mxu1  ;;  %10575 = vst [vmem:[%s15706_s4 + $0x50] sm:$0x1] %v8362_v59 }
 0xaf8   : >> { %v8178_v51 = vrot.slane %v8176_v19, 7  ;;  %v8016_v42 = vadd.f32 %v15690_v4, %v8015_v20  ;;  %v8092_v43 = vadd.f32 %v15695_v63, %v8091_v56  ;;  %v10556_v56 = vld [vmem:[%s15706_s4 + $0x24] sm:$0xf] }
 0xafa   : >> { %v8181_v6 = vor.u32 %v8179_v9, %v8178_v51  ;;  %v8127_v16 = vmul.f32 %v8092_v43, %v8016_v42  ;;  %v8182_v58 = vrot.slane %v8178_v51, 4 }
 0xafc   : >> { %v8330_v2 = vsel %vm12459_vm12, %v8181_v6, %v10551_v14  ;;  %v8143_v23 = vpack.c.bf16 %v8127_v16, %v8127_v16 }
 0xafd   : >> { %10552 = vst [vmem:[%s15706_s4 + $0x18] sm:$0xf] %v8330_v2  ;;  %v10559_v2 = vld [vmem:[%s15706_s4 + $0x2c] sm:$0x1] }
 0xafe   : >> { %v8184_v3 = vshrl.u32 %v8143_v23, 16  ;;  %v8187_v26 = vshll.u32 %v8143_v23, 16 }
 0xb00   : >> { %v8186_v30 = vrot.slane %v8184_v3, 7 }
 0xb02   : >> { %v8189_v10 = vor.u32 %v8187_v26, %v8186_v30  ;;  %v8191_v8 = vrot.slane %v8186_v30, 4 }
 0xb04   : >> { %v8190_v22 = vsel %vm12515_vm1, %v8182_v58, %v8189_v10  ;;  %v8334_v28 = vsel %vm11925_vm3, %v8191_v8, %v10554_v38 }
 0xb05   : >> { %10553 = vst.msk [vmem:[%s15706_s4 + $0x1c] sm:$0xf] %vm16812_vm8, %v8190_v22 }
 0xb06   : >> { %10555 = vst [vmem:[%s15706_s4 + $0x20] sm:$0x1] %v8334_v28 }
 0xb0d   : >> { %v8038_v55 = vpop.f32.mrf.mxu2  ;;  %v8114_v35 = vpop.f32.mrf.mxu3 }
 0xb0e   : >> { %v8039_v31 = vadd.f32 %v15690_v4, %v8038_v55  ;;  %v8115_v0 = vadd.f32 %v15695_v63, %v8114_v35 }
 0xb10   : >> { %v8136_v5 = vmul.f32 %v8115_v0, %v8039_v31 }
 0xb12   : >> { %v8152_v44 = vpack.c.bf16 %v8136_v5, %v8136_v5 }
 0xb14   : >> { %v8261_v57 = vshrl.u32 %v8152_v44, 16  ;;  %v8264_v33 = vshll.u32 %v8152_v44, 16 }
 0xb15   : >> { %v8040_v52 = vpop.f32.mrf.mxu2  ;;  %v8116_v37 = vpop.f32.mrf.mxu3 }
 0xb16   : >> { %v8263_v53 = vrot.slane %v8261_v57, 7  ;;  %v8041_v50 = vadd.f32 %v15690_v4, %v8040_v52  ;;  %v8117_v49 = vadd.f32 %v15695_v63, %v8116_v37  ;;  %v10581_v37 = vld [vmem:[%s15706_s4 + $0x60] sm:$0xf] }
 0xb18   : >> { %v8266_v24 = vor.u32 %v8264_v33, %v8263_v53  ;;  %v8137_v45 = vmul.f32 %v8117_v49, %v8041_v50  ;;  %v8018_v18 = vpop.f32.mrf.mxu0  ;;  %v8094_v25 = vpop.f32.mrf.mxu1  ;;  %v8267_v29 = vrot.slane %v8263_v53, 4 }
 0xb19   : >> { %v8019_v21 = vadd.f32 %v15690_v4, %v8018_v18  ;;  %v8095_v54 = vadd.f32 %v15695_v63, %v8094_v25 }
 0xb1a   : >> { %v8365_v12 = vsel %vm12459_vm12, %v8266_v24, %v10576_v40  ;;  %v8153_v36 = vpack.c.bf16 %v8137_v45, %v8137_v45 }
 0xb1b   : >> { %10577 = vst [vmem:[%s15706_s4 + $0x54] sm:$0xf] %v8365_v12  ;;  %v8128_v7 = vmul.f32 %v8095_v54, %v8019_v21 }
 0xb1c   : >> { %v8269_v41 = vshrl.u32 %v8153_v36, 16  ;;  %v8272_v17 = vshll.u32 %v8153_v36, 16 }
 0xb1d   : >> { %v8144_v61 = vpack.c.bf16 %v8128_v7, %v8128_v7 }
 0xb1e   : >> { %v8271_v15 = vrot.slane %v8269_v41, 7  ;;  %v10584_v41 = vld [vmem:[%s15706_s4 + $0x68] sm:$0x1] }
 0xb1f   : >> { %v8193_v32 = vshrl.u32 %v8144_v61, 16  ;;  %v8196_v39 = vshll.u32 %v8144_v61, 16 }
 0xb20   : >> { %v8274_v27 = vor.u32 %v8272_v17, %v8271_v15  ;;  %v8276_v62 = vrot.slane %v8271_v15, 4  ;;  %v8020_v48 = vpop.f32.mrf.mxu0  ;;  %v8096_v60 = vpop.f32.mrf.mxu1 }
 0xb21   : >> { %v8195_v47 = vrot.slane %v8193_v32, 7  ;;  %v8021_v46 = vadd.f32 %v15690_v4, %v8020_v48  ;;  %v8097_v59 = vadd.f32 %v15695_v63, %v8096_v60 }
 0xb22   : >> { %v8275_v19 = vsel %vm12515_vm1, %v8267_v29, %v8274_v27  ;;  %v8369_v20 = vsel %vm11925_vm3, %v8276_v62, %v10579_v34 }
 0xb23   : >> { %10578 = vst.msk [vmem:[%s15706_s4 + $0x58] sm:$0xf] %vm16813_vm2, %v8275_v19  ;;  %v8198_v51 = vor.u32 %v8196_v39, %v8195_v47  ;;  %v8129_v9 = vmul.f32 %v8097_v59, %v8021_v46  ;;  %v8199_v23 = vrot.slane %v8195_v47, 4  ;;  %v10561_v39 = vld [vmem:[%s15706_s4 + $0x30] sm:$0xf] }
 0xb24   : >> { %10580 = vst [vmem:[%s15706_s4 + $0x5c] sm:$0x1] %v8369_v20 }
 0xb25   : >> { %v8337_v42 = vsel %vm12459_vm12, %v8198_v51, %v10556_v56  ;;  %v8145_v43 = vpack.c.bf16 %v8129_v9, %v8129_v9  ;;  %v10564_v51 = vld [vmem:[%s15706_s4 + $0x38] sm:$0x1] }
 0xb26   : >> { %10557 = vst [vmem:[%s15706_s4 + $0x24] sm:$0xf] %v8337_v42 }
 0xb27   : >> { %v8201_v14 = vshrl.u32 %v8145_v43, 16  ;;  %v8204_v16 = vshll.u32 %v8145_v43, 16 }
 0xb29   : >> { %v8203_v6 = vrot.slane %v8201_v14, 7 }
 0xb2b   : >> { %v8206_v3 = vor.u32 %v8204_v16, %v8203_v6  ;;  %v8208_v30 = vrot.slane %v8203_v6, 4 }
 0xb2d   : >> { %v8207_v26 = vsel %vm12515_vm1, %v8199_v23, %v8206_v3  ;;  %v8341_v38 = vsel %vm11925_vm3, %v8208_v30, %v10559_v2 }
 0xb2e   : >> { %10558 = vst.msk [vmem:[%s15706_s4 + $0x28] sm:$0xf] %vm16814_vm10, %v8207_v26 }
 0xb2f   : >> { %10560 = vst [vmem:[%s15706_s4 + $0x2c] sm:$0x1] %v8341_v38 }
 0xb3c   : >> { %v8043_v58 = vpop.f32.mrf.mxu2  ;;  %v8119_v10 = vpop.f32.mrf.mxu3 }
 0xb3d   : >> { %v8044_v8 = vadd.f32 %v15690_v4, %v8043_v58  ;;  %v8120_v22 = vadd.f32 %v15695_v63, %v8119_v10 }
 0xb3f   : >> { %v8138_v28 = vmul.f32 %v8120_v22, %v8044_v8 }
 0xb41   : >> { %v8154_v55 = vpack.c.bf16 %v8138_v28, %v8138_v28 }
 0xb43   : >> { %v8278_v35 = vshrl.u32 %v8154_v55, 16  ;;  %v8281_v44 = vshll.u32 %v8154_v55, 16 }
 0xb44   : >> { %v8045_v31 = vpop.f32.mrf.mxu2  ;;  %v8121_v0 = vpop.f32.mrf.mxu3 }
 0xb45   : >> { %v8280_v5 = vrot.slane %v8278_v35, 7  ;;  %v8046_v57 = vadd.f32 %v15690_v4, %v8045_v31  ;;  %v8122_v52 = vadd.f32 %v15695_v63, %v8121_v0 }
 0xb46   : >> { %v8023_v53 = vpop.f32.mrf.mxu0  ;;  %v8099_v33 = vpop.f32.mrf.mxu1 }
 0xb47   : >> { %v8283_v50 = vor.u32 %v8281_v44, %v8280_v5  ;;  %v8139_v49 = vmul.f32 %v8122_v52, %v8046_v57  ;;  %v8024_v40 = vadd.f32 %v15690_v4, %v8023_v53  ;;  %v8100_v24 = vadd.f32 %v15695_v63, %v8099_v33 }
 0xb48   : >> { %v8284_v7 = vrot.slane %v8280_v5, 4 }
 0xb49   : >> { %v8372_v45 = vsel %vm12459_vm12, %v8283_v50, %v10581_v37  ;;  %v8155_v18 = vpack.c.bf16 %v8139_v49, %v8139_v49  ;;  %v8130_v25 = vmul.f32 %v8100_v24, %v8024_v40 }
 0xb4a   : >> { %10582 = vst [vmem:[%s15706_s4 + $0x60] sm:$0xf] %v8372_v45 }
 0xb4b   : >> { %v8286_v21 = vshrl.u32 %v8155_v18, 16  ;;  %v8146_v54 = vpack.c.bf16 %v8130_v25, %v8130_v25  ;;  %v8289_v36 = vshll.u32 %v8155_v18, 16 }
 0xb4d   : >> { %v8288_v12 = vrot.slane %v8286_v21, 7  ;;  %v8210_v61 = vshrl.u32 %v8146_v54, 16  ;;  %v8213_v48 = vshll.u32 %v8146_v54, 16 }
 0xb4e   : >> { %v8025_v15 = vpop.f32.mrf.mxu0  ;;  %v8101_v17 = vpop.f32.mrf.mxu1 }
 0xb4f   : >> { %v8291_v34 = vor.u32 %v8289_v36, %v8288_v12  ;;  %v8293_v32 = vrot.slane %v8288_v12, 4  ;;  %v8026_v29 = vadd.f32 %v15690_v4, %v8025_v15  ;;  %v8102_v27 = vadd.f32 %v15695_v63, %v8101_v17 }
 0xb50   : >> { %v8212_v62 = vrot.slane %v8210_v61, 7 }
 0xb51   : >> { %v8292_v60 = vsel %vm12515_vm1, %v8284_v7, %v8291_v34  ;;  %v8376_v47 = vsel %vm11925_vm3, %v8293_v32, %v10584_v41  ;;  %v8131_v46 = vmul.f32 %v8102_v27, %v8026_v29 }
 0xb52   : >> { %10583 = vst.msk [vmem:[%s15706_s4 + $0x64] sm:$0xf] %vm16815_vm7, %v8292_v60  ;;  %v8215_v59 = vor.u32 %v8213_v48, %v8212_v62  ;;  %v8216_v9 = vrot.slane %v8212_v62, 4 }
 0xb53   : >> { %10585 = vst [vmem:[%s15706_s4 + $0x68] sm:$0x1] %v8376_v47  ;;  %v8147_v4 = vpack.c.bf16 %v8131_v46, %v8131_v46 }
 0xb54   : >> { %v8344_v63 = vsel %vm12459_vm12, %v8215_v59, %v10561_v39 }
 0xb55   : >> { %10562 = vst [vmem:[%s15706_s4 + $0x30] sm:$0xf] %v8344_v63  ;;  %v8218_v19 = vshrl.u32 %v8147_v4, 16  ;;  %v8221_v56 = vshll.u32 %v8147_v4, 16 }
 0xb57   : >> { %v8220_v20 = vrot.slane %v8218_v19, 7 }
 0xb59   : >> { %v8223_v42 = vor.u32 %v8221_v56, %v8220_v20  ;;  %v8225_v43 = vrot.slane %v8220_v20, 4  ;;  %6825 = sbr.rel (!%p6823_p8) target bundleno = 2450 (0x992), region = 258 }
 0xb5b   : >> { %v8224_v14 = vsel %vm12515_vm1, %v8216_v9, %v8223_v42  ;;  %v8348_v6 = vsel %vm11925_vm3, %v8225_v43, %v10564_v51 }
 0xb5c   : >> { %10563 = vst.msk [vmem:[%s15706_s4 + $0x34] sm:$0xf] %vm16816_vm5, %v8224_v14 }
 0xb5d   : >> { %10565 = vst [vmem:[%s15706_s4 + $0x38] sm:$0x1] %v8348_v6 }
 0xb5e LB: >> { %s10764_s0 = smul.u32 96, %s11718_s28  ;;  %s11763_s1 = smov 8   ;;  %vm16817_vm1 = vsmask.f32 7424  ;;  %s11718_s28 = sphi %s15837_s28, %s8383_s28  }
 0xb5f   : >> { %s11764_s6 = smov 4   ;;  %s11765_s2 = smov 12   ;;  %vm16818_vm3 = vmmov %vm16817_vm1 }
 0xb60   : >> { %s15843_s25 = scalar_lea.vmem [#allocation2], %s10764_s0  ;;  %vm16819_vm12 = vmmov %vm16817_vm1  ;;  %s11766_s29 = smov 16  }
 0xb61   : >> { %vm16820_vm13 = vmmov %vm16817_vm1  ;;  %s11767_s3 = smov 20   ;;  %s11768_s5 = smov 24  }
 0xb62   : >> { %vm16821_vm14 = vmmov %vm16817_vm1  ;;  %s11769_s26 = smov 28   ;;  %s11770_s24 = smov 32  }
 0xb63   : >> { %vm16822_vm0 = vmmov %vm16817_vm1 }
 0xb64   : >> { %v11221_v1 = vld [vmem:[%s15843_s25 + $0x30] sm:$0xf0]  ;;  %v8408_v13 = vld [vmem:[%s15843_s25 + $0x38] sm:$0x1]  ;;  %v11222_v11 = vld [vmem:[%s15843_s25 + $0x30] sm:$0xe] }
 0xb65   : >> { %v8544_v16 = vunpack.c.l.b16 %v8408_v13  ;;  %v11223_v2 = vor.u32 %v11222_v11, %v11221_v1  ;;  %v15849_v23 = vld [vmem:[%s15843_s25 + $0x30] sm:$0xff]   ;;  %v11224_v3 = vld [vmem:[%s15843_s25 + $0x48] sm:$0xf0]  ;;  %v11225_v58 = vld [vmem:[%s15843_s25 + $0x48] sm:$0xe] }
 0xb66   : >> { %v8410_v30 = vld [vmem:[%s15843_s25 + $0x50] sm:$0x1]  ;;  %v8606_v26 = vshrl.u32 %v15849_v23, 16  ;;  %v8608_v38 = vshll.u32 %v15849_v23, 16  ;;  %v15857_v8 = vld [vmem:[%s15843_s25 + $0x48] sm:$0xff]   ;;  %v10603_v22 = vld [vmem:[%s15843_s25 + $0x54] sm:$0xff]   ;;  %v11226_v31 = vor.u32 %v11225_v58, %v11224_v3 }
 0xb67   : >> { %v8546_v10 = vunpack.c.l.b16 %v8410_v30  ;;  %v15861_v28 = vld [vmem:[%s15843_s25 + $0x54] sm:$0xf0]  ;;  %v8552_v55 = vpack.c.b16 %v8544_v16, %v8544_v16  ;;  %v8706_v35 = vrot.slane %v11223_v2, 1  ;;  %v8632_v44 = vshll.u32 %v15857_v8, 16  ;;  %v10613_v57 = vld [vmem:[%s15843_s25 + $0x5c] sm:$0x1]  ;;  %vm16823_vm4 = vmmov %vm16822_vm0 }
 0xb68   : >> { %v8610_v0 = vrot.slane %v8608_v38, 1  ;;  %v10599_v53 = vld [vmem:[%s15843_s25 + $0x3c] sm:$0xff]   ;;  %v8630_v49 = vshrl.u32 %v15857_v8, 16  ;;  %v8804_v25 = vunpack.c.l.b16 %v10613_v57  ;;  %v10611_v21 = vld [vmem:[%s15843_s25 + $0x44] sm:$0x1]  ;;  %v8712_v54 = vrot.slane %v11226_v31, 1  ;;  %vm16824_vm8 = vmmov %vm16822_vm0 }
 0xb69   : >> { %v8554_v5 = vpack.c.b16 %v8546_v10, %v8546_v10  ;;  %v8707_v52 = vrot.slane %v8552_v55, 1  ;;  %v8613_v37 = vshll.u32 %v8552_v55, 16  ;;  %v11628_v33 = vld [vmem:[%s15843_s25 + $0x3c] sm:$0xf0]  ;;  %v8634_v40 = vrot.slane %v8632_v44, 1  ;;  %8782 = vrot.lane.b32.xlu2 %v10599_v53, %s11765_s2  ;;  %v15892_v1 = vld [vmem:[%s15843_s25 + $0x18] sm:$0xff]   ;;  %vm16825_vm2 = vmmov %vm16822_vm0 }
 0xb6a   : >> { %v15867_v50 = vor.u32 %v8610_v0, %v8606_v26  ;;  %v8812_v7 = vpack.c.b16 %v8804_v25, %v8804_v25  ;;  %v8889_v41 = vshll.u32 %v10603_v22, 16  ;;  %v8802_v61 = vunpack.c.l.b16 %v10611_v21  ;;  %v11629_v32 = vld [vmem:[%s15843_s25 + $0x3c] sm:$0xe]  ;;  %v11632_v59 = vld [vmem:[%s15843_s25 + $0x54] sm:$0xe]  ;;  %v15897_v3 = vld [vmem:[%s15843_s25] sm:$0xff]  }
 0xb6b   : >> { %v8637_v24 = vshll.u32 %v8554_v5, 16  ;;  %v8708_v45 = vsel %vm2017_vm15, %v8706_v35, %v8707_v52  ;;  %v8615_v18 = vrot.slane %v8613_v37, 1  ;;  %v8713_v36 = vrot.slane %v8554_v5, 1  ;;  %v8406_v20 = vld [vmem:[%s15843_s25 + $0x20] sm:$0x1]  ;;  %vm16826_vm10 = vmmov %vm16822_vm0 }
 0xb6c   : >> { %8726 = vrot.lane.b32.xlu1 %v8708_v45, %s11763_s1  ;;  %v15876_v15 = vor.u32 %v8634_v40, %v8630_v49  ;;  %v8810_v34 = vpack.c.b16 %v8802_v61, %v8802_v61  ;;  %v8887_v27 = vshrl.u32 %v10603_v22, 16  ;;  %v8891_v62 = vrot.slane %v8889_v41, 1  ;;  %v8404_v42 = vld [vmem:[%s15843_s25 + $0x8] sm:$0x1]  ;;  %v10645_v30 = vld [vmem:[%s15843_s25 + $0x50] sm:$0x1]  ;;  %vm16827_vm7 = vmmov %vm16822_vm0 }
 0xb6d   : >> { %v8616_v12 = vsel %vm16817_vm1, %v15867_v50, %v8615_v18  ;;  %v8639_v17 = vrot.slane %v8637_v24, 1  ;;  %v8714_v29 = vsel %vm2017_vm15, %v8712_v54, %v8713_v36  ;;  %v8894_v48 = vshll.u32 %v8812_v7, 16  ;;  %v10647_v31 = vld [vmem:[%s15843_s25 + $0x68] sm:$0x1]  ;;  %v11215_v18 = vld [vmem:[%s15843_s25] sm:$0xf0]  ;;  %vm16828_vm5 = vmmov %vm16822_vm0 }
 0xb6e   : >> { %8661 = vrot.lane.b32.xlu0 %v8616_v12, %s11764_s6  ;;  %v8865_v60 = vshll.u32 %v10599_v53, 16  ;;  %v8863_v39 = vshrl.u32 %v10599_v53, 16  ;;  %v8870_v46 = vshll.u32 %v8810_v34, 16  ;;  %v8892_v63 = vor.u32 %v8891_v62, %v8887_v27  ;;  %v11216_v25 = vld [vmem:[%s15843_s25] sm:$0xe]  ;;  %vm16829_vm1 = vmmov %vm16822_vm0 }
 0xb6f   : >> { %v8640_v47 = vsel %vm16818_vm3, %v15876_v15, %v8639_v17  ;;  %v8896_v19 = vrot.slane %v8894_v48, 1  ;;  %v11630_v9 = vor.u32 %v11629_v32, %v11628_v33  ;;  %v8542_v14 = vunpack.c.l.b16 %v8406_v20  ;;  %v15913_v33 = vld [vmem:[%s15843_s25 + $0x60] sm:$0xff]   ;;  %v15935_v32 = vld [vmem:[%s15843_s25 + $0xc] sm:$0xf0]  ;;  %vm16830_vm3 = vmmov %vm16822_vm0 }
 0xb70   : >> { %v8867_v4 = vrot.slane %v8865_v60, 1  ;;  %v8872_v51 = vrot.slane %v8870_v46, 1  ;;  %v11633_v6 = vor.u32 %v11632_v59, %v15861_v28  ;;  %v8963_v16 = vrot.slane %v8810_v34, 1  ;;  %v15932_v34 = vld [vmem:[%s15843_s25 + $0xc] sm:$0xff]   ;;  %v11218_v60 = vld [vmem:[%s15843_s25 + $0x18] sm:$0xf0] }
 0xb71   : >> { %v8897_v43 = vsel %vm16819_vm12, %v8892_v63, %v8896_v19  ;;  %8786 = vrot.lane.b32.xlu2 %v10603_v22, %s11765_s2  ;;  %v8962_v11 = vrot.slane %v11630_v9, 1  ;;  %v8540_v2 = vunpack.c.l.b16 %v8404_v42  ;;  %v15900_v26 = vpack.c.b16 %v8542_v14, %v8542_v14  ;;  %v11248_v59 = vld [vmem:[%s15843_s25 + $0x60] sm:$0xf0]  ;;  %v10607_v63 = vld [vmem:[%s15843_s25 + $0x14] sm:$0x1]  ;;  %vm16831_vm12 = vmmov %vm16822_vm0 }
 0xb72   : >> { %v8868_v56 = vor.u32 %v8867_v4, %v8863_v39  ;;  %v8584_v38 = vshll.u32 %v15892_v1, 16  ;;  %v8968_v58 = vrot.slane %v11633_v6, 1  ;;  %v8969_v10 = vrot.slane %v8812_v7, 1  ;;  %v11249_v4 = vld [vmem:[%s15843_s25 + $0x60] sm:$0xe] }
 0xb73   : >> { %v8964_v22 = vsel %vm2017_vm15, %v8962_v11, %v8963_v16  ;;  %v8548_v28 = vpack.c.b16 %v8540_v2, %v8540_v2  ;;  %v8560_v55 = vshll.u32 %v15897_v3, 16  ;;  %v9058_v35 = vunpack.c.l.b16 %v10645_v30  ;;  %v11245_v42 = vld [vmem:[%s15843_s25 + $0x48] sm:$0xf0]  ;;  %v11634_v11 = vld [vmem:[%s15843_s25 + $0x24] sm:$0xf0] }
 0xb74   : >> { %8730 = vrot.lane.b32.xlu1 %v8714_v29, %s11763_s1  ;;  %v8873_v13 = vsel %vm16820_vm13, %v8868_v56, %v8872_v51  ;;  %v8582_v0 = vshrl.u32 %v15892_v1, 16  ;;  %v8586_v5 = vrot.slane %v8584_v38, 1  ;;  %v8589_v44 = vshll.u32 %v15900_v26, 16  ;;  %vm16832_vm13 = vmmov %vm16822_vm0 }
 0xb75   : >> { %v8970_v57 = vsel %vm2017_vm15, %v8968_v58, %v8969_v10  ;;  %v8558_v52 = vshrl.u32 %v15897_v3, 16  ;;  %v8562_v37 = vrot.slane %v8560_v55, 1  ;;  %v8565_v53 = vshll.u32 %v8548_v28, 16  ;;  %v10609_v55 = vld [vmem:[%s15843_s25 + $0x2c] sm:$0x1] }
 0xb76   : >> { %8665 = vrot.lane.b32.xlu0 %v8640_v47, %s11764_s6  ;;  %v9060_v49 = vunpack.c.l.b16 %v10647_v31  ;;  %v15915_v40 = vpack.c.b16 %v9058_v35, %v9058_v35  ;;  %v15919_v24 = vor.u32 %v8586_v5, %v8582_v0  ;;  %v8591_v45 = vrot.slane %v8589_v44, 1  ;;  %v11219_v47 = vld [vmem:[%s15843_s25 + $0x18] sm:$0xe] }
 0xb77   : >> { %v9145_v21 = vshll.u32 %v15913_v33, 16  ;;  %v8563_v54 = vor.u32 %v8562_v37, %v8558_v52  ;;  %v8567_v12 = vrot.slane %v8565_v53, 1  ;;  %v11217_v61 = vor.u32 %v11216_v25, %v11215_v18  ;;  %v11635_v37 = vld [vmem:[%s15843_s25 + $0x24] sm:$0xe] }
 0xb78   : >> { %v9068_v36 = vpack.c.b16 %v9060_v49, %v9060_v49  ;;  %v9126_v7 = vshll.u32 %v15915_v40, 16  ;;  %v8592_v41 = vsel %vm16821_vm14, %v15919_v24, %v8591_v45  ;;  %v9143_v17 = vshrl.u32 %v15913_v33, 16  ;;  %vm16833_vm14 = vmmov %vm16822_vm0 }
 0xb79   : >> { %8982 = vrot.lane.b32.xlu2 %v8964_v22, %s11767_s3  ;;  %v8568_v29 = vsel %vm16822_vm0, %v8563_v54, %v8567_v12  ;;  %v9147_v27 = vrot.slane %v9145_v21, 1  ;;  %v8694_v39 = vrot.slane %v11217_v61, 1  ;;  %v8695_v46 = vrot.slane %v8548_v28, 1  ;;  %v10641_v21 = vld [vmem:[%s15843_s25 + $0x20] sm:$0x1] }
 0xb7a   : >> { %v9150_v62 = vshll.u32 %v9068_v36, 16  ;;  %v9128_v48 = vrot.slane %v9126_v7, 1  ;;  %v11220_v51 = vor.u32 %v11219_v47, %v11218_v60  ;;  %v11250_v9 = vor.u32 %v11249_v4, %v11248_v59  ;;  %v10643_v47 = vld [vmem:[%s15843_s25 + $0x38] sm:$0x1] }
 0xb7b   : >> { %v15945_v19 = vor.u32 %v9147_v27, %v9143_v17  ;;  %v8696_v14 = vsel %vm2017_vm15, %v8694_v39, %v8695_v46  ;;  %v8798_v6 = vunpack.c.l.b16 %v10607_v63  ;;  %v8701_v38 = vrot.slane %v15900_v26, 1  ;;  %v15984_v63 = vld [vmem:[%s15843_s25 + $0x3c] sm:$0xff]  }
 0xb7c   : >> { %8922 = vrot.lane.b32.xlu1 %v8897_v43, %s11766_s29  ;;  %v9152_v20 = vrot.slane %v9150_v62, 1  ;;  %v9129_v56 = vsel %vm16823_vm4, %v15876_v15, %v9128_v48  ;;  %v11246_v43 = vld [vmem:[%s15843_s25 + $0x48] sm:$0xe]  ;;  %v8700_v30 = vrot.slane %v11220_v51, 1  ;;  %v9224_v58 = vrot.slane %v11250_v9, 1  ;;  %v15989_v51 = vld [vmem:[%s15843_s25 + $0x54] sm:$0xff]   ;;  %vm16834_vm4 = vmmov %vm16822_vm0 }
 0xb7d   : >> { %v11247_v2 = vor.u32 %v11246_v43, %v11245_v42  ;;  %v9225_v10 = vrot.slane %v9068_v36, 1  ;;  %v8806_v22 = vpack.c.b16 %v8798_v6, %v8798_v6  ;;  %v8817_v28 = vshll.u32 %v15932_v34, 16  ;;  %v11643_v9 = vld [vmem:[%s15843_s25 + $0x54] sm:$0xf0]  ;;  %v11242_v43 = vld [vmem:[%s15843_s25 + $0x30] sm:$0xf0] }
 0xb7e   : >> { %8918 = vrot.lane.b32.xlu0 %v8873_v13, %s11766_s29  ;;  %v10595_v13 = vld [vmem:[%s15843_s25 + $0x24] sm:$0xff]   ;;  %v9153_v16 = vsel %vm16824_vm8, %v15945_v19, %v9152_v20  ;;  %v9219_v31 = vrot.slane %v15915_v40, 1  ;;  %v8702_v0 = vsel %vm2017_vm15, %v8700_v30, %v8701_v38  ;;  %v8815_v26 = vshrl.u32 %v15932_v34, 16  ;;  %v11638_v40 = vld [vmem:[%s15843_s25 + $0xc] sm:$0xe]  ;;  %vm16835_vm8 = vmmov %vm16822_vm0 }
 0xb7f   : >> { %v9218_v35 = vrot.slane %v11247_v2, 1  ;;  %v9226_v5 = vsel %vm2017_vm15, %v9224_v58, %v9225_v10  ;;  %v8819_v44 = vrot.slane %v8817_v28, 1  ;;  %v8800_v52 = vunpack.c.l.b16 %v10609_v55  ;;  %v11640_v20 = vld [vmem:[%s15843_s25 + $0x3c] sm:$0xf0]  ;;  %v11243_v6 = vld [vmem:[%s15843_s25 + $0x30] sm:$0xe] }
 0xb80   : >> { %v8841_v49 = vshll.u32 %v10595_v13, 16  ;;  %v8839_v54 = vshrl.u32 %v10595_v13, 16  ;;  %v9054_v61 = vunpack.c.l.b16 %v10641_v21  ;;  %v11639_v17 = vor.u32 %v11638_v40, %v15935_v32  ;;  %v8411_v30 = vld [vmem:[%s15843_s25 + $0x5c] sm:$0x1]  ;;  %v11641_v28 = vld [vmem:[%s15843_s25 + $0x3c] sm:$0xe] }
 0xb81   : >> { %9042 = vrot.lane.b32.xlu2 %v15913_v33, %s11768_s5  ;;  %v9220_v53 = vsel %vm2017_vm15, %v9218_v35, %v9219_v31  ;;  %v8820_v45 = vor.u32 %v8819_v44, %v8815_v26  ;;  %v8808_v25 = vpack.c.b16 %v8800_v52, %v8800_v52  ;;  %v8951_v46 = vrot.slane %v8806_v22, 1 }
 0xb82   : >> { %v8843_v12 = vrot.slane %v8841_v49, 1  ;;  %v9062_v60 = vpack.c.b16 %v9054_v61, %v9054_v61  ;;  %v8950_v39 = vrot.slane %v11639_v17, 1  ;;  %v9056_v4 = vunpack.c.l.b16 %v10643_v47 }
 0xb83   : >> { %v8846_v36 = vshll.u32 %v8808_v25, 16  ;;  %v8957_v48 = vrot.slane %v8808_v25, 1  ;;  %v11244_v58 = vor.u32 %v11243_v6, %v11242_v43  ;;  %v8547_v55 = vunpack.c.l.b16 %v8411_v30  ;;  %v10635_v30 = vld [vmem:[%s15843_s25 + $0x54] sm:$0xff]  }
 0xb84   : >> { %9038 = vrot.lane.b32.xlu1 %v15857_v8, %s11768_s5  ;;  %v9078_v59 = vshll.u32 %v9062_v60, 16  ;;  %v8620_v31 = vshll.u32 %v15984_v63, 16  ;;  %v8618_v49 = vshrl.u32 %v15984_v63, 16  ;;  %v11642_v21 = vor.u32 %v11641_v28, %v11640_v20  ;;  %v16045_v28 = vld [vmem:[%s15843_s25 + $0x24] sm:$0xff]  }
 0xb85   : >> { %v8848_v27 = vrot.slane %v8846_v36, 1  ;;  %v8555_v52 = vpack.c.b16 %v8547_v55, %v8547_v55  ;;  %v16048_v55 = vld [vmem:[%s15843_s25 + $0x24] sm:$0xf0] }
 0xb86   : >> { %8986 = vrot.lane.b32.xlu0 %v8970_v57, %s11767_s3  ;;  %v8822_v57 = vshll.u32 %v8806_v22, 16  ;;  %v9080_v42 = vrot.slane %v9078_v59, 1  ;;  %v8622_v40 = vrot.slane %v8620_v31, 1  ;;  %v8709_v17 = vrot.slane %v11642_v21, 1  ;;  %v8405_v31 = vld [vmem:[%s15843_s25 + $0x14] sm:$0x1] }
 0xb87   : >> { %v8716_v20 = vrot.slane %v8555_v52, 1 }
 0xb88   : >> { %v8824_v18 = vrot.slane %v8822_v57, 1  ;;  %v9081_v38 = vsel %vm16827_vm7, %v15919_v24, %v9080_v42  ;;  %v9207_v57 = vrot.slane %v9062_v60, 1  ;;  %v11234_v42 = vld [vmem:[%s15843_s25 + $0x48] sm:$0xe]  ;;  %vm16838_vm7 = vmmov %vm16822_vm0 }
 0xb89   : >> { %9174 = vrot.lane.b32.xlu2 %v9129_v56, %s11769_s26  ;;  %v8952_v56 = vsel %vm2017_vm15, %v8950_v39, %v8951_v46  ;;  %v10614_v39 = vld [vmem:[%s15843_s25 + $0x68] sm:$0x1] }
 0xb8a   : >> { %v8825_v7 = vsel %vm16825_vm2, %v8820_v45, %v8824_v18  ;;  %v11644_v18 = vld [vmem:[%s15843_s25 + $0x54] sm:$0xe]  ;;  %vm16836_vm2 = vcmask 1041408  }
 0xb8b   : >> { %v11645_v47 = vor.u32 %v11644_v18, %v11643_v9  ;;  %v11233_v9 = vld [vmem:[%s15843_s25 + $0x48] sm:$0xf0] }
 0xb8c   : >> { %8657 = vrot.lane.b32.xlu1 %v8592_v41, %s11764_s6  ;;  %v11636_v41 = vor.u32 %v11635_v37, %v11634_v11  ;;  %v8409_v11 = vld [vmem:[%s15843_s25 + $0x44] sm:$0x1]  ;;  %v8644_v37 = vshll.u32 %v15989_v51, 16 }
 0xb8d   : >> { %v8545_v10 = vunpack.c.l.b16 %v8409_v11  ;;  %v16035_v11 = vld [vmem:[%s15843_s25 + $0xc] sm:$0xf0] }
 0xb8e   : >> { %8653 = vrot.lane.b32.xlu0 %v8568_v29, %s11764_s6  ;;  %v8844_v29 = vor.u32 %v8843_v12, %v8839_v54  ;;  %v8956_v62 = vrot.slane %v11636_v41, 1  ;;  %v8642_v12 = vshrl.u32 %v15989_v51, 16  ;;  %v8646_v36 = vrot.slane %v8644_v37, 1  ;;  %v8407_v37 = vld [vmem:[%s15843_s25 + $0x2c] sm:$0x1] }
 0xb8f   : >> { %v8553_v26 = vpack.c.b16 %v8545_v10, %v8545_v10  ;;  %v8623_v41 = vor.u32 %v8622_v40, %v8618_v49  ;;  %v11236_v10 = vld [vmem:[%s15843_s25 + $0x60] sm:$0xf0]  ;;  %v16064_v40 = vld [vmem:[%s15843_s25 + $0x6c] sm:$0xf0]  ;;  %v8543_v21 = vunpack.c.l.b16 %v8407_v37 }
 0xb90   : >> { %v8958_v32 = vsel %vm2017_vm15, %v8956_v62, %v8957_v48  ;;  %v8647_v62 = vor.u32 %v8646_v36, %v8642_v12 }
 0xb91   : >> { %8722 = vrot.lane.b32.xlu2 %v8702_v0, %s11763_s1  ;;  %v9212_v0 = vrot.slane %v11244_v58, 1  ;;  %v8625_v45 = vshll.u32 %v8553_v26, 16 }
 0xb93   : >> { %v8627_v61 = vrot.slane %v8625_v45, 1 }
 0xb94   : >> { %8718 = vrot.lane.b32.xlu1 %v8696_v14, %s11763_s1  ;;  %v9064_v14 = vpack.c.b16 %v9056_v4, %v9056_v4  ;;  %v8715_v4 = vrot.slane %v11645_v47, 1  ;;  %v9131_v47 = vshrl.u32 %v10635_v30, 16 }
 0xb95   : >> { %v8628_v60 = vsel %vm16829_vm1, %v8623_v41, %v8627_v61  ;;  %v9133_v61 = vshll.u32 %v10635_v30, 16 }
 0xb96   : >> { %9178 = vrot.lane.b32.xlu0 %v9153_v16, %s11769_s26  ;;  %v11240_v16 = vld [vmem:[%s15843_s25 + $0x18] sm:$0xe]  ;;  %v9102_v2 = vshll.u32 %v9064_v14, 16 }
 0xb98   : >> { %v9104_v35 = vrot.slane %v9102_v2, 1 }
 0xb99   : >> { %8774 = vrot.lane.b32.xlu2 %v15932_v34, %s11765_s2  ;;  %v8849_v34 = vsel %vm16826_vm10, %v8844_v29, %v8848_v27  ;;  %v8710_v29 = vrot.slane %v8553_v26, 1  ;;  %v10612_v27 = vld [vmem:[%s15843_s25 + $0x50] sm:$0x1]  ;;  %v10646_v26 = vld [vmem:[%s15843_s25 + $0x5c] sm:$0x1]  ;;  %vm16837_vm10 = vmmov %vm16822_vm0 }
 0xb9a   : >> { %v9059_v45 = vunpack.c.l.b16 %v10646_v26 }
 0xb9b   : >> { %v8711_v46 = vsel %vm2017_vm15, %v8709_v17, %v8710_v29  ;;  %v8551_v29 = vpack.c.b16 %v8543_v21, %v8543_v21  ;;  %v10610_v21 = vld [vmem:[%s15843_s25 + $0x38] sm:$0x1] }
 0xb9c   : >> { %9242 = vrot.lane.b32.xlu1 %v9226_v5, %s11770_s24  ;;  %v9213_v5 = vrot.slane %v9064_v14, 1  ;;  %v8717_v14 = vsel %vm2017_vm15, %v8715_v4, %v8716_v20  ;;  %v16076_v41 = vpack.c.b16 %v9059_v45, %v9059_v45  ;;  %v11647_v4 = vld [vmem:[%s15843_s25 + $0x24] sm:$0xe]  ;;  %v11656_v45 = vld [vmem:[%s15843_s25 + $0x6c] sm:$0xe] }
 0xb9e   : >> { %9238 = vrot.lane.b32.xlu0 %v9220_v53, %s11770_s24  ;;  %v9105_v53 = vsel %vm16828_vm5, %v15867_v50, %v9104_v35  ;;  %v9214_v25 = vsel %vm2017_vm15, %v9212_v0, %v9213_v5  ;;  %vm16839_vm5 = vcmask 31744  }
 0xb9f   : >> { %vm16840_vm1 = vmmov %vm16839_vm5 }
 0xba1   : >> { %8914 = vrot.lane.b32.xlu2 %v8849_v34, %s11766_s29  ;;  %v8803_v34 = vunpack.c.l.b16 %v10612_v27 }
 0xba4   : >> { %8910 = vrot.lane.b32.xlu1 %v8825_v7, %s11766_s29  ;;  %v8649_v7 = vshll.u32 %v8555_v52, 16 }
 0xba6   : >> { %8778 = vrot.lane.b32.xlu0 %v10595_v13, %s11765_s2  ;;  %v11239_v13 = vld [vmem:[%s15843_s25 + $0x18] sm:$0xf0]  ;;  %v8651_v48 = vrot.slane %v8649_v7, 1  ;;  %v10648_v7 = vld [vmem:[%s15843_s25 + $0x74] sm:$0x1] }
 0xba7   : >> { %v11241_v22 = vor.u32 %v11240_v16, %v11239_v13  ;;  %v16032_v13 = vld [vmem:[%s15843_s25 + $0xc] sm:$0xff]   ;;  %v11235_v16 = vor.u32 %v11234_v42, %v11233_v9 }
 0xba8   : >> { %v8652_v59 = vsel %vm16830_vm3, %v8647_v62, %v8651_v48  ;;  %v8570_v27 = vshrl.u32 %v16032_v13, 16  ;;  %v11650_v9 = vld [vmem:[%s15843_s25 + $0xc] sm:$0xe]  ;;  %vm16841_vm3 = vcmask 97280  }
 0xba9   : >> { %9030 = vrot.lane.b32.xlu2 %v15892_v1, %s11768_s5  ;;  %v9206_v44 = vrot.slane %v11241_v22, 1  ;;  %v11237_v22 = vld [vmem:[%s15843_s25 + $0x60] sm:$0xe]  ;;  %v8965_v0 = vrot.slane %v11235_v16, 1 }
 0xbab   : >> { %v9208_v54 = vsel %vm2017_vm15, %v9206_v44, %v9207_v57  ;;  %v11238_v44 = vor.u32 %v11237_v22, %v11236_v10 }
 0xbac   : >> { %8978 = vrot.lane.b32.xlu1 %v8958_v32, %s11767_s3  ;;  %v8805_v32 = vunpack.c.l.b16 %v10614_v39  ;;  %v9135_v39 = vrot.slane %v9133_v61, 1 }
 0xbad   : >> { %v8971_v18 = vrot.slane %v11238_v44, 1  ;;  %v11653_v44 = vld [vmem:[%s15843_s25 + $0x54] sm:$0xe] }
 0xbae   : >> { %8974 = vrot.lane.b32.xlu0 %v8952_v56, %s11767_s3  ;;  %v8811_v56 = vpack.c.b16 %v8803_v34, %v8803_v34  ;;  %v8813_v43 = vpack.c.b16 %v8805_v32, %v8805_v32  ;;  %v8594_v34 = vshrl.u32 %v16045_v28, 16 }
 0xbb0   : >> { %v8882_v6 = vshll.u32 %v8811_v56, 16  ;;  %v8906_v2 = vshll.u32 %v8813_v43, 16  ;;  %v8966_v5 = vrot.slane %v8811_v56, 1 }
 0xbb1   : >> { %9170 = vrot.lane.b32.xlu2 %v9105_v53, %s11769_s26  ;;  %v8541_v53 = vunpack.c.l.b16 %v8405_v31 }
 0xbb2   : >> { %v8884_v58 = vrot.slane %v8882_v6, 1  ;;  %v8908_v57 = vrot.slane %v8906_v2, 1  ;;  %v8967_v49 = vsel %vm2017_vm15, %v8965_v0, %v8966_v5  ;;  %v9136_v6 = vor.u32 %v9135_v39, %v9131_v47  ;;  %v9467_v39 = vld [vmem:[%s16454_s20 + $0x10] sm:$0x3] }
 0xbb3   : >> { %v16069_v12 = vpack.c.b16 %v8541_v53, %v8541_v53 }
 0xbb4   : >> { %9166 = vrot.lane.b32.xlu1 %v9081_v38, %s11769_s26  ;;  %v16040_v38 = vld [vmem:[%s15843_s25 + $0x54] sm:$0xf0]  ;;  %v8885_v52 = vsel %vm16831_vm12, %v15876_v15, %v8884_v58  ;;  %v8572_v15 = vshll.u32 %v16032_v13, 16  ;;  %vm16842_vm12 = vmmov %vm16841_vm3 }
 0xbb5   : >> { %v8577_v48 = vshll.u32 %v16069_v12, 16 }
 0xbb6   : >> { %9034 = vrot.lane.b32.xlu0 %v15849_v23, %s11768_s5  ;;  %v8574_v62 = vrot.slane %v8572_v15, 1 }
 0xbb7   : >> { %v8579_v56 = vrot.slane %v8577_v48, 1 }
 0xbb8   : >> { %v8575_v20 = vor.u32 %v8574_v62, %v8570_v27  ;;  %v11657_v62 = vor.u32 %v11656_v45, %v16064_v40  ;;  %v9521_v40 = vunpack.c.l.b16 %v9467_v39 }
 0xbb9   : >> { %8663 = vrot.lane.b32.xlu2 %v8628_v60, %s11764_s6  ;;  %v9061_v60 = vunpack.c.l.b16 %v10648_v7  ;;  %v11654_v7 = vor.u32 %v11653_v44, %v16040_v38  ;;  %v10627_v44 = vld [vmem:[%s15843_s25 + $0x24] sm:$0xff]  }
 0xbba   : >> { %v8580_v22 = vsel %vm16833_vm14, %v8575_v20, %v8579_v56  ;;  %v9524_v56 = vpack.c.b16 %v9521_v40, %v9521_v40  ;;  %vm16844_vm14 = vcmask 162816  }
 0xbbb   : >> { %v16088_v42 = vpack.c.b16 %v9061_v60, %v9061_v60  ;;  %v9221_v48 = vrot.slane %v11654_v7, 1  ;;  %v9222_v60 = vrot.slane %v16076_v41, 1 }
 0xbbc   : >> { %9234 = vrot.lane.b32.xlu1 %v9214_v25, %s11770_s24  ;;  %v8972_v25 = vrot.slane %v8813_v43, 1 }
 0xbbd   : >> { %v9162_v5 = vshll.u32 %v16088_v42, 16 }
 0xbbe   : >> { %9230 = vrot.lane.b32.xlu0 %v9208_v54, %s11770_s24  ;;  %v8909_v54 = vsel %vm16832_vm13, %v15945_v19, %v8908_v57  ;;  %v8973_v17 = vsel %vm2017_vm15, %v8971_v18, %v8972_v25  ;;  %v8596_v19 = vshll.u32 %v16045_v28, 16  ;;  %v8704_v25 = vrot.slane %v8551_v29, 1  ;;  %vm16843_vm13 = vmmov %vm16822_vm0 }
 0xbc0   : >> { %v8598_v32 = vrot.slane %v8596_v19, 1  ;;  %v10608_v19 = vld [vmem:[%s15843_s25 + $0x20] sm:$0x1] }
 0xbc1   : >> { %8732 = vrot.lane.b32.xlu2 %v8717_v14, %s11763_s1 }
 0xbc2   : >> { %v8599_v58 = vor.u32 %v8598_v32, %v8594_v34  ;;  %v9227_v34 = vrot.slane %v11657_v62, 1  ;;  %v9223_v32 = vsel %vm2017_vm15, %v9221_v48, %v9222_v60 }
 0xbc3   : >> { %v16052_v35 = vpop.permute.xlu2 %8782 }
 0xbc4   : >> { %8728 = vrot.lane.b32.xlu1 %v8711_v46, %s11763_s1  ;;  %v9138_v46 = vshll.u32 %v16076_v41, 16  ;;  %v9228_v41 = vrot.slane %v16088_v42, 1 }
 0xbc6   : >> { %8667 = vrot.lane.b32.xlu0 %v8652_v59, %s11764_s6  ;;  %v8601_v59 = vshll.u32 %v8551_v29, 16  ;;  %v9140_v16 = vrot.slane %v9138_v46, 1  ;;  %v9229_v42 = vsel %vm2017_vm15, %v9227_v34, %v9228_v41  ;;  %v11659_v34 = vld [vmem:[%s15843_s25 + $0x24] sm:$0xe] }
 0xbc8   : >> { %v8603_v10 = vrot.slane %v8601_v59, 1  ;;  %v9141_v57 = vsel %vm16822_vm0, %v9136_v6, %v9140_v16  ;;  %v9554_v6 = vsel %vm16836_vm2, %v9524_v56, 0  ;;  %vm16847_vm2 = vcmask 261120  }
 0xbc9   : >> { %8920 = vrot.lane.b32.xlu2 %v8885_v52, %s11766_s29  ;;  %v11648_v52 = vor.u32 %v11647_v4, %v16048_v55  ;;  %11287 = vmatpush.bf16.msra.mxu3 %v9554_v6 }
 0xbca   : >> { %v8604_v37 = vsel %vm16834_vm4, %v8599_v58, %v8603_v10  ;;  %11286 = vmatpush.bf16.msra.mxu2 %v9554_v6  ;;  %11285 = vmatpush.bf16.msra.mxu1 %v9554_v6  ;;  %vm16845_vm4 = vmmov %vm16844_vm14 }
 0xbcb   : >> { %v16073_v36 = vpop.permute.xlu2 %8786  ;;  %v8703_v18 = vrot.slane %v11648_v52, 1  ;;  %9561 = vmatpush.bf16.msra.mxu0 %v9554_v6  ;;  %v10644_v52 = vld [vmem:[%s15843_s25 + $0x44] sm:$0x1]  ;;  %v9083_v6 = vshrl.u32 %v10627_v44, 16 }
 0xbcc   : >> { %8788 = vrot.lane.b32.xlu1 %v15913_v33, %s11765_s2  ;;  %v10639_v33 = vld [vmem:[%s15843_s25 + $0x6c] sm:$0xff]  }
 0xbcd   : >> { %v9157_v43 = vshll.u32 %v10639_v33, 16  ;;  %v9155_v31 = vshrl.u32 %v10639_v33, 16  ;;  %v8705_v27 = vsel %vm2017_vm15, %v8703_v18, %v8704_v25  ;;  %v10642_v25 = vld [vmem:[%s15843_s25 + $0x2c] sm:$0x1] }
 0xbce   : >> { %8784 = vrot.lane.b32.xlu0 %v15857_v8, %s11765_s2  ;;  %v9055_v7 = vunpack.c.l.b16 %v10642_v25 }
 0xbcf   : >> { %v9159_v0 = vrot.slane %v9157_v43, 1  ;;  %v16146_v43 = vld [vmem:[%s15843_s25 + $0x3c] sm:$0xf0] }
 0xbd0   : >> { %v9063_v60 = vpack.c.b16 %v9055_v7, %v9055_v7 }
 0xbd1   : >> { %8988 = vrot.lane.b32.xlu2 %v8973_v17, %s11767_s3  ;;  %v9160_v53 = vor.u32 %v9159_v0, %v9155_v31  ;;  %v8801_v17 = vunpack.c.l.b16 %v10610_v21  ;;  %v11228_v31 = vld [vmem:[%s15843_s25 + $0x18] sm:$0xe]  ;;  %v10774_v0 = vld [vmem:[%s16454_s20 + $0x8] sm:$0xff]  ;;  %v9057_v21 = vunpack.c.l.b16 %v10644_v52 }
 0xbd2   : >> { %11290 = vmatpush.bf16.msra.mxu3 %v10774_v0  ;;  %11289 = vmatpush.bf16.msra.mxu2 %v10774_v0 }
 0xbd3   : >> { %v16091_v14 = vpop.permute.xlu2 %8982  ;;  %v16128_v47 = vpack.c.b16 %v8801_v17, %v8801_v17  ;;  %11288 = vmatpush.bf16.msra.mxu1 %v10774_v0  ;;  %9562 = vmatpush.bf16.msra.mxu0 %v10774_v0 }
 0xbd4   : >> { %8984 = vrot.lane.b32.xlu1 %v8967_v49, %s11767_s3  ;;  %v9164_v49 = vrot.slane %v9162_v5, 1 }
 0xbd5   : >> { %v8858_v20 = vshll.u32 %v16128_v47, 16  ;;  %v8960_v48 = vrot.slane %v16128_v47, 1 }
 0xbd6   : >> { %8924 = vrot.lane.b32.xlu0 %v8909_v54, %s11766_s29  ;;  %v9165_v15 = vsel %vm16835_vm8, %v9160_v53, %v9164_v49  ;;  %v11231_v53 = vld [vmem:[%s15843_s25 + $0x30] sm:$0xe]  ;;  %vm16846_vm8 = vcmask 228352  }
 0xbd7   : >> { %v8860_v58 = vrot.slane %v8858_v20, 1 }
 0xbd9   : >> { %8655 = vrot.lane.b32.xlu2 %v8580_v22, %s11764_s6  ;;  %v11227_v22 = vld [vmem:[%s15843_s25 + $0x18] sm:$0xf0]  ;;  %v8861_v18 = vsel %vm16837_vm10, %v15867_v50, %v8860_v58  ;;  %vm16848_vm10 = vmmov %vm16846_vm8 }
 0xbda   : >> { %v11229_v49 = vor.u32 %v11228_v31, %v11227_v22  ;;  %v11662_v22 = vld [vmem:[%s15843_s25 + $0x3c] sm:$0xe] }
 0xbdc   : >> { %9044 = vrot.lane.b32.xlu1 %v10639_v33, %s11768_s5  ;;  %v16107_v33 = vpop.permute.xlu2 %9042  ;;  %v8953_v17 = vrot.slane %v11229_v49, 1 }
 0xbde   : >> { %v16093_v2 = vpop.permute.xlu1 %8726  ;;  %9040 = vrot.lane.b32.xlu0 %v10635_v30, %s11768_s5  ;;  %v11651_v30 = vor.u32 %v11650_v9, %v16035_v11  ;;  %v8698_v11 = vrot.slane %v16069_v12, 1  ;;  %v8799_v12 = vunpack.c.l.b16 %v10608_v19  ;;  %v16143_v9 = vld [vmem:[%s15843_s25 + $0x3c] sm:$0xff]  }
 0xbdf   : >> { %v9107_v41 = vshrl.u32 %v16143_v9, 16 }
 0xbe0   : >> { %v16098_v26 = vpop.permute.xlu0 %8661  ;;  %v8697_v55 = vrot.slane %v11651_v30, 1  ;;  %v8807_v59 = vpack.c.b16 %v8799_v12, %v8799_v12  ;;  %v9085_v12 = vshll.u32 %v10627_v44, 16 }
 0xbe1   : >> { %9180 = vrot.lane.b32.xlu2 %v9165_v15, %s11769_s26  ;;  %v9255_v20 = vsel %vm16839_vm5, %v15849_v23, %v16098_v26  ;;  %vm16850_vm5 = vcmask 289792  }
 0xbe2   : >> { %v8699_v29 = vsel %vm2017_vm15, %v8697_v55, %v8698_v11  ;;  %v8834_v16 = vshll.u32 %v8807_v59, 16  ;;  %v10773_v55 = vld [vmem:[%s16454_s20] sm:$0xff]  ;;  %v8954_v19 = vrot.slane %v8807_v59, 1  ;;  %v9271_v31 = vsel %vm2587_vm9, %v9255_v20, %v16093_v2 }
 0xbe3   : >> { %11293 = vmatpush.bf16.msra.mxu3 %v10773_v55  ;;  %11292 = vmatpush.bf16.msra.mxu2 %v10773_v55 }
 0xbe4   : >> { %9176 = vrot.lane.b32.xlu1 %v9141_v57, %s11769_s26  ;;  %v16126_v38 = vpop.permute.xlu2 %9174  ;;  %v16164_v57 = vld [vmem:[%s15843_s25 + $0x24] sm:$0xf0]  ;;  %v8836_v30 = vrot.slane %v8834_v16, 1  ;;  %11291 = vmatpush.bf16.msra.mxu1 %v10773_v55  ;;  %v8955_v39 = vsel %vm2017_vm15, %v8953_v17, %v8954_v19  ;;  %v9090_v16 = vshll.u32 %v9063_v60, 16 }
 0xbe5   : >> { %9563 = vmatpush.bf16.msra.mxu0 %v10773_v55 }
 0xbe6   : >> { %v16111_v54 = vpop.permute.xlu1 %8730  ;;  %8659 = vrot.lane.b32.xlu0 %v8604_v37, %s11764_s6  ;;  %v11230_v37 = vld [vmem:[%s15843_s25 + $0x30] sm:$0xf0]  ;;  %v8837_v15 = vsel %vm16838_vm7, %v15919_v24, %v8836_v30  ;;  %v9092_v52 = vrot.slane %v9090_v16, 1  ;;  %v11660_v30 = vor.u32 %v11659_v34, %v16164_v57  ;;  %vm16849_vm7 = vmmov %vm16847_vm2  ;;  %s10775_s25 = sshll.u32 %s11718_s28, 7  ;;  %s8383_s28 = sadd.s32 1, %s11718_s28  }
 0xbe7   : >> { %v11232_v11 = vor.u32 %v11231_v53, %v11230_v37  ;;  %v9287_v37 = vsel %vm16842_vm12, %v9271_v31, %v16052_v35  ;;  %v9210_v35 = vrot.slane %v9063_v60, 1  ;;  %p8380_p9 = scmp.ge.s32.totalorder %s8383_s28, 2  }
 0xbe8   : >> { %v16117_v61 = vpop.permute.xlu0 %8665  ;;  %v9209_v25 = vrot.slane %v11660_v30, 1 }
 0xbe9   : >> { %9240 = vrot.lane.b32.xlu2 %v9223_v32, %s11770_s24  ;;  %v8959_v24 = vrot.slane %v11232_v11, 1  ;;  %v9259_v47 = vsel %vm16840_vm1, %v15857_v8, %v16117_v61  ;;  %vm16851_vm1 = vmmov %vm16850_vm5 }
 0xbea   : >> { %vm16853_vm12 = vmmov %vm16851_vm1 }
 0xbeb   : >> { %v8961_v56 = vsel %vm2017_vm15, %v8959_v24, %v8960_v48 }
 0xbec   : >> { %8724 = vrot.lane.b32.xlu1 %v8705_v27, %s11763_s1  ;;  %v16152_v10 = vpop.permute.xlu2 %8722  ;;  %v16182_v27 = vpack.c.b16 %v9057_v21, %v9057_v21 }
 0xbee   : >> { %v16133_v46 = vpop.permute.xlu1 %8922  ;;  %8720 = vrot.lane.b32.xlu0 %v8699_v29, %s11763_s1  ;;  %v9109_v29 = vshll.u32 %v16143_v9, 16  ;;  %v9114_v59 = vshll.u32 %v16182_v27, 16 }
 0xbf0   : >> { %v16138_v4 = vpop.permute.xlu0 %8918  ;;  %v9111_v32 = vrot.slane %v9109_v29, 1  ;;  %v9116_v8 = vrot.slane %v9114_v59, 1 }
 0xbf1   : >> { %8780 = vrot.lane.b32.xlu2 %v15849_v23, %s11765_s2  ;;  %v9275_v23 = vsel %vm2587_vm9, %v9259_v47, %v16111_v54  ;;  %v9303_v53 = vsel %vm2621_vm11, %v9287_v37, %v16138_v4 }
 0xbf2   : >> { %v9112_v26 = vor.u32 %v9111_v32, %v9107_v41  ;;  %v9319_v21 = vsel %vm16845_vm4, %v9303_v53, %v16091_v14  ;;  %v9211_v14 = vsel %vm2017_vm15, %v9209_v25, %v9210_v35 }
 0xbf4   : >> { %8776 = vrot.lane.b32.xlu1 %v15892_v1, %s11765_s2  ;;  %v16180_v50 = vpop.permute.xlu2 %8774  ;;  %v9117_v49 = vsel %vm16843_vm13, %v9112_v26, %v9116_v8  ;;  %vm16854_vm13 = vcmask 293888  }
 0xbf6   : >> { %v16159_v5 = vpop.permute.xlu1 %9038  ;;  %9244 = vrot.lane.b32.xlu0 %v9229_v42, %s11770_s24  ;;  %v9087_v42 = vrot.slane %v9085_v12, 1 }
 0xbf7   : >> { %v9335_v4 = vsel %vm2655_vm6, %v9319_v21, %v16159_v5 }
 0xbf8   : >> { %v8987_v45 = vpop.permute.xlu0 %8986  ;;  %v9088_v0 = vor.u32 %v9087_v42, %v9083_v6  ;;  %v9351_v7 = vsel %vm16848_vm10, %v9335_v4, %v16126_v38  ;;  %vm16860_vm10 = vcmask 162816  }
 0xbf9   : >> { %8976 = vrot.lane.b32.xlu2 %v8955_v39, %s11767_s3 }
 0xbfa   : >> { %v9093_v57 = vsel %vm16822_vm0, %v9088_v0, %v9092_v52  ;;  %vm16856_vm0 = vcmask 31744  }
 0xbfb   : >> { %vm16857_vm4 = vmmov %vm16856_vm0 }
 0xbfc   : >> { %8916 = vrot.lane.b32.xlu1 %v8861_v18, %s11766_s29  ;;  %v16204_v58 = vpop.permute.xlu2 %8914 }
 0xbfe   : >> { %v16185_v62 = vpop.permute.xlu1 %8657  ;;  %8912 = vrot.lane.b32.xlu0 %v8837_v15, %s11766_s29  ;;  %v9216_v15 = vrot.slane %v16182_v27, 1 }
 0xbff   : >> { %v9251_v6 = vsel %vm16856_vm0, %v15892_v1, %v16185_v62 }
 0xc00   : >> { %v16190_v40 = vpop.permute.xlu0 %8653  ;;  %v9267_v16 = vsel %vm2587_vm9, %v9251_v6, %v16152_v10 }
 0xc01   : >> { %9036 = vrot.lane.b32.xlu2 %v16143_v9, %s11768_s5 }
 0xc04   : >> { %9032 = vrot.lane.b32.xlu1 %v10627_v44, %s11768_s5  ;;  %v9291_v44 = vsel %vm16841_vm3, %v9275_v23, %v16073_v36  ;;  %v11663_v36 = vor.u32 %v11662_v22, %v16146_v43  ;;  %vm16852_vm3 = vmmov %vm16851_vm1  ;;  %v9247_v22 = vsel %vm16857_vm4, %v15897_v3, %v16190_v40 }
 0xc05   : >> { %v9307_v54 = vsel %vm2621_vm11, %v9291_v44, %v16133_v46  ;;  %v9031_v46 = vpop.permute.xlu2 %9030 }
 0xc06   : >> { %v16211_v61 = vpop.permute.xlu1 %8718  ;;  %8980 = vrot.lane.b32.xlu0 %v8961_v56, %s11767_s3  ;;  %v9323_v18 = vsel %vm16844_vm14, %v9307_v54, %v8987_v45  ;;  %v9215_v11 = vrot.slane %v11663_v36, 1  ;;  %vm16855_vm14 = vmmov %vm16854_vm13  ;;  %s16341_s3 = scalar_lea.vmem %s11915_s27, %s10775_s25 }
 0xc07   : >> { %v9339_v45 = vsel %vm2655_vm6, %v9323_v18, %v16107_v33  ;;  %v9263_v26 = vsel %vm2587_vm9, %v9247_v22, %v16211_v61 }
 0xc08   : >> { %v9179_v2 = vpop.permute.xlu0 %9178  ;;  %v9217_v12 = vsel %vm2017_vm15, %v9215_v11, %v9216_v15 }
 0xc09   : >> { %v9355_v9 = vsel %vm16846_vm8, %v9339_v45, %v9179_v2  ;;  %9232 = vrot.lane.b32.xlu2 %v9211_v14, %s11770_s24  ;;  %vm16858_vm8 = vcmask 97280  }
 0xc0c   : >> { %9172 = vrot.lane.b32.xlu1 %v9117_v49, %s11769_s26 }
 0xc0d   : >> { %v9171_v34 = vpop.permute.xlu2 %9170 }
 0xc0e   : >> { %v9243_v55 = vpop.permute.xlu1 %9242  ;;  %9168 = vrot.lane.b32.xlu0 %v9093_v57, %s11769_s26 }
 0xc0f   : >> { %v9371_v43 = vsel %vm16847_vm2, %v9355_v9, %v9243_v55  ;;  %vm16859_vm2 = vmmov %vm16858_vm8 }
 0xc10   : >> { %v9394_v17 = vunpack.c.l.b16 %v9371_v43  ;;  %v9395_v5 = vunpack.c.h.b16 %v9371_v43  ;;  %v9239_v19 = vpop.permute.xlu0 %9238  ;;  %v9279_v1 = vsel %vm16859_vm2, %v9263_v26, %v16180_v50 }
 0xc11   : >> { %v9367_v33 = vsel %vm16849_vm7, %v9351_v7, %v9239_v19  ;;  %vm16861_vm7 = vmmov %vm16860_vm10 }
 0xc12   : >> { %v9410_v29 = vpack.c.b16 %v9394_v17, %v9394_v17  ;;  %v9411_v24 = vpack.c.b16 %v9395_v5, %v9395_v5  ;;  %v9390_v48 = vunpack.c.l.b16 %v9367_v33  ;;  %v9391_v60 = vunpack.c.h.b16 %v9367_v33 }
 0xc14   : >> { %9443 = vst.msk [vmem:[#allocation5 + $0x30] sm:$0xf] %vm16850_vm5, %v9410_v29  ;;  %v9406_v27 = vpack.c.b16 %v9390_v48, %v9390_v48  ;;  %v9407_v39 = vpack.c.b16 %v9391_v60, %v9391_v60  ;;  %vm16862_vm5 = vcmask 228352  }
 0xc15   : >> { %9444 = vst.msk [vmem:[#allocation5 + $0x34] sm:$0xf] %vm16851_vm1, %v9411_v24  ;;  %v8664_v59 = vpop.permute.xlu2 %8663  ;;  %vm16863_vm1 = vcmask 261120  }
 0xc16   : >> { %9439 = vst.msk [vmem:[#allocation5 + $0x20] sm:$0xf] %vm16852_vm3, %v9406_v27  ;;  %v8911_v38 = vpop.permute.xlu1 %8910  ;;  %9236 = vrot.lane.b32.xlu0 %v9217_v12, %s11770_s24  ;;  %vm16864_vm3 = vmmov %vm16862_vm5  ;;  %s16903_s24 = sld [smem:[#allocation17_spill]] }
 0xc17   : >> { %9440 = vst.msk [vmem:[#allocation5 + $0x24] sm:$0xf] %vm16853_vm12, %v9407_v39  ;;  %v9295_v10 = vsel %vm2621_vm11, %v9279_v1, %v8911_v38  ;;  %vm16865_vm12 = vmmov %vm16863_vm1 }
 0xc18   : >> { %v8779_v41 = vpop.permute.xlu0 %8778 }
 0xc19   : >> { %v9283_v31 = vsel %vm16858_vm8, %v9267_v16, %v8779_v41  ;;  %vm16870_vm8 = vcmask 293888  }
 0xc1a   : >> { %v9299_v0 = vsel %vm2621_vm11, %v9283_v31, %v16204_v58  ;;  %vm16871_vm2 = vmmov %vm16870_vm8 }
 0xc1c   : >> { %v10771_v32 = vld [vmem:[#allocation5 + $0x30] sm:$0xff] }
 0xc1d   : >> { %10703 = vmatmul.msk.bf16.vlgmr.msra.gmra.mxu3 %vm16854_vm13, %v10771_v32  ;;  %v16256_v42 = vpop.permute.xlu2 %8732  ;;  %vm16866_vm13 = vcmask 289792  }
 0xc1e   : >> { %v8979_v20 = vpop.permute.xlu1 %8978  ;;  %v10769_v47 = vld [vmem:[#allocation5 + $0x20] sm:$0xff]  ;;  %vm16868_vm0 = vmmov %vm16866_vm13 }
 0xc1f   : >> { %10701 = vmatmul.msk.bf16.vlgmr.msra.gmra.mxu2 %vm16855_vm14, %v10769_v47  ;;  %v9315_v62 = vsel %vm16860_vm10, %v9299_v0, %v8979_v20  ;;  %vm16867_vm14 = vmmov %vm16866_vm13  ;;  %vm16872_vm10 = vcmask 31744  }
 0xc20   : >> { %v8975_v56 = vpop.permute.xlu0 %8974  ;;  %vm16869_vm4 = vmmov %vm16868_vm0  ;;  %v9257_v17 = vsel %vm16872_vm10, %v15984_v63, %v8664_v59 }
 0xc21   : >> { %v9311_v3 = vsel %vm16861_vm7, %v9295_v10, %v8975_v56  ;;  %vm16873_vm7 = vcmask 97280  }
 0xc22   : >> { %v9327_v61 = vsel %vm2655_vm6, %v9311_v3, %v9031_v46 }
 0xc25   : >> { %v8921_v40 = vpop.permute.xlu2 %8920 }
 0xc26   : >> { %v9167_v23 = vpop.permute.xlu1 %9166 }
 0xc27   : >> { %v9343_v58 = vsel %vm16864_vm3, %v9327_v61, %v9167_v23 }
 0xc28   : >> { %v9035_v8 = vpop.permute.xlu0 %9034 }
 0xc29   : >> { %v9331_v52 = vsel %vm2655_vm6, %v9315_v62, %v9035_v8 }
 0xc2a   : >> { %v9347_v44 = vsel %vm16862_vm5, %v9331_v52, %v9171_v34  ;;  %vm16874_vm5 = vcmask 162816  }
 0xc2d   : >> { %v8989_v46 = vpop.permute.xlu2 %8988 }
 0xc2e   : >> { %v9235_v30 = vpop.permute.xlu1 %9234 }
 0xc2f   : >> { %v9363_v37 = vsel %vm16863_vm1, %v9347_v44, %v9235_v30  ;;  %vm16875_vm1 = vmmov %vm16864_vm3 }
 0xc30   : >> { %v9386_v2 = vunpack.c.l.b16 %v9363_v37  ;;  %v9387_v50 = vunpack.c.h.b16 %v9363_v37  ;;  %v9231_v54 = vpop.permute.xlu0 %9230  ;;  %vm16876_vm3 = vmmov %vm16865_vm12 }
 0xc31   : >> { %v9359_v53 = vsel %vm16865_vm12, %v9343_v58, %v9231_v54  ;;  %vm16877_vm12 = vmmov %vm16872_vm10 }
 0xc32   : >> { %v9402_v49 = vpack.c.b16 %v9386_v2, %v9386_v2  ;;  %v9403_v18 = vpack.c.b16 %v9387_v50, %v9387_v50  ;;  %v9382_v57 = vunpack.c.l.b16 %v9359_v53  ;;  %v9383_v36 = vunpack.c.h.b16 %v9359_v53  ;;  %vm16884_vm10 = vmmov %vm16876_vm3 }
 0xc34   : >> { %9435 = vst.msk [vmem:[#allocation5 + $0x10] sm:$0xf] %vm16866_vm13, %v9402_v49  ;;  %v9398_v25 = vpack.c.b16 %v9382_v57, %v9382_v57  ;;  %v9399_v35 = vpack.c.b16 %v9383_v36, %v9383_v36  ;;  %vm16878_vm13 = vmmov %vm16868_vm0 }
 0xc35   : >> { %9436 = vst.msk [vmem:[#allocation5 + $0x14] sm:$0xf] %vm16867_vm14, %v9403_v18  ;;  %v8656_v11 = vpop.permute.xlu2 %8655  ;;  %vm16879_vm14 = vmmov %vm16868_vm0 }
 0xc36   : >> { %9431 = vst.msk [vmem:[#allocation5] sm:$0xf] %vm16868_vm0, %v9398_v25  ;;  %v8729_v21 = vpop.permute.xlu1 %8728  ;;  %vm16880_vm0 = vmmov %vm16873_vm7 }
 0xc37   : >> { %9432 = vst.msk [vmem:[#allocation5 + $0x4] sm:$0xf] %vm16869_vm4, %v9399_v35  ;;  %v9273_v19 = vsel %vm2587_vm9, %v9257_v17, %v8729_v21  ;;  %vm16881_vm4 = vmmov %vm16874_vm5 }
 0xc38   : >> { %v8668_v4 = vpop.permute.xlu0 %8667 }
 0xc39   : >> { %v9261_v20 = vsel %vm16877_vm12, %v15989_v51, %v8668_v4 }
 0xc3a   : >> { %v9277_v56 = vsel %vm2587_vm9, %v9261_v20, %v16256_v42 }
 0xc3c   : >> { %v10767_v45 = vld [vmem:[#allocation5 + $0x10] sm:$0xff] }
 0xc3d   : >> { %10699 = vmatmul.msk.bf16.vlgmr.msra.gmra.mxu1 %vm16870_vm8, %v10767_v45  ;;  %v9181_v7 = vpop.permute.xlu2 %9180  ;;  %vm16882_vm8 = vmmov %vm16871_vm2 }
 0xc3e   : >> { %v8789_v9 = vpop.permute.xlu1 %8788  ;;  %v10765_v55 = vld [vmem:[#allocation5] sm:$0xff] }
 0xc3f   : >> { %10697 = vmatmul.msk.bf16.vlgmr.msra.gmra.mxu0 %vm16871_vm2, %v10765_v55  ;;  %v9293_v6 = vsel %vm16880_vm0, %v9277_v56, %v8789_v9  ;;  %vm16883_vm2 = vmmov %vm16875_vm1 }
 0xc40   : >> { %v8785_v43 = vpop.permute.xlu0 %8784 }
 0xc41   : >> { %v9289_v29 = vsel %vm16873_vm7, %v9273_v19, %v8785_v43  ;;  %vm16885_vm7 = vmmov %vm16878_vm13 }
 0xc42   : >> { %v9305_v24 = vsel %vm2621_vm11, %v9289_v29, %v8921_v40 }
 0xc45   : >> { %v9241_v60 = vpop.permute.xlu2 %9240 }
 0xc46   : >> { %v8985_v15 = vpop.permute.xlu1 %8984 }
 0xc47   : >> { %v9321_v48 = vsel %vm16874_vm5, %v9305_v24, %v8985_v15  ;;  %vm16886_vm5 = vmmov %vm16885_vm7 }
 0xc48   : >> { %v8925_v14 = vpop.permute.xlu0 %8924 }
 0xc49   : >> { %v9309_v22 = vsel %vm2621_vm11, %v9293_v6, %v8925_v14 }
 0xc4a   : >> { %v9325_v23 = vsel %vm16881_vm4, %v9309_v22, %v8989_v46  ;;  %v9620_v22 = vld [vmem:[%s16341_s3 + $0x68] sm:$0xff] }
 0xc4d   : >> { %v8781_v31 = vpop.permute.xlu2 %8780 }
 0xc4e   : >> { %v9045_v5 = vpop.permute.xlu1 %9044 }
 0xc4f   : >> { %v9341_v26 = vsel %vm2655_vm6, %v9325_v23, %v9045_v5 }
 0xc50   : >> { %v9041_v33 = vpop.permute.xlu0 %9040  ;;  %v9357_v0 = vsel %vm16883_vm2, %v9341_v26, %v9181_v7 }
 0xc51   : >> { %v9337_v12 = vsel %vm2655_vm6, %v9321_v48, %v9041_v33 }
 0xc55   : >> { %v8977_v52 = vpop.permute.xlu2 %8976 }
 0xc56   : >> { %v9177_v27 = vpop.permute.xlu1 %9176 }
 0xc57   : >> { %v9353_v39 = vsel %vm16875_vm1, %v9337_v12, %v9177_v27  ;;  %vm16887_vm1 = vmmov %vm16882_vm8  ;;  %v16338_v12 = vld [vmem:[%s16455_s21] ss:$0 sm:$0xff] }
 0xc58   : >> { %v9369_v34 = vsel %vm16876_vm3, %v9353_v39, %v9241_v60  ;;  %v8660_v38 = vpop.permute.xlu0 %8659  ;;  %vm16888_vm3 = vmmov %vm16877_vm12  ;;  %v16346_v27 = vld [vmem:[%s16903_s24] ss:$0 sm:$0xff] }
 0xc59   : >> { %v9392_v63 = vunpack.c.l.b16 %v9369_v34  ;;  %v9393_v41 = vunpack.c.h.b16 %v9369_v34  ;;  %v9249_v2 = vsel %vm16888_vm3, %v16032_v13, %v8656_v11  ;;  %vm16889_vm12 = vmmov %vm16880_vm0 }
 0xc5a   : >> { %vm16892_vm0 = vmmov %vm16883_vm2 }
 0xc5b   : >> { %v9408_v32 = vpack.c.b16 %v9392_v63, %v9392_v63  ;;  %v9409_v59 = vpack.c.b16 %v9393_v41, %v9393_v41 }
 0xc5d   : >> { %9441 = vst.msk [vmem:[#allocation5 + $0x28] sm:$0xf] %vm16878_vm13, %v9408_v32  ;;  %v9037_v61 = vpop.permute.xlu2 %9036  ;;  %vm16890_vm13 = vmmov %vm16888_vm3 }
 0xc5e   : >> { %9442 = vst.msk [vmem:[#allocation5 + $0x2c] sm:$0xf] %vm16879_vm14, %v9409_v59  ;;  %v8725_v47 = vpop.permute.xlu1 %8724  ;;  %v9253_v18 = vsel %vm16890_vm13, %v16045_v28, %v8660_v38  ;;  %vm16891_vm14 = vmmov %vm16881_vm4  ;;  %vm16901_vm13 = vcmask 293888   ;;  %v9619_v38 = vld [vmem:[%s16341_s3 + $0x60] sm:$0xff] }
 0xc5f   : >> { %v9269_v57 = vsel %vm2587_vm9, %v9253_v18, %v8725_v47  ;;  %vm16893_vm4 = vmmov %vm16889_vm12  ;;  %v9615_v59 = vld [vmem:[%s16341_s3 + $0x40] sm:$0xff]  ;;  %v9608_v18 = vld [vmem:[%s16341_s3 + $0x8] sm:$0xff] }
 0xc60   : >> { %v8721_v16 = vpop.permute.xlu0 %8720  ;;  %v9285_v46 = vsel %vm16893_vm4, %v9269_v57, %v8781_v31  ;;  %vm16895_vm2 = vmmov %vm16891_vm14 }
 0xc61   : >> { %v9265_v50 = vsel %vm2587_vm9, %v9249_v2, %v8721_v16  ;;  %vm16899_vm3 = vmmov %vm16886_vm5 }
 0xc65   : >> { %v10770_v8 = vld [vmem:[#allocation5 + $0x28] sm:$0xff]  ;;  %v9233_v25 = vpop.permute.xlu2 %9232 }
 0xc66   : >> { %v8777_v51 = vpop.permute.xlu1 %8776  ;;  %10702 = vmatmul.msk.bf16.gmra.mxu2 %vm16882_vm8, %v10770_v8  ;;  %vm16894_vm8 = vmmov %vm16884_vm10  ;;  %v9616_v8 = vld [vmem:[%s16341_s3 + $0x48] sm:$0xff] }
 0xc67   : >> { %v9281_v54 = vsel %vm16889_vm12, %v9265_v50, %v8777_v51  ;;  %vm16900_vm12 = vmmov %vm16899_vm3  ;;  %v9612_v50 = vld [vmem:[%s16341_s3 + $0x28] sm:$0xff] }
 0xc68   : >> { %v9245_v1 = vpop.permute.xlu0 %9244 }
 0xc69   : >> { %v9373_v62 = vsel %vm16884_vm10, %v9357_v0, %v9245_v1  ;;  %vm16896_vm10 = vmmov %vm16886_vm5 }
 0xc6a   : >> { %v9396_v42 = vunpack.c.l.b16 %v9373_v62  ;;  %v9397_v10 = vunpack.c.h.b16 %v9373_v62 }
 0xc6c   : >> { %v9412_v3 = vpack.c.b16 %v9396_v42, %v9396_v42  ;;  %v9413_v40 = vpack.c.b16 %v9397_v10, %v9397_v10  ;;  %v9611_v10 = vld [vmem:[%s16341_s3 + $0x20] sm:$0xff] }
 0xc6e   : >> { %9445 = vst.msk [vmem:[#allocation5 + $0x38] sm:$0xf] %vm16885_vm7, %v9412_v3  ;;  %v8917_v44 = vpop.permute.xlu1 %8916  ;;  %vm16897_vm7 = vmmov %vm16892_vm0 }
 0xc6f   : >> { %9446 = vst.msk [vmem:[#allocation5 + $0x3c] sm:$0xf] %vm16886_vm5, %v9413_v40  ;;  %v9301_v45 = vsel %vm2621_vm11, %v9285_v46, %v8917_v44 }
 0xc70   : >> { %v8913_v30 = vpop.permute.xlu0 %8912 }
 0xc71   : >> { %v9297_v49 = vsel %vm2621_vm11, %v9281_v54, %v8913_v30  ;;  %v9607_v30 = vld [vmem:[%s16341_s3] sm:$0xff] }
 0xc72   : >> { %v9313_v36 = vsel %vm16891_vm14, %v9297_v49, %v8977_v52  ;;  %vm16902_vm14 = vmmov %vm16901_vm13 }
 0xc76   : >> { %v10772_v37 = vld [vmem:[#allocation5 + $0x38] sm:$0xff]  ;;  %v9033_v53 = vpop.permute.xlu1 %9032 }
 0xc77   : >> { %10704 = vmatmul.msk.bf16.gmra.mxu3 %vm16887_vm1, %v10772_v37  ;;  %v9329_v35 = vsel %vm2655_vm6, %v9313_v36, %v9033_v53  ;;  %vm16898_vm1 = vmmov %vm16894_vm8 }
 0xc78   : >> { %v8981_v58 = vpop.permute.xlu0 %8980 }
 0xc79   : >> { %v9317_v28 = vsel %vm16895_vm2, %v9301_v45, %v8981_v58 }
 0xc7a   : >> { %v9333_v14 = vsel %vm2655_vm6, %v9317_v28, %v9037_v61 }
 0xc7e   : >> { %v9173_v43 = vpop.permute.xlu1 %9172 }
 0xc7f   : >> { %v9349_v7 = vsel %vm16897_vm7, %v9333_v14, %v9173_v43  ;;  %v9621_v14 = vld [vmem:[%s16341_s3 + $0x70] sm:$0xff] }
 0xc80   : >> { %v9169_v21 = vpop.permute.xlu0 %9168 }
 0xc81   : >> { %v9345_v13 = vsel %vm16892_vm0, %v9329_v35, %v9169_v21  ;;  %vm16904_vm0 = vcmask 31744  }
 0xc82   : >> { %v9361_v4 = vsel %vm16894_vm8, %v9345_v13, %v9233_v25  ;;  %vm16905_vm4 = vmmov %vm16904_vm0  ;;  %v9617_v13 = vld [vmem:[%s16341_s3 + $0x50] sm:$0xff] }
 0xc83   : >> { %v9384_v9 = vunpack.c.l.b16 %v9361_v4  ;;  %v9385_v55 = vunpack.c.h.b16 %v9361_v4  ;;  %vm16906_vm8 = vmmov %vm16904_vm0 }
 0xc84   : >> { %vm16907_vm2 = vmmov %vm16904_vm0 }
 0xc85   : >> { %v9400_v11 = vpack.c.b16 %v9384_v9, %v9384_v9  ;;  %v9401_v15 = vpack.c.b16 %v9385_v55, %v9385_v55  ;;  %vm16909_vm7 = vmmov %vm16904_vm0  ;;  %v9618_v55 = vld [vmem:[%s16341_s3 + $0x58] sm:$0xff] }
 0xc87   : >> { %9433 = vst.msk [vmem:[#allocation5 + $0x8] sm:$0xf] %vm16896_vm10, %v9400_v11  ;;  %vm16908_vm10 = vmmov %vm16904_vm0 }
 0xc88   : >> { %9434 = vst.msk [vmem:[#allocation5 + $0xc] sm:$0xf] %vm16886_vm5, %v9401_v15  ;;  %v9237_v17 = vpop.permute.xlu0 %9236  ;;  %vm16910_vm5 = vmmov %vm16904_vm0 }
 0xc89   : >> { %v9365_v5 = vsel %vm16898_vm1, %v9349_v7, %v9237_v17  ;;  %vm16911_vm1 = vmmov %vm16904_vm0 }
 0xc8a   : >> { %v9388_v19 = vunpack.c.l.b16 %v9365_v5  ;;  %v9389_v33 = vunpack.c.h.b16 %v9365_v5 }
 0xc8c   : >> { %v9404_v29 = vpack.c.b16 %v9388_v19, %v9388_v19  ;;  %v9405_v24 = vpack.c.b16 %v9389_v33, %v9389_v33  ;;  %v9622_v33 = vld [vmem:[%s16341_s3 + $0x78] sm:$0xff] }
 0xc8e   : >> { %9437 = vst.msk [vmem:[#allocation5 + $0x18] sm:$0xf] %vm16899_vm3, %v9404_v29  ;;  %vm16912_vm3 = vmmov %vm16904_vm0 }
 0xc8f   : >> { %9438 = vst.msk [vmem:[#allocation5 + $0x1c] sm:$0xf] %vm16900_vm12, %v9405_v24  ;;  %v10766_v48 = vld [vmem:[#allocation5 + $0x8] sm:$0xff]  ;;  %vm16913_vm12 = vmmov %vm16904_vm0 }
 0xc90   : >> { %10698 = vmatmul.msk.bf16.gmra.mxu0 %vm16901_vm13, %v10766_v48  ;;  %vm16914_vm13 = vmmov %vm16904_vm0 }
 0xc96   : >> { %v10768_v60 = vld [vmem:[#allocation5 + $0x18] sm:$0xff] }
 0xc97   : >> { %10700 = vmatmul.msk.bf16.gmra.mxu1 %vm16902_vm14, %v10768_v60  ;;  %vm16915_vm14 = vmmov %vm16904_vm0 }
 0xca0   : >> { %v9595_v39 = vpop.f32.mrf.mxu3 }
 0xca1   : >> { %v9596_v34 = vadd.f32 %v16338_v12, %v9595_v39  ;;  %v9609_v39 = vld [vmem:[%s16341_s3 + $0x10] sm:$0xff] }
 0xca2   : >> { %v9585_v63 = vpop.f32.mrf.mxu2 }
 0xca3   : >> { %v9639_v41 = vmul.f32 %v16346_v27, %v9596_v34  ;;  %v9586_v32 = vadd.f32 %v16338_v12, %v9585_v63 }
 0xca5   : >> { %v9655_v20 = vadd.f32 %v9639_v41, %v9619_v38  ;;  %v9635_v47 = vmul.f32 %v16346_v27, %v9586_v32 }
 0xca7   : >> { %9671 = vst.msk [vmem:[%s16341_s3 + $0x60] sm:$0xff] %vm16904_vm0, %v9655_v20  ;;  %v9651_v56 = vadd.f32 %v9635_v47, %v9615_v59  ;;  %v9613_v59 = vld [vmem:[%s16341_s3 + $0x30] sm:$0xff] }
 0xca8   : >> { %v9597_v6 = vpop.f32.mrf.mxu3 }
 0xca9   : >> { %9667 = vst.msk [vmem:[%s16341_s3 + $0x40] sm:$0xff] %vm16905_vm4, %v9651_v56  ;;  %v9598_v16 = vadd.f32 %v16338_v12, %v9597_v6  ;;  %v9610_v56 = vld [vmem:[%s16341_s3 + $0x18] sm:$0xff]  ;;  %vm16916_vm4 = vmmov %vm16904_vm0 }
 0xcaa   : >> { %v9587_v31 = vpop.f32.mrf.mxu2 }
 0xcab   : >> { %v9640_v23 = vmul.f32 %v16346_v27, %v9598_v16  ;;  %v9588_v26 = vadd.f32 %v16338_v12, %v9587_v31 }
 0xcad   : >> { %v9656_v51 = vadd.f32 %v9640_v23, %v9620_v22  ;;  %v9636_v0 = vmul.f32 %v16346_v27, %v9588_v26  ;;  %v9614_v26 = vld [vmem:[%s16341_s3 + $0x38] sm:$0xff] }
 0xcaf   : >> { %9672 = vst.msk [vmem:[%s16341_s3 + $0x68] sm:$0xff] %vm16906_vm8, %v9656_v51  ;;  %v9652_v1 = vadd.f32 %v9636_v0, %v9616_v8  ;;  %vm16917_vm8 = vmmov %vm16904_vm0 }
 0xcb1   : >> { %9668 = vst.msk [vmem:[%s16341_s3 + $0x48] sm:$0xff] %vm16907_vm2, %v9652_v1  ;;  %vm16918_vm2 = vmmov %vm16904_vm0 }
 0xcba   : >> { %v9575_v62 = vpop.f32.mrf.mxu1 }
 0xcbb   : >> { %v9576_v42 = vadd.f32 %v16338_v12, %v9575_v62 }
 0xcbc   : >> { %v9565_v52 = vpop.f32.mrf.mxu0 }
 0xcbd   : >> { %v9631_v3 = vmul.f32 %v16346_v27, %v9576_v42  ;;  %v9566_v40 = vadd.f32 %v16338_v12, %v9565_v52 }
 0xcbf   : >> { %v9647_v44 = vadd.f32 %v9631_v3, %v9611_v10  ;;  %v9627_v61 = vmul.f32 %v16346_v27, %v9566_v40 }
 0xcc1   : >> { %9663 = vst.msk [vmem:[%s16341_s3 + $0x20] sm:$0xff] %vm16908_vm10, %v9647_v44  ;;  %v9643_v37 = vadd.f32 %v9627_v61, %v9607_v30 }
 0xcc2   : >> { %v9577_v58 = vpop.f32.mrf.mxu1 }
 0xcc3   : >> { %9659 = vst.msk [vmem:[%s16341_s3] sm:$0xff] %vm16909_vm7, %v9643_v37  ;;  %v9578_v2 = vadd.f32 %v16338_v12, %v9577_v58 }
 0xcc4   : >> { %v9567_v54 = vpop.f32.mrf.mxu0 }
 0xcc5   : >> { %v9632_v53 = vmul.f32 %v16346_v27, %v9578_v2  ;;  %v9568_v49 = vadd.f32 %v16338_v12, %v9567_v54 }
 0xcc7   : >> { %v9648_v57 = vadd.f32 %v9632_v53, %v9612_v50  ;;  %v9628_v36 = vmul.f32 %v16346_v27, %v9568_v49 }
 0xcc9   : >> { %9664 = vst.msk [vmem:[%s16341_s3 + $0x28] sm:$0xff] %vm16910_vm5, %v9648_v57  ;;  %v9644_v25 = vadd.f32 %v9628_v36, %v9608_v18 }
 0xccb   : >> { %9660 = vst.msk [vmem:[%s16341_s3 + $0x8] sm:$0xff] %vm16911_vm1, %v9644_v25 }
 0xce9   : >> { %v9590_v35 = vpop.f32.mrf.mxu2 }
 0xcea   : >> { %v9591_v21 = vadd.f32 %v16338_v12, %v9590_v35 }
 0xcec   : >> { %v9637_v46 = vmul.f32 %v16346_v27, %v9591_v21 }
 0xcee   : >> { %v9653_v4 = vadd.f32 %v9637_v46, %v9617_v13 }
 0xcf0   : >> { %9669 = vst.msk [vmem:[%s16341_s3 + $0x50] sm:$0xff] %vm16912_vm3, %v9653_v4 }
 0xcf1   : >> { %v9592_v45 = vpop.f32.mrf.mxu2 }
 0xcf2   : >> { %v9593_v9 = vadd.f32 %v16338_v12, %v9592_v45 }
 0xcf4   : >> { %v9638_v28 = vmul.f32 %v16346_v27, %v9593_v9 }
 0xcf6   : >> { %v9654_v43 = vadd.f32 %v9638_v28, %v9618_v55 }
 0xcf8   : >> { %9670 = vst.msk [vmem:[%s16341_s3 + $0x58] sm:$0xff] %vm16913_vm12, %v9654_v43 }
 0xcfa   : >> { %v9600_v11 = vpop.f32.mrf.mxu3 }
 0xcfb   : >> { %v9601_v15 = vadd.f32 %v16338_v12, %v9600_v11 }
 0xcfd   : >> { %v9641_v7 = vmul.f32 %v16346_v27, %v9601_v15 }
 0xcff   : >> { %v9657_v17 = vadd.f32 %v9641_v7, %v9621_v14 }
 0xd01   : >> { %9673 = vst.msk [vmem:[%s16341_s3 + $0x70] sm:$0xff] %vm16914_vm13, %v9657_v17 }
 0xd02   : >> { %v9602_v5 = vpop.f32.mrf.mxu3 }
 0xd03   : >> { %v9603_v19 = vadd.f32 %v16338_v12, %v9602_v5 }
 0xd05   : >> { %v9642_v29 = vmul.f32 %v16346_v27, %v9603_v19 }
 0xd07   : >> { %v9658_v24 = vadd.f32 %v9642_v29, %v9622_v33 }
 0xd09   : >> { %9674 = vst.msk [vmem:[%s16341_s3 + $0x78] sm:$0xff] %vm16915_vm14, %v9658_v24 }
 0xd0d   : >> { %v9570_v48 = vpop.f32.mrf.mxu0 }
 0xd0e   : >> { %v9571_v60 = vadd.f32 %v16338_v12, %v9570_v48 }
 0xd10   : >> { %v9629_v34 = vmul.f32 %v16346_v27, %v9571_v60 }
 0xd12   : >> { %v9645_v38 = vadd.f32 %v9629_v34, %v9609_v39 }
 0xd14   : >> { %9661 = vst.msk [vmem:[%s16341_s3 + $0x10] sm:$0xff] %vm16904_vm0, %v9645_v38  ;;  %v9580_v63 = vpop.f32.mrf.mxu1 }
 0xd15   : >> { %v9581_v41 = vadd.f32 %v16338_v12, %v9580_v63  ;;  %v9572_v32 = vpop.f32.mrf.mxu0 }
 0xd16   : >> { %v9573_v20 = vadd.f32 %v16338_v12, %v9572_v32 }
 0xd17   : >> { %v9633_v47 = vmul.f32 %v16346_v27, %v9581_v41 }
 0xd18   : >> { %v9630_v6 = vmul.f32 %v16346_v27, %v9573_v20 }
 0xd19   : >> { %v9649_v16 = vadd.f32 %v9633_v47, %v9613_v59 }
 0xd1a   : >> { %v9646_v22 = vadd.f32 %v9630_v6, %v9610_v56 }
 0xd1b   : >> { %9665 = vst.msk [vmem:[%s16341_s3 + $0x30] sm:$0xff] %vm16916_vm4, %v9649_v16 }
 0xd1c   : >> { %9662 = vst.msk [vmem:[%s16341_s3 + $0x18] sm:$0xff] %vm16917_vm8, %v9646_v22  ;;  %v9582_v31 = vpop.f32.mrf.mxu1 }
 0xd1d   : >> { %v9583_v23 = vadd.f32 %v16338_v12, %v9582_v31 }
 0xd1f   : >> { %v9634_v8 = vmul.f32 %v16346_v27, %v9583_v23  ;;  %8382 = sbr.rel (!%p8380_p9) target bundleno = 2910 (0xb5e), region = 269 }
 0xd21   : >> { %v9650_v51 = vadd.f32 %v9634_v8, %v9614_v26 }
 0xd23   : >> { %9666 = vst.msk [vmem:[%s16341_s3 + $0x38] sm:$0xff] %vm16918_vm2, %v9650_v51 }
 0xd24 PF: > { %s16919_s22 = sld [smem:[#allocation8_spill]] }
 0xd2a   : > { %s33_s4 = sadd.s32 1, %s16919_s22  }
 0xd2b   : > { %p30_p10 = scmp.ge.s32.totalorder %s33_s4, 4  }
 0xd2d   :  { %32 = sbr.rel (!%p30_p10) target bundleno = 11 (0xb), region = 280 }

</bundles_post_ra>
